<compile_context>
chip_gen: v6e
topology: v6e:2x2x1
jax: 0.10.0
libtpu: 0.0.40
codegen_flags: <defaults>
</compile_context>

<pallas_src>
import jax
import jax.numpy as jnp
from jax.experimental import pallas as pl
from jax.experimental.pallas import tpu as pltpu

EPS = 1e-5


# ---------------------------------------------------------------------------
# Fused kernel: conv1+BN+ReLU -> conv2+BN+ReLU -> maxpool -> fc1+ReLU -> fc2
# Per grid step it processes a batch tile of TB samples; all activations stay
# in registers / VMEM scratch.
#
# Data layout inside the kernel (rows = sublanes, cols = lanes):
#   x_ref[0]   : (32*TB, 12)   rows=(w_padded, b), cols=h
#   y1 / y1p   : (·*TB, 384)   rows=(w, b),        cols=h*32 + c_in
#   y2         : (21*TB, 32)   rows=(w_out, b),    cols=c_out
# ---------------------------------------------------------------------------
def cnn_fused_kernel(x_ref, w1_ref, s1_ref, b1_ref, w2_ref, s2_ref, b2_ref,
                     fc1w_ref, fc1b_ref, fc2w_ref, fc2b_ref, o_ref, y1p_ref):
    TB = o_ref.shape[0]
    x = x_ref[0]                                        # (32*TB, 12)

    # ---- conv1 (1x10, W pre-padded by 1 each side) ----
    # y1pre[(w,b), h*32+c] = sum_k x[(w+k,b), h'] * w1m[k, h', h*32+c]
    acc1 = jnp.dot(x[0:23 * TB, :], w1_ref[0],
                   preferred_element_type=jnp.float32)
    for k in range(1, 10):
        acc1 = acc1 + jnp.dot(x[k * TB:(k + 23) * TB, :], w1_ref[k],
                              preferred_element_type=jnp.float32)
    y1 = jnp.maximum(acc1 * s1_ref[...] + b1_ref[...], 0.0)     # (23*TB, 384)

    # ---- conv2 W-padding (0,1): zero-padded scratch (25*TB, 384) ----
    y1p_ref[0:TB, :] = jnp.zeros((TB, 384), jnp.float32)
    y1p_ref[TB:24 * TB, :] = y1
    y1p_ref[24 * TB:25 * TB, :] = jnp.zeros((TB, 384), jnp.float32)

    # ---- conv2 (12x5) as 5 accumulated K=384 matmuls ----
    acc2 = jnp.dot(y1p_ref[0:21 * TB, :], w2_ref[0],
                   preferred_element_type=jnp.float32)
    for kw in range(1, 5):
        acc2 = acc2 + jnp.dot(y1p_ref[kw * TB:(kw + 21) * TB, :], w2_ref[kw],
                              preferred_element_type=jnp.float32)
    y2 = jnp.maximum(acc2 * s2_ref[...] + b2_ref[...], 0.0)     # (21*TB, 32)

    # ---- maxpool(1,3) + NCHW flatten + fc1, folded into 7 matmuls ----
    accf = jnp.zeros((TB, 32), jnp.float32)
    for wp in range(7):
        r0 = 3 * wp * TB
        ym = jnp.maximum(jnp.maximum(y2[r0:r0 + TB, :],
                                     y2[r0 + TB:r0 + 2 * TB, :]),
                         y2[r0 + 2 * TB:r0 + 3 * TB, :])        # (TB, 32)
        accf = accf + jnp.dot(ym, fc1w_ref[wp],
                              preferred_element_type=jnp.float32)
    h1 = jnp.maximum(accf + fc1b_ref[...], 0.0)                 # (TB, 32)

    o_ref[...] = (jnp.dot(h1, fc2w_ref[...],
                          preferred_element_type=jnp.float32) + fc2b_ref[...])


# ---------------------------------------------------------------------------
# Parameters (deterministic, synthetic; PyTorch layouts)
# ---------------------------------------------------------------------------
def init_params(key):
    ks = jax.random.split(key, 8)
    return {
        "conv1_w": 0.05 * jax.random.normal(ks[0], (32, 1, 1, 10), jnp.float32),
        "conv1_b": 0.05 * jax.random.normal(ks[1], (32,), jnp.float32),
        "bn1_g": jnp.ones((32,), jnp.float32),
        "bn1_b": jnp.zeros((32,), jnp.float32),
        "bn1_m": jnp.zeros((32,), jnp.float32),
        "bn1_v": jnp.ones((32,), jnp.float32),
        "conv2_w": 0.05 * jax.random.normal(ks[2], (32, 32, 12, 5), jnp.float32),
        "conv2_b": 0.05 * jax.random.normal(ks[3], (32,), jnp.float32),
        "bn2_g": jnp.ones((32,), jnp.float32),
        "bn2_b": jnp.zeros((32,), jnp.float32),
        "bn2_m": jnp.zeros((32,), jnp.float32),
        "bn2_v": jnp.ones((32,), jnp.float32),
        "fc1_w": 0.05 * jax.random.normal(ks[4], (32, 224), jnp.float32),
        "fc1_b": 0.05 * jax.random.normal(ks[5], (32,), jnp.float32),
        "fc2_w": 0.05 * jax.random.normal(ks[6], (4, 32), jnp.float32),
        "fc2_b": 0.05 * jax.random.normal(ks[7], (4,), jnp.float32),
    }


def _bn_fold(conv_b, g, b, m, v):
    scale = g / jnp.sqrt(v + EPS)
    shift = b + (conv_b - m) * scale
    return scale, shift


def _pick_tb(n):
    """Batch-tile size: multiple of 8, capped so VMEM stays tiny on any gen."""
    return max(8, min(128, ((n + 7) // 8) * 8))


# ---------------------------------------------------------------------------
# Forward pass: weight staging (cheap, one-time XLA ops) + one fused kernel
# ---------------------------------------------------------------------------
def cnn_forward(x, P):
    # x: NCHW (N, 1, 12, 30)
    N = x.shape[0]
    tb = _pick_tb(N)
    nb = -(-N // tb)
    n_pad = nb * tb

    # input: squeeze channel, pad W by (1,1), pad batch, relayout to
    # (nb, 32*tb, 12) with rows ordered (w_padded, b) per tile.
    xs = jnp.pad(x[:, 0], ((0, n_pad - N), (0, 0), (1, 1)))      # (n_pad,12,32)
    xk = jnp.transpose(xs.reshape(nb, tb, 12, 32), (0, 3, 1, 2))
    xk = xk.reshape(nb, 32 * tb, 12)

    # conv1 weights as block-diagonal slices: w1m[k, h', h*32+c] = 1[h'==h]*W1[c,k]
    w1c = P["conv1_w"].reshape(32, 10)                           # [c, k]
    eye12 = jnp.eye(12, dtype=jnp.float32)
    w1m = (eye12[None, :, :, None] * w1c.T[:, None, None, :]).reshape(10, 12, 384)

    s1, sh1 = _bn_fold(P["conv1_b"], P["bn1_g"], P["bn1_b"], P["bn1_m"], P["bn1_v"])
    s1_384 = jnp.tile(s1, 12).reshape(1, 384)
    sh1_384 = jnp.tile(sh1, 12).reshape(1, 384)

    # conv2 weights: w2f[kw, h*32+cin, cout] = W2[cout, cin, h, kw]
    w2f = jnp.transpose(P["conv2_w"], (3, 2, 1, 0)).reshape(5, 384, 32)
    s2, sh2 = _bn_fold(P["conv2_b"], P["bn2_g"], P["bn2_b"], P["bn2_m"], P["bn2_v"])
    s2 = s2.reshape(1, 32)
    sh2 = sh2.reshape(1, 32)

    # fc1 weights split per pooled-width position: fc1w[wp, c, j] = W[j, c*7+wp]
    fc1w = jnp.transpose(P["fc1_w"].reshape(32, 32, 7), (2, 1, 0))  # (7,32,32)
    fc1b = P["fc1_b"].reshape(1, 32)
    fc2w = P["fc2_w"].T                                             # (32, 4)
    fc2b = P["fc2_b"].reshape(1, 4)

    flops_per_sample = 2 * (23 * 12 * 32 * 10 + 21 * 32 * 1920 + 224 * 32 + 32 * 4)
    cost = pl.CostEstimate(
        flops=int(flops_per_sample * n_pad),
        transcendentals=0,
        bytes_accessed=int(n_pad * (12 * 32 + 4) * 4 + 600_000),
    )

    const2 = lambda i: (0, 0)
    const3 = lambda i: (0, 0, 0)

    out = pl.pallas_call(
        cnn_fused_kernel,
        out_shape=jax.ShapeDtypeStruct((n_pad, 4), jnp.float32),
        grid=(nb,),
        in_specs=[
            pl.BlockSpec((1, 32 * tb, 12), lambda i: (i, 0, 0)),   # input tile
            pl.BlockSpec((10, 12, 384), const3),                   # conv1 (blockdiag)
            pl.BlockSpec((1, 384), const2),                        # bn1 scale
            pl.BlockSpec((1, 384), const2),                        # bn1 shift
            pl.BlockSpec((5, 384, 32), const3),                    # conv2
            pl.BlockSpec((1, 32), const2),                         # bn2 scale
            pl.BlockSpec((1, 32), const2),                         # bn2 shift
            pl.BlockSpec((7, 32, 32), const3),                     # fc1
            pl.BlockSpec((1, 32), const2),                         # fc1 bias
            pl.BlockSpec((32, 4), const2),                         # fc2
            pl.BlockSpec((1, 4), const2),                          # fc2 bias
        ],
        out_specs=pl.BlockSpec((tb, 4), lambda i: (i, 0)),
        scratch_shapes=[pltpu.VMEM((25 * tb, 384), jnp.float32)],
        compiler_params=pltpu.CompilerParams(
            dimension_semantics=("parallel",),
            vmem_limit_bytes=32 * 1024 * 1024,
        ),
        cost_estimate=cost,
    )(xk, w1m, s1_384, sh1_384, w2f, s2, sh2, fc1w, fc1b, fc2w, fc2b)
    return out[:N]


# ---------------------------------------------------------------------------
# Pure-JAX reference (for correctness check)
# ---------------------------------------------------------------------------
def cnn_reference(x, P):
    dn = ("NCHW", "OIHW", "NCHW")

    def bn_relu(y, g, b, m, v):
        y = (y - m.reshape(1, -1, 1, 1)) / jnp.sqrt(v.reshape(1, -1, 1, 1) + EPS)
        y = y * g.reshape(1, -1, 1, 1) + b.reshape(1, -1, 1, 1)
        return jnp.maximum(y, 0.0)

    y = jax.lax.conv_general_dilated(x, P["conv1_w"], (1, 1),
                                     [(0, 0), (1, 1)], dimension_numbers=dn)
    y = y + P["conv1_b"].reshape(1, -1, 1, 1)
    y = bn_relu(y, P["bn1_g"], P["bn1_b"], P["bn1_m"], P["bn1_v"])

    y = jax.lax.conv_general_dilated(y, P["conv2_w"], (1, 1),
                                     [(0, 0), (1, 1)], dimension_numbers=dn)
    y = y + P["conv2_b"].reshape(1, -1, 1, 1)
    y = bn_relu(y, P["bn2_g"], P["bn2_b"], P["bn2_m"], P["bn2_v"])

    N = y.shape[0]
    y = y.reshape(N, 32, 1, 7, 3).max(axis=-1)                    # MaxPool (1,3)
    y = y.reshape(N, -1)                                          # (N, 224)
    y = jnp.maximum(y @ P["fc1_w"].T + P["fc1_b"], 0.0)
    return y @ P["fc2_w"].T + P["fc2_b"]


if __name__ == "__main__":
    key = jax.random.PRNGKey(0)
    k_x, k_p = jax.random.split(key)
    x = jax.random.normal(k_x, (2, 1, 12, 30), jnp.float32)       # NCHW, like PyTorch
    params = init_params(k_p)

    out = jax.block_until_ready(cnn_forward(x, params))
    ref = jax.block_until_ready(cnn_reference(x, params))

    assert out.shape == (2, 4), out.shape
    assert jnp.all(jnp.isfinite(out))
    assert jnp.allclose(out, ref, atol=1e-2, rtol=1e-2), (out, ref)
    print("KERNEL_OK")
</pallas_src>

<mosaic_0001>
module attributes {stable_mosaic.version = 11 : i64} {
  func.func @cnn_fused_kernel(%arg0: i32, %arg1: memref<1x256x12xf32, #tpu.memory_space<vmem>>, %arg2: memref<10x12x384xf32, #tpu.memory_space<vmem>>, %arg3: memref<1x384xf32, #tpu.memory_space<vmem>>, %arg4: memref<1x384xf32, #tpu.memory_space<vmem>>, %arg5: memref<5x384x32xf32, #tpu.memory_space<vmem>>, %arg6: memref<1x32xf32, #tpu.memory_space<vmem>>, %arg7: memref<1x32xf32, #tpu.memory_space<vmem>>, %arg8: memref<7x32x32xf32, #tpu.memory_space<vmem>>, %arg9: memref<1x32xf32, #tpu.memory_space<vmem>>, %arg10: memref<32x4xf32, #tpu.memory_space<vmem>>, %arg11: memref<1x4xf32, #tpu.memory_space<vmem>>, %arg12: memref<8x4xf32, #tpu.memory_space<vmem>>, %arg13: memref<200x384xf32, #tpu.memory_space<vmem>>) attributes {dimension_semantics = [#tpu.dimension_semantics<parallel>], iteration_bounds = array<i64: 1>, scalar_prefetch = 0 : i64, scratch_operands = 1 : i64, tpu.core_type = #tpu.core_type<tc>, window_params = [{transform_indices = @transform_0, window_bounds = array<i64: 1, 256, 12>}, {pipeline_mode = #tpu.pipeline_mode<synchronous>, transform_indices = @transform_1, window_bounds = array<i64: 10, 12, 384>}, {pipeline_mode = #tpu.pipeline_mode<synchronous>, transform_indices = @transform_2, window_bounds = array<i64: 1, 384>}, {pipeline_mode = #tpu.pipeline_mode<synchronous>, transform_indices = @transform_3, window_bounds = array<i64: 1, 384>}, {pipeline_mode = #tpu.pipeline_mode<synchronous>, transform_indices = @transform_4, window_bounds = array<i64: 5, 384, 32>}, {pipeline_mode = #tpu.pipeline_mode<synchronous>, transform_indices = @transform_5, window_bounds = array<i64: 1, 32>}, {pipeline_mode = #tpu.pipeline_mode<synchronous>, transform_indices = @transform_6, window_bounds = array<i64: 1, 32>}, {pipeline_mode = #tpu.pipeline_mode<synchronous>, transform_indices = @transform_7, window_bounds = array<i64: 7, 32, 32>}, {pipeline_mode = #tpu.pipeline_mode<synchronous>, transform_indices = @transform_8, window_bounds = array<i64: 1, 32>}, {pipeline_mode = #tpu.pipeline_mode<synchronous>, transform_indices = @transform_9, window_bounds = array<i64: 32, 4>}, {pipeline_mode = #tpu.pipeline_mode<synchronous>, transform_indices = @transform_10, window_bounds = array<i64: 1, 4>}, {transform_indices = @transform_11, window_bounds = array<i64: 8, 4>}]} {
    %c0 = arith.constant 0 : index
    %c0_0 = arith.constant 0 : index
    %c0_1 = arith.constant 0 : index
    %0 = vector.load %arg1[%c0, %c0_0, %c0_1] : memref<1x256x12xf32, #tpu.memory_space<vmem>>, vector<1x256x12xf32>
    %1 = vector.shape_cast %0 : vector<1x256x12xf32> to vector<256x12xf32>
    %2 = vector.extract_strided_slice %1 {offsets = [0, 0], sizes = [184, 12], strides = [1, 1]} : vector<256x12xf32> to vector<184x12xf32>
    %c0_2 = arith.constant 0 : index
    %c0_3 = arith.constant 0 : index
    %c0_4 = arith.constant 0 : index
    %3 = vector.load %arg2[%c0_2, %c0_3, %c0_4] : memref<10x12x384xf32, #tpu.memory_space<vmem>>, vector<1x12x384xf32>
    %4 = vector.shape_cast %3 : vector<1x12x384xf32> to vector<12x384xf32>
    %cst = arith.constant dense<0.000000e+00> : vector<184x384xf32>
    %5 = tpu.matmul %2, %4, %cst {dimension_numbers = #tpu.dot_dimension_numbers<[1], [0], [0], [1], [0, 0, 1, 1], [], []>} : vector<184x12xf32>, vector<12x384xf32>, vector<184x384xf32> -> vector<184x384xf32>
    %6 = vector.extract_strided_slice %1 {offsets = [8, 0], sizes = [184, 12], strides = [1, 1]} : vector<256x12xf32> to vector<184x12xf32>
    %c1 = arith.constant 1 : index
    %c0_5 = arith.constant 0 : index
    %c0_6 = arith.constant 0 : index
    %7 = vector.load %arg2[%c1, %c0_5, %c0_6] : memref<10x12x384xf32, #tpu.memory_space<vmem>>, vector<1x12x384xf32>
    %8 = vector.shape_cast %7 : vector<1x12x384xf32> to vector<12x384xf32>
    %cst_7 = arith.constant dense<0.000000e+00> : vector<184x384xf32>
    %9 = tpu.matmul %6, %8, %cst_7 {dimension_numbers = #tpu.dot_dimension_numbers<[1], [0], [0], [1], [0, 0, 1, 1], [], []>} : vector<184x12xf32>, vector<12x384xf32>, vector<184x384xf32> -> vector<184x384xf32>
    %10 = arith.addf %5, %9 : vector<184x384xf32>
    %11 = vector.extract_strided_slice %1 {offsets = [16, 0], sizes = [184, 12], strides = [1, 1]} : vector<256x12xf32> to vector<184x12xf32>
    %c2 = arith.constant 2 : index
    %c0_8 = arith.constant 0 : index
    %c0_9 = arith.constant 0 : index
    %12 = vector.load %arg2[%c2, %c0_8, %c0_9] : memref<10x12x384xf32, #tpu.memory_space<vmem>>, vector<1x12x384xf32>
    %13 = vector.shape_cast %12 : vector<1x12x384xf32> to vector<12x384xf32>
    %cst_10 = arith.constant dense<0.000000e+00> : vector<184x384xf32>
    %14 = tpu.matmul %11, %13, %cst_10 {dimension_numbers = #tpu.dot_dimension_numbers<[1], [0], [0], [1], [0, 0, 1, 1], [], []>} : vector<184x12xf32>, vector<12x384xf32>, vector<184x384xf32> -> vector<184x384xf32>
    %15 = arith.addf %10, %14 : vector<184x384xf32>
    %16 = vector.extract_strided_slice %1 {offsets = [24, 0], sizes = [184, 12], strides = [1, 1]} : vector<256x12xf32> to vector<184x12xf32>
    %c3 = arith.constant 3 : index
    %c0_11 = arith.constant 0 : index
    %c0_12 = arith.constant 0 : index
    %17 = vector.load %arg2[%c3, %c0_11, %c0_12] : memref<10x12x384xf32, #tpu.memory_space<vmem>>, vector<1x12x384xf32>
    %18 = vector.shape_cast %17 : vector<1x12x384xf32> to vector<12x384xf32>
    %cst_13 = arith.constant dense<0.000000e+00> : vector<184x384xf32>
    %19 = tpu.matmul %16, %18, %cst_13 {dimension_numbers = #tpu.dot_dimension_numbers<[1], [0], [0], [1], [0, 0, 1, 1], [], []>} : vector<184x12xf32>, vector<12x384xf32>, vector<184x384xf32> -> vector<184x384xf32>
    %20 = arith.addf %15, %19 : vector<184x384xf32>
    %21 = vector.extract_strided_slice %1 {offsets = [32, 0], sizes = [184, 12], strides = [1, 1]} : vector<256x12xf32> to vector<184x12xf32>
    %c4 = arith.constant 4 : index
    %c0_14 = arith.constant 0 : index
    %c0_15 = arith.constant 0 : index
    %22 = vector.load %arg2[%c4, %c0_14, %c0_15] : memref<10x12x384xf32, #tpu.memory_space<vmem>>, vector<1x12x384xf32>
    %23 = vector.shape_cast %22 : vector<1x12x384xf32> to vector<12x384xf32>
    %cst_16 = arith.constant dense<0.000000e+00> : vector<184x384xf32>
    %24 = tpu.matmul %21, %23, %cst_16 {dimension_numbers = #tpu.dot_dimension_numbers<[1], [0], [0], [1], [0, 0, 1, 1], [], []>} : vector<184x12xf32>, vector<12x384xf32>, vector<184x384xf32> -> vector<184x384xf32>
    %25 = arith.addf %20, %24 : vector<184x384xf32>
    %26 = vector.extract_strided_slice %1 {offsets = [40, 0], sizes = [184, 12], strides = [1, 1]} : vector<256x12xf32> to vector<184x12xf32>
    %c5 = arith.constant 5 : index
    %c0_17 = arith.constant 0 : index
    %c0_18 = arith.constant 0 : index
    %27 = vector.load %arg2[%c5, %c0_17, %c0_18] : memref<10x12x384xf32, #tpu.memory_space<vmem>>, vector<1x12x384xf32>
    %28 = vector.shape_cast %27 : vector<1x12x384xf32> to vector<12x384xf32>
    %cst_19 = arith.constant dense<0.000000e+00> : vector<184x384xf32>
    %29 = tpu.matmul %26, %28, %cst_19 {dimension_numbers = #tpu.dot_dimension_numbers<[1], [0], [0], [1], [0, 0, 1, 1], [], []>} : vector<184x12xf32>, vector<12x384xf32>, vector<184x384xf32> -> vector<184x384xf32>
    %30 = arith.addf %25, %29 : vector<184x384xf32>
    %31 = vector.extract_strided_slice %1 {offsets = [48, 0], sizes = [184, 12], strides = [1, 1]} : vector<256x12xf32> to vector<184x12xf32>
    %c6 = arith.constant 6 : index
    %c0_20 = arith.constant 0 : index
    %c0_21 = arith.constant 0 : index
    %32 = vector.load %arg2[%c6, %c0_20, %c0_21] : memref<10x12x384xf32, #tpu.memory_space<vmem>>, vector<1x12x384xf32>
    %33 = vector.shape_cast %32 : vector<1x12x384xf32> to vector<12x384xf32>
    %cst_22 = arith.constant dense<0.000000e+00> : vector<184x384xf32>
    %34 = tpu.matmul %31, %33, %cst_22 {dimension_numbers = #tpu.dot_dimension_numbers<[1], [0], [0], [1], [0, 0, 1, 1], [], []>} : vector<184x12xf32>, vector<12x384xf32>, vector<184x384xf32> -> vector<184x384xf32>
    %35 = arith.addf %30, %34 : vector<184x384xf32>
    %36 = vector.extract_strided_slice %1 {offsets = [56, 0], sizes = [184, 12], strides = [1, 1]} : vector<256x12xf32> to vector<184x12xf32>
    %c7 = arith.constant 7 : index
    %c0_23 = arith.constant 0 : index
    %c0_24 = arith.constant 0 : index
    %37 = vector.load %arg2[%c7, %c0_23, %c0_24] : memref<10x12x384xf32, #tpu.memory_space<vmem>>, vector<1x12x384xf32>
    %38 = vector.shape_cast %37 : vector<1x12x384xf32> to vector<12x384xf32>
    %cst_25 = arith.constant dense<0.000000e+00> : vector<184x384xf32>
    %39 = tpu.matmul %36, %38, %cst_25 {dimension_numbers = #tpu.dot_dimension_numbers<[1], [0], [0], [1], [0, 0, 1, 1], [], []>} : vector<184x12xf32>, vector<12x384xf32>, vector<184x384xf32> -> vector<184x384xf32>
    %40 = arith.addf %35, %39 : vector<184x384xf32>
    %41 = vector.extract_strided_slice %1 {offsets = [64, 0], sizes = [184, 12], strides = [1, 1]} : vector<256x12xf32> to vector<184x12xf32>
    %c8 = arith.constant 8 : index
    %c0_26 = arith.constant 0 : index
    %c0_27 = arith.constant 0 : index
    %42 = vector.load %arg2[%c8, %c0_26, %c0_27] : memref<10x12x384xf32, #tpu.memory_space<vmem>>, vector<1x12x384xf32>
    %43 = vector.shape_cast %42 : vector<1x12x384xf32> to vector<12x384xf32>
    %cst_28 = arith.constant dense<0.000000e+00> : vector<184x384xf32>
    %44 = tpu.matmul %41, %43, %cst_28 {dimension_numbers = #tpu.dot_dimension_numbers<[1], [0], [0], [1], [0, 0, 1, 1], [], []>} : vector<184x12xf32>, vector<12x384xf32>, vector<184x384xf32> -> vector<184x384xf32>
    %45 = arith.addf %40, %44 : vector<184x384xf32>
    %46 = vector.extract_strided_slice %1 {offsets = [72, 0], sizes = [184, 12], strides = [1, 1]} : vector<256x12xf32> to vector<184x12xf32>
    %c9 = arith.constant 9 : index
    %c0_29 = arith.constant 0 : index
    %c0_30 = arith.constant 0 : index
    %47 = vector.load %arg2[%c9, %c0_29, %c0_30] : memref<10x12x384xf32, #tpu.memory_space<vmem>>, vector<1x12x384xf32>
    %48 = vector.shape_cast %47 : vector<1x12x384xf32> to vector<12x384xf32>
    %cst_31 = arith.constant dense<0.000000e+00> : vector<184x384xf32>
    %49 = tpu.matmul %46, %48, %cst_31 {dimension_numbers = #tpu.dot_dimension_numbers<[1], [0], [0], [1], [0, 0, 1, 1], [], []>} : vector<184x12xf32>, vector<12x384xf32>, vector<184x384xf32> -> vector<184x384xf32>
    %50 = arith.addf %45, %49 : vector<184x384xf32>
    %c0_32 = arith.constant 0 : index
    %c0_33 = arith.constant 0 : index
    %51 = vector.load %arg3[%c0_32, %c0_33] : memref<1x384xf32, #tpu.memory_space<vmem>>, vector<1x384xf32>
    %52 = vector.broadcast %51 : vector<1x384xf32> to vector<184x384xf32>
    %53 = arith.mulf %50, %52 : vector<184x384xf32>
    %c0_34 = arith.constant 0 : index
    %c0_35 = arith.constant 0 : index
    %54 = vector.load %arg4[%c0_34, %c0_35] : memref<1x384xf32, #tpu.memory_space<vmem>>, vector<1x384xf32>
    %55 = vector.broadcast %54 : vector<1x384xf32> to vector<184x384xf32>
    %56 = arith.addf %53, %55 : vector<184x384xf32>
    %cst_36 = arith.constant 0.000000e+00 : f32
    %57 = vector.broadcast %cst_36 : f32 to vector<184x384xf32>
    %58 = arith.maximumf %56, %57 : vector<184x384xf32>
    %cst_37 = arith.constant 0.000000e+00 : f32
    %59 = vector.broadcast %cst_37 : f32 to vector<8x384xf32>
    %c0_38 = arith.constant 0 : index
    %c0_39 = arith.constant 0 : index
    %60 = vector.load %arg13[%c0_38, %c0_39] : memref<200x384xf32, #tpu.memory_space<vmem>>, vector<8x384xf32>
    tpu.vector_store %arg13[%c0_38, %c0_39], %59 {strides = array<i32>} : memref<200x384xf32, #tpu.memory_space<vmem>>, vector<8x384xf32>,
    %c8_40 = arith.constant 8 : index
    %c0_41 = arith.constant 0 : index
    %61 = vector.load %arg13[%c8_40, %c0_41] : memref<200x384xf32, #tpu.memory_space<vmem>>, vector<184x384xf32>
    tpu.vector_store %arg13[%c8_40, %c0_41], %58 {strides = array<i32>} : memref<200x384xf32, #tpu.memory_space<vmem>>, vector<184x384xf32>,
    %cst_42 = arith.constant 0.000000e+00 : f32
    %62 = vector.broadcast %cst_42 : f32 to vector<8x384xf32>
    %c192 = arith.constant 192 : index
    %c0_43 = arith.constant 0 : index
    %63 = vector.load %arg13[%c192, %c0_43] : memref<200x384xf32, #tpu.memory_space<vmem>>, vector<8x384xf32>
    tpu.vector_store %arg13[%c192, %c0_43], %62 {strides = array<i32>} : memref<200x384xf32, #tpu.memory_space<vmem>>, vector<8x384xf32>,
    %c0_44 = arith.constant 0 : index
    %c0_45 = arith.constant 0 : index
    %64 = vector.load %arg13[%c0_44, %c0_45] : memref<200x384xf32, #tpu.memory_space<vmem>>, vector<168x384xf32>
    %c0_46 = arith.constant 0 : index
    %c0_47 = arith.constant 0 : index
    %c0_48 = arith.constant 0 : index
    %65 = vector.load %arg5[%c0_46, %c0_47, %c0_48] : memref<5x384x32xf32, #tpu.memory_space<vmem>>, vector<1x384x32xf32>
    %66 = vector.shape_cast %65 : vector<1x384x32xf32> to vector<384x32xf32>
    %cst_49 = arith.constant dense<0.000000e+00> : vector<168x32xf32>
    %67 = tpu.matmul %64, %66, %cst_49 {dimension_numbers = #tpu.dot_dimension_numbers<[1], [0], [0], [1], [0, 0, 1, 1], [], []>} : vector<168x384xf32>, vector<384x32xf32>, vector<168x32xf32> -> vector<168x32xf32>
    %c8_50 = arith.constant 8 : index
    %c0_51 = arith.constant 0 : index
    %68 = vector.load %arg13[%c8_50, %c0_51] : memref<200x384xf32, #tpu.memory_space<vmem>>, vector<168x384xf32>
    %c1_52 = arith.constant 1 : index
    %c0_53 = arith.constant 0 : index
    %c0_54 = arith.constant 0 : index
    %69 = vector.load %arg5[%c1_52, %c0_53, %c0_54] : memref<5x384x32xf32, #tpu.memory_space<vmem>>, vector<1x384x32xf32>
    %70 = vector.shape_cast %69 : vector<1x384x32xf32> to vector<384x32xf32>
    %cst_55 = arith.constant dense<0.000000e+00> : vector<168x32xf32>
    %71 = tpu.matmul %68, %70, %cst_55 {dimension_numbers = #tpu.dot_dimension_numbers<[1], [0], [0], [1], [0, 0, 1, 1], [], []>} : vector<168x384xf32>, vector<384x32xf32>, vector<168x32xf32> -> vector<168x32xf32>
    %72 = arith.addf %67, %71 : vector<168x32xf32>
    %c16 = arith.constant 16 : index
    %c0_56 = arith.constant 0 : index
    %73 = vector.load %arg13[%c16, %c0_56] : memref<200x384xf32, #tpu.memory_space<vmem>>, vector<168x384xf32>
    %c2_57 = arith.constant 2 : index
    %c0_58 = arith.constant 0 : index
    %c0_59 = arith.constant 0 : index
    %74 = vector.load %arg5[%c2_57, %c0_58, %c0_59] : memref<5x384x32xf32, #tpu.memory_space<vmem>>, vector<1x384x32xf32>
    %75 = vector.shape_cast %74 : vector<1x384x32xf32> to vector<384x32xf32>
    %cst_60 = arith.constant dense<0.000000e+00> : vector<168x32xf32>
    %76 = tpu.matmul %73, %75, %cst_60 {dimension_numbers = #tpu.dot_dimension_numbers<[1], [0], [0], [1], [0, 0, 1, 1], [], []>} : vector<168x384xf32>, vector<384x32xf32>, vector<168x32xf32> -> vector<168x32xf32>
    %77 = arith.addf %72, %76 : vector<168x32xf32>
    %c24 = arith.constant 24 : index
    %c0_61 = arith.constant 0 : index
    %78 = vector.load %arg13[%c24, %c0_61] : memref<200x384xf32, #tpu.memory_space<vmem>>, vector<168x384xf32>
    %c3_62 = arith.constant 3 : index
    %c0_63 = arith.constant 0 : index
    %c0_64 = arith.constant 0 : index
    %79 = vector.load %arg5[%c3_62, %c0_63, %c0_64] : memref<5x384x32xf32, #tpu.memory_space<vmem>>, vector<1x384x32xf32>
    %80 = vector.shape_cast %79 : vector<1x384x32xf32> to vector<384x32xf32>
    %cst_65 = arith.constant dense<0.000000e+00> : vector<168x32xf32>
    %81 = tpu.matmul %78, %80, %cst_65 {dimension_numbers = #tpu.dot_dimension_numbers<[1], [0], [0], [1], [0, 0, 1, 1], [], []>} : vector<168x384xf32>, vector<384x32xf32>, vector<168x32xf32> -> vector<168x32xf32>
    %82 = arith.addf %77, %81 : vector<168x32xf32>
    %c32 = arith.constant 32 : index
    %c0_66 = arith.constant 0 : index
    %83 = vector.load %arg13[%c32, %c0_66] : memref<200x384xf32, #tpu.memory_space<vmem>>, vector<168x384xf32>
    %c4_67 = arith.constant 4 : index
    %c0_68 = arith.constant 0 : index
    %c0_69 = arith.constant 0 : index
    %84 = vector.load %arg5[%c4_67, %c0_68, %c0_69] : memref<5x384x32xf32, #tpu.memory_space<vmem>>, vector<1x384x32xf32>
    %85 = vector.shape_cast %84 : vector<1x384x32xf32> to vector<384x32xf32>
    %cst_70 = arith.constant dense<0.000000e+00> : vector<168x32xf32>
    %86 = tpu.matmul %83, %85, %cst_70 {dimension_numbers = #tpu.dot_dimension_numbers<[1], [0], [0], [1], [0, 0, 1, 1], [], []>} : vector<168x384xf32>, vector<384x32xf32>, vector<168x32xf32> -> vector<168x32xf32>
    %87 = arith.addf %82, %86 : vector<168x32xf32>
    %c0_71 = arith.constant 0 : index
    %c0_72 = arith.constant 0 : index
    %88 = vector.load %arg6[%c0_71, %c0_72] : memref<1x32xf32, #tpu.memory_space<vmem>>, vector<1x32xf32>
    %89 = vector.broadcast %88 : vector<1x32xf32> to vector<168x32xf32>
    %90 = arith.mulf %87, %89 : vector<168x32xf32>
    %c0_73 = arith.constant 0 : index
    %c0_74 = arith.constant 0 : index
    %91 = vector.load %arg7[%c0_73, %c0_74] : memref<1x32xf32, #tpu.memory_space<vmem>>, vector<1x32xf32>
    %92 = vector.broadcast %91 : vector<1x32xf32> to vector<168x32xf32>
    %93 = arith.addf %90, %92 : vector<168x32xf32>
    %cst_75 = arith.constant 0.000000e+00 : f32
    %94 = vector.broadcast %cst_75 : f32 to vector<168x32xf32>
    %95 = arith.maximumf %93, %94 : vector<168x32xf32>
    %cst_76 = arith.constant 0.000000e+00 : f32
    %96 = vector.broadcast %cst_76 : f32 to vector<8x32xf32>
    %97 = vector.extract_strided_slice %95 {offsets = [0, 0], sizes = [8, 32], strides = [1, 1]} : vector<168x32xf32> to vector<8x32xf32>
    %98 = vector.extract_strided_slice %95 {offsets = [8, 0], sizes = [8, 32], strides = [1, 1]} : vector<168x32xf32> to vector<8x32xf32>
    %99 = arith.maximumf %97, %98 : vector<8x32xf32>
    %100 = vector.extract_strided_slice %95 {offsets = [16, 0], sizes = [8, 32], strides = [1, 1]} : vector<168x32xf32> to vector<8x32xf32>
    %101 = arith.maximumf %99, %100 : vector<8x32xf32>
    %c0_77 = arith.constant 0 : index
    %c0_78 = arith.constant 0 : index
    %c0_79 = arith.constant 0 : index
    %102 = vector.load %arg8[%c0_77, %c0_78, %c0_79] : memref<7x32x32xf32, #tpu.memory_space<vmem>>, vector<1x32x32xf32>
    %103 = vector.shape_cast %102 : vector<1x32x32xf32> to vector<32x32xf32>
    %cst_80 = arith.constant dense<0.000000e+00> : vector<8x32xf32>
    %104 = tpu.matmul %101, %103, %cst_80 {dimension_numbers = #tpu.dot_dimension_numbers<[1], [0], [0], [1], [0, 0, 1, 1], [], []>} : vector<8x32xf32>, vector<32x32xf32>, vector<8x32xf32> -> vector<8x32xf32>
    %105 = arith.addf %96, %104 : vector<8x32xf32>
    %106 = vector.extract_strided_slice %95 {offsets = [24, 0], sizes = [8, 32], strides = [1, 1]} : vector<168x32xf32> to vector<8x32xf32>
    %107 = vector.extract_strided_slice %95 {offsets = [32, 0], sizes = [8, 32], strides = [1, 1]} : vector<168x32xf32> to vector<8x32xf32>
    %108 = arith.maximumf %106, %107 : vector<8x32xf32>
    %109 = vector.extract_strided_slice %95 {offsets = [40, 0], sizes = [8, 32], strides = [1, 1]} : vector<168x32xf32> to vector<8x32xf32>
    %110 = arith.maximumf %108, %109 : vector<8x32xf32>
    %c1_81 = arith.constant 1 : index
    %c0_82 = arith.constant 0 : index
    %c0_83 = arith.constant 0 : index
    %111 = vector.load %arg8[%c1_81, %c0_82, %c0_83] : memref<7x32x32xf32, #tpu.memory_space<vmem>>, vector<1x32x32xf32>
    %112 = vector.shape_cast %111 : vector<1x32x32xf32> to vector<32x32xf32>
    %cst_84 = arith.constant dense<0.000000e+00> : vector<8x32xf32>
    %113 = tpu.matmul %110, %112, %cst_84 {dimension_numbers = #tpu.dot_dimension_numbers<[1], [0], [0], [1], [0, 0, 1, 1], [], []>} : vector<8x32xf32>, vector<32x32xf32>, vector<8x32xf32> -> vector<8x32xf32>
    %114 = arith.addf %105, %113 : vector<8x32xf32>
    %115 = vector.extract_strided_slice %95 {offsets = [48, 0], sizes = [8, 32], strides = [1, 1]} : vector<168x32xf32> to vector<8x32xf32>
    %116 = vector.extract_strided_slice %95 {offsets = [56, 0], sizes = [8, 32], strides = [1, 1]} : vector<168x32xf32> to vector<8x32xf32>
    %117 = arith.maximumf %115, %116 : vector<8x32xf32>
    %118 = vector.extract_strided_slice %95 {offsets = [64, 0], sizes = [8, 32], strides = [1, 1]} : vector<168x32xf32> to vector<8x32xf32>
    %119 = arith.maximumf %117, %118 : vector<8x32xf32>
    %c2_85 = arith.constant 2 : index
    %c0_86 = arith.constant 0 : index
    %c0_87 = arith.constant 0 : index
    %120 = vector.load %arg8[%c2_85, %c0_86, %c0_87] : memref<7x32x32xf32, #tpu.memory_space<vmem>>, vector<1x32x32xf32>
    %121 = vector.shape_cast %120 : vector<1x32x32xf32> to vector<32x32xf32>
    %cst_88 = arith.constant dense<0.000000e+00> : vector<8x32xf32>
    %122 = tpu.matmul %119, %121, %cst_88 {dimension_numbers = #tpu.dot_dimension_numbers<[1], [0], [0], [1], [0, 0, 1, 1], [], []>} : vector<8x32xf32>, vector<32x32xf32>, vector<8x32xf32> -> vector<8x32xf32>
    %123 = arith.addf %114, %122 : vector<8x32xf32>
    %124 = vector.extract_strided_slice %95 {offsets = [72, 0], sizes = [8, 32], strides = [1, 1]} : vector<168x32xf32> to vector<8x32xf32>
    %125 = vector.extract_strided_slice %95 {offsets = [80, 0], sizes = [8, 32], strides = [1, 1]} : vector<168x32xf32> to vector<8x32xf32>
    %126 = arith.maximumf %124, %125 : vector<8x32xf32>
    %127 = vector.extract_strided_slice %95 {offsets = [88, 0], sizes = [8, 32], strides = [1, 1]} : vector<168x32xf32> to vector<8x32xf32>
    %128 = arith.maximumf %126, %127 : vector<8x32xf32>
    %c3_89 = arith.constant 3 : index
    %c0_90 = arith.constant 0 : index
    %c0_91 = arith.constant 0 : index
    %129 = vector.load %arg8[%c3_89, %c0_90, %c0_91] : memref<7x32x32xf32, #tpu.memory_space<vmem>>, vector<1x32x32xf32>
    %130 = vector.shape_cast %129 : vector<1x32x32xf32> to vector<32x32xf32>
    %cst_92 = arith.constant dense<0.000000e+00> : vector<8x32xf32>
    %131 = tpu.matmul %128, %130, %cst_92 {dimension_numbers = #tpu.dot_dimension_numbers<[1], [0], [0], [1], [0, 0, 1, 1], [], []>} : vector<8x32xf32>, vector<32x32xf32>, vector<8x32xf32> -> vector<8x32xf32>
    %132 = arith.addf %123, %131 : vector<8x32xf32>
    %133 = vector.extract_strided_slice %95 {offsets = [96, 0], sizes = [8, 32], strides = [1, 1]} : vector<168x32xf32> to vector<8x32xf32>
    %134 = vector.extract_strided_slice %95 {offsets = [104, 0], sizes = [8, 32], strides = [1, 1]} : vector<168x32xf32> to vector<8x32xf32>
    %135 = arith.maximumf %133, %134 : vector<8x32xf32>
    %136 = vector.extract_strided_slice %95 {offsets = [112, 0], sizes = [8, 32], strides = [1, 1]} : vector<168x32xf32> to vector<8x32xf32>
    %137 = arith.maximumf %135, %136 : vector<8x32xf32>
    %c4_93 = arith.constant 4 : index
    %c0_94 = arith.constant 0 : index
    %c0_95 = arith.constant 0 : index
    %138 = vector.load %arg8[%c4_93, %c0_94, %c0_95] : memref<7x32x32xf32, #tpu.memory_space<vmem>>, vector<1x32x32xf32>
    %139 = vector.shape_cast %138 : vector<1x32x32xf32> to vector<32x32xf32>
    %cst_96 = arith.constant dense<0.000000e+00> : vector<8x32xf32>
    %140 = tpu.matmul %137, %139, %cst_96 {dimension_numbers = #tpu.dot_dimension_numbers<[1], [0], [0], [1], [0, 0, 1, 1], [], []>} : vector<8x32xf32>, vector<32x32xf32>, vector<8x32xf32> -> vector<8x32xf32>
    %141 = arith.addf %132, %140 : vector<8x32xf32>
    %142 = vector.extract_strided_slice %95 {offsets = [120, 0], sizes = [8, 32], strides = [1, 1]} : vector<168x32xf32> to vector<8x32xf32>
    %143 = vector.extract_strided_slice %95 {offsets = [128, 0], sizes = [8, 32], strides = [1, 1]} : vector<168x32xf32> to vector<8x32xf32>
    %144 = arith.maximumf %142, %143 : vector<8x32xf32>
    %145 = vector.extract_strided_slice %95 {offsets = [136, 0], sizes = [8, 32], strides = [1, 1]} : vector<168x32xf32> to vector<8x32xf32>
    %146 = arith.maximumf %144, %145 : vector<8x32xf32>
    %c5_97 = arith.constant 5 : index
    %c0_98 = arith.constant 0 : index
    %c0_99 = arith.constant 0 : index
    %147 = vector.load %arg8[%c5_97, %c0_98, %c0_99] : memref<7x32x32xf32, #tpu.memory_space<vmem>>, vector<1x32x32xf32>
    %148 = vector.shape_cast %147 : vector<1x32x32xf32> to vector<32x32xf32>
    %cst_100 = arith.constant dense<0.000000e+00> : vector<8x32xf32>
    %149 = tpu.matmul %146, %148, %cst_100 {dimension_numbers = #tpu.dot_dimension_numbers<[1], [0], [0], [1], [0, 0, 1, 1], [], []>} : vector<8x32xf32>, vector<32x32xf32>, vector<8x32xf32> -> vector<8x32xf32>
    %150 = arith.addf %141, %149 : vector<8x32xf32>
    %151 = vector.extract_strided_slice %95 {offsets = [144, 0], sizes = [8, 32], strides = [1, 1]} : vector<168x32xf32> to vector<8x32xf32>
    %152 = vector.extract_strided_slice %95 {offsets = [152, 0], sizes = [8, 32], strides = [1, 1]} : vector<168x32xf32> to vector<8x32xf32>
    %153 = arith.maximumf %151, %152 : vector<8x32xf32>
    %154 = vector.extract_strided_slice %95 {offsets = [160, 0], sizes = [8, 32], strides = [1, 1]} : vector<168x32xf32> to vector<8x32xf32>
    %155 = arith.maximumf %153, %154 : vector<8x32xf32>
    %c6_101 = arith.constant 6 : index
    %c0_102 = arith.constant 0 : index
    %c0_103 = arith.constant 0 : index
    %156 = vector.load %arg8[%c6_101, %c0_102, %c0_103] : memref<7x32x32xf32, #tpu.memory_space<vmem>>, vector<1x32x32xf32>
    %157 = vector.shape_cast %156 : vector<1x32x32xf32> to vector<32x32xf32>
    %cst_104 = arith.constant dense<0.000000e+00> : vector<8x32xf32>
    %158 = tpu.matmul %155, %157, %cst_104 {dimension_numbers = #tpu.dot_dimension_numbers<[1], [0], [0], [1], [0, 0, 1, 1], [], []>} : vector<8x32xf32>, vector<32x32xf32>, vector<8x32xf32> -> vector<8x32xf32>
    %159 = arith.addf %150, %158 : vector<8x32xf32>
    %c0_105 = arith.constant 0 : index
    %c0_106 = arith.constant 0 : index
    %160 = vector.load %arg9[%c0_105, %c0_106] : memref<1x32xf32, #tpu.memory_space<vmem>>, vector<1x32xf32>
    %161 = vector.broadcast %160 : vector<1x32xf32> to vector<8x32xf32>
    %162 = arith.addf %159, %161 : vector<8x32xf32>
    %cst_107 = arith.constant 0.000000e+00 : f32
    %163 = vector.broadcast %cst_107 : f32 to vector<8x32xf32>
    %164 = arith.maximumf %162, %163 : vector<8x32xf32>
    %c0_108 = arith.constant 0 : index
    %c0_109 = arith.constant 0 : index
    %165 = vector.load %arg10[%c0_108, %c0_109] : memref<32x4xf32, #tpu.memory_space<vmem>>, vector<32x4xf32>
    %cst_110 = arith.constant dense<0.000000e+00> : vector<8x4xf32>
    %166 = tpu.matmul %164, %165, %cst_110 {dimension_numbers = #tpu.dot_dimension_numbers<[1], [0], [0], [1], [0, 0, 1, 1], [], []>} : vector<8x32xf32>, vector<32x4xf32>, vector<8x4xf32> -> vector<8x4xf32>
    %c0_111 = arith.constant 0 : index
    %c0_112 = arith.constant 0 : index
    %167 = vector.load %arg11[%c0_111, %c0_112] : memref<1x4xf32, #tpu.memory_space<vmem>>, vector<1x4xf32>
    %168 = vector.broadcast %167 : vector<1x4xf32> to vector<8x4xf32>
    %169 = arith.addf %166, %168 : vector<8x4xf32>
    %c0_113 = arith.constant 0 : index
    %c0_114 = arith.constant 0 : index
    %170 = vector.load %arg12[%c0_113, %c0_114] : memref<8x4xf32, #tpu.memory_space<vmem>>, vector<8x4xf32>
    tpu.vector_store %arg12[%c0_113, %c0_114], %169 {strides = array<i32>} : memref<8x4xf32, #tpu.memory_space<vmem>>, vector<8x4xf32>,
    return
  }
  func.func @transform_0(%arg0: i32) -> (i32, i32, i32) {
    %c0_i32 = arith.constant 0 : i32
    %c0_i32_0 = arith.constant 0 : i32
    %c0_i32_1 = arith.constant 0 : i32
    return %arg0, %c0_i32, %c0_i32_0 : i32, i32, i32
  }
  func.func @transform_1(%arg0: i32) -> (i32, i32, i32) {
    %c0_i32 = arith.constant 0 : i32
    %c0_i32_0 = arith.constant 0 : i32
    %c0_i32_1 = arith.constant 0 : i32
    %c0_i32_2 = arith.constant 0 : i32
    return %c0_i32, %c0_i32_0, %c0_i32_1 : i32, i32, i32
  }
  func.func @transform_2(%arg0: i32) -> (i32, i32) {
    %c0_i32 = arith.constant 0 : i32
    %c0_i32_0 = arith.constant 0 : i32
    %c0_i32_1 = arith.constant 0 : i32
    return %c0_i32, %c0_i32_0 : i32, i32
  }
  func.func @transform_3(%arg0: i32) -> (i32, i32) {
    %c0_i32 = arith.constant 0 : i32
    %c0_i32_0 = arith.constant 0 : i32
    %c0_i32_1 = arith.constant 0 : i32
    return %c0_i32, %c0_i32_0 : i32, i32
  }
  func.func @transform_4(%arg0: i32) -> (i32, i32, i32) {
    %c0_i32 = arith.constant 0 : i32
    %c0_i32_0 = arith.constant 0 : i32
    %c0_i32_1 = arith.constant 0 : i32
    %c0_i32_2 = arith.constant 0 : i32
    return %c0_i32, %c0_i32_0, %c0_i32_1 : i32, i32, i32
  }
  func.func @transform_5(%arg0: i32) -> (i32, i32) {
    %c0_i32 = arith.constant 0 : i32
    %c0_i32_0 = arith.constant 0 : i32
    %c0_i32_1 = arith.constant 0 : i32
    return %c0_i32, %c0_i32_0 : i32, i32
  }
  func.func @transform_6(%arg0: i32) -> (i32, i32) {
    %c0_i32 = arith.constant 0 : i32
    %c0_i32_0 = arith.constant 0 : i32
    %c0_i32_1 = arith.constant 0 : i32
    return %c0_i32, %c0_i32_0 : i32, i32
  }
  func.func @transform_7(%arg0: i32) -> (i32, i32, i32) {
    %c0_i32 = arith.constant 0 : i32
    %c0_i32_0 = arith.constant 0 : i32
    %c0_i32_1 = arith.constant 0 : i32
    %c0_i32_2 = arith.constant 0 : i32
    return %c0_i32, %c0_i32_0, %c0_i32_1 : i32, i32, i32
  }
  func.func @transform_8(%arg0: i32) -> (i32, i32) {
    %c0_i32 = arith.constant 0 : i32
    %c0_i32_0 = arith.constant 0 : i32
    %c0_i32_1 = arith.constant 0 : i32
    return %c0_i32, %c0_i32_0 : i32, i32
  }
  func.func @transform_9(%arg0: i32) -> (i32, i32) {
    %c0_i32 = arith.constant 0 : i32
    %c0_i32_0 = arith.constant 0 : i32
    %c0_i32_1 = arith.constant 0 : i32
    return %c0_i32, %c0_i32_0 : i32, i32
  }
  func.func @transform_10(%arg0: i32) -> (i32, i32) {
    %c0_i32 = arith.constant 0 : i32
    %c0_i32_0 = arith.constant 0 : i32
    %c0_i32_1 = arith.constant 0 : i32
    return %c0_i32, %c0_i32_0 : i32, i32
  }
  func.func @transform_11(%arg0: i32) -> (i32, i32) {
    %c0_i32 = arith.constant 0 : i32
    %c0_i32_0 = arith.constant 0 : i32
    return %arg0, %c0_i32 : i32, i32
  }
}

</mosaic_0001>

<bundles_post_ra>
// kernel: tpu_custom_call.1
= control target key start
LH: loop header
LB: loop body
LE: loop exit
PB: predicated region body
PF: predicated region fallthrough
CT: control target
= control target key end

     0   :  { %vm153_vm0 = vcmask 1043456   ;;  %v17143_v0 = vmov 0.0   ;;  %vm10636_vm1 = vmmov 0   ;;  %vm83_vm2 = vcmask 97280   ;;  %s17129_s1 = inlined_call_operand.vmem [shape: f32[10,12,384], index: 1, kind: input, shape index: {}]   ;;  %s17130_s0 = inlined_call_operand.vmem [shape: f32[1,256,12], index: 0, kind: input, shape index: {}]   ;;  %s17131_s4 = inlined_call_operand.vmem [shape: f32[5,384,32], index: 4, kind: input, shape index: {}]   ;;  %s17132_s2 = inlined_call_operand.vmem [shape: f32[1,384], index: 2, kind: input, shape index: {}]   ;;  %s17133_s3 = inlined_call_operand.vmem [shape: f32[1,384], index: 3, kind: input, shape index: {}]   ;;  %s17134_s7 = inlined_call_operand.vmem [shape: f32[7,32,32], index: 7, kind: input, shape index: {}]   ;;  %s17135_s5 = inlined_call_operand.vmem [shape: f32[1,32], index: 5, kind: input, shape index: {}]   ;;  %s17136_s6 = inlined_call_operand.vmem [shape: f32[1,32], index: 6, kind: input, shape index: {}]   ;;  %s17137_s9 = inlined_call_operand.vmem [shape: f32[32,4], index: 9, kind: input, shape index: {}]   ;;  %s17138_s8 = inlined_call_operand.vmem [shape: f32[1,32], index: 8, kind: input, shape index: {}]   ;;  %s17139_s10 = inlined_call_operand.vmem [shape: f32[1,4], index: 10, kind: input, shape index: {}]   ;;  %s17140_s11 = inlined_call_operand.vmem [shape: f32[8,4], index: 11, kind: output, shape index: {}]  }
   0x1   :  { %9275 = vmatprep.subr.mxu1 %v17143_v0  ;;  %v8032_v1 = vld [vmem:[%s17129_s1 + $0x50] sm:$0xf]  ;;  %v8033_v2 = vld [vmem:[%s17129_s1 + $0x58] sm:$0xf]  ;;  %v8031_v3 = vld [vmem:[%s17129_s1 + $0x48] sm:$0xf]  ;;  %9279 = vmatprep.mubr.msk.f32.mxu1 %vm10636_vm1, %v17143_v0 }
   0x2   :  { %8034 = vmatprep.subr.msk.mxu0 %vm153_vm0, %v8032_v1  ;;  %9276 = vmatpush3.msk.msra.mxu1 %vm153_vm0, %v8033_v2  ;;  %v8029_v4 = vld [vmem:[%s17129_s1 + $0x38] sm:$0xff]  ;;  %v8030_v5 = vld [vmem:[%s17129_s1 + $0x40] sm:$0xff]  ;;  %v8028_v6 = vld [vmem:[%s17129_s1 + $0x30] sm:$0xff]  ;;  %vm7377_vm3 = vcmask 261120   ;;  %vm8022_vm4 = vcmask 31744  }
   0x3   :  { %8035 = vmatpush1.msk.msra.mxu0 %vm153_vm0, %v8031_v3  ;;  %9277 = vmatprep.subr.mxu1 %v17143_v0  ;;  %v10725_v7 = vld [vmem:[%s17130_s0 + $0x8] sm:$0xff]  ;;  %v74_v8 = vld [vmem:[%s17129_s1 + $0x20] sm:$0xf]  ;;  %v73_v9 = vld [vmem:[%s17129_s1 + $0x18] sm:$0xf] }
   0x4   :  { %193 = vmatprep.subr.mxu0 %v8029_v4  ;;  %9278 = vmatpush3.msra.mxu1 %v8030_v5  ;;  %v10744_v10 = vld [vmem:[%s17130_s0 + $0x10] sm:$0xff]  ;;  %v75_v11 = vld [vmem:[%s17129_s1 + $0x28] sm:$0xf]  ;;  %v70_v13 = vld [vmem:[%s17129_s1] sm:$0xff] }
   0x5   :  { %194 = vmatpush1.msra.mxu0 %v8028_v6  ;;  %227 = vmatprep.mubr.f32.mxu0 %v17143_v0  ;;  %v71_v12 = vld [vmem:[%s17129_s1 + $0x8] sm:$0xff]  ;;  %v10768_v14 = vld [vmem:[%s17130_s0 + $0x18] sm:$0xff]  ;;  %v72_v15 = vld [vmem:[%s17129_s1 + $0x10] sm:$0xff] }
   0x6   :  { %9280 = vmatmul.mubr.msk.f32.vlgmr.msra.gmra.mxu1 %vm83_vm2, %v10725_v7  ;;  %8036 = vmatmul.mubr.msk.f32.vlgmr.msra.gmra.mxu0 %vm83_vm2, %v10725_v7  ;;  %v8136_v16 = vld [vmem:[%s17129_s1 + $0x80] sm:$0xf]  ;;  %v10802_v18 = vld [vmem:[%s17130_s0 + $0x28] sm:$0xff]  ;;  %v10814_v19 = vld [vmem:[%s17130_s0 + $0x30] sm:$0xff] }
   0x7   :  { %8083 = vmatprep.subr.msk.mxu0 %vm153_vm0, %v74_v8  ;;  %9282 = vmatprep.mubr.msk.f32.mxu1 %vm10636_vm1, %v17143_v0  ;;  %v10788_v17 = vld [vmem:[%s17130_s0 + $0x20] sm:$0xff]  ;;  %v10826_v20 = vld [vmem:[%s17130_s0 + $0x38] sm:$0xff]  ;;  %v10850_v22 = vld [vmem:[%s17130_s0 + $0x48] sm:$0xff] }
   0x8   :  { %8084 = vmatpush1.msk.msra.mxu0 %vm153_vm0, %v73_v9  ;;  %233 = vmatprep.mubr.f32.mxu0 %v17143_v0  ;;  %v10838_v21 = vld [vmem:[%s17130_s0 + $0x40] sm:$0xff]  ;;  %v10862_v23 = vld [vmem:[%s17130_s0 + $0x50] sm:$0xff]  ;;  %v10874_v24 = vld [vmem:[%s17130_s0 + $0x58] sm:$0xff] }
   0x9   :  { %9348 = vmatprep.subr.mxu1 %v17143_v0  ;;  %588 = vmatprep.subr.mxu0 %v71_v12  ;;  %v10886_v25 = vld [vmem:[%s17130_s0 + $0x60] sm:$0xff]  ;;  %v10898_v26 = vld [vmem:[%s17130_s0 + $0x68] sm:$0xff]  ;;  %v10910_v27 = vld [vmem:[%s17130_s0 + $0x70] sm:$0xff] }
   0xa   :  { %9283 = vmatmul.mubr.msk.f32.gmra.mxu1 %vm83_vm2, %v10744_v10  ;;  %8037 = vmatmul.mubr.msk.f32.gmra.mxu0 %vm83_vm2, %v10744_v10  ;;  %v10922_v28 = vld [vmem:[%s17130_s0 + $0x78] sm:$0xff]  ;;  %v10934_v29 = vld [vmem:[%s17130_s0 + $0x80] sm:$0xff]  ;;  %v10946_v30 = vld [vmem:[%s17130_s0 + $0x88] sm:$0xff] }
   0xb   :  { %9349 = vmatpush3.msk.msra.mxu1 %vm153_vm0, %v75_v11  ;;  %9285 = vmatprep.mubr.msk.f32.mxu1 %vm10636_vm1, %v17143_v0  ;;  %v10958_v31 = vld [vmem:[%s17130_s0 + $0x90] sm:$0xff]  ;;  %v10970_v32 = vld [vmem:[%s17130_s0 + $0x98] sm:$0xff]  ;;  %v10982_v33 = vld [vmem:[%s17130_s0 + $0xa0] sm:$0xff] }
   0xc   :  { %239 = vmatprep.mubr.f32.mxu0 %v17143_v0  ;;  %589 = vmatpush1.msra.mxu0 %v70_v13  ;;  %v10994_v34 = vld [vmem:[%s17130_s0 + $0xa8] sm:$0xff]  ;;  %v11006_v35 = vld [vmem:[%s17130_s0 + $0xb0] sm:$0xff]  ;;  %v11018_v36 = vld [vmem:[%s17130_s0 + $0xb8] sm:$0xff] }
   0xd   :  { %9350 = vmatprep.subr.mxu1 %v17143_v0  ;;  %8138 = vmatprep.subr.msk.mxu0 %vm153_vm0, %v8136_v16  ;;  %v38_v37 = vld [vmem:[%s17130_s0] sm:$0xff]  ;;  %v8135_v38 = vld [vmem:[%s17129_s1 + $0x78] sm:$0xf]  ;;  %v8137_v39 = vld [vmem:[%s17129_s1 + $0x88] sm:$0xf] }
   0xe   :  { %9286 = vmatmul.mubr.msk.f32.gmra.mxu1 %vm83_vm2, %v10768_v14  ;;  %8038 = vmatmul.mubr.msk.f32.gmra.mxu0 %vm83_vm2, %v10768_v14  ;;  %v8133_v40 = vld [vmem:[%s17129_s1 + $0x68] sm:$0xff]  ;;  %v8132_v41 = vld [vmem:[%s17129_s1 + $0x60] sm:$0xff]  ;;  %v8134_v42 = vld [vmem:[%s17129_s1 + $0x70] sm:$0xff] }
   0xf   :  { %9288 = vmatprep.mubr.msk.f32.mxu1 %vm10636_vm1, %v17143_v0  ;;  %245 = vmatprep.mubr.f32.mxu0 %v17143_v0  ;;  %v8191_v43 = vld [vmem:[%s17129_s1 + $0xb0] sm:$0xf]  ;;  %v8190_v44 = vld [vmem:[%s17129_s1 + $0xa8] sm:$0xf]  ;;  %v8192_v45 = vld [vmem:[%s17129_s1 + $0xb8] sm:$0xf] }
  0x10   :  { %9351 = vmatpush3.msra.mxu1 %v72_v15  ;;  %v8188_v46 = vld [vmem:[%s17129_s1 + $0x98] sm:$0xff]  ;;  %v8187_v47 = vld [vmem:[%s17129_s1 + $0x90] sm:$0xff]  ;;  %v8189_v48 = vld [vmem:[%s17129_s1 + $0xa0] sm:$0xff] }
  0x11   :  { %9421 = vmatprep.subr.mxu1 %v17143_v0  ;;  %v8246_v49 = vld [vmem:[%s17129_s1 + $0xe0] sm:$0xf] }
  0x12   :  { %9289 = vmatmul.mubr.msk.f32.gmra.mxu1 %vm83_vm2, %v10788_v17  ;;  %8039 = vmatmul.mubr.msk.f32.gmra.mxu0 %vm83_vm2, %v10788_v17 }
  0x13   :  { %9291 = vmatprep.mubr.msk.f32.mxu1 %vm10636_vm1, %v17143_v0  ;;  %251 = vmatprep.mubr.f32.mxu0 %v17143_v0 }
  0x16   :  { %9292 = vmatmul.mubr.msk.f32.gmra.mxu1 %vm83_vm2, %v10802_v18  ;;  %8040 = vmatmul.mubr.msk.f32.gmra.mxu0 %vm83_vm2, %v10802_v18 }
  0x17   :  { %9294 = vmatprep.mubr.msk.f32.mxu1 %vm10636_vm1, %v17143_v0  ;;  %257 = vmatprep.mubr.f32.mxu0 %v17143_v0 }
  0x1a   :  { %9295 = vmatmul.mubr.msk.f32.gmra.mxu1 %vm83_vm2, %v10814_v19  ;;  %8041 = vmatmul.mubr.msk.f32.gmra.mxu0 %vm83_vm2, %v10814_v19 }
  0x1b   :  { %9297 = vmatprep.mubr.msk.f32.mxu1 %vm10636_vm1, %v17143_v0  ;;  %263 = vmatprep.mubr.f32.mxu0 %v17143_v0 }
  0x1e   :  { %9298 = vmatmul.mubr.msk.f32.gmra.mxu1 %vm83_vm2, %v10826_v20  ;;  %8042 = vmatmul.mubr.msk.f32.gmra.mxu0 %vm83_vm2, %v10826_v20 }
  0x1f   :  { %9300 = vmatprep.mubr.msk.f32.mxu1 %vm10636_vm1, %v17143_v0  ;;  %269 = vmatprep.mubr.f32.mxu0 %v17143_v0 }
  0x22   :  { %9301 = vmatmul.mubr.msk.f32.gmra.mxu1 %vm83_vm2, %v10838_v21  ;;  %8043 = vmatmul.mubr.msk.f32.gmra.mxu0 %vm83_vm2, %v10838_v21 }
  0x23   :  { %9303 = vmatprep.mubr.msk.f32.mxu1 %vm10636_vm1, %v17143_v0  ;;  %275 = vmatprep.mubr.f32.mxu0 %v17143_v0 }
  0x26   :  { %9304 = vmatmul.mubr.msk.f32.gmra.mxu1 %vm83_vm2, %v10850_v22  ;;  %8044 = vmatmul.mubr.msk.f32.gmra.mxu0 %vm83_vm2, %v10850_v22 }
  0x27   :  { %9306 = vmatprep.mubr.msk.f32.mxu1 %vm10636_vm1, %v17143_v0  ;;  %281 = vmatprep.mubr.f32.mxu0 %v17143_v0 }
  0x2a   :  { %9307 = vmatmul.mubr.msk.f32.gmra.mxu1 %vm83_vm2, %v10862_v23  ;;  %8045 = vmatmul.mubr.msk.f32.gmra.mxu0 %vm83_vm2, %v10862_v23 }
  0x2b   :  { %9309 = vmatprep.mubr.msk.f32.mxu1 %vm10636_vm1, %v17143_v0  ;;  %287 = vmatprep.mubr.f32.mxu0 %v17143_v0 }
  0x2e   :  { %9310 = vmatmul.mubr.msk.f32.gmra.mxu1 %vm83_vm2, %v10874_v24  ;;  %8046 = vmatmul.mubr.msk.f32.gmra.mxu0 %vm83_vm2, %v10874_v24 }
  0x2f   :  { %9312 = vmatprep.mubr.msk.f32.mxu1 %vm10636_vm1, %v17143_v0  ;;  %293 = vmatprep.mubr.f32.mxu0 %v17143_v0 }
  0x32   :  { %9313 = vmatmul.mubr.msk.f32.gmra.mxu1 %vm83_vm2, %v10886_v25  ;;  %8047 = vmatmul.mubr.msk.f32.gmra.mxu0 %vm83_vm2, %v10886_v25 }
  0x33   :  { %9315 = vmatprep.mubr.msk.f32.mxu1 %vm10636_vm1, %v17143_v0  ;;  %299 = vmatprep.mubr.f32.mxu0 %v17143_v0 }
  0x36   :  { %9316 = vmatmul.mubr.msk.f32.gmra.mxu1 %vm83_vm2, %v10898_v26  ;;  %8048 = vmatmul.mubr.msk.f32.gmra.mxu0 %vm83_vm2, %v10898_v26 }
  0x37   :  { %9318 = vmatprep.mubr.msk.f32.mxu1 %vm10636_vm1, %v17143_v0  ;;  %305 = vmatprep.mubr.f32.mxu0 %v17143_v0 }
  0x3a   :  { %9319 = vmatmul.mubr.msk.f32.gmra.mxu1 %vm83_vm2, %v10910_v27  ;;  %8049 = vmatmul.mubr.msk.f32.gmra.mxu0 %vm83_vm2, %v10910_v27 }
  0x3b   :  { %9321 = vmatprep.mubr.msk.f32.mxu1 %vm10636_vm1, %v17143_v0  ;;  %311 = vmatprep.mubr.f32.mxu0 %v17143_v0 }
  0x3e   :  { %9322 = vmatmul.mubr.msk.f32.gmra.mxu1 %vm83_vm2, %v10922_v28  ;;  %8050 = vmatmul.mubr.msk.f32.gmra.mxu0 %vm83_vm2, %v10922_v28 }
  0x3f   :  { %9324 = vmatprep.mubr.msk.f32.mxu1 %vm10636_vm1, %v17143_v0  ;;  %317 = vmatprep.mubr.f32.mxu0 %v17143_v0 }
  0x42   :  { %9325 = vmatmul.mubr.msk.f32.gmra.mxu1 %vm83_vm2, %v10934_v29  ;;  %8051 = vmatmul.mubr.msk.f32.gmra.mxu0 %vm83_vm2, %v10934_v29 }
  0x43   :  { %9327 = vmatprep.mubr.msk.f32.mxu1 %vm10636_vm1, %v17143_v0  ;;  %323 = vmatprep.mubr.f32.mxu0 %v17143_v0 }
  0x46   :  { %9328 = vmatmul.mubr.msk.f32.gmra.mxu1 %vm83_vm2, %v10946_v30  ;;  %8052 = vmatmul.mubr.msk.f32.gmra.mxu0 %vm83_vm2, %v10946_v30 }
  0x47   :  { %9330 = vmatprep.mubr.msk.f32.mxu1 %vm10636_vm1, %v17143_v0  ;;  %329 = vmatprep.mubr.f32.mxu0 %v17143_v0 }
  0x4a   :  { %9331 = vmatmul.mubr.msk.f32.gmra.mxu1 %vm83_vm2, %v10958_v31  ;;  %8053 = vmatmul.mubr.msk.f32.gmra.mxu0 %vm83_vm2, %v10958_v31 }
  0x4b   :  { %9333 = vmatprep.mubr.msk.f32.mxu1 %vm10636_vm1, %v17143_v0  ;;  %335 = vmatprep.mubr.f32.mxu0 %v17143_v0 }
  0x4e   :  { %9334 = vmatmul.mubr.msk.f32.gmra.mxu1 %vm83_vm2, %v10970_v32  ;;  %8054 = vmatmul.mubr.msk.f32.gmra.mxu0 %vm83_vm2, %v10970_v32 }
  0x4f   :  { %9336 = vmatprep.mubr.msk.f32.mxu1 %vm10636_vm1, %v17143_v0  ;;  %341 = vmatprep.mubr.f32.mxu0 %v17143_v0 }
  0x52   :  { %9337 = vmatmul.mubr.msk.f32.gmra.mxu1 %vm83_vm2, %v10982_v33  ;;  %8055 = vmatmul.mubr.msk.f32.gmra.mxu0 %vm83_vm2, %v10982_v33 }
  0x53   :  { %9339 = vmatprep.mubr.msk.f32.mxu1 %vm10636_vm1, %v17143_v0  ;;  %347 = vmatprep.mubr.f32.mxu0 %v17143_v0 }
  0x56   :  { %9340 = vmatmul.mubr.msk.f32.gmra.mxu1 %vm83_vm2, %v10994_v34  ;;  %8056 = vmatmul.mubr.msk.f32.gmra.mxu0 %vm83_vm2, %v10994_v34 }
  0x57   :  { %9342 = vmatprep.mubr.msk.f32.mxu1 %vm10636_vm1, %v17143_v0  ;;  %353 = vmatprep.mubr.f32.mxu0 %v17143_v0 }
  0x5a   :  { %9343 = vmatmul.mubr.msk.f32.gmra.mxu1 %vm83_vm2, %v11006_v35  ;;  %8057 = vmatmul.mubr.msk.f32.gmra.mxu0 %vm83_vm2, %v11006_v35 }
  0x5b   :  { %9345 = vmatprep.mubr.msk.f32.mxu1 %vm10636_vm1, %v17143_v0  ;;  %359 = vmatprep.mubr.f32.mxu0 %v17143_v0 }
  0x5e   :  { %9346 = vmatmul.mubr.msk.f32.gmra.mxu1 %vm83_vm2, %v11018_v36  ;;  %8058 = vmatmul.mubr.msk.f32.gmra.mxu0 %vm83_vm2, %v11018_v36 }
  0x5f   :  { %9352 = vmatprep.mubr.msk.f32.mxu1 %vm10636_vm1, %v17143_v0  ;;  %622 = vmatprep.mubr.f32.mxu0 %v17143_v0 }
  0x62   :  { %9353 = vmatmul.mubr.msk.f32.vlgmr.msra.gmra.mxu1 %vm83_vm2, %v38_v37  ;;  %8085 = vmatmul.mubr.msk.f32.vlgmr.msra.gmra.mxu0 %vm83_vm2, %v38_v37 }
  0x63   :  { %8139 = vmatpush1.msk.msra.mxu0 %vm153_vm0, %v8135_v38  ;;  %9355 = vmatprep.mubr.msk.f32.mxu1 %vm10636_vm1, %v17143_v0 }
  0x64   :  { %628 = vmatprep.mubr.f32.mxu0 %v17143_v0  ;;  %9422 = vmatpush3.msk.msra.mxu1 %vm153_vm0, %v8137_v39 }
  0x65   :  { %990 = vmatprep.subr.mxu0 %v8133_v40  ;;  %9423 = vmatprep.subr.mxu1 %v17143_v0 }
  0x66   :  { %9356 = vmatmul.mubr.msk.f32.gmra.mxu1 %vm83_vm2, %v10725_v7  ;;  %8086 = vmatmul.mubr.msk.f32.gmra.mxu0 %vm83_vm2, %v10725_v7 }
  0x67   :  { %9358 = vmatprep.mubr.msk.f32.mxu1 %vm10636_vm1, %v17143_v0  ;;  %634 = vmatprep.mubr.f32.mxu0 %v17143_v0 }
  0x68   :  { %991 = vmatpush1.msra.mxu0 %v8132_v41  ;;  %9424 = vmatpush3.msra.mxu1 %v8134_v42 }
  0x69   :  { %8193 = vmatprep.subr.msk.mxu0 %vm153_vm0, %v8191_v43  ;;  %9494 = vmatprep.subr.mxu1 %v17143_v0 }
  0x6a   :  { %9359 = vmatmul.mubr.msk.f32.gmra.mxu1 %vm83_vm2, %v10744_v10  ;;  %8087 = vmatmul.mubr.msk.f32.gmra.mxu0 %vm83_vm2, %v10744_v10 }
  0x6b   :  { %9361 = vmatprep.mubr.msk.f32.mxu1 %vm10636_vm1, %v17143_v0  ;;  %640 = vmatprep.mubr.f32.mxu0 %v17143_v0 }
  0x6e   :  { %9362 = vmatmul.mubr.msk.f32.gmra.mxu1 %vm83_vm2, %v10768_v14  ;;  %8088 = vmatmul.mubr.msk.f32.gmra.mxu0 %vm83_vm2, %v10768_v14 }
  0x6f   :  { %9364 = vmatprep.mubr.msk.f32.mxu1 %vm10636_vm1, %v17143_v0  ;;  %646 = vmatprep.mubr.f32.mxu0 %v17143_v0 }
  0x72   :  { %9365 = vmatmul.mubr.msk.f32.gmra.mxu1 %vm83_vm2, %v10788_v17  ;;  %8089 = vmatmul.mubr.msk.f32.gmra.mxu0 %vm83_vm2, %v10788_v17 }
  0x73   :  { %9367 = vmatprep.mubr.msk.f32.mxu1 %vm10636_vm1, %v17143_v0  ;;  %652 = vmatprep.mubr.f32.mxu0 %v17143_v0 }
  0x76   :  { %9368 = vmatmul.mubr.msk.f32.gmra.mxu1 %vm83_vm2, %v10802_v18  ;;  %8090 = vmatmul.mubr.msk.f32.gmra.mxu0 %vm83_vm2, %v10802_v18 }
  0x77   :  { %9370 = vmatprep.mubr.msk.f32.mxu1 %vm10636_vm1, %v17143_v0  ;;  %658 = vmatprep.mubr.f32.mxu0 %v17143_v0 }
  0x7a   :  { %9371 = vmatmul.mubr.msk.f32.gmra.mxu1 %vm83_vm2, %v10814_v19  ;;  %8091 = vmatmul.mubr.msk.f32.gmra.mxu0 %vm83_vm2, %v10814_v19 }
  0x7b   :  { %9373 = vmatprep.mubr.msk.f32.mxu1 %vm10636_vm1, %v17143_v0  ;;  %664 = vmatprep.mubr.f32.mxu0 %v17143_v0 }
  0x7e   :  { %9374 = vmatmul.mubr.msk.f32.gmra.mxu1 %vm83_vm2, %v10826_v20  ;;  %8092 = vmatmul.mubr.msk.f32.gmra.mxu0 %vm83_vm2, %v10826_v20 }
  0x7f   :  { %9376 = vmatprep.mubr.msk.f32.mxu1 %vm10636_vm1, %v17143_v0  ;;  %670 = vmatprep.mubr.f32.mxu0 %v17143_v0 }
  0x82   :  { %9377 = vmatmul.mubr.msk.f32.gmra.mxu1 %vm83_vm2, %v10838_v21  ;;  %8093 = vmatmul.mubr.msk.f32.gmra.mxu0 %vm83_vm2, %v10838_v21 }
  0x83   :  { %9379 = vmatprep.mubr.msk.f32.mxu1 %vm10636_vm1, %v17143_v0  ;;  %676 = vmatprep.mubr.f32.mxu0 %v17143_v0 }
  0x86   :  { %9380 = vmatmul.mubr.msk.f32.gmra.mxu1 %vm83_vm2, %v10850_v22  ;;  %8094 = vmatmul.mubr.msk.f32.gmra.mxu0 %vm83_vm2, %v10850_v22 }
  0x87   :  { %9382 = vmatprep.mubr.msk.f32.mxu1 %vm10636_vm1, %v17143_v0  ;;  %682 = vmatprep.mubr.f32.mxu0 %v17143_v0 }
  0x8a   :  { %9383 = vmatmul.mubr.msk.f32.gmra.mxu1 %vm83_vm2, %v10862_v23  ;;  %8095 = vmatmul.mubr.msk.f32.gmra.mxu0 %vm83_vm2, %v10862_v23 }
  0x8b   :  { %9385 = vmatprep.mubr.msk.f32.mxu1 %vm10636_vm1, %v17143_v0  ;;  %688 = vmatprep.mubr.f32.mxu0 %v17143_v0 }
  0x8e   :  { %9386 = vmatmul.mubr.msk.f32.gmra.mxu1 %vm83_vm2, %v10874_v24  ;;  %8096 = vmatmul.mubr.msk.f32.gmra.mxu0 %vm83_vm2, %v10874_v24 }
  0x8f   :  { %9388 = vmatprep.mubr.msk.f32.mxu1 %vm10636_vm1, %v17143_v0  ;;  %694 = vmatprep.mubr.f32.mxu0 %v17143_v0 }
  0x92   :  { %9389 = vmatmul.mubr.msk.f32.gmra.mxu1 %vm83_vm2, %v10886_v25  ;;  %8097 = vmatmul.mubr.msk.f32.gmra.mxu0 %vm83_vm2, %v10886_v25 }
  0x93   :  { %9391 = vmatprep.mubr.msk.f32.mxu1 %vm10636_vm1, %v17143_v0  ;;  %700 = vmatprep.mubr.f32.mxu0 %v17143_v0 }
  0x96   :  { %9392 = vmatmul.mubr.msk.f32.gmra.mxu1 %vm83_vm2, %v10898_v26  ;;  %8098 = vmatmul.mubr.msk.f32.gmra.mxu0 %vm83_vm2, %v10898_v26 }
  0x97   :  { %9394 = vmatprep.mubr.msk.f32.mxu1 %vm10636_vm1, %v17143_v0  ;;  %706 = vmatprep.mubr.f32.mxu0 %v17143_v0 }
  0x9a   :  { %9395 = vmatmul.mubr.msk.f32.gmra.mxu1 %vm83_vm2, %v10910_v27  ;;  %8099 = vmatmul.mubr.msk.f32.gmra.mxu0 %vm83_vm2, %v10910_v27 }
  0x9b   :  { %9397 = vmatprep.mubr.msk.f32.mxu1 %vm10636_vm1, %v17143_v0  ;;  %712 = vmatprep.mubr.f32.mxu0 %v17143_v0 }
  0x9e   :  { %9398 = vmatmul.mubr.msk.f32.gmra.mxu1 %vm83_vm2, %v10922_v28  ;;  %8100 = vmatmul.mubr.msk.f32.gmra.mxu0 %vm83_vm2, %v10922_v28 }
  0x9f   :  { %9400 = vmatprep.mubr.msk.f32.mxu1 %vm10636_vm1, %v17143_v0  ;;  %718 = vmatprep.mubr.f32.mxu0 %v17143_v0 }
  0xa2   :  { %9401 = vmatmul.mubr.msk.f32.gmra.mxu1 %vm83_vm2, %v10934_v29  ;;  %8101 = vmatmul.mubr.msk.f32.gmra.mxu0 %vm83_vm2, %v10934_v29 }
  0xa3   :  { %9403 = vmatprep.mubr.msk.f32.mxu1 %vm10636_vm1, %v17143_v0  ;;  %724 = vmatprep.mubr.f32.mxu0 %v17143_v0 }
  0xa6   :  { %9404 = vmatmul.mubr.msk.f32.gmra.mxu1 %vm83_vm2, %v10946_v30  ;;  %8102 = vmatmul.mubr.msk.f32.gmra.mxu0 %vm83_vm2, %v10946_v30 }
  0xa7   :  { %9406 = vmatprep.mubr.msk.f32.mxu1 %vm10636_vm1, %v17143_v0  ;;  %730 = vmatprep.mubr.f32.mxu0 %v17143_v0 }
  0xaa   :  { %9407 = vmatmul.mubr.msk.f32.gmra.mxu1 %vm83_vm2, %v10958_v31  ;;  %8103 = vmatmul.mubr.msk.f32.gmra.mxu0 %vm83_vm2, %v10958_v31 }
  0xab   :  { %9409 = vmatprep.mubr.msk.f32.mxu1 %vm10636_vm1, %v17143_v0  ;;  %736 = vmatprep.mubr.f32.mxu0 %v17143_v0 }
  0xae   :  { %9410 = vmatmul.mubr.msk.f32.gmra.mxu1 %vm83_vm2, %v10970_v32  ;;  %8104 = vmatmul.mubr.msk.f32.gmra.mxu0 %vm83_vm2, %v10970_v32 }
  0xaf   :  { %9412 = vmatprep.mubr.msk.f32.mxu1 %vm10636_vm1, %v17143_v0  ;;  %742 = vmatprep.mubr.f32.mxu0 %v17143_v0 }
  0xb2   :  { %9413 = vmatmul.mubr.msk.f32.gmra.mxu1 %vm83_vm2, %v10982_v33  ;;  %8105 = vmatmul.mubr.msk.f32.gmra.mxu0 %vm83_vm2, %v10982_v33 }
  0xb3   :  { %9415 = vmatprep.mubr.msk.f32.mxu1 %vm10636_vm1, %v17143_v0  ;;  %748 = vmatprep.mubr.f32.mxu0 %v17143_v0 }
  0xb6   :  { %9416 = vmatmul.mubr.msk.f32.gmra.mxu1 %vm83_vm2, %v10994_v34  ;;  %8106 = vmatmul.mubr.msk.f32.gmra.mxu0 %vm83_vm2, %v10994_v34 }
  0xb7   :  { %9418 = vmatprep.mubr.msk.f32.mxu1 %vm10636_vm1, %v17143_v0  ;;  %754 = vmatprep.mubr.f32.mxu0 %v17143_v0 }
  0xba   :  { %9419 = vmatmul.mubr.msk.f32.gmra.mxu1 %vm83_vm2, %v11006_v35  ;;  %8107 = vmatmul.mubr.msk.f32.gmra.mxu0 %vm83_vm2, %v11006_v35 }
  0xbb   :  { %9425 = vmatprep.mubr.msk.f32.mxu1 %vm10636_vm1, %v17143_v0  ;;  %1024 = vmatprep.mubr.f32.mxu0 %v17143_v0 }
  0xbe   :  { %9426 = vmatmul.mubr.msk.f32.vlgmr.msra.gmra.mxu1 %vm83_vm2, %v10744_v10  ;;  %8140 = vmatmul.mubr.msk.f32.vlgmr.msra.gmra.mxu0 %vm83_vm2, %v10744_v10 }
  0xbf   :  { %8194 = vmatpush1.msk.msra.mxu0 %vm153_vm0, %v8190_v44  ;;  %9428 = vmatprep.mubr.msk.f32.mxu1 %vm10636_vm1, %v17143_v0 }
  0xc0   :  { %1030 = vmatprep.mubr.f32.mxu0 %v17143_v0  ;;  %9495 = vmatpush3.msk.msra.mxu1 %vm153_vm0, %v8192_v45 }
  0xc1   :  { %1461 = vmatprep.subr.mxu0 %v8188_v46  ;;  %9496 = vmatprep.subr.mxu1 %v17143_v0 }
  0xc2   :  { %9429 = vmatmul.mubr.msk.f32.gmra.mxu1 %vm83_vm2, %v10768_v14  ;;  %8141 = vmatmul.mubr.msk.f32.gmra.mxu0 %vm83_vm2, %v10768_v14 }
  0xc3   :  { %9431 = vmatprep.mubr.msk.f32.mxu1 %vm10636_vm1, %v17143_v0  ;;  %1036 = vmatprep.mubr.f32.mxu0 %v17143_v0 }
  0xc4   :  { %1462 = vmatpush1.msra.mxu0 %v8187_v47  ;;  %9497 = vmatpush3.msra.mxu1 %v8189_v48 }
  0xc5   :  { %8248 = vmatprep.subr.msk.mxu0 %vm153_vm0, %v8246_v49  ;;  %9567 = vmatprep.subr.mxu1 %v17143_v0 }
  0xc6   :  { %v11249_v50 = vpop.f32.mrf.mxu1  ;;  %9432 = vmatmul.mubr.msk.f32.gmra.mxu1 %vm83_vm2, %v10788_v17  ;;  %v11253_v51 = vpop.f32.mrf.mxu0  ;;  %8142 = vmatmul.mubr.msk.f32.gmra.mxu0 %vm83_vm2, %v10788_v17 }
  0xc7   :  { %9434 = vmatprep.mubr.msk.f32.mxu1 %vm10636_vm1, %v17143_v0  ;;  %1042 = vmatprep.mubr.f32.mxu0 %v17143_v0 }
  0xc8   :  { %v9281_v52 = vpop.f32.mrf.mxu1  ;;  %v11260_v53 = vpop.f32.mrf.mxu0 }
  0xca   :  { %v11262_v54 = vpop.f32.mrf.mxu1  ;;  %9435 = vmatmul.mubr.msk.f32.gmra.mxu1 %vm83_vm2, %v10802_v18  ;;  %v11266_v55 = vpop.f32.mrf.mxu0  ;;  %8143 = vmatmul.mubr.msk.f32.gmra.mxu0 %vm83_vm2, %v10802_v18 }
  0xcb   :  { %9437 = vmatprep.mubr.msk.f32.mxu1 %vm10636_vm1, %v17143_v0  ;;  %1048 = vmatprep.mubr.f32.mxu0 %v17143_v0 }
  0xcc   :  { %v9284_v56 = vpop.f32.mrf.mxu1  ;;  %v11273_v57 = vpop.f32.mrf.mxu0 }
  0xce   :  { %v11275_v58 = vpop.f32.mrf.mxu1  ;;  %9438 = vmatmul.mubr.msk.f32.gmra.mxu1 %vm83_vm2, %v10814_v19  ;;  %v11279_v59 = vpop.f32.mrf.mxu0  ;;  %8144 = vmatmul.mubr.msk.f32.gmra.mxu0 %vm83_vm2, %v10814_v19 }
  0xcf   :  { %9440 = vmatprep.mubr.msk.f32.mxu1 %vm10636_vm1, %v17143_v0  ;;  %1054 = vmatprep.mubr.f32.mxu0 %v17143_v0 }
  0xd0   :  { %v9287_v60 = vpop.f32.mrf.mxu1  ;;  %v11286_v61 = vpop.f32.mrf.mxu0 }
  0xd2   :  { %v11288_v62 = vpop.f32.mrf.mxu1  ;;  %9441 = vmatmul.mubr.msk.f32.gmra.mxu1 %vm83_vm2, %v10826_v20  ;;  %v11292_v63 = vpop.f32.mrf.mxu0  ;;  %8145 = vmatmul.mubr.msk.f32.gmra.mxu0 %vm83_vm2, %v10826_v20 }
  0xd3   :  { %9443 = vmatprep.mubr.msk.f32.mxu1 %vm10636_vm1, %v17143_v0  ;;  %1060 = vmatprep.mubr.f32.mxu0 %v17143_v0 }
  0xd4   :  { %v9290_v1 = vpop.f32.mrf.mxu1  ;;  %v11299_v2 = vpop.f32.mrf.mxu0 }
  0xd6   :  { %v11301_v3 = vpop.f32.mrf.mxu1  ;;  %9444 = vmatmul.mubr.msk.f32.gmra.mxu1 %vm83_vm2, %v10838_v21  ;;  %v11305_v4 = vpop.f32.mrf.mxu0  ;;  %8146 = vmatmul.mubr.msk.f32.gmra.mxu0 %vm83_vm2, %v10838_v21 }
  0xd7   :  { %9446 = vmatprep.mubr.msk.f32.mxu1 %vm10636_vm1, %v17143_v0  ;;  %1066 = vmatprep.mubr.f32.mxu0 %v17143_v0 }
  0xd8   :  { %v9293_v5 = vpop.f32.mrf.mxu1  ;;  %v11312_v6 = vpop.f32.mrf.mxu0 }
  0xda   :  { %v11314_v7 = vpop.f32.mrf.mxu1  ;;  %9447 = vmatmul.mubr.msk.f32.gmra.mxu1 %vm83_vm2, %v10850_v22  ;;  %v11318_v8 = vpop.f32.mrf.mxu0  ;;  %8147 = vmatmul.mubr.msk.f32.gmra.mxu0 %vm83_vm2, %v10850_v22 }
  0xdb   :  { %9449 = vmatprep.mubr.msk.f32.mxu1 %vm10636_vm1, %v17143_v0  ;;  %1072 = vmatprep.mubr.f32.mxu0 %v17143_v0 }
  0xdc   :  { %v9296_v9 = vpop.f32.mrf.mxu1  ;;  %v11325_v10 = vpop.f32.mrf.mxu0 }
  0xde   :  { %v11327_v11 = vpop.f32.mrf.mxu1  ;;  %9450 = vmatmul.mubr.msk.f32.gmra.mxu1 %vm83_vm2, %v10862_v23  ;;  %v11331_v12 = vpop.f32.mrf.mxu0  ;;  %8148 = vmatmul.mubr.msk.f32.gmra.mxu0 %vm83_vm2, %v10862_v23 }
  0xdf   :  { %9452 = vmatprep.mubr.msk.f32.mxu1 %vm10636_vm1, %v17143_v0  ;;  %1078 = vmatprep.mubr.f32.mxu0 %v17143_v0 }
  0xe0   :  { %v9299_v13 = vpop.f32.mrf.mxu1  ;;  %v11338_v15 = vpop.f32.mrf.mxu0 }
  0xe2   :  { %v11340_v16 = vpop.f32.mrf.mxu1  ;;  %9453 = vmatmul.mubr.msk.f32.gmra.mxu1 %vm83_vm2, %v10874_v24  ;;  %v11344_v37 = vpop.f32.mrf.mxu0  ;;  %8149 = vmatmul.mubr.msk.f32.gmra.mxu0 %vm83_vm2, %v10874_v24 }
  0xe3   :  { %9455 = vmatprep.mubr.msk.f32.mxu1 %vm10636_vm1, %v17143_v0  ;;  %1084 = vmatprep.mubr.f32.mxu0 %v17143_v0 }
  0xe4   :  { %v9302_v38 = vpop.f32.mrf.mxu1  ;;  %v11351_v39 = vpop.f32.mrf.mxu0 }
  0xe5   :  { %17258 = vst [vmem:[#allocation3_spill] sm:$0xff] %v11351_v39 }
  0xe6   :  { %v11353_v40 = vpop.f32.mrf.mxu1  ;;  %9456 = vmatmul.mubr.msk.f32.gmra.mxu1 %vm83_vm2, %v10886_v25  ;;  %v11357_v41 = vpop.f32.mrf.mxu0  ;;  %8150 = vmatmul.mubr.msk.f32.gmra.mxu0 %vm83_vm2, %v10886_v25 }
  0xe7   :  { %17259 = vst [vmem:[#allocation4_spill] sm:$0xff] %v11353_v40  ;;  %17260 = vst [vmem:[#allocation5_spill] sm:$0xff] %v11357_v41  ;;  %9458 = vmatprep.mubr.msk.f32.mxu1 %vm10636_vm1, %v17143_v0  ;;  %1090 = vmatprep.mubr.f32.mxu0 %v17143_v0 }
  0xe8   :  { %v9305_v42 = vpop.f32.mrf.mxu1  ;;  %v11364_v43 = vpop.f32.mrf.mxu0 }
  0xe9   :  { %17261 = vst [vmem:[#allocation6_spill] sm:$0xff] %v11364_v43 }
  0xea   :  { %v11366_v44 = vpop.f32.mrf.mxu1  ;;  %9459 = vmatmul.mubr.msk.f32.gmra.mxu1 %vm83_vm2, %v10898_v26  ;;  %v11370_v45 = vpop.f32.mrf.mxu0  ;;  %8151 = vmatmul.mubr.msk.f32.gmra.mxu0 %vm83_vm2, %v10898_v26 }
  0xeb   :  { %17262 = vst [vmem:[#allocation7_spill] sm:$0xff] %v11366_v44  ;;  %17263 = vst [vmem:[#allocation8_spill] sm:$0xff] %v11370_v45  ;;  %9461 = vmatprep.mubr.msk.f32.mxu1 %vm10636_vm1, %v17143_v0  ;;  %1096 = vmatprep.mubr.f32.mxu0 %v17143_v0 }
  0xec   :  { %v9308_v46 = vpop.f32.mrf.mxu1  ;;  %v11377_v47 = vpop.f32.mrf.mxu0 }
  0xed   :  { %17264 = vst [vmem:[#allocation9_spill] sm:$0xff] %v11377_v47 }
  0xee   :  { %v11379_v48 = vpop.f32.mrf.mxu1  ;;  %9462 = vmatmul.mubr.msk.f32.gmra.mxu1 %vm83_vm2, %v10910_v27  ;;  %v11383_v49 = vpop.f32.mrf.mxu0  ;;  %8152 = vmatmul.mubr.msk.f32.gmra.mxu0 %vm83_vm2, %v10910_v27 }
  0xef   :  { %17265 = vst [vmem:[#allocation10_spill] sm:$0xff] %v11379_v48  ;;  %17266 = vst [vmem:[#allocation11_spill] sm:$0xff] %v11383_v49  ;;  %9464 = vmatprep.mubr.msk.f32.mxu1 %vm10636_vm1, %v17143_v0  ;;  %1102 = vmatprep.mubr.f32.mxu0 %v17143_v0 }
  0xf0   :  { %v9311_v52 = vpop.f32.mrf.mxu1  ;;  %v11390_v56 = vpop.f32.mrf.mxu0 }
  0xf1   :  { %17267 = vst [vmem:[#allocation12_spill] sm:$0xff] %v11390_v56 }
  0xf2   :  { %v11392_v60 = vpop.f32.mrf.mxu1  ;;  %9465 = vmatmul.mubr.msk.f32.gmra.mxu1 %vm83_vm2, %v10922_v28  ;;  %v11396_v1 = vpop.f32.mrf.mxu0  ;;  %8153 = vmatmul.mubr.msk.f32.gmra.mxu0 %vm83_vm2, %v10922_v28 }
  0xf3   :  { %17268 = vst [vmem:[#allocation13_spill] sm:$0xff] %v11392_v60  ;;  %17269 = vst [vmem:[#allocation14_spill] sm:$0xff] %v11396_v1  ;;  %9467 = vmatprep.mubr.msk.f32.mxu1 %vm10636_vm1, %v17143_v0  ;;  %1108 = vmatprep.mubr.f32.mxu0 %v17143_v0 }
  0xf4   :  { %v9314_v5 = vpop.f32.mrf.mxu1  ;;  %v11403_v9 = vpop.f32.mrf.mxu0 }
  0xf5   :  { %17270 = vst [vmem:[#allocation15_spill] sm:$0xff] %v11403_v9 }
  0xf6   :  { %v11405_v13 = vpop.f32.mrf.mxu1  ;;  %9468 = vmatmul.mubr.msk.f32.gmra.mxu1 %vm83_vm2, %v10934_v29  ;;  %v11409_v38 = vpop.f32.mrf.mxu0  ;;  %8154 = vmatmul.mubr.msk.f32.gmra.mxu0 %vm83_vm2, %v10934_v29 }
  0xf7   :  { %17271 = vst [vmem:[#allocation16_spill] sm:$0xff] %v11405_v13  ;;  %17272 = vst [vmem:[#allocation17_spill] sm:$0xff] %v11409_v38  ;;  %9470 = vmatprep.mubr.msk.f32.mxu1 %vm10636_vm1, %v17143_v0  ;;  %1114 = vmatprep.mubr.f32.mxu0 %v17143_v0 }
  0xf8   :  { %v9317_v42 = vpop.f32.mrf.mxu1  ;;  %v11416_v46 = vpop.f32.mrf.mxu0 }
  0xf9   :  { %17273 = vst [vmem:[#allocation18_spill] sm:$0xff] %v11416_v46 }
  0xfa   :  { %v11418_v52 = vpop.f32.mrf.mxu1  ;;  %9471 = vmatmul.mubr.msk.f32.gmra.mxu1 %vm83_vm2, %v10946_v30  ;;  %v11422_v5 = vpop.f32.mrf.mxu0  ;;  %8155 = vmatmul.mubr.msk.f32.gmra.mxu0 %vm83_vm2, %v10946_v30 }
  0xfb   :  { %17274 = vst [vmem:[#allocation19_spill] sm:$0xff] %v11418_v52  ;;  %17275 = vst [vmem:[#allocation20_spill] sm:$0xff] %v11422_v5  ;;  %9473 = vmatprep.mubr.msk.f32.mxu1 %vm10636_vm1, %v17143_v0  ;;  %1120 = vmatprep.mubr.f32.mxu0 %v17143_v0 }
  0xfc   :  { %v9320_v38 = vpop.f32.mrf.mxu1  ;;  %v11429_v13 = vpop.f32.mrf.mxu0 }
  0xfd   :  { %17276 = vst [vmem:[#allocation21_spill] sm:$0xff] %v11429_v13 }
  0xfe   :  { %v11431_v42 = vpop.f32.mrf.mxu1  ;;  %9474 = vmatmul.mubr.msk.f32.gmra.mxu1 %vm83_vm2, %v10958_v31  ;;  %v11435_v52 = vpop.f32.mrf.mxu0  ;;  %8156 = vmatmul.mubr.msk.f32.gmra.mxu0 %vm83_vm2, %v10958_v31 }
  0xff   :  { %17277 = vst [vmem:[#allocation22_spill] sm:$0xff] %v11431_v42  ;;  %17278 = vst [vmem:[#allocation23_spill] sm:$0xff] %v11435_v52  ;;  %9476 = vmatprep.mubr.msk.f32.mxu1 %vm10636_vm1, %v17143_v0  ;;  %1126 = vmatprep.mubr.f32.mxu0 %v17143_v0 }
 0x100   :  { %v9323_v5 = vpop.f32.mrf.mxu1  ;;  %v11442_v46 = vpop.f32.mrf.mxu0 }
 0x101   :  { %17279 = vst [vmem:[#allocation24_spill] sm:$0xff] %v11442_v46 }
 0x102   :  { %v11444_v38 = vpop.f32.mrf.mxu1  ;;  %9477 = vmatmul.mubr.msk.f32.gmra.mxu1 %vm83_vm2, %v10970_v32  ;;  %v11448_v42 = vpop.f32.mrf.mxu0  ;;  %8157 = vmatmul.mubr.msk.f32.gmra.mxu0 %vm83_vm2, %v10970_v32 }
 0x103   :  { %17280 = vst [vmem:[#allocation25_spill] sm:$0xff] %v11444_v38  ;;  %17281 = vst [vmem:[#allocation26_spill] sm:$0xff] %v11448_v42  ;;  %9479 = vmatprep.mubr.msk.f32.mxu1 %vm10636_vm1, %v17143_v0  ;;  %1132 = vmatprep.mubr.f32.mxu0 %v17143_v0 }
 0x104   :  { %v9326_v52 = vpop.f32.mrf.mxu1  ;;  %v11455_v13 = vpop.f32.mrf.mxu0 }
 0x105   :  { %17282 = vst [vmem:[#allocation27_spill] sm:$0xff] %v11455_v13 }
 0x106   :  { %v11457_v5 = vpop.f32.mrf.mxu1  ;;  %9480 = vmatmul.mubr.msk.f32.gmra.mxu1 %vm83_vm2, %v10982_v33  ;;  %v11461_v38 = vpop.f32.mrf.mxu0  ;;  %8158 = vmatmul.mubr.msk.f32.gmra.mxu0 %vm83_vm2, %v10982_v33 }
 0x107   :  { %17283 = vst [vmem:[#allocation28_spill] sm:$0xff] %v11457_v5  ;;  %17284 = vst [vmem:[#allocation29_spill] sm:$0xff] %v11461_v38  ;;  %9482 = vmatprep.mubr.msk.f32.mxu1 %vm10636_vm1, %v17143_v0  ;;  %1138 = vmatprep.mubr.f32.mxu0 %v17143_v0 }
 0x108   :  { %v9329_v42 = vpop.f32.mrf.mxu1  ;;  %v11468_v46 = vpop.f32.mrf.mxu0 }
 0x109   :  { %17285 = vst [vmem:[#allocation30_spill] sm:$0xff] %v11468_v46 }
 0x10a   :  { %v11470_v52 = vpop.f32.mrf.mxu1  ;;  %9483 = vmatmul.mubr.msk.f32.gmra.mxu1 %vm83_vm2, %v10994_v34  ;;  %v11474_v5 = vpop.f32.mrf.mxu0  ;;  %8159 = vmatmul.mubr.msk.f32.gmra.mxu0 %vm83_vm2, %v10994_v34 }
 0x10b   :  { %17286 = vst [vmem:[#allocation31_spill] sm:$0xff] %v11470_v52  ;;  %17287 = vst [vmem:[#allocation32_spill] sm:$0xff] %v11474_v5  ;;  %9485 = vmatprep.mubr.msk.f32.mxu1 %vm10636_vm1, %v17143_v0  ;;  %1144 = vmatprep.mubr.f32.mxu0 %v17143_v0 }
 0x10c   :  { %v9332_v38 = vpop.f32.mrf.mxu1  ;;  %v11481_v13 = vpop.f32.mrf.mxu0 }
 0x10d   :  { %17288 = vst [vmem:[#allocation33_spill] sm:$0xff] %v11481_v13 }
 0x10e   :  { %v11483_v42 = vpop.f32.mrf.mxu1  ;;  %9486 = vmatmul.mubr.msk.f32.gmra.mxu1 %vm83_vm2, %v11006_v35  ;;  %v11487_v52 = vpop.f32.mrf.mxu0  ;;  %8160 = vmatmul.mubr.msk.f32.gmra.mxu0 %vm83_vm2, %v11006_v35 }
 0x10f   :  { %17289 = vst [vmem:[#allocation34_spill] sm:$0xff] %v11483_v42  ;;  %17290 = vst [vmem:[#allocation35_spill] sm:$0xff] %v11487_v52  ;;  %9488 = vmatprep.mubr.msk.f32.mxu1 %vm10636_vm1, %v17143_v0  ;;  %1150 = vmatprep.mubr.f32.mxu0 %v17143_v0 }
 0x110   :  { %v9335_v5 = vpop.f32.mrf.mxu1  ;;  %v11494_v46 = vpop.f32.mrf.mxu0 }
 0x111   :  { %17291 = vst [vmem:[#allocation36_spill] sm:$0xff] %v11494_v46  ;;  %v11510_v5 = vld [vmem:[%s17130_s0 + $0xc0] sm:$0xff] }
 0x112   :  { %v11496_v38 = vpop.f32.mrf.mxu1  ;;  %9489 = vmatmul.mubr.msk.f32.gmra.mxu1 %vm83_vm2, %v11018_v36  ;;  %v11500_v42 = vpop.f32.mrf.mxu0  ;;  %8161 = vmatmul.mubr.msk.f32.gmra.mxu0 %vm83_vm2, %v11018_v36  ;;  %17294 = vst [vmem:[#allocation39_spill] sm:$0xff] %v11510_v5 }
 0x113   :  { %17292 = vst [vmem:[#allocation37_spill] sm:$0xff] %v11496_v38  ;;  %17293 = vst [vmem:[#allocation38_spill] sm:$0xff] %v11500_v42  ;;  %9491 = vmatprep.mubr.msk.f32.mxu1 %vm10636_vm1, %v17143_v0  ;;  %1156 = vmatprep.mubr.f32.mxu0 %v17143_v0 }
 0x114   :  { %v9338_v46 = vpop.f32.mrf.mxu1  ;;  %v11512_v38 = vpop.f32.mrf.mxu0 }
 0x115   :  { %17295 = vst [vmem:[#allocation40_spill] sm:$0xff] %v11512_v38  ;;  %v8245_v46 = vld [vmem:[%s17129_s1 + $0xd8] sm:$0xf] }
 0x116   :  { %v11514_v52 = vpop.f32.mrf.mxu1  ;;  %9492 = vmatmul.mubr.msk.f32.gmra.mxu1 %vm83_vm2, %v11510_v5  ;;  %v11518_v42 = vpop.f32.mrf.mxu0  ;;  %8162 = vmatmul.mubr.msk.f32.gmra.mxu0 %vm83_vm2, %v11510_v5 }
 0x117   :  { %17296 = vst [vmem:[#allocation41_spill] sm:$0xff] %v11514_v52  ;;  %17297 = vst [vmem:[#allocation42_spill] sm:$0xff] %v11518_v42  ;;  %9498 = vmatprep.mubr.msk.f32.mxu1 %vm10636_vm1, %v17143_v0  ;;  %1495 = vmatprep.mubr.f32.mxu0 %v17143_v0  ;;  %v8247_v52 = vld [vmem:[%s17129_s1 + $0xe8] sm:$0xf] }
 0x118   :  { %v9341_v13 = vpop.f32.mrf.mxu1  ;;  %v11525_v9 = vpop.f32.mrf.mxu0 }
 0x119   :  { %17298 = vst [vmem:[#allocation43_spill] sm:$0xff] %v11525_v9  ;;  %v8243_v13 = vld [vmem:[%s17129_s1 + $0xc8] sm:$0xff] }
 0x11a   :  { %v11533_v42 = vpop.f32.mrf.mxu1  ;;  %9499 = vmatmul.mubr.msk.f32.vlgmr.msra.gmra.mxu1 %vm83_vm2, %v10768_v14  ;;  %v11537_v38 = vpop.f32.mrf.mxu0  ;;  %8195 = vmatmul.mubr.msk.f32.vlgmr.msra.gmra.mxu0 %vm83_vm2, %v10768_v14  ;;  %v8242_v14 = vld [vmem:[%s17129_s1 + $0xc0] sm:$0xff] }
 0x11b   :  { %17299 = vst [vmem:[#allocation44_spill] sm:$0xff] %v11533_v42  ;;  %17300 = vst [vmem:[#allocation45_spill] sm:$0xff] %v11537_v38  ;;  %8249 = vmatpush1.msk.msra.mxu0 %vm153_vm0, %v8245_v46  ;;  %9501 = vmatprep.mubr.msk.f32.mxu1 %vm10636_vm1, %v17143_v0  ;;  %v8244_v46 = vld [vmem:[%s17129_s1 + $0xd0] sm:$0xff] }
 0x11c   :  { %v9344_v9 = vpop.f32.mrf.mxu1  ;;  %v11547_v1 = vpop.f32.mrf.mxu0  ;;  %1501 = vmatprep.mubr.f32.mxu0 %v17143_v0  ;;  %9568 = vmatpush3.msk.msra.mxu1 %vm153_vm0, %v8247_v52  ;;  %v8301_v52 = vld [vmem:[%s17129_s1 + $0x110] sm:$0xf] }
 0x11d   :  { %17301 = vst [vmem:[#allocation46_spill] sm:$0xff] %v11547_v1  ;;  %1932 = vmatprep.subr.mxu0 %v8243_v13  ;;  %9569 = vmatprep.subr.mxu1 %v17143_v0 }
 0x11e   :  { %v11558_v38 = vpop.f32.mrf.mxu1  ;;  %9502 = vmatmul.mubr.msk.f32.gmra.mxu1 %vm83_vm2, %v10788_v17  ;;  %v11562_v9 = vpop.f32.mrf.mxu0  ;;  %8196 = vmatmul.mubr.msk.f32.gmra.mxu0 %vm83_vm2, %v10788_v17 }
 0x11f   :  { %17302 = vst [vmem:[#allocation47_spill] sm:$0xff] %v11558_v38  ;;  %17303 = vst [vmem:[#allocation48_spill] sm:$0xff] %v11562_v9  ;;  %9504 = vmatprep.mubr.msk.f32.mxu1 %vm10636_vm1, %v17143_v0  ;;  %1507 = vmatprep.mubr.f32.mxu0 %v17143_v0 }
 0x120   :  { %v9347_v13 = vpop.f32.mrf.mxu1  ;;  %v11572_v1 = vpop.f32.mrf.mxu0  ;;  %1933 = vmatpush1.msra.mxu0 %v8242_v14  ;;  %9570 = vmatpush3.msra.mxu1 %v8244_v46 }
 0x121   :  { %17304 = vst [vmem:[#allocation49_spill] sm:$0xff] %v11572_v1  ;;  %8303 = vmatprep.subr.msk.mxu0 %vm153_vm0, %v8301_v52  ;;  %9640 = vmatprep.subr.mxu1 %v17143_v0 }
 0x122   :  { %v11576_v9 = vpop.f32.mrf.mxu1  ;;  %9505 = vmatmul.mubr.msk.f32.gmra.mxu1 %vm83_vm2, %v10802_v18  ;;  %v11580_v17 = vpop.f32.mrf.mxu0  ;;  %8197 = vmatmul.mubr.msk.f32.gmra.mxu0 %vm83_vm2, %v10802_v18 }
 0x123   :  { %9507 = vmatprep.mubr.msk.f32.mxu1 %vm10636_vm1, %v17143_v0  ;;  %1513 = vmatprep.mubr.f32.mxu0 %v17143_v0 }
 0x124   :  { %v9354_v14 = vpop.f32.mrf.mxu1  ;;  %v11587_v46 = vpop.f32.mrf.mxu0 }
 0x126   :  { %v11589_v52 = vpop.f32.mrf.mxu1  ;;  %9508 = vmatmul.mubr.msk.f32.gmra.mxu1 %vm83_vm2, %v10814_v19  ;;  %v11593_v13 = vpop.f32.mrf.mxu0  ;;  %8198 = vmatmul.mubr.msk.f32.gmra.mxu0 %vm83_vm2, %v10814_v19 }
 0x127   :  { %9510 = vmatprep.mubr.msk.f32.mxu1 %vm10636_vm1, %v17143_v0  ;;  %1519 = vmatprep.mubr.f32.mxu0 %v17143_v0 }
 0x128   :  { %v9357_v18 = vpop.f32.mrf.mxu1  ;;  %v11600_v1 = vpop.f32.mrf.mxu0 }
 0x12a   :  { %v11602_v14 = vpop.f32.mrf.mxu1  ;;  %9511 = vmatmul.mubr.msk.f32.gmra.mxu1 %vm83_vm2, %v10826_v20  ;;  %v11606_v38 = vpop.f32.mrf.mxu0  ;;  %8199 = vmatmul.mubr.msk.f32.gmra.mxu0 %vm83_vm2, %v10826_v20 }
 0x12b   :  { %9513 = vmatprep.mubr.msk.f32.mxu1 %vm10636_vm1, %v17143_v0  ;;  %1525 = vmatprep.mubr.f32.mxu0 %v17143_v0 }
 0x12c   :  { %v9360_v19 = vpop.f32.mrf.mxu1  ;;  %v11613_v42 = vpop.f32.mrf.mxu0 }
 0x12e   :  { %v11615_v18 = vpop.f32.mrf.mxu1  ;;  %9514 = vmatmul.mubr.msk.f32.gmra.mxu1 %vm83_vm2, %v10838_v21  ;;  %v11619_v60 = vpop.f32.mrf.mxu0  ;;  %8200 = vmatmul.mubr.msk.f32.gmra.mxu0 %vm83_vm2, %v10838_v21 }
 0x12f   :  { %9516 = vmatprep.mubr.msk.f32.mxu1 %vm10636_vm1, %v17143_v0  ;;  %1531 = vmatprep.mubr.f32.mxu0 %v17143_v0 }
 0x130   :  { %v9363_v20 = vpop.f32.mrf.mxu1  ;;  %v11626_v56 = vpop.f32.mrf.mxu0 }
 0x132   :  { %v11628_v19 = vpop.f32.mrf.mxu1  ;;  %9517 = vmatmul.mubr.msk.f32.gmra.mxu1 %vm83_vm2, %v10850_v22  ;;  %v11632_v49 = vpop.f32.mrf.mxu0  ;;  %8201 = vmatmul.mubr.msk.f32.gmra.mxu0 %vm83_vm2, %v10850_v22 }
 0x133   :  { %9519 = vmatprep.mubr.msk.f32.mxu1 %vm10636_vm1, %v17143_v0  ;;  %1537 = vmatprep.mubr.f32.mxu0 %v17143_v0 }
 0x134   :  { %v9366_v21 = vpop.f32.mrf.mxu1  ;;  %v11639_v48 = vpop.f32.mrf.mxu0 }
 0x136   :  { %v11641_v20 = vpop.f32.mrf.mxu1  ;;  %9520 = vmatmul.mubr.msk.f32.gmra.mxu1 %vm83_vm2, %v10862_v23  ;;  %v11645_v47 = vpop.f32.mrf.mxu0  ;;  %8202 = vmatmul.mubr.msk.f32.gmra.mxu0 %vm83_vm2, %v10862_v23 }
 0x137   :  { %9522 = vmatprep.mubr.msk.f32.mxu1 %vm10636_vm1, %v17143_v0  ;;  %1543 = vmatprep.mubr.f32.mxu0 %v17143_v0 }
 0x138   :  { %v9369_v22 = vpop.f32.mrf.mxu1  ;;  %v11652_v45 = vpop.f32.mrf.mxu0 }
 0x13a   :  { %v11654_v21 = vpop.f32.mrf.mxu1  ;;  %9523 = vmatmul.mubr.msk.f32.gmra.mxu1 %vm83_vm2, %v10874_v24  ;;  %v11658_v44 = vpop.f32.mrf.mxu0  ;;  %8203 = vmatmul.mubr.msk.f32.gmra.mxu0 %vm83_vm2, %v10874_v24 }
 0x13b   :  { %9525 = vmatprep.mubr.msk.f32.mxu1 %vm10636_vm1, %v17143_v0  ;;  %1549 = vmatprep.mubr.f32.mxu0 %v17143_v0 }
 0x13c   :  { %v9372_v23 = vpop.f32.mrf.mxu1  ;;  %v11665_v43 = vpop.f32.mrf.mxu0 }
 0x13e   :  { %v11667_v22 = vpop.f32.mrf.mxu1  ;;  %9526 = vmatmul.mubr.msk.f32.gmra.mxu1 %vm83_vm2, %v10886_v25  ;;  %v11671_v41 = vpop.f32.mrf.mxu0  ;;  %8204 = vmatmul.mubr.msk.f32.gmra.mxu0 %vm83_vm2, %v10886_v25 }
 0x13f   :  { %17305 = vst [vmem:[#allocation50_spill] sm:$0xff] %v11671_v41  ;;  %9528 = vmatprep.mubr.msk.f32.mxu1 %vm10636_vm1, %v17143_v0  ;;  %1555 = vmatprep.mubr.f32.mxu0 %v17143_v0 }
 0x140   :  { %v9375_v24 = vpop.f32.mrf.mxu1  ;;  %v11678_v40 = vpop.f32.mrf.mxu0 }
 0x142   :  { %v11680_v23 = vpop.f32.mrf.mxu1  ;;  %9529 = vmatmul.mubr.msk.f32.gmra.mxu1 %vm83_vm2, %v10898_v26  ;;  %v11684_v39 = vpop.f32.mrf.mxu0  ;;  %8205 = vmatmul.mubr.msk.f32.gmra.mxu0 %vm83_vm2, %v10898_v26 }
 0x143   :  { %17306 = vst [vmem:[#allocation51_spill] sm:$0xff] %v11680_v23  ;;  %17307 = vst [vmem:[#allocation52_spill] sm:$0xff] %v11684_v39  ;;  %9531 = vmatprep.mubr.msk.f32.mxu1 %vm10636_vm1, %v17143_v0  ;;  %1561 = vmatprep.mubr.f32.mxu0 %v17143_v0 }
 0x144   :  { %v9378_v25 = vpop.f32.mrf.mxu1  ;;  %v11691_v41 = vpop.f32.mrf.mxu0 }
 0x146   :  { %v11693_v24 = vpop.f32.mrf.mxu1  ;;  %9532 = vmatmul.mubr.msk.f32.gmra.mxu1 %vm83_vm2, %v10910_v27  ;;  %v11697_v23 = vpop.f32.mrf.mxu0  ;;  %8206 = vmatmul.mubr.msk.f32.gmra.mxu0 %vm83_vm2, %v10910_v27 }
 0x147   :  { %17308 = vst [vmem:[#allocation53_spill] sm:$0xff] %v11693_v24  ;;  %17309 = vst [vmem:[#allocation54_spill] sm:$0xff] %v11697_v23  ;;  %9534 = vmatprep.mubr.msk.f32.mxu1 %vm10636_vm1, %v17143_v0  ;;  %1567 = vmatprep.mubr.f32.mxu0 %v17143_v0 }
 0x148   :  { %v9381_v26 = vpop.f32.mrf.mxu1  ;;  %v11704_v39 = vpop.f32.mrf.mxu0 }
 0x14a   :  { %v11706_v25 = vpop.f32.mrf.mxu1  ;;  %9535 = vmatmul.mubr.msk.f32.gmra.mxu1 %vm83_vm2, %v10922_v28  ;;  %v11710_v24 = vpop.f32.mrf.mxu0  ;;  %8207 = vmatmul.mubr.msk.f32.gmra.mxu0 %vm83_vm2, %v10922_v28 }
 0x14b   :  { %17310 = vst [vmem:[#allocation55_spill] sm:$0xff] %v11706_v25  ;;  %17311 = vst [vmem:[#allocation56_spill] sm:$0xff] %v11710_v24  ;;  %9537 = vmatprep.mubr.msk.f32.mxu1 %vm10636_vm1, %v17143_v0  ;;  %1573 = vmatprep.mubr.f32.mxu0 %v17143_v0 }
 0x14c   :  { %v9384_v27 = vpop.f32.mrf.mxu1  ;;  %v11717_v23 = vpop.f32.mrf.mxu0 }
 0x14e   :  { %v11719_v26 = vpop.f32.mrf.mxu1  ;;  %9538 = vmatmul.mubr.msk.f32.gmra.mxu1 %vm83_vm2, %v10934_v29  ;;  %v11723_v25 = vpop.f32.mrf.mxu0  ;;  %8208 = vmatmul.mubr.msk.f32.gmra.mxu0 %vm83_vm2, %v10934_v29 }
 0x14f   :  { %17312 = vst [vmem:[#allocation57_spill] sm:$0xff] %v11719_v26  ;;  %17313 = vst [vmem:[#allocation58_spill] sm:$0xff] %v11723_v25  ;;  %9540 = vmatprep.mubr.msk.f32.mxu1 %vm10636_vm1, %v17143_v0  ;;  %1579 = vmatprep.mubr.f32.mxu0 %v17143_v0 }
 0x150   :  { %v9387_v28 = vpop.f32.mrf.mxu1  ;;  %v11730_v24 = vpop.f32.mrf.mxu0 }
 0x152   :  { %v11732_v27 = vpop.f32.mrf.mxu1  ;;  %9541 = vmatmul.mubr.msk.f32.gmra.mxu1 %vm83_vm2, %v10946_v30  ;;  %v11736_v26 = vpop.f32.mrf.mxu0  ;;  %8209 = vmatmul.mubr.msk.f32.gmra.mxu0 %vm83_vm2, %v10946_v30 }
 0x153   :  { %17314 = vst [vmem:[#allocation59_spill] sm:$0xff] %v11732_v27  ;;  %17315 = vst [vmem:[#allocation60_spill] sm:$0xff] %v11736_v26  ;;  %9543 = vmatprep.mubr.msk.f32.mxu1 %vm10636_vm1, %v17143_v0  ;;  %1585 = vmatprep.mubr.f32.mxu0 %v17143_v0 }
 0x154   :  { %v9390_v29 = vpop.f32.mrf.mxu1  ;;  %v11743_v25 = vpop.f32.mrf.mxu0 }
 0x156   :  { %v11745_v28 = vpop.f32.mrf.mxu1  ;;  %9544 = vmatmul.mubr.msk.f32.gmra.mxu1 %vm83_vm2, %v10958_v31  ;;  %v11749_v27 = vpop.f32.mrf.mxu0  ;;  %8210 = vmatmul.mubr.msk.f32.gmra.mxu0 %vm83_vm2, %v10958_v31 }
 0x157   :  { %17316 = vst [vmem:[#allocation61_spill] sm:$0xff] %v11745_v28  ;;  %17317 = vst [vmem:[#allocation62_spill] sm:$0xff] %v11749_v27  ;;  %9546 = vmatprep.mubr.msk.f32.mxu1 %vm10636_vm1, %v17143_v0  ;;  %1591 = vmatprep.mubr.f32.mxu0 %v17143_v0 }
 0x158   :  { %v9393_v30 = vpop.f32.mrf.mxu1  ;;  %v11756_v26 = vpop.f32.mrf.mxu0 }
 0x15a   :  { %v11758_v29 = vpop.f32.mrf.mxu1  ;;  %9547 = vmatmul.mubr.msk.f32.gmra.mxu1 %vm83_vm2, %v10970_v32  ;;  %v11762_v28 = vpop.f32.mrf.mxu0  ;;  %8211 = vmatmul.mubr.msk.f32.gmra.mxu0 %vm83_vm2, %v10970_v32 }
 0x15b   :  { %17318 = vst [vmem:[#allocation63_spill] sm:$0xff] %v11758_v29  ;;  %17319 = vst [vmem:[#allocation64_spill] sm:$0xff] %v11762_v28  ;;  %9549 = vmatprep.mubr.msk.f32.mxu1 %vm10636_vm1, %v17143_v0  ;;  %1597 = vmatprep.mubr.f32.mxu0 %v17143_v0 }
 0x15c   :  { %v9396_v31 = vpop.f32.mrf.mxu1  ;;  %v11769_v27 = vpop.f32.mrf.mxu0 }
 0x15e   :  { %v11771_v30 = vpop.f32.mrf.mxu1  ;;  %9550 = vmatmul.mubr.msk.f32.gmra.mxu1 %vm83_vm2, %v10982_v33  ;;  %v11775_v29 = vpop.f32.mrf.mxu0  ;;  %8212 = vmatmul.mubr.msk.f32.gmra.mxu0 %vm83_vm2, %v10982_v33 }
 0x15f   :  { %17320 = vst [vmem:[#allocation65_spill] sm:$0xff] %v11771_v30  ;;  %17321 = vst [vmem:[#allocation66_spill] sm:$0xff] %v11775_v29  ;;  %9552 = vmatprep.mubr.msk.f32.mxu1 %vm10636_vm1, %v17143_v0  ;;  %1603 = vmatprep.mubr.f32.mxu0 %v17143_v0 }
 0x160   :  { %v9399_v32 = vpop.f32.mrf.mxu1  ;;  %v11782_v28 = vpop.f32.mrf.mxu0 }
 0x162   :  { %v11784_v31 = vpop.f32.mrf.mxu1  ;;  %9553 = vmatmul.mubr.msk.f32.gmra.mxu1 %vm83_vm2, %v10994_v34  ;;  %v11788_v30 = vpop.f32.mrf.mxu0  ;;  %8213 = vmatmul.mubr.msk.f32.gmra.mxu0 %vm83_vm2, %v10994_v34 }
 0x163   :  { %17322 = vst [vmem:[#allocation67_spill] sm:$0xff] %v11784_v31  ;;  %17323 = vst [vmem:[#allocation68_spill] sm:$0xff] %v11788_v30  ;;  %9555 = vmatprep.mubr.msk.f32.mxu1 %vm10636_vm1, %v17143_v0  ;;  %1609 = vmatprep.mubr.f32.mxu0 %v17143_v0 }
 0x164   :  { %v9402_v33 = vpop.f32.mrf.mxu1  ;;  %v11795_v29 = vpop.f32.mrf.mxu0 }
 0x165   :  { %17324 = vst [vmem:[#allocation69_spill] sm:$0xff] %v11795_v29  ;;  %v11916_v29 = vld [vmem:[%s17130_s0 + $0x30] sm:$0xff] }
 0x166   :  { %v11797_v32 = vpop.f32.mrf.mxu1  ;;  %9556 = vmatmul.mubr.msk.f32.gmra.mxu1 %vm83_vm2, %v11006_v35  ;;  %v11801_v31 = vpop.f32.mrf.mxu0  ;;  %8214 = vmatmul.mubr.msk.f32.gmra.mxu0 %vm83_vm2, %v11006_v35 }
 0x167   :  { %17325 = vst [vmem:[#allocation70_spill] sm:$0xff] %v11797_v32  ;;  %17326 = vst [vmem:[#allocation71_spill] sm:$0xff] %v11801_v31  ;;  %9558 = vmatprep.mubr.msk.f32.mxu1 %vm10636_vm1, %v17143_v0  ;;  %1615 = vmatprep.mubr.f32.mxu0 %v17143_v0 }
 0x168   :  { %v9405_v34 = vpop.f32.mrf.mxu1  ;;  %v11808_v30 = vpop.f32.mrf.mxu0 }
 0x169   :  { %17327 = vst [vmem:[#allocation72_spill] sm:$0xff] %v11808_v30 }
 0x16a   :  { %v11810_v33 = vpop.f32.mrf.mxu1  ;;  %9559 = vmatmul.mubr.msk.f32.gmra.mxu1 %vm83_vm2, %v11018_v36  ;;  %v11814_v32 = vpop.f32.mrf.mxu0  ;;  %8215 = vmatmul.mubr.msk.f32.gmra.mxu0 %vm83_vm2, %v11018_v36  ;;  %v11837_v36 = vld [vmem:[%s17130_s0 + $0xc8] sm:$0xff] }
 0x16b   :  { %17328 = vst [vmem:[#allocation73_spill] sm:$0xff] %v11810_v33  ;;  %17329 = vst [vmem:[#allocation74_spill] sm:$0xff] %v11814_v32  ;;  %9561 = vmatprep.mubr.msk.f32.mxu1 %vm10636_vm1, %v17143_v0  ;;  %1621 = vmatprep.mubr.f32.mxu0 %v17143_v0 }
 0x16c   :  { %v9408_v35 = vpop.f32.mrf.mxu1  ;;  %v11821_v31 = vpop.f32.mrf.mxu0  ;;  %17333 = vst [vmem:[#allocation78_spill] sm:$0xff] %v11837_v36 }
 0x16d   :  { %17330 = vst [vmem:[#allocation75_spill] sm:$0xff] %v11821_v31 }
 0x16e   :  { %v11823_v34 = vpop.f32.mrf.mxu1  ;;  %9562 = vmatmul.mubr.msk.f32.gmra.mxu1 %vm83_vm2, %v11510_v5  ;;  %v11827_v33 = vpop.f32.mrf.mxu0  ;;  %8216 = vmatmul.mubr.msk.f32.gmra.mxu0 %vm83_vm2, %v11510_v5 }
 0x16f   :  { %17331 = vst [vmem:[#allocation76_spill] sm:$0xff] %v11823_v34  ;;  %17332 = vst [vmem:[#allocation77_spill] sm:$0xff] %v11827_v33  ;;  %9564 = vmatprep.mubr.msk.f32.mxu1 %vm10636_vm1, %v17143_v0  ;;  %1627 = vmatprep.mubr.f32.mxu0 %v17143_v0 }
 0x170   :  { %v9411_v35 = vpop.f32.mrf.mxu1  ;;  %v11839_v34 = vpop.f32.mrf.mxu0 }
 0x171   :  { %17334 = vst [vmem:[#allocation79_spill] sm:$0xff] %v11839_v34  ;;  %v8300_v35 = vld [vmem:[%s17129_s1 + $0x108] sm:$0xf]  ;;  %v10570_v34 = vld [vmem:[%s17130_s0 + $0x20] sm:$0xff] }
 0x172   :  { %v11841_v31 = vpop.f32.mrf.mxu1  ;;  %9565 = vmatmul.mubr.msk.f32.gmra.mxu1 %vm83_vm2, %v11837_v36  ;;  %v11845_v33 = vpop.f32.mrf.mxu0  ;;  %8217 = vmatmul.mubr.msk.f32.gmra.mxu0 %vm83_vm2, %v11837_v36 }
 0x173   :  { %17335 = vst [vmem:[#allocation80_spill] sm:$0xff] %v11841_v31  ;;  %17336 = vst [vmem:[#allocation81_spill] sm:$0xff] %v11845_v33  ;;  %9571 = vmatprep.mubr.msk.f32.mxu1 %vm10636_vm1, %v17143_v0  ;;  %1966 = vmatprep.mubr.f32.mxu0 %v17143_v0  ;;  %v8302_v31 = vld [vmem:[%s17129_s1 + $0x118] sm:$0xf] }
 0x174   :  { %v9414_v5 = vpop.f32.mrf.mxu1  ;;  %v11852_v32 = vpop.f32.mrf.mxu0 }
 0x175   :  { %17337 = vst [vmem:[#allocation82_spill] sm:$0xff] %v11852_v32  ;;  %v8298_v5 = vld [vmem:[%s17129_s1 + $0xf8] sm:$0xff]  ;;  %v17340_v32 = vmov 0.0  }
 0x176   :  { %v11860_v33 = vpop.f32.mrf.mxu1  ;;  %9572 = vmatmul.mubr.msk.f32.vlgmr.msra.gmra.mxu1 %vm83_vm2, %v10570_v34  ;;  %v11866_v0 = vpop.f32.mrf.mxu0  ;;  %8250 = vmatmul.mubr.msk.f32.vlgmr.msra.gmra.mxu0 %vm83_vm2, %v10570_v34  ;;  %v8297_v34 = vld [vmem:[%s17129_s1 + $0xf0] sm:$0xff] }
 0x177   :  { %17338 = vst [vmem:[#allocation83_spill] sm:$0xff] %v11860_v33  ;;  %17339 = vst [vmem:[#allocation84_spill] sm:$0xff] %v11866_v0  ;;  %8304 = vmatpush1.msk.msra.mxu0 %vm153_vm0, %v8300_v35  ;;  %9574 = vmatprep.mubr.msk.f32.mxu1 %vm10636_vm1, %v17340_v32  ;;  %v8299_v35 = vld [vmem:[%s17129_s1 + $0x100] sm:$0xff] }
 0x178   :  { %v9417_v33 = vpop.f32.mrf.mxu1  ;;  %v11875_v36 = vpop.f32.mrf.mxu0  ;;  %1972 = vmatprep.mubr.f32.mxu0 %v17340_v32  ;;  %9641 = vmatpush3.msk.msra.mxu1 %vm153_vm0, %v8302_v31 }
 0x179   :  { %17341 = vst [vmem:[#allocation85_spill] sm:$0xff] %v11875_v36  ;;  %2403 = vmatprep.subr.mxu0 %v8298_v5  ;;  %9642 = vmatprep.subr.mxu1 %v17340_v32  ;;  %v11891_v33 = vld [vmem:[%s17130_s0 + $0x28] sm:$0xff]  ;;  %v8356_v5 = vld [vmem:[%s17129_s1 + $0x140] sm:$0xf] }
 0x17a   :  { %v11886_v0 = vpop.f32.mrf.mxu1  ;;  %17343 = vst [vmem:[#allocation87_spill] sm:$0xff] %v11891_v33  ;;  %9575 = vmatmul.mubr.msk.f32.gmra.mxu1 %vm83_vm2, %v11891_v33  ;;  %v11895_v31 = vpop.f32.mrf.mxu0  ;;  %8251 = vmatmul.mubr.msk.f32.gmra.mxu0 %vm83_vm2, %v11891_v33  ;;  %v625_v33 = vadd.f32 %v11580_v17, %v11253_v51 }
 0x17b   :  { %17342 = vst [vmem:[#allocation86_spill] sm:$0xff] %v11886_v0  ;;  %17344 = vst [vmem:[#allocation88_spill] sm:$0xff] %v11895_v31  ;;  %9577 = vmatprep.mubr.msk.f32.mxu1 %vm10636_vm1, %v17340_v32  ;;  %1978 = vmatprep.mubr.f32.mxu0 %v17340_v32  ;;  %v828_v31 = vadd.f32 %v11576_v9, %v11249_v50  ;;  %v627_v50 = vadd.f32 %v11587_v46, %v11260_v53  ;;  %v11940_v46 = vld [vmem:[%s17130_s0 + $0x38] sm:$0xff] }
 0x17c   :  { %v9420_v0 = vpop.f32.mrf.mxu1  ;;  %v11905_v36 = vpop.f32.mrf.mxu0  ;;  %2404 = vmatpush1.msra.mxu0 %v8297_v34  ;;  %9643 = vmatpush3.msra.mxu1 %v8299_v35  ;;  %v833_v35 = vadd.f32 %v11589_v52, %v11262_v54  ;;  %v633_v54 = vadd.f32 %v11600_v1, %v11273_v57  ;;  %v11964_v1 = vld [vmem:[%s17130_s0 + $0x40] sm:$0xff] }
 0x17d   :  { %17345 = vst [vmem:[#allocation89_spill] sm:$0xff] %v11905_v36  ;;  %8358 = vmatprep.subr.msk.mxu0 %vm153_vm0, %v8356_v5  ;;  %9713 = vmatprep.subr.mxu1 %v17340_v32  ;;  %v631_v5 = vadd.f32 %v11593_v13, %v11266_v55 }
 0x17e   :  { %v1229_v30 = vpop.f32.mrf.mxu1  ;;  %9578 = vmatmul.mubr.msk.f32.gmra.mxu1 %vm83_vm2, %v11916_v29  ;;  %v1026_v0 = vpop.f32.mrf.mxu0  ;;  %8252 = vmatmul.mubr.msk.f32.gmra.mxu0 %vm83_vm2, %v11916_v29 }
 0x17f   :  { %v11924_v51 = vadd.f32 %v1229_v30, %v828_v31  ;;  %v11926_v9 = vadd.f32 %v1026_v0, %v625_v33  ;;  %9580 = vmatprep.mubr.msk.f32.mxu1 %vm10636_vm1, %v17340_v32  ;;  %1984 = vmatprep.mubr.f32.mxu0 %v17340_v32  ;;  %v838_v31 = vadd.f32 %v11602_v14, %v11275_v58 }
 0x180   :  { %v9427_v17 = vpop.f32.mrf.mxu1  ;;  %v1028_v34 = vpop.f32.mrf.mxu0  ;;  %v637_v0 = vadd.f32 %v11606_v38, %v11279_v59  ;;  %v639_v58 = vadd.f32 %v11613_v42, %v11286_v61  ;;  %v11988_v42 = vld [vmem:[%s17130_s0 + $0x48] sm:$0xff] }
 0x181   :  { %v11935_v36 = vadd.f32 %v1028_v34, %v627_v50 }
 0x182   :  { %v1234_v53 = vpop.f32.mrf.mxu1  ;;  %9581 = vmatmul.mubr.msk.f32.gmra.mxu1 %vm83_vm2, %v11940_v46  ;;  %v1032_v30 = vpop.f32.mrf.mxu0  ;;  %8253 = vmatmul.mubr.msk.f32.gmra.mxu0 %vm83_vm2, %v11940_v46 }
 0x183   :  { %v11948_v52 = vadd.f32 %v1234_v53, %v833_v35  ;;  %v11950_v55 = vadd.f32 %v1032_v30, %v631_v5  ;;  %9583 = vmatprep.mubr.msk.f32.mxu1 %vm10636_vm1, %v17340_v32  ;;  %1990 = vmatprep.mubr.f32.mxu0 %v17340_v32  ;;  %v843_v35 = vadd.f32 %v11615_v18, %v11288_v62 }
 0x184   :  { %v9430_v13 = vpop.f32.mrf.mxu1  ;;  %v1034_v33 = vpop.f32.mrf.mxu0  ;;  %v643_v5 = vadd.f32 %v11619_v60, %v11292_v63  ;;  %v645_v62 = vadd.f32 %v11626_v56, %v11299_v2  ;;  %v12012_v56 = vld [vmem:[%s17130_s0 + $0x50] sm:$0xff] }
 0x185   :  { %v11959_v50 = vadd.f32 %v1034_v33, %v633_v54  ;;  %v848_v13 = vadd.f32 %v11628_v19, %v11301_v3  ;;  %v649_v33 = vadd.f32 %v11632_v49, %v11305_v4  ;;  %v651_v3 = vadd.f32 %v11639_v48, %v11312_v6  ;;  %v12036_v48 = vld [vmem:[%s17130_s0 + $0x58] sm:$0xff] }
 0x186   :  { %v1239_v57 = vpop.f32.mrf.mxu1  ;;  %9584 = vmatmul.mubr.msk.f32.gmra.mxu1 %vm83_vm2, %v11964_v1  ;;  %v1038_v17 = vpop.f32.mrf.mxu0  ;;  %8254 = vmatmul.mubr.msk.f32.gmra.mxu0 %vm83_vm2, %v11964_v1 }
 0x187   :  { %v11972_v14 = vadd.f32 %v1239_v57, %v838_v31  ;;  %v11974_v59 = vadd.f32 %v1038_v17, %v637_v0  ;;  %9586 = vmatprep.mubr.msk.f32.mxu1 %vm10636_vm1, %v17340_v32  ;;  %1996 = vmatprep.mubr.f32.mxu0 %v17340_v32  ;;  %v853_v17 = vadd.f32 %v11641_v20, %v11314_v7 }
 0x188   :  { %v9433_v38 = vpop.f32.mrf.mxu1  ;;  %v1040_v34 = vpop.f32.mrf.mxu0  ;;  %v657_v7 = vadd.f32 %v11652_v45, %v11325_v10  ;;  %v12060_v45 = vld [vmem:[%s17130_s0 + $0x60] sm:$0xff] }
 0x189   :  { %v11983_v53 = vadd.f32 %v1040_v34, %v639_v58  ;;  %v655_v58 = vadd.f32 %v11645_v47, %v11318_v8 }
 0x18a   :  { %v1244_v61 = vpop.f32.mrf.mxu1  ;;  %9587 = vmatmul.mubr.msk.f32.gmra.mxu1 %vm83_vm2, %v11988_v42  ;;  %v1044_v30 = vpop.f32.mrf.mxu0  ;;  %8255 = vmatmul.mubr.msk.f32.gmra.mxu0 %vm83_vm2, %v11988_v42 }
 0x18b   :  { %v11996_v18 = vadd.f32 %v1244_v61, %v843_v35  ;;  %v11998_v63 = vadd.f32 %v1044_v30, %v643_v5  ;;  %9589 = vmatprep.mubr.msk.f32.mxu1 %vm10636_vm1, %v17340_v32  ;;  %2002 = vmatprep.mubr.f32.mxu0 %v17340_v32  ;;  %v858_v5 = vadd.f32 %v11654_v21, %v11327_v11 }
 0x18c   :  { %v9436_v60 = vpop.f32.mrf.mxu1  ;;  %v1046_v54 = vpop.f32.mrf.mxu0  ;;  %v661_v61 = vadd.f32 %v11658_v44, %v11331_v12  ;;  %v663_v11 = vadd.f32 %v11665_v43, %v11338_v15  ;;  %v12084_v43 = vld [vmem:[%s17130_s0 + $0x68] sm:$0xff] }
 0x18d   :  { %v12007_v31 = vadd.f32 %v1046_v54, %v645_v62  ;;  %v863_v54 = vadd.f32 %v11667_v22, %v11340_v16 }
 0x18e   :  { %v1249_v2 = vpop.f32.mrf.mxu1  ;;  %9590 = vmatmul.mubr.msk.f32.gmra.mxu1 %vm83_vm2, %v12012_v56  ;;  %v1050_v0 = vpop.f32.mrf.mxu0  ;;  %8256 = vmatmul.mubr.msk.f32.gmra.mxu0 %vm83_vm2, %v12012_v56 }
 0x18f   :  { %v12020_v19 = vadd.f32 %v1249_v2, %v848_v13  ;;  %v12022_v4 = vadd.f32 %v1050_v0, %v649_v33  ;;  %9592 = vmatprep.mubr.msk.f32.mxu1 %vm10636_vm1, %v17340_v32  ;;  %2008 = vmatprep.mubr.f32.mxu0 %v17340_v32  ;;  %v17346_v13 = vld [vmem:[#allocation50_spill] sm:$0xff] }
 0x190   :  { %v9439_v49 = vpop.f32.mrf.mxu1  ;;  %v1052_v57 = vpop.f32.mrf.mxu0  ;;  %v667_v33 = vadd.f32 %v17346_v13, %v11344_v37  ;;  %v17353_v13 = vld [vmem:[#allocation7_spill] sm:$0xff] }
 0x191   :  { %v12031_v38 = vadd.f32 %v1052_v57, %v651_v3  ;;  %v17347_v3 = vld [vmem:[#allocation3_spill] sm:$0xff] }
 0x192   :  { %v1254_v6 = vpop.f32.mrf.mxu1  ;;  %9593 = vmatmul.mubr.msk.f32.gmra.mxu1 %vm83_vm2, %v12036_v48  ;;  %v1056_v34 = vpop.f32.mrf.mxu0  ;;  %8257 = vmatmul.mubr.msk.f32.gmra.mxu0 %vm83_vm2, %v12036_v48  ;;  %v669_v16 = vadd.f32 %v11678_v40, %v17347_v3  ;;  %v17356_v3 = vld [vmem:[#allocation54_spill] sm:$0xff] }
 0x193   :  { %v12044_v20 = vadd.f32 %v1254_v6, %v853_v17  ;;  %v12046_v8 = vadd.f32 %v1056_v34, %v655_v58  ;;  %9595 = vmatprep.mubr.msk.f32.mxu1 %vm10636_vm1, %v17340_v32  ;;  %2014 = vmatprep.mubr.f32.mxu0 %v17340_v32  ;;  %v17348_v17 = vld [vmem:[#allocation4_spill] sm:$0xff]  ;;  %v17349_v58 = vld [vmem:[#allocation51_spill] sm:$0xff]  ;;  %v17350_v34 = vld [vmem:[#allocation5_spill] sm:$0xff] }
 0x194   :  { %v9442_v47 = vpop.f32.mrf.mxu1  ;;  %v1058_v35 = vpop.f32.mrf.mxu0  ;;  %v868_v6 = vadd.f32 %v17349_v58, %v17348_v17  ;;  %v17357_v58 = vld [vmem:[#allocation9_spill] sm:$0xff] }
 0x195   :  { %v12055_v30 = vadd.f32 %v1058_v35, %v657_v7  ;;  %v17351_v7 = vld [vmem:[#allocation52_spill] sm:$0xff] }
 0x196   :  { %v1259_v10 = vpop.f32.mrf.mxu1  ;;  %9596 = vmatmul.mubr.msk.f32.gmra.mxu1 %vm83_vm2, %v12060_v45  ;;  %v1062_v62 = vpop.f32.mrf.mxu0  ;;  %8258 = vmatmul.mubr.msk.f32.gmra.mxu0 %vm83_vm2, %v12060_v45  ;;  %v673_v47 = vadd.f32 %v17351_v7, %v17350_v34 }
 0x197   :  { %v12068_v21 = vadd.f32 %v1259_v10, %v858_v5  ;;  %v12070_v12 = vadd.f32 %v1062_v62, %v661_v61  ;;  %9598 = vmatprep.mubr.msk.f32.mxu1 %vm10636_vm1, %v17340_v32  ;;  %2020 = vmatprep.mubr.f32.mxu0 %v17340_v32  ;;  %v12108_v5 = vld [vmem:[%s17130_s0 + $0x70] sm:$0xff]  ;;  %v17352_v10 = vld [vmem:[#allocation6_spill] sm:$0xff] }
 0x198   :  { %v9445_v44 = vpop.f32.mrf.mxu1  ;;  %v1064_v60 = vpop.f32.mrf.mxu0  ;;  %v675_v62 = vadd.f32 %v11691_v41, %v17352_v10  ;;  %v17359_v10 = vld [vmem:[#allocation55_spill] sm:$0xff] }
 0x199   :  { %v12079_v2 = vadd.f32 %v1064_v60, %v663_v11 }
 0x19a   :  { %v1264_v15 = vpop.f32.mrf.mxu1  ;;  %9599 = vmatmul.mubr.msk.f32.gmra.mxu1 %vm83_vm2, %v12084_v43  ;;  %v1068_v0 = vpop.f32.mrf.mxu0  ;;  %8259 = vmatmul.mubr.msk.f32.gmra.mxu0 %vm83_vm2, %v12084_v43 }
 0x19b   :  { %v12092_v22 = vadd.f32 %v1264_v15, %v863_v54  ;;  %v12094_v37 = vadd.f32 %v1068_v0, %v667_v33  ;;  %9601 = vmatprep.mubr.msk.f32.mxu1 %vm10636_vm1, %v17340_v32  ;;  %2026 = vmatprep.mubr.f32.mxu0 %v17340_v32  ;;  %v17354_v33 = vld [vmem:[#allocation53_spill] sm:$0xff]  ;;  %v17355_v0 = vld [vmem:[#allocation8_spill] sm:$0xff] }
 0x19c   :  { %v9448_v49 = vpop.f32.mrf.mxu1  ;;  %v1070_v57 = vpop.f32.mrf.mxu0  ;;  %v873_v15 = vadd.f32 %v17354_v33, %v17353_v13 }
 0x19d   :  { %v12103_v35 = vadd.f32 %v1070_v57, %v669_v16  ;;  %v679_v16 = vadd.f32 %v17356_v3, %v17355_v0  ;;  %v12132_v57 = vld [vmem:[%s17130_s0 + $0x78] sm:$0xff]  ;;  %v17363_v3 = vld [vmem:[#allocation12_spill] sm:$0xff] }
 0x19e   :  { %v1269_v40 = vpop.f32.mrf.mxu1  ;;  %9602 = vmatmul.mubr.msk.f32.gmra.mxu1 %vm83_vm2, %v12108_v5  ;;  %v1074_v61 = vpop.f32.mrf.mxu0  ;;  %8260 = vmatmul.mubr.msk.f32.gmra.mxu0 %vm83_vm2, %v12108_v5 }
 0x19f   :  { %v12116_v11 = vadd.f32 %v1269_v40, %v868_v6  ;;  %v12118_v44 = vadd.f32 %v1074_v61, %v673_v47  ;;  %9604 = vmatprep.mubr.msk.f32.mxu1 %vm10636_vm1, %v17340_v32  ;;  %2032 = vmatprep.mubr.f32.mxu0 %v17340_v32  ;;  %v681_v6 = vadd.f32 %v11704_v39, %v17357_v58  ;;  %v17358_v61 = vld [vmem:[#allocation10_spill] sm:$0xff] }
 0x1a0   :  { %v9451_v60 = vpop.f32.mrf.mxu1  ;;  %v1076_v54 = vpop.f32.mrf.mxu0 }
 0x1a1   :  { %v12127_v49 = vadd.f32 %v1076_v54, %v675_v62  ;;  %v878_v62 = vadd.f32 %v17359_v10, %v17358_v61  ;;  %v17360_v60 = vld [vmem:[#allocation11_spill] sm:$0xff]  ;;  %v17361_v54 = vld [vmem:[#allocation56_spill] sm:$0xff]  ;;  %v17368_v10 = vld [vmem:[#allocation14_spill] sm:$0xff] }
 0x1a2   :  { %v1274_v41 = vpop.f32.mrf.mxu1  ;;  %9605 = vmatmul.mubr.msk.f32.gmra.mxu1 %vm83_vm2, %v12132_v57  ;;  %v1080_v17 = vpop.f32.mrf.mxu0  ;;  %8261 = vmatmul.mubr.msk.f32.gmra.mxu0 %vm83_vm2, %v12132_v57  ;;  %v685_v13 = vadd.f32 %v17361_v54, %v17360_v60  ;;  %v17369_v60 = vld [vmem:[#allocation58_spill] sm:$0xff] }
 0x1a3   :  { %v12140_v34 = vadd.f32 %v1274_v41, %v873_v15  ;;  %v12142_v7 = vadd.f32 %v1080_v17, %v679_v16  ;;  %9607 = vmatprep.mubr.msk.f32.mxu1 %vm10636_vm1, %v17340_v32  ;;  %2038 = vmatprep.mubr.f32.mxu0 %v17340_v32  ;;  %v12156_v15 = vld [vmem:[%s17130_s0 + $0x80] sm:$0xff]  ;;  %v687_v16 = vadd.f32 %v11717_v23, %v17363_v3 }
 0x1a4   :  { %v9454_v47 = vpop.f32.mrf.mxu1  ;;  %v1082_v40 = vpop.f32.mrf.mxu0  ;;  %v691_v54 = vadd.f32 %v17369_v60, %v17368_v10  ;;  %v17376_v60 = vld [vmem:[#allocation17_spill] sm:$0xff] }
 0x1a5   :  { %v12151_v33 = vadd.f32 %v1082_v40, %v681_v6  ;;  %v17366_v47 = vld [vmem:[#allocation13_spill] sm:$0xff] }
 0x1a6   :  { %v1279_v39 = vpop.f32.mrf.mxu1  ;;  %9608 = vmatmul.mubr.msk.f32.gmra.mxu1 %vm83_vm2, %v12156_v15  ;;  %v1086_v0 = vpop.f32.mrf.mxu0  ;;  %8262 = vmatmul.mubr.msk.f32.gmra.mxu0 %vm83_vm2, %v12156_v15  ;;  %v17367_v40 = vld [vmem:[#allocation57_spill] sm:$0xff] }
 0x1a7   :  { %17362 = vst [vmem:[#allocation50_spill] sm:$0xff] %v12151_v33  ;;  %v12164_v41 = vadd.f32 %v1279_v39, %v878_v62  ;;  %v12166_v17 = vadd.f32 %v1086_v0, %v685_v13  ;;  %9610 = vmatprep.mubr.msk.f32.mxu1 %vm10636_vm1, %v17340_v32  ;;  %2044 = vmatprep.mubr.f32.mxu0 %v17340_v32  ;;  %v12180_v62 = vld [vmem:[%s17130_s0 + $0x88] sm:$0xff]  ;;  %v17371_v39 = vld [vmem:[#allocation15_spill] sm:$0xff] }
 0x1a8   :  { %v9457_v58 = vpop.f32.mrf.mxu1  ;;  %v1088_v6 = vpop.f32.mrf.mxu0  ;;  %v883_v61 = vadd.f32 %v17367_v40, %v17366_v47  ;;  %v693_v0 = vadd.f32 %v11730_v24, %v17371_v39  ;;  %v17374_v47 = vld [vmem:[#allocation16_spill] sm:$0xff]  ;;  %v17375_v40 = vld [vmem:[#allocation59_spill] sm:$0xff] }
 0x1a9   :  { %17364 = vst [vmem:[#allocation3_spill] sm:$0xff] %v12164_v41  ;;  %17365 = vst [vmem:[#allocation4_spill] sm:$0xff] %v12166_v17  ;;  %v12175_v33 = vadd.f32 %v1088_v6, %v687_v16  ;;  %v888_v10 = vadd.f32 %v17375_v40, %v17374_v47  ;;  %v17383_v47 = vld [vmem:[#allocation61_spill] sm:$0xff] }
 0x1aa   :  { %v1284_v23 = vpop.f32.mrf.mxu1  ;;  %9611 = vmatmul.mubr.msk.f32.gmra.mxu1 %vm83_vm2, %v12180_v62  ;;  %v1092_v13 = vpop.f32.mrf.mxu0  ;;  %8263 = vmatmul.mubr.msk.f32.gmra.mxu0 %vm83_vm2, %v12180_v62 }
 0x1ab   :  { %17370 = vst [vmem:[#allocation51_spill] sm:$0xff] %v12175_v33  ;;  %v12188_v3 = vadd.f32 %v1284_v23, %v883_v61  ;;  %v12190_v16 = vadd.f32 %v1092_v13, %v691_v54  ;;  %9613 = vmatprep.mubr.msk.f32.mxu1 %vm10636_vm1, %v17340_v32  ;;  %2050 = vmatprep.mubr.f32.mxu0 %v17340_v32  ;;  %v17377_v33 = vld [vmem:[#allocation60_spill] sm:$0xff]  ;;  %v12204_v61 = vld [vmem:[%s17130_s0 + $0x90] sm:$0xff]  ;;  %v17379_v23 = vld [vmem:[#allocation18_spill] sm:$0xff] }
 0x1ac   :  { %v9460_v58 = vpop.f32.mrf.mxu1  ;;  %v1094_v6 = vpop.f32.mrf.mxu0  ;;  %v697_v17 = vadd.f32 %v17377_v33, %v17376_v60  ;;  %v699_v13 = vadd.f32 %v11743_v25, %v17379_v23  ;;  %v17384_v60 = vld [vmem:[#allocation20_spill] sm:$0xff] }
 0x1ad   :  { %17372 = vst [vmem:[#allocation5_spill] sm:$0xff] %v12188_v3  ;;  %17373 = vst [vmem:[#allocation52_spill] sm:$0xff] %v12190_v16  ;;  %v12199_v41 = vadd.f32 %v1094_v6, %v693_v0  ;;  %v17382_v6 = vld [vmem:[#allocation19_spill] sm:$0xff] }
 0x1ae   :  { %v1289_v24 = vpop.f32.mrf.mxu1  ;;  %9614 = vmatmul.mubr.msk.f32.gmra.mxu1 %vm83_vm2, %v12204_v61  ;;  %v1098_v54 = vpop.f32.mrf.mxu0  ;;  %8264 = vmatmul.mubr.msk.f32.gmra.mxu0 %vm83_vm2, %v12204_v61  ;;  %v893_v40 = vadd.f32 %v17383_v47, %v17382_v6  ;;  %v17391_v6 = vld [vmem:[#allocation63_spill] sm:$0xff] }
 0x1af   :  { %17378 = vst [vmem:[#allocation6_spill] sm:$0xff] %v12199_v41  ;;  %v12212_v39 = vadd.f32 %v1289_v24, %v888_v10  ;;  %v12214_v33 = vadd.f32 %v1098_v54, %v697_v17  ;;  %9616 = vmatprep.mubr.msk.f32.mxu1 %vm10636_vm1, %v17340_v32  ;;  %2056 = vmatprep.mubr.f32.mxu0 %v17340_v32  ;;  %v17385_v41 = vld [vmem:[#allocation62_spill] sm:$0xff]  ;;  %v17387_v24 = vld [vmem:[#allocation21_spill] sm:$0xff] }
 0x1b0   :  { %v9463_v0 = vpop.f32.mrf.mxu1  ;;  %v1100_v58 = vpop.f32.mrf.mxu0  ;;  %v703_v16 = vadd.f32 %v17385_v41, %v17384_v60  ;;  %v12228_v17 = vld [vmem:[%s17130_s0 + $0x98] sm:$0xff]  ;;  %v705_v54 = vadd.f32 %v11756_v26, %v17387_v24  ;;  %v17392_v60 = vld [vmem:[#allocation23_spill] sm:$0xff] }
 0x1b1   :  { %17380 = vst [vmem:[#allocation7_spill] sm:$0xff] %v12212_v39  ;;  %17381 = vst [vmem:[#allocation53_spill] sm:$0xff] %v12214_v33  ;;  %v12223_v3 = vadd.f32 %v1100_v58, %v699_v13  ;;  %v17390_v58 = vld [vmem:[#allocation22_spill] sm:$0xff] }
 0x1b2   :  { %v1294_v25 = vpop.f32.mrf.mxu1  ;;  %9617 = vmatmul.mubr.msk.f32.gmra.mxu1 %vm83_vm2, %v12228_v17  ;;  %v1104_v10 = vpop.f32.mrf.mxu0  ;;  %8265 = vmatmul.mubr.msk.f32.gmra.mxu0 %vm83_vm2, %v12228_v17  ;;  %v898_v47 = vadd.f32 %v17391_v6, %v17390_v58  ;;  %v17399_v58 = vld [vmem:[#allocation65_spill] sm:$0xff] }
 0x1b3   :  { %17386 = vst [vmem:[#allocation8_spill] sm:$0xff] %v12223_v3  ;;  %v12236_v23 = vadd.f32 %v1294_v25, %v893_v40  ;;  %v12238_v41 = vadd.f32 %v1104_v10, %v703_v16  ;;  %9619 = vmatprep.mubr.msk.f32.mxu1 %vm10636_vm1, %v17340_v32  ;;  %2062 = vmatprep.mubr.f32.mxu0 %v17340_v32  ;;  %v17393_v3 = vld [vmem:[#allocation64_spill] sm:$0xff]  ;;  %v12252_v16 = vld [vmem:[%s17130_s0 + $0xa0] sm:$0xff] }
 0x1b4   :  { %v9466_v13 = vpop.f32.mrf.mxu1  ;;  %v1106_v0 = vpop.f32.mrf.mxu0  ;;  %v709_v33 = vadd.f32 %v17393_v3, %v17392_v60  ;;  %v17395_v25 = vld [vmem:[#allocation24_spill] sm:$0xff]  ;;  %v17400_v60 = vld [vmem:[#allocation26_spill] sm:$0xff] }
 0x1b5   :  { %17388 = vst [vmem:[#allocation54_spill] sm:$0xff] %v12236_v23  ;;  %17389 = vst [vmem:[#allocation9_spill] sm:$0xff] %v12238_v41  ;;  %v12247_v39 = vadd.f32 %v1106_v0, %v705_v54  ;;  %v711_v10 = vadd.f32 %v11769_v27, %v17395_v25  ;;  %v17398_v0 = vld [vmem:[#allocation25_spill] sm:$0xff] }
 0x1b6   :  { %v1299_v26 = vpop.f32.mrf.mxu1  ;;  %9620 = vmatmul.mubr.msk.f32.gmra.mxu1 %vm83_vm2, %v12252_v16  ;;  %v1110_v40 = vpop.f32.mrf.mxu0  ;;  %8266 = vmatmul.mubr.msk.f32.gmra.mxu0 %vm83_vm2, %v12252_v16  ;;  %v903_v6 = vadd.f32 %v17399_v58, %v17398_v0  ;;  %v17407_v0 = vld [vmem:[#allocation67_spill] sm:$0xff] }
 0x1b7   :  { %17394 = vst [vmem:[#allocation10_spill] sm:$0xff] %v12247_v39  ;;  %v12260_v24 = vadd.f32 %v1299_v26, %v898_v47  ;;  %v12262_v3 = vadd.f32 %v1110_v40, %v709_v33  ;;  %9622 = vmatprep.mubr.msk.f32.mxu1 %vm10636_vm1, %v17340_v32  ;;  %2068 = vmatprep.mubr.f32.mxu0 %v17340_v32  ;;  %v17401_v39 = vld [vmem:[#allocation66_spill] sm:$0xff]  ;;  %v12276_v33 = vld [vmem:[%s17130_s0 + $0xa8] sm:$0xff]  ;;  %v17403_v26 = vld [vmem:[#allocation27_spill] sm:$0xff] }
 0x1b8   :  { %v9469_v54 = vpop.f32.mrf.mxu1  ;;  %v1112_v13 = vpop.f32.mrf.mxu0  ;;  %v715_v41 = vadd.f32 %v17401_v39, %v17400_v60  ;;  %v717_v40 = vadd.f32 %v11782_v28, %v17403_v26  ;;  %v17408_v60 = vld [vmem:[#allocation29_spill] sm:$0xff] }
 0x1b9   :  { %17396 = vst [vmem:[#allocation55_spill] sm:$0xff] %v12260_v24  ;;  %17397 = vst [vmem:[#allocation11_spill] sm:$0xff] %v12262_v3  ;;  %v12271_v23 = vadd.f32 %v1112_v13, %v711_v10  ;;  %v17406_v13 = vld [vmem:[#allocation28_spill] sm:$0xff] }
 0x1ba   :  { %v1304_v27 = vpop.f32.mrf.mxu1  ;;  %9623 = vmatmul.mubr.msk.f32.gmra.mxu1 %vm83_vm2, %v12276_v33  ;;  %v1116_v47 = vpop.f32.mrf.mxu0  ;;  %8267 = vmatmul.mubr.msk.f32.gmra.mxu0 %vm83_vm2, %v12276_v33  ;;  %v908_v58 = vadd.f32 %v17407_v0, %v17406_v13  ;;  %v17416_v13 = vld [vmem:[#allocation31_spill] sm:$0xff]  ;;  %v17417_v0 = vld [vmem:[#allocation70_spill] sm:$0xff] }
 0x1bb   :  { %17402 = vst [vmem:[#allocation56_spill] sm:$0xff] %v12271_v23  ;;  %v12284_v25 = vadd.f32 %v1304_v27, %v903_v6  ;;  %v12286_v39 = vadd.f32 %v1116_v47, %v715_v41  ;;  %9625 = vmatprep.mubr.msk.f32.mxu1 %vm10636_vm1, %v17340_v32  ;;  %2074 = vmatprep.mubr.f32.mxu0 %v17340_v32  ;;  %v17409_v23 = vld [vmem:[#allocation68_spill] sm:$0xff]  ;;  %v12300_v41 = vld [vmem:[%s17130_s0 + $0xb0] sm:$0xff]  ;;  %v17412_v27 = vld [vmem:[#allocation30_spill] sm:$0xff] }
 0x1bc   :  { %v9472_v10 = vpop.f32.mrf.mxu1  ;;  %v1118_v54 = vpop.f32.mrf.mxu0  ;;  %v721_v3 = vadd.f32 %v17409_v23, %v17408_v60  ;;  %17411 = vst [vmem:[#allocation14_spill] sm:$0xff] %v12300_v41  ;;  %v17413_v47 = vld [vmem:[#allocation69_spill] sm:$0xff]  ;;  %v913_v60 = vadd.f32 %v17417_v0, %v17416_v13 }
 0x1bd   :  { %17404 = vst [vmem:[#allocation12_spill] sm:$0xff] %v12284_v25  ;;  %17405 = vst [vmem:[#allocation13_spill] sm:$0xff] %v12286_v39  ;;  %v12295_v24 = vadd.f32 %v1118_v54, %v717_v40  ;;  %v723_v26 = vadd.f32 %v17413_v47, %v17412_v27  ;;  %v17419_v39 = vld [vmem:[#allocation71_spill] sm:$0xff]  ;;  %v17427_v13 = vld [vmem:[#allocation73_spill] sm:$0xff] }
 0x1be   :  { %v1309_v28 = vpop.f32.mrf.mxu1  ;;  %9626 = vmatmul.mubr.msk.f32.gmra.mxu1 %vm83_vm2, %v12300_v41  ;;  %v1122_v6 = vpop.f32.mrf.mxu0  ;;  %8268 = vmatmul.mubr.msk.f32.gmra.mxu0 %vm83_vm2, %v12300_v41 }
 0x1bf   :  { %17410 = vst [vmem:[#allocation57_spill] sm:$0xff] %v12295_v24  ;;  %v12308_v10 = vadd.f32 %v1309_v28, %v908_v58  ;;  %v12310_v23 = vadd.f32 %v1122_v6, %v721_v3  ;;  %9628 = vmatprep.mubr.msk.f32.mxu1 %vm10636_vm1, %v17340_v32  ;;  %2080 = vmatprep.mubr.f32.mxu0 %v17340_v32  ;;  %v17418_v24 = vld [vmem:[#allocation32_spill] sm:$0xff]  ;;  %v12324_v3 = vld [vmem:[%s17130_s0 + $0xb8] sm:$0xff]  ;;  %v17422_v28 = vld [vmem:[#allocation33_spill] sm:$0xff] }
 0x1c0   :  { %v9475_v40 = vpop.f32.mrf.mxu1  ;;  %v1124_v54 = vpop.f32.mrf.mxu0  ;;  %v727_v25 = vadd.f32 %v17419_v39, %v17418_v24  ;;  %17421 = vst [vmem:[#allocation59_spill] sm:$0xff] %v12324_v3  ;;  %v17423_v6 = vld [vmem:[#allocation72_spill] sm:$0xff] }
 0x1c1   :  { %17414 = vst [vmem:[#allocation58_spill] sm:$0xff] %v12308_v10  ;;  %17415 = vst [vmem:[#allocation15_spill] sm:$0xff] %v12310_v23  ;;  %v12319_v41 = vadd.f32 %v1124_v54, %v723_v26  ;;  %v729_v47 = vadd.f32 %v17423_v6, %v17422_v28  ;;  %v17426_v54 = vld [vmem:[#allocation34_spill] sm:$0xff] }
 0x1c2   :  { %v1314_v27 = vpop.f32.mrf.mxu1  ;;  %9629 = vmatmul.mubr.msk.f32.gmra.mxu1 %vm83_vm2, %v12324_v3  ;;  %v1128_v58 = vpop.f32.mrf.mxu0  ;;  %8269 = vmatmul.mubr.msk.f32.gmra.mxu0 %vm83_vm2, %v12324_v3  ;;  %v918_v0 = vadd.f32 %v17427_v13, %v17426_v54  ;;  %v17429_v23 = vld [vmem:[#allocation74_spill] sm:$0xff] }
 0x1c3   :  { %17420 = vst [vmem:[#allocation16_spill] sm:$0xff] %v12319_v41  ;;  %v12332_v40 = vadd.f32 %v1314_v27, %v913_v60  ;;  %v12334_v24 = vadd.f32 %v1128_v58, %v727_v25  ;;  %9631 = vmatprep.mubr.msk.f32.mxu1 %vm10636_vm1, %v17340_v32  ;;  %2086 = vmatprep.mubr.f32.mxu0 %v17340_v32  ;;  %v17428_v41 = vld [vmem:[#allocation35_spill] sm:$0xff]  ;;  %v17432_v27 = vld [vmem:[#allocation36_spill] sm:$0xff]  ;;  %v17438_v13 = vld [vmem:[#allocation38_spill] sm:$0xff] }
 0x1c4   :  { %v9478_v39 = vpop.f32.mrf.mxu1  ;;  %v1130_v26 = vpop.f32.mrf.mxu0  ;;  %v733_v10 = vadd.f32 %v17429_v23, %v17428_v41  ;;  %v17431_v60 = vld [vmem:[#allocation39_spill] sm:$0xff] }
 0x1c5   :  { %17424 = vst [vmem:[#allocation17_spill] sm:$0xff] %v12332_v40  ;;  %17425 = vst [vmem:[#allocation60_spill] sm:$0xff] %v12334_v24  ;;  %v12343_v3 = vadd.f32 %v1130_v26, %v729_v47  ;;  %v17433_v58 = vld [vmem:[#allocation75_spill] sm:$0xff]  ;;  %v17436_v47 = vld [vmem:[#allocation37_spill] sm:$0xff] }
 0x1c6   :  { %v1319_v28 = vpop.f32.mrf.mxu1  ;;  %9632 = vmatmul.mubr.msk.f32.gmra.mxu1 %vm83_vm2, %v17431_v60  ;;  %v1134_v25 = vpop.f32.mrf.mxu0  ;;  %8270 = vmatmul.mubr.msk.f32.gmra.mxu0 %vm83_vm2, %v17431_v60  ;;  %v735_v6 = vadd.f32 %v17433_v58, %v17432_v27  ;;  %v17437_v26 = vld [vmem:[#allocation76_spill] sm:$0xff] }
 0x1c7   :  { %17430 = vst [vmem:[#allocation18_spill] sm:$0xff] %v12343_v3  ;;  %v12351_v39 = vadd.f32 %v1319_v28, %v918_v0  ;;  %v12353_v24 = vadd.f32 %v1134_v25, %v733_v10  ;;  %9634 = vmatprep.mubr.msk.f32.mxu1 %vm10636_vm1, %v17340_v32  ;;  %2092 = vmatprep.mubr.f32.mxu0 %v17340_v32  ;;  %v17439_v3 = vld [vmem:[#allocation77_spill] sm:$0xff]  ;;  %v17441_v0 = vld [vmem:[#allocation78_spill] sm:$0xff]  ;;  %v17442_v28 = vld [vmem:[#allocation40_spill] sm:$0xff] }
 0x1c8   :  { %v9481_v41 = vpop.f32.mrf.mxu1  ;;  %v1136_v23 = vpop.f32.mrf.mxu0  ;;  %v923_v54 = vadd.f32 %v17437_v26, %v17436_v47  ;;  %v739_v60 = vadd.f32 %v17439_v3, %v17438_v13  ;;  %v17443_v25 = vld [vmem:[#allocation79_spill] sm:$0xff]  ;;  %v12380_v3 = vld [vmem:[%s17130_s0 + $0xd0] sm:$0xff]  ;;  %v17448_v26 = vld [vmem:[#allocation80_spill] sm:$0xff] }
 0x1c9   :  { %17434 = vst [vmem:[#allocation19_spill] sm:$0xff] %v12351_v39  ;;  %17435 = vst [vmem:[#allocation61_spill] sm:$0xff] %v12353_v24  ;;  %v12362_v40 = vadd.f32 %v1136_v23, %v735_v6  ;;  %v741_v58 = vadd.f32 %v17443_v25, %v17442_v28  ;;  %v17447_v47 = vld [vmem:[#allocation41_spill] sm:$0xff]  ;;  %v17452_v25 = vld [vmem:[#allocation43_spill] sm:$0xff] }
 0x1ca   :  { %v1324_v27 = vpop.f32.mrf.mxu1  ;;  %9635 = vmatmul.mubr.msk.f32.gmra.mxu1 %vm83_vm2, %v17441_v0  ;;  %v1140_v10 = vpop.f32.mrf.mxu0  ;;  %8271 = vmatmul.mubr.msk.f32.gmra.mxu0 %vm83_vm2, %v17441_v0  ;;  %17446 = vst [vmem:[#allocation22_spill] sm:$0xff] %v12380_v3  ;;  %v928_v13 = vadd.f32 %v17448_v26, %v17447_v47  ;;  %v17449_v0 = vld [vmem:[#allocation42_spill] sm:$0xff]  ;;  %v17456_v26 = vld [vmem:[#allocation44_spill] sm:$0xff] }
 0x1cb   :  { %17440 = vst [vmem:[#allocation20_spill] sm:$0xff] %v12362_v40  ;;  %v12370_v41 = vadd.f32 %v1324_v27, %v923_v54  ;;  %v12372_v24 = vadd.f32 %v1140_v10, %v739_v60  ;;  %9637 = vmatprep.mubr.msk.f32.mxu1 %vm10636_vm1, %v17340_v32  ;;  %2098 = vmatprep.mubr.f32.mxu0 %v17340_v32  ;;  %v17450_v54 = vld [vmem:[#allocation81_spill] sm:$0xff]  ;;  %v8355_v47 = vld [vmem:[%s17129_s1 + $0x138] sm:$0xf]  ;;  %v17466_v39 = vld [vmem:[#allocation48_spill] sm:$0xff] }
 0x1cc   :  { %v9484_v6 = vpop.f32.mrf.mxu1  ;;  %v1142_v23 = vpop.f32.mrf.mxu0  ;;  %v745_v27 = vadd.f32 %v17450_v54, %v17449_v0  ;;  %v17457_v0 = vld [vmem:[#allocation83_spill] sm:$0xff] }
 0x1cd   :  { %17444 = vst [vmem:[#allocation62_spill] sm:$0xff] %v12370_v41  ;;  %17445 = vst [vmem:[#allocation21_spill] sm:$0xff] %v12372_v24  ;;  %v12386_v60 = vadd.f32 %v1142_v23, %v741_v58  ;;  %v17453_v24 = vld [vmem:[#allocation82_spill] sm:$0xff]  ;;  %v933_v54 = vadd.f32 %v17457_v0, %v17456_v26  ;;  %v8353_v26 = vld [vmem:[%s17129_s1 + $0x128] sm:$0xff] }
 0x1ce   :  { %v1329_v10 = vpop.f32.mrf.mxu1  ;;  %9638 = vmatmul.mubr.msk.f32.gmra.mxu1 %vm83_vm2, %v12380_v3  ;;  %v1146_v28 = vpop.f32.mrf.mxu0  ;;  %8272 = vmatmul.mubr.msk.f32.gmra.mxu0 %vm83_vm2, %v12380_v3  ;;  %v747_v6 = vadd.f32 %v17453_v24, %v17452_v25  ;;  %v17459_v24 = vld [vmem:[#allocation84_spill] sm:$0xff]  ;;  %v17461_v25 = vld [vmem:[#allocation87_spill] sm:$0xff]  ;;  %v17462_v0 = vld [vmem:[#allocation46_spill] sm:$0xff] }
 0x1cf   :  { %17451 = vst [vmem:[#allocation63_spill] sm:$0xff] %v12386_v60  ;;  %v12394_v41 = vadd.f32 %v1329_v10, %v928_v13  ;;  %v12396_v40 = vadd.f32 %v1146_v28, %v745_v27  ;;  %9644 = vmatprep.mubr.msk.f32.mxu1 %vm10636_vm1, %v17340_v32  ;;  %2437 = vmatprep.mubr.f32.mxu0 %v17340_v32  ;;  %v17458_v60 = vld [vmem:[#allocation45_spill] sm:$0xff]  ;;  %v8357_v27 = vld [vmem:[%s17129_s1 + $0x148] sm:$0xf] }
 0x1d0   :  { %v9487_v58 = vpop.f32.mrf.mxu1  ;;  %v1148_v23 = vpop.f32.mrf.mxu0  ;;  %v751_v13 = vadd.f32 %v17459_v24, %v17458_v60  ;;  %v17463_v60 = vld [vmem:[#allocation85_spill] sm:$0xff] }
 0x1d1   :  { %17454 = vst [vmem:[#allocation23_spill] sm:$0xff] %v12394_v41  ;;  %17455 = vst [vmem:[#allocation64_spill] sm:$0xff] %v12396_v40  ;;  %v12408_v10 = vadd.f32 %v1148_v23, %v747_v6  ;;  %v753_v6 = vadd.f32 %v17463_v60, %v17462_v0  ;;  %v17465_v41 = vld [vmem:[#allocation86_spill] sm:$0xff]  ;;  %v17467_v0 = vld [vmem:[#allocation88_spill] sm:$0xff] }
 0x1d2   :  { %v1334_v28 = vpop.f32.mrf.mxu1  ;;  %9645 = vmatmul.mubr.msk.f32.vlgmr.msra.gmra.mxu1 %vm83_vm2, %v17461_v25  ;;  %v1152_v58 = vpop.f32.mrf.mxu0  ;;  %8305 = vmatmul.mubr.msk.f32.vlgmr.msra.gmra.mxu0 %vm83_vm2, %v17461_v25  ;;  %v17464_v25 = vld [vmem:[#allocation47_spill] sm:$0xff] }
 0x1d3   :  { %17460 = vst [vmem:[#allocation24_spill] sm:$0xff] %v12408_v10  ;;  %v12422_v23 = vadd.f32 %v1334_v28, %v933_v54  ;;  %v12424_v24 = vadd.f32 %v1152_v58, %v751_v13  ;;  %8359 = vmatpush1.msk.msra.mxu0 %vm153_vm0, %v8355_v47  ;;  %9647 = vmatprep.mubr.msk.f32.mxu1 %vm10636_vm1, %v17340_v32  ;;  %v8352_v47 = vld [vmem:[%s17129_s1 + $0x120] sm:$0xff]  ;;  %v8354_v13 = vld [vmem:[%s17129_s1 + $0x130] sm:$0xff] }
 0x1d4   :  { %v9490_v10 = vpop.f32.mrf.mxu1  ;;  %v1154_v40 = vpop.f32.mrf.mxu0  ;;  %2443 = vmatprep.mubr.f32.mxu0 %v17340_v32  ;;  %9714 = vmatpush3.msk.msra.mxu1 %vm153_vm0, %v8357_v27  ;;  %v938_v3 = vadd.f32 %v17465_v41, %v17464_v25  ;;  %v757_v54 = vadd.f32 %v17467_v0, %v17466_v39  ;;  %v17468_v39 = vld [vmem:[#allocation49_spill] sm:$0xff] }
 0x1d5   :  { %v12435_v28 = vadd.f32 %v1154_v40, %v753_v6  ;;  %2874 = vmatprep.subr.mxu0 %v8353_v26  ;;  %9715 = vmatprep.subr.mxu1 %v17340_v32  ;;  %v8411_v40 = vld [vmem:[%s17129_s1 + $0x170] sm:$0xf] }
 0x1d6   :  { %v1339_v10 = vpop.f32.mrf.mxu1  ;;  %9648 = vmatmul.mubr.msk.f32.gmra.mxu1 %vm83_vm2, %v11916_v29  ;;  %v1158_v41 = vpop.f32.mrf.mxu0  ;;  %8306 = vmatmul.mubr.msk.f32.gmra.mxu0 %vm83_vm2, %v11916_v29  ;;  %v17469_v27 = vld [vmem:[#allocation89_spill] sm:$0xff] }
 0x1d7   :  { %v759_v58 = vadd.f32 %v17469_v27, %v17468_v39  ;;  %v12453_v26 = vadd.f32 %v1339_v10, %v938_v3  ;;  %v12455_v60 = vadd.f32 %v1158_v41, %v757_v54  ;;  %9650 = vmatprep.mubr.msk.f32.mxu1 %vm10636_vm1, %v17340_v32  ;;  %2449 = vmatprep.mubr.f32.mxu0 %v17340_v32 }
 0x1d8   :  { %v9493_v6 = vpop.f32.mrf.mxu1  ;;  %v1160_v25 = vpop.f32.mrf.mxu0  ;;  %2875 = vmatpush1.msra.mxu0 %v8352_v47  ;;  %9716 = vmatpush3.msra.mxu1 %v8354_v13 }
 0x1d9   :  { %v12460_v29 = vadd.f32 %v1160_v25, %v759_v58  ;;  %8413 = vmatprep.subr.msk.mxu0 %vm153_vm0, %v8411_v40  ;;  %9786 = vmatprep.subr.mxu1 %v17340_v32 }
 0x1da   :  { %v1700_v0 = vpop.f32.mrf.mxu1  ;;  %9651 = vmatmul.mubr.msk.f32.gmra.mxu1 %vm83_vm2, %v11940_v46  ;;  %v1497_v3 = vpop.f32.mrf.mxu0  ;;  %8307 = vmatmul.mubr.msk.f32.gmra.mxu0 %vm83_vm2, %v11940_v46 }
 0x1db   :  { %v12469_v54 = vadd.f32 %v1700_v0, %v11924_v51  ;;  %v12472_v47 = vadd.f32 %v1497_v3, %v11926_v9  ;;  %9653 = vmatprep.mubr.msk.f32.mxu1 %vm10636_vm1, %v17340_v32  ;;  %2455 = vmatprep.mubr.f32.mxu0 %v17340_v32 }
 0x1dc   :  { %v9500_v13 = vpop.f32.mrf.mxu1  ;;  %v1499_v10 = vpop.f32.mrf.mxu0 }
 0x1dd   :  { %v12478_v41 = vadd.f32 %v1499_v10, %v11935_v36 }
 0x1de   :  { %v1705_v40 = vpop.f32.mrf.mxu1  ;;  %9654 = vmatmul.mubr.msk.f32.gmra.mxu1 %vm83_vm2, %v11964_v1  ;;  %v1503_v46 = vpop.f32.mrf.mxu0  ;;  %8308 = vmatmul.mubr.msk.f32.gmra.mxu0 %vm83_vm2, %v11964_v1 }
 0x1df   :  { %v12485_v51 = vadd.f32 %v1705_v40, %v11948_v52  ;;  %v12488_v9 = vadd.f32 %v1503_v46, %v11950_v55  ;;  %9656 = vmatprep.mubr.msk.f32.mxu1 %vm10636_vm1, %v17340_v32  ;;  %2461 = vmatprep.mubr.f32.mxu0 %v17340_v32 }
 0x1e0   :  { %v9503_v36 = vpop.f32.mrf.mxu1  ;;  %v1505_v39 = vpop.f32.mrf.mxu0 }
 0x1e1   :  { %v12494_v27 = vadd.f32 %v1505_v39, %v11959_v50 }
 0x1e2   :  { %v1710_v58 = vpop.f32.mrf.mxu1  ;;  %9657 = vmatmul.mubr.msk.f32.gmra.mxu1 %vm83_vm2, %v11988_v42  ;;  %v1509_v1 = vpop.f32.mrf.mxu0  ;;  %8309 = vmatmul.mubr.msk.f32.gmra.mxu0 %vm83_vm2, %v11988_v42 }
 0x1e3   :  { %v12501_v52 = vadd.f32 %v1710_v58, %v11972_v14  ;;  %v12504_v55 = vadd.f32 %v1509_v1, %v11974_v59  ;;  %9659 = vmatprep.mubr.msk.f32.mxu1 %vm10636_vm1, %v17340_v32  ;;  %2467 = vmatprep.mubr.f32.mxu0 %v17340_v32 }
 0x1e4   :  { %v9506_v50 = vpop.f32.mrf.mxu1  ;;  %v1511_v6 = vpop.f32.mrf.mxu0 }
 0x1e5   :  { %v12510_v25 = vadd.f32 %v1511_v6, %v11983_v53 }
 0x1e6   :  { %v1715_v0 = vpop.f32.mrf.mxu1  ;;  %9660 = vmatmul.mubr.msk.f32.gmra.mxu1 %vm83_vm2, %v12012_v56  ;;  %v1515_v42 = vpop.f32.mrf.mxu0  ;;  %8310 = vmatmul.mubr.msk.f32.gmra.mxu0 %vm83_vm2, %v12012_v56 }
 0x1e7   :  { %v12517_v14 = vadd.f32 %v1715_v0, %v11996_v18  ;;  %v12520_v59 = vadd.f32 %v1515_v42, %v11998_v63  ;;  %9662 = vmatprep.mubr.msk.f32.mxu1 %vm10636_vm1, %v17340_v32  ;;  %2473 = vmatprep.mubr.f32.mxu0 %v17340_v32 }
 0x1e8   :  { %v9509_v53 = vpop.f32.mrf.mxu1  ;;  %v1517_v3 = vpop.f32.mrf.mxu0 }
 0x1e9   :  { %v12526_v13 = vadd.f32 %v1517_v3, %v12007_v31 }
 0x1ea   :  { %v1720_v10 = vpop.f32.mrf.mxu1  ;;  %9663 = vmatmul.mubr.msk.f32.gmra.mxu1 %vm83_vm2, %v12036_v48  ;;  %v1521_v56 = vpop.f32.mrf.mxu0  ;;  %8311 = vmatmul.mubr.msk.f32.gmra.mxu0 %vm83_vm2, %v12036_v48 }
 0x1eb   :  { %v12533_v18 = vadd.f32 %v1720_v10, %v12020_v19  ;;  %v12536_v63 = vadd.f32 %v1521_v56, %v12022_v4  ;;  %9665 = vmatprep.mubr.msk.f32.mxu1 %vm10636_vm1, %v17340_v32  ;;  %2479 = vmatprep.mubr.f32.mxu0 %v17340_v32 }
 0x1ec   :  { %v9512_v31 = vpop.f32.mrf.mxu1  ;;  %v1523_v40 = vpop.f32.mrf.mxu0 }
 0x1ed   :  { %v12542_v46 = vadd.f32 %v1523_v40, %v12031_v38 }
 0x1ee   :  { %v1725_v36 = vpop.f32.mrf.mxu1  ;;  %9666 = vmatmul.mubr.msk.f32.gmra.mxu1 %vm83_vm2, %v12060_v45  ;;  %v1527_v48 = vpop.f32.mrf.mxu0  ;;  %8312 = vmatmul.mubr.msk.f32.gmra.mxu0 %vm83_vm2, %v12060_v45 }
 0x1ef   :  { %v12549_v19 = vadd.f32 %v1725_v36, %v12044_v20  ;;  %v12552_v4 = vadd.f32 %v1527_v48, %v12046_v8  ;;  %9668 = vmatprep.mubr.msk.f32.mxu1 %vm10636_vm1, %v17340_v32  ;;  %2485 = vmatprep.mubr.f32.mxu0 %v17340_v32  ;;  %v17470_v36 = vld [vmem:[#allocation50_spill] sm:$0xff] }
 0x1f0   :  { %v9515_v38 = vpop.f32.mrf.mxu1  ;;  %v1529_v39 = vpop.f32.mrf.mxu0 }
 0x1f1   :  { %v12558_v58 = vadd.f32 %v1529_v39, %v12055_v30  ;;  %v17472_v39 = vld [vmem:[#allocation4_spill] sm:$0xff] }
 0x1f2   :  { %v1730_v1 = vpop.f32.mrf.mxu1  ;;  %9669 = vmatmul.mubr.msk.f32.gmra.mxu1 %vm83_vm2, %v12084_v43  ;;  %v1533_v45 = vpop.f32.mrf.mxu0  ;;  %8313 = vmatmul.mubr.msk.f32.gmra.mxu0 %vm83_vm2, %v12084_v43 }
 0x1f3   :  { %v12565_v20 = vadd.f32 %v1730_v1, %v12068_v21  ;;  %v12568_v8 = vadd.f32 %v1533_v45, %v12070_v12  ;;  %9671 = vmatprep.mubr.msk.f32.mxu1 %vm10636_vm1, %v17340_v32  ;;  %2491 = vmatprep.mubr.f32.mxu0 %v17340_v32 }
 0x1f4   :  { %v9518_v30 = vpop.f32.mrf.mxu1  ;;  %v1535_v50 = vpop.f32.mrf.mxu0 }
 0x1f5   :  { %v12574_v6 = vadd.f32 %v1535_v50, %v12079_v2  ;;  %v17473_v50 = vld [vmem:[#allocation51_spill] sm:$0xff] }
 0x1f6   :  { %v1735_v0 = vpop.f32.mrf.mxu1  ;;  %9672 = vmatmul.mubr.msk.f32.gmra.mxu1 %vm83_vm2, %v12108_v5  ;;  %v1539_v43 = vpop.f32.mrf.mxu0  ;;  %8314 = vmatmul.mubr.msk.f32.gmra.mxu0 %vm83_vm2, %v12108_v5 }
 0x1f7   :  { %v12581_v21 = vadd.f32 %v1735_v0, %v12092_v22  ;;  %v12584_v12 = vadd.f32 %v1539_v43, %v12094_v37  ;;  %9674 = vmatprep.mubr.msk.f32.mxu1 %vm10636_vm1, %v17340_v32  ;;  %2497 = vmatprep.mubr.f32.mxu0 %v17340_v32 }
 0x1f8   :  { %v9521_v2 = vpop.f32.mrf.mxu1  ;;  %v1541_v42 = vpop.f32.mrf.mxu0 }
 0x1f9   :  { %v12590_v53 = vadd.f32 %v1541_v42, %v12103_v35  ;;  %v17474_v2 = vld [vmem:[#allocation5_spill] sm:$0xff] }
 0x1fa   :  { %v1740_v3 = vpop.f32.mrf.mxu1  ;;  %9675 = vmatmul.mubr.msk.f32.gmra.mxu1 %vm83_vm2, %v12132_v57  ;;  %v1545_v5 = vpop.f32.mrf.mxu0  ;;  %8315 = vmatmul.mubr.msk.f32.gmra.mxu0 %vm83_vm2, %v12132_v57 }
 0x1fb   :  { %v12597_v22 = vadd.f32 %v1740_v3, %v12116_v11  ;;  %v12600_v37 = vadd.f32 %v1545_v5, %v12118_v44  ;;  %9677 = vmatprep.mubr.msk.f32.mxu1 %vm10636_vm1, %v17340_v32  ;;  %2503 = vmatprep.mubr.f32.mxu0 %v17340_v32  ;;  %v17475_v3 = vld [vmem:[#allocation52_spill] sm:$0xff] }
 0x1fc   :  { %v9524_v35 = vpop.f32.mrf.mxu1  ;;  %v1547_v10 = vpop.f32.mrf.mxu0 }
 0x1fd   :  { %v12606_v56 = vadd.f32 %v1547_v10, %v12127_v49 }
 0x1fe   :  { %v1745_v31 = vpop.f32.mrf.mxu1  ;;  %9678 = vmatmul.mubr.msk.f32.gmra.mxu1 %vm83_vm2, %v12156_v15  ;;  %v1551_v57 = vpop.f32.mrf.mxu0  ;;  %8316 = vmatmul.mubr.msk.f32.gmra.mxu0 %vm83_vm2, %v12156_v15 }
 0x1ff   :  { %v12613_v11 = vadd.f32 %v1745_v31, %v12140_v34  ;;  %v12616_v44 = vadd.f32 %v1551_v57, %v12142_v7  ;;  %9680 = vmatprep.mubr.msk.f32.mxu1 %vm10636_vm1, %v17340_v32  ;;  %2509 = vmatprep.mubr.f32.mxu0 %v17340_v32  ;;  %v17471_v34 = vld [vmem:[#allocation3_spill] sm:$0xff]  ;;  %v17476_v31 = vld [vmem:[#allocation6_spill] sm:$0xff] }
 0x200   :  { %v9527_v49 = vpop.f32.mrf.mxu1  ;;  %v1553_v40 = vpop.f32.mrf.mxu0 }
 0x201   :  { %v12622_v48 = vadd.f32 %v1553_v40, %v17470_v36  ;;  %v17477_v40 = vld [vmem:[#allocation7_spill] sm:$0xff] }
 0x202   :  { %v1750_v38 = vpop.f32.mrf.mxu1  ;;  %9681 = vmatmul.mubr.msk.f32.gmra.mxu1 %vm83_vm2, %v12180_v62  ;;  %v1557_v15 = vpop.f32.mrf.mxu0  ;;  %8317 = vmatmul.mubr.msk.f32.gmra.mxu0 %vm83_vm2, %v12180_v62 }
 0x203   :  { %v12629_v7 = vadd.f32 %v1750_v38, %v17471_v34  ;;  %v12632_v1 = vadd.f32 %v1557_v15, %v17472_v39  ;;  %9683 = vmatprep.mubr.msk.f32.mxu1 %vm10636_vm1, %v17340_v32  ;;  %2515 = vmatprep.mubr.f32.mxu0 %v17340_v32  ;;  %v17478_v38 = vld [vmem:[#allocation53_spill] sm:$0xff] }
 0x204   :  { %v9530_v45 = vpop.f32.mrf.mxu1  ;;  %v1559_v30 = vpop.f32.mrf.mxu0 }
 0x205   :  { %v12638_v0 = vadd.f32 %v1559_v30, %v17473_v50  ;;  %v17479_v45 = vld [vmem:[#allocation8_spill] sm:$0xff] }
 0x206   :  { %v1755_v43 = vpop.f32.mrf.mxu1  ;;  %9684 = vmatmul.mubr.msk.f32.gmra.mxu1 %vm83_vm2, %v12204_v61  ;;  %v1563_v62 = vpop.f32.mrf.mxu0  ;;  %8318 = vmatmul.mubr.msk.f32.gmra.mxu0 %vm83_vm2, %v12204_v61 }
 0x207   :  { %v12645_v42 = vadd.f32 %v1755_v43, %v17474_v2  ;;  %v12648_v5 = vadd.f32 %v1563_v62, %v17475_v3  ;;  %9686 = vmatprep.mubr.msk.f32.mxu1 %vm10636_vm1, %v17340_v32  ;;  %2521 = vmatprep.mubr.f32.mxu0 %v17340_v32  ;;  %v17480_v43 = vld [vmem:[#allocation54_spill] sm:$0xff]  ;;  %v17481_v2 = vld [vmem:[#allocation9_spill] sm:$0xff] }
 0x208   :  { %v9533_v35 = vpop.f32.mrf.mxu1  ;;  %v1565_v10 = vpop.f32.mrf.mxu0 }
 0x209   :  { %v12654_v57 = vadd.f32 %v1565_v10, %v17476_v31  ;;  %v17482_v31 = vld [vmem:[#allocation10_spill] sm:$0xff] }
 0x20a   :  { %v1760_v49 = vpop.f32.mrf.mxu1  ;;  %9687 = vmatmul.mubr.msk.f32.gmra.mxu1 %vm83_vm2, %v12228_v17  ;;  %v1569_v61 = vpop.f32.mrf.mxu0  ;;  %8319 = vmatmul.mubr.msk.f32.gmra.mxu0 %vm83_vm2, %v12228_v17 }
 0x20b   :  { %v12661_v36 = vadd.f32 %v1760_v49, %v17477_v40  ;;  %v12664_v15 = vadd.f32 %v1569_v61, %v17478_v38  ;;  %9689 = vmatprep.mubr.msk.f32.mxu1 %vm10636_vm1, %v17340_v32  ;;  %2527 = vmatprep.mubr.f32.mxu0 %v17340_v32  ;;  %v17483_v40 = vld [vmem:[#allocation55_spill] sm:$0xff] }
 0x20c   :  { %v9536_v34 = vpop.f32.mrf.mxu1  ;;  %v1571_v39 = vpop.f32.mrf.mxu0 }
 0x20d   :  { %v12670_v30 = vadd.f32 %v1571_v39, %v17479_v45  ;;  %v17484_v34 = vld [vmem:[#allocation11_spill] sm:$0xff] }
 0x20e   :  { %v1765_v50 = vpop.f32.mrf.mxu1  ;;  %9690 = vmatmul.mubr.msk.f32.gmra.mxu1 %vm83_vm2, %v12252_v16  ;;  %v1575_v17 = vpop.f32.mrf.mxu0  ;;  %8320 = vmatmul.mubr.msk.f32.gmra.mxu0 %vm83_vm2, %v12252_v16 }
 0x20f   :  { %v12677_v62 = vadd.f32 %v1765_v50, %v17480_v43  ;;  %v12680_v3 = vadd.f32 %v1575_v17, %v17481_v2  ;;  %9692 = vmatprep.mubr.msk.f32.mxu1 %vm10636_vm1, %v17340_v32  ;;  %2533 = vmatprep.mubr.f32.mxu0 %v17340_v32  ;;  %v17485_v17 = vld [vmem:[#allocation56_spill] sm:$0xff] }
 0x210   :  { %v9539_v35 = vpop.f32.mrf.mxu1  ;;  %v1577_v10 = vpop.f32.mrf.mxu0 }
 0x211   :  { %v12686_v49 = vadd.f32 %v1577_v10, %v17482_v31  ;;  %v17487_v35 = vld [vmem:[#allocation14_spill] sm:$0xff]  ;;  %v17488_v10 = vld [vmem:[#allocation12_spill] sm:$0xff] }
 0x212   :  { %v1770_v61 = vpop.f32.mrf.mxu1  ;;  %9693 = vmatmul.mubr.msk.f32.gmra.mxu1 %vm83_vm2, %v12276_v33  ;;  %v1581_v16 = vpop.f32.mrf.mxu0  ;;  %8321 = vmatmul.mubr.msk.f32.gmra.mxu0 %vm83_vm2, %v12276_v33 }
 0x213   :  { %v12693_v38 = vadd.f32 %v1770_v61, %v17483_v40  ;;  %v12696_v39 = vadd.f32 %v1581_v16, %v17484_v34  ;;  %9695 = vmatprep.mubr.msk.f32.mxu1 %vm10636_vm1, %v17340_v32  ;;  %2539 = vmatprep.mubr.f32.mxu0 %v17340_v32  ;;  %v17490_v61 = vld [vmem:[#allocation13_spill] sm:$0xff] }
 0x214   :  { %v9542_v45 = vpop.f32.mrf.mxu1  ;;  %v1583_v50 = vpop.f32.mrf.mxu0 }
 0x215   :  { %v12702_v43 = vadd.f32 %v1583_v50, %v17485_v17  ;;  %v17492_v45 = vld [vmem:[#allocation57_spill] sm:$0xff] }
 0x216   :  { %v1775_v2 = vpop.f32.mrf.mxu1  ;;  %9696 = vmatmul.mubr.msk.f32.gmra.mxu1 %vm83_vm2, %v17487_v35  ;;  %v1587_v33 = vpop.f32.mrf.mxu0  ;;  %8322 = vmatmul.mubr.msk.f32.gmra.mxu0 %vm83_vm2, %v17487_v35 }
 0x217   :  { %17486 = vst [vmem:[#allocation25_spill] sm:$0xff] %v12702_v43  ;;  %v12709_v31 = vadd.f32 %v1775_v2, %v17488_v10  ;;  %v12712_v16 = vadd.f32 %v1587_v33, %v17490_v61  ;;  %9698 = vmatprep.mubr.msk.f32.mxu1 %vm10636_vm1, %v17340_v32  ;;  %2545 = vmatprep.mubr.f32.mxu0 %v17340_v32  ;;  %v17494_v43 = vld [vmem:[#allocation59_spill] sm:$0xff]  ;;  %v17495_v2 = vld [vmem:[#allocation58_spill] sm:$0xff] }
 0x218   :  { %v9545_v40 = vpop.f32.mrf.mxu1  ;;  %v1589_v34 = vpop.f32.mrf.mxu0  ;;  %v17497_v10 = vld [vmem:[#allocation15_spill] sm:$0xff] }
 0x219   :  { %17489 = vst [vmem:[#allocation65_spill] sm:$0xff] %v12709_v31  ;;  %17491 = vst [vmem:[#allocation26_spill] sm:$0xff] %v12712_v16  ;;  %v12718_v50 = vadd.f32 %v1589_v34, %v17492_v45  ;;  %v17499_v45 = vld [vmem:[#allocation16_spill] sm:$0xff]  ;;  %v17514_v31 = vld [vmem:[#allocation22_spill] sm:$0xff] }
 0x21a   :  { %v1780_v17 = vpop.f32.mrf.mxu1  ;;  %9699 = vmatmul.mubr.msk.f32.gmra.mxu1 %vm83_vm2, %v17494_v43  ;;  %v1593_v35 = vpop.f32.mrf.mxu0  ;;  %8323 = vmatmul.mubr.msk.f32.gmra.mxu0 %vm83_vm2, %v17494_v43  ;;  %v12739_v43 = vld [vmem:[%s17130_s0 + $0xc0] sm:$0xff] }
 0x21b   :  { %17493 = vst [vmem:[#allocation66_spill] sm:$0xff] %v12718_v50  ;;  %v12725_v33 = vadd.f32 %v1780_v17, %v17495_v2  ;;  %v12728_v61 = vadd.f32 %v1593_v35, %v17497_v10  ;;  %9701 = vmatprep.mubr.msk.f32.mxu1 %vm10636_vm1, %v17340_v32  ;;  %2551 = vmatprep.mubr.f32.mxu0 %v17340_v32  ;;  %17501 = vst [vmem:[#allocation29_spill] sm:$0xff] %v12739_v43  ;;  %v17502_v35 = vld [vmem:[#allocation17_spill] sm:$0xff]  ;;  %v17504_v10 = vld [vmem:[#allocation60_spill] sm:$0xff] }
 0x21c   :  { %v9548_v40 = vpop.f32.mrf.mxu1  ;;  %v1595_v34 = vpop.f32.mrf.mxu0 }
 0x21d   :  { %17496 = vst [vmem:[#allocation27_spill] sm:$0xff] %v12725_v33  ;;  %17498 = vst [vmem:[#allocation28_spill] sm:$0xff] %v12728_v61  ;;  %v12734_v50 = vadd.f32 %v1595_v34, %v17499_v45 }
 0x21e   :  { %v1785_v16 = vpop.f32.mrf.mxu1  ;;  %9702 = vmatmul.mubr.msk.f32.gmra.mxu1 %vm83_vm2, %v12739_v43  ;;  %v1599_v17 = vpop.f32.mrf.mxu0  ;;  %8324 = vmatmul.mubr.msk.f32.gmra.mxu0 %vm83_vm2, %v12739_v43  ;;  %v12760_v43 = vld [vmem:[%s17130_s0 + $0xc8] sm:$0xff] }
 0x21f   :  { %17500 = vst [vmem:[#allocation67_spill] sm:$0xff] %v12734_v50  ;;  %v12746_v2 = vadd.f32 %v1785_v16, %v17502_v35  ;;  %v12749_v40 = vadd.f32 %v1599_v17, %v17504_v10  ;;  %9704 = vmatprep.mubr.msk.f32.mxu1 %vm10636_vm1, %v17340_v32  ;;  %2557 = vmatprep.mubr.f32.mxu0 %v17340_v32  ;;  %v17506_v50 = vld [vmem:[#allocation18_spill] sm:$0xff]  ;;  %17508 = vst [vmem:[#allocation31_spill] sm:$0xff] %v12760_v43  ;;  %v17509_v17 = vld [vmem:[#allocation19_spill] sm:$0xff] }
 0x220   :  { %v9551_v34 = vpop.f32.mrf.mxu1  ;;  %v1601_v45 = vpop.f32.mrf.mxu0  ;;  %v17510_v10 = vld [vmem:[#allocation61_spill] sm:$0xff] }
 0x221   :  { %17503 = vst [vmem:[#allocation68_spill] sm:$0xff] %v12746_v2  ;;  %17505 = vst [vmem:[#allocation30_spill] sm:$0xff] %v12749_v40  ;;  %v12755_v61 = vadd.f32 %v1601_v45, %v17506_v50 }
 0x222   :  { %v1790_v33 = vpop.f32.mrf.mxu1  ;;  %9705 = vmatmul.mubr.msk.f32.gmra.mxu1 %vm83_vm2, %v12760_v43  ;;  %v1605_v16 = vpop.f32.mrf.mxu0  ;;  %8325 = vmatmul.mubr.msk.f32.gmra.mxu0 %vm83_vm2, %v12760_v43 }
 0x223   :  { %17507 = vst [vmem:[#allocation69_spill] sm:$0xff] %v12755_v61  ;;  %v12767_v35 = vadd.f32 %v1790_v33, %v17509_v17  ;;  %v12770_v34 = vadd.f32 %v1605_v16, %v17510_v10  ;;  %9707 = vmatprep.mubr.msk.f32.mxu1 %vm10636_vm1, %v17340_v32  ;;  %2563 = vmatprep.mubr.f32.mxu0 %v17340_v32  ;;  %v17512_v61 = vld [vmem:[#allocation20_spill] sm:$0xff]  ;;  %v17515_v33 = vld [vmem:[#allocation62_spill] sm:$0xff]  ;;  %v17517_v17 = vld [vmem:[#allocation21_spill] sm:$0xff] }
 0x224   :  { %v9554_v50 = vpop.f32.mrf.mxu1  ;;  %v1607_v45 = vpop.f32.mrf.mxu0 }
 0x225   :  { %17511 = vst [vmem:[#allocation70_spill] sm:$0xff] %v12770_v34  ;;  %v12776_v40 = vadd.f32 %v1607_v45, %v17512_v61  ;;  %v12794_v61 = vld [vmem:[%s17130_s0 + $0xd8] sm:$0xff] }
 0x226   :  { %v1795_v2 = vpop.f32.mrf.mxu1  ;;  %9708 = vmatmul.mubr.msk.f32.gmra.mxu1 %vm83_vm2, %v17514_v31  ;;  %v1611_v43 = vpop.f32.mrf.mxu0  ;;  %8326 = vmatmul.mubr.msk.f32.gmra.mxu0 %vm83_vm2, %v17514_v31 }
 0x227   :  { %17513 = vst [vmem:[#allocation32_spill] sm:$0xff] %v12776_v40  ;;  %v12783_v16 = vadd.f32 %v1795_v2, %v17515_v33  ;;  %v12786_v10 = vadd.f32 %v1611_v43, %v17517_v17  ;;  %9710 = vmatprep.mubr.msk.f32.mxu1 %vm10636_vm1, %v17340_v32  ;;  %2569 = vmatprep.mubr.f32.mxu0 %v17340_v32  ;;  %v17519_v40 = vld [vmem:[#allocation63_spill] sm:$0xff] }
 0x228   :  { %v9557_v50 = vpop.f32.mrf.mxu1  ;;  %v1613_v45 = vpop.f32.mrf.mxu0  ;;  %v17521_v33 = vld [vmem:[#allocation23_spill] sm:$0xff] }
 0x229   :  { %17516 = vst [vmem:[#allocation71_spill] sm:$0xff] %v12783_v16  ;;  %17518 = vst [vmem:[#allocation33_spill] sm:$0xff] %v12786_v10  ;;  %v12797_v31 = vadd.f32 %v1613_v45, %v17519_v40  ;;  %v17522_v10 = vld [vmem:[#allocation64_spill] sm:$0xff] }
 0x22a   :  { %v1800_v2 = vpop.f32.mrf.mxu1  ;;  %9711 = vmatmul.mubr.msk.f32.gmra.mxu1 %vm83_vm2, %v12794_v61  ;;  %v1617_v43 = vpop.f32.mrf.mxu0  ;;  %8327 = vmatmul.mubr.msk.f32.gmra.mxu0 %vm83_vm2, %v12794_v61  ;;  %v8410_v45 = vld [vmem:[%s17129_s1 + $0x168] sm:$0xf] }
 0x22b   :  { %17520 = vst [vmem:[#allocation72_spill] sm:$0xff] %v12797_v31  ;;  %v12804_v17 = vadd.f32 %v1800_v2, %v17521_v33  ;;  %v12807_v16 = vadd.f32 %v1617_v43, %v17522_v10  ;;  %9717 = vmatprep.mubr.msk.f32.mxu1 %vm10636_vm1, %v17340_v32  ;;  %2908 = vmatprep.mubr.f32.mxu0 %v17340_v32  ;;  %v17524_v31 = vld [vmem:[#allocation24_spill] sm:$0xff]  ;;  %v8412_v2 = vld [vmem:[%s17129_s1 + $0x178] sm:$0xf]  ;;  %v10592_v43 = vld [vmem:[%s17130_s0 + $0x30] sm:$0xff] }
 0x22c   :  { %v9560_v40 = vpop.f32.mrf.mxu1  ;;  %v1619_v50 = vpop.f32.mrf.mxu0 }
 0x22d   :  { %17523 = vst [vmem:[#allocation34_spill] sm:$0xff] %v12807_v16  ;;  %v12816_v34 = vadd.f32 %v1619_v50, %v17524_v31  ;;  %v8408_v40 = vld [vmem:[%s17129_s1 + $0x158] sm:$0xff] }
 0x22e   :  { %v1805_v10 = vpop.f32.mrf.mxu1  ;;  %9718 = vmatmul.mubr.msk.f32.vlgmr.msra.gmra.mxu1 %vm83_vm2, %v10592_v43  ;;  %v1623_v33 = vpop.f32.mrf.mxu0  ;;  %8360 = vmatmul.mubr.msk.f32.vlgmr.msra.gmra.mxu0 %vm83_vm2, %v10592_v43 }
 0x22f   :  { %17525 = vst [vmem:[#allocation73_spill] sm:$0xff] %v12816_v34  ;;  %v12830_v31 = vadd.f32 %v1805_v10, %v12422_v23  ;;  %v12833_v50 = vadd.f32 %v1623_v33, %v12424_v24  ;;  %8414 = vmatpush1.msk.msra.mxu0 %vm153_vm0, %v8410_v45  ;;  %9720 = vmatprep.mubr.msk.f32.mxu1 %vm10636_vm1, %v17340_v32  ;;  %v8407_v23 = vld [vmem:[%s17129_s1 + $0x150] sm:$0xff]  ;;  %v8409_v24 = vld [vmem:[%s17129_s1 + $0x160] sm:$0xff]  ;;  %v12853_v45 = vld [vmem:[%s17130_s0 + $0x38] sm:$0xff] }
 0x230   :  { %v9563_v34 = vpop.f32.mrf.mxu1  ;;  %v1625_v16 = vpop.f32.mrf.mxu0  ;;  %2914 = vmatprep.mubr.f32.mxu0 %v17340_v32  ;;  %9787 = vmatpush3.msk.msra.mxu1 %vm153_vm0, %v8412_v2 }
 0x231   :  { %v12841_v43 = vadd.f32 %v1625_v16, %v12435_v28  ;;  %3345 = vmatprep.subr.mxu0 %v8408_v40  ;;  %9788 = vmatprep.subr.mxu1 %v17340_v32  ;;  %v8466_v16 = vld [vmem:[%s17129_s1 + $0x1a0] sm:$0xf] }
 0x232   :  { %v1810_v34 = vpop.f32.mrf.mxu1  ;;  %9721 = vmatmul.mubr.msk.f32.gmra.mxu1 %vm83_vm2, %v12853_v45  ;;  %v1629_v28 = vpop.f32.mrf.mxu0  ;;  %8361 = vmatmul.mubr.msk.f32.gmra.mxu0 %vm83_vm2, %v12853_v45 }
 0x233   :  { %17526 = vst [vmem:[#allocation35_spill] sm:$0xff] %v12841_v43  ;;  %v12863_v2 = vadd.f32 %v1810_v34, %v12453_v26  ;;  %v12866_v10 = vadd.f32 %v1629_v28, %v12455_v60  ;;  %9723 = vmatprep.mubr.msk.f32.mxu1 %vm10636_vm1, %v17340_v32  ;;  %2920 = vmatprep.mubr.f32.mxu0 %v17340_v32  ;;  %v12879_v60 = vld [vmem:[%s17130_s0 + $0x40] sm:$0xff] }
 0x234   :  { %v9566_v33 = vpop.f32.mrf.mxu1  ;;  %v1631_v40 = vpop.f32.mrf.mxu0  ;;  %3346 = vmatpush1.msra.mxu0 %v8407_v23  ;;  %9789 = vmatpush3.msra.mxu1 %v8409_v24 }
 0x235   :  { %v12872_v43 = vadd.f32 %v1631_v40, %v12460_v29  ;;  %8468 = vmatprep.subr.msk.mxu0 %vm153_vm0, %v8466_v16  ;;  %9859 = vmatprep.subr.mxu1 %v17340_v32  ;;  %v12900_v40 = vld [vmem:[%s17130_s0 + $0x48] sm:$0xff] }
 0x236   :  { %v2171_v26 = vpop.f32.mrf.mxu1  ;;  %9724 = vmatmul.mubr.msk.f32.gmra.mxu1 %vm83_vm2, %v12879_v60  ;;  %v1968_v34 = vpop.f32.mrf.mxu0  ;;  %8362 = vmatmul.mubr.msk.f32.gmra.mxu0 %vm83_vm2, %v12879_v60 }
 0x237   :  { %v12886_v29 = vadd.f32 %v2171_v26, %v12469_v54  ;;  %v12889_v23 = vadd.f32 %v1968_v34, %v12472_v47  ;;  %9726 = vmatprep.mubr.msk.f32.mxu1 %vm10636_vm1, %v17340_v32  ;;  %2926 = vmatprep.mubr.f32.mxu0 %v17340_v32 }
 0x238   :  { %v9573_v24 = vpop.f32.mrf.mxu1  ;;  %v1970_v28 = vpop.f32.mrf.mxu0 }
 0x239   :  { %v12895_v16 = vadd.f32 %v1970_v28, %v12478_v41 }
 0x23a   :  { %v2176_v33 = vpop.f32.mrf.mxu1  ;;  %9727 = vmatmul.mubr.msk.f32.gmra.mxu1 %vm83_vm2, %v12900_v40  ;;  %v1974_v54 = vpop.f32.mrf.mxu0  ;;  %8363 = vmatmul.mubr.msk.f32.gmra.mxu0 %vm83_vm2, %v12900_v40 }
 0x23b   :  { %17527 = vst [vmem:[#allocation74_spill] sm:$0xff] %v12895_v16  ;;  %v12907_v47 = vadd.f32 %v2176_v33, %v12485_v51  ;;  %v12910_v26 = vadd.f32 %v1974_v54, %v12488_v9  ;;  %9729 = vmatprep.mubr.msk.f32.mxu1 %vm10636_vm1, %v17340_v32  ;;  %2932 = vmatprep.mubr.f32.mxu0 %v17340_v32  ;;  %v12921_v16 = vld [vmem:[%s17130_s0 + $0x50] sm:$0xff] }
 0x23c   :  { %v9576_v41 = vpop.f32.mrf.mxu1  ;;  %v1976_v34 = vpop.f32.mrf.mxu0 }
 0x23d   :  { %v12916_v24 = vadd.f32 %v1976_v34, %v12494_v27 }
 0x23e   :  { %v2181_v28 = vpop.f32.mrf.mxu1  ;;  %9730 = vmatmul.mubr.msk.f32.gmra.mxu1 %vm83_vm2, %v12921_v16  ;;  %v1980_v51 = vpop.f32.mrf.mxu0  ;;  %8364 = vmatmul.mubr.msk.f32.gmra.mxu0 %vm83_vm2, %v12921_v16 }
 0x23f   :  { %17528 = vst [vmem:[#allocation39_spill] sm:$0xff] %v12916_v24  ;;  %v12928_v9 = vadd.f32 %v2181_v28, %v12501_v52  ;;  %v12931_v33 = vadd.f32 %v1980_v51, %v12504_v55  ;;  %9732 = vmatprep.mubr.msk.f32.mxu1 %vm10636_vm1, %v17340_v32  ;;  %2938 = vmatprep.mubr.f32.mxu0 %v17340_v32  ;;  %v12942_v24 = vld [vmem:[%s17130_s0 + $0x58] sm:$0xff] }
 0x240   :  { %v9579_v27 = vpop.f32.mrf.mxu1  ;;  %v1982_v54 = vpop.f32.mrf.mxu0 }
 0x241   :  { %v12937_v41 = vadd.f32 %v1982_v54, %v12510_v25 }
 0x242   :  { %v2186_v34 = vpop.f32.mrf.mxu1  ;;  %9733 = vmatmul.mubr.msk.f32.gmra.mxu1 %vm83_vm2, %v12942_v24  ;;  %v1986_v52 = vpop.f32.mrf.mxu0  ;;  %8365 = vmatmul.mubr.msk.f32.gmra.mxu0 %vm83_vm2, %v12942_v24 }
 0x243   :  { %17529 = vst [vmem:[#allocation36_spill] sm:$0xff] %v12937_v41  ;;  %v12949_v55 = vadd.f32 %v2186_v34, %v12517_v14  ;;  %v12952_v28 = vadd.f32 %v1986_v52, %v12520_v59  ;;  %9735 = vmatprep.mubr.msk.f32.mxu1 %vm10636_vm1, %v17340_v32  ;;  %2944 = vmatprep.mubr.f32.mxu0 %v17340_v32  ;;  %v12963_v41 = vld [vmem:[%s17130_s0 + $0x60] sm:$0xff] }
 0x244   :  { %v9582_v25 = vpop.f32.mrf.mxu1  ;;  %v1988_v51 = vpop.f32.mrf.mxu0 }
 0x245   :  { %v12958_v27 = vadd.f32 %v1988_v51, %v12526_v13 }
 0x246   :  { %v2191_v54 = vpop.f32.mrf.mxu1  ;;  %9736 = vmatmul.mubr.msk.f32.gmra.mxu1 %vm83_vm2, %v12963_v41  ;;  %v1992_v14 = vpop.f32.mrf.mxu0  ;;  %8366 = vmatmul.mubr.msk.f32.gmra.mxu0 %vm83_vm2, %v12963_v41 }
 0x247   :  { %17530 = vst [vmem:[#allocation75_spill] sm:$0xff] %v12958_v27  ;;  %v12970_v59 = vadd.f32 %v2191_v54, %v12533_v18  ;;  %v12973_v34 = vadd.f32 %v1992_v14, %v12536_v63  ;;  %9738 = vmatprep.mubr.msk.f32.mxu1 %vm10636_vm1, %v17340_v32  ;;  %2950 = vmatprep.mubr.f32.mxu0 %v17340_v32  ;;  %v12984_v27 = vld [vmem:[%s17130_s0 + $0x68] sm:$0xff] }
 0x248   :  { %v9585_v13 = vpop.f32.mrf.mxu1  ;;  %v1994_v52 = vpop.f32.mrf.mxu0 }
 0x249   :  { %v12979_v25 = vadd.f32 %v1994_v52, %v12542_v46 }
 0x24a   :  { %v2196_v51 = vpop.f32.mrf.mxu1  ;;  %9739 = vmatmul.mubr.msk.f32.gmra.mxu1 %vm83_vm2, %v12984_v27  ;;  %v1998_v18 = vpop.f32.mrf.mxu0  ;;  %8367 = vmatmul.mubr.msk.f32.gmra.mxu0 %vm83_vm2, %v12984_v27 }
 0x24b   :  { %17531 = vst [vmem:[#allocation37_spill] sm:$0xff] %v12979_v25  ;;  %v12991_v63 = vadd.f32 %v2196_v51, %v12549_v19  ;;  %v12994_v54 = vadd.f32 %v1998_v18, %v12552_v4  ;;  %9741 = vmatprep.mubr.msk.f32.mxu1 %vm10636_vm1, %v17340_v32  ;;  %2956 = vmatprep.mubr.f32.mxu0 %v17340_v32  ;;  %v13005_v25 = vld [vmem:[%s17130_s0 + $0x70] sm:$0xff] }
 0x24c   :  { %v9588_v46 = vpop.f32.mrf.mxu1  ;;  %v2000_v14 = vpop.f32.mrf.mxu0 }
 0x24d   :  { %v13000_v13 = vadd.f32 %v2000_v14, %v12558_v58 }
 0x24e   :  { %v2201_v52 = vpop.f32.mrf.mxu1  ;;  %9742 = vmatmul.mubr.msk.f32.gmra.mxu1 %vm83_vm2, %v13005_v25  ;;  %v2004_v19 = vpop.f32.mrf.mxu0  ;;  %8368 = vmatmul.mubr.msk.f32.gmra.mxu0 %vm83_vm2, %v13005_v25 }
 0x24f   :  { %17532 = vst [vmem:[#allocation76_spill] sm:$0xff] %v13000_v13  ;;  %v13012_v4 = vadd.f32 %v2201_v52, %v12565_v20  ;;  %v13015_v51 = vadd.f32 %v2004_v19, %v12568_v8  ;;  %9744 = vmatprep.mubr.msk.f32.mxu1 %vm10636_vm1, %v17340_v32  ;;  %2962 = vmatprep.mubr.f32.mxu0 %v17340_v32  ;;  %v13026_v13 = vld [vmem:[%s17130_s0 + $0x78] sm:$0xff] }
 0x250   :  { %v9591_v58 = vpop.f32.mrf.mxu1  ;;  %v2006_v18 = vpop.f32.mrf.mxu0 }
 0x251   :  { %v13021_v46 = vadd.f32 %v2006_v18, %v12574_v6 }
 0x252   :  { %v2206_v14 = vpop.f32.mrf.mxu1  ;;  %9745 = vmatmul.mubr.msk.f32.gmra.mxu1 %vm83_vm2, %v13026_v13  ;;  %v2010_v20 = vpop.f32.mrf.mxu0  ;;  %8369 = vmatmul.mubr.msk.f32.gmra.mxu0 %vm83_vm2, %v13026_v13 }
 0x253   :  { %17533 = vst [vmem:[#allocation38_spill] sm:$0xff] %v13021_v46  ;;  %v13033_v8 = vadd.f32 %v2206_v14, %v12581_v21  ;;  %v13036_v52 = vadd.f32 %v2010_v20, %v12584_v12  ;;  %9747 = vmatprep.mubr.msk.f32.mxu1 %vm10636_vm1, %v17340_v32  ;;  %2968 = vmatprep.mubr.f32.mxu0 %v17340_v32  ;;  %v13047_v46 = vld [vmem:[%s17130_s0 + $0x80] sm:$0xff] }
 0x254   :  { %v9594_v6 = vpop.f32.mrf.mxu1  ;;  %v2012_v19 = vpop.f32.mrf.mxu0 }
 0x255   :  { %v13042_v58 = vadd.f32 %v2012_v19, %v12590_v53 }
 0x256   :  { %v2211_v18 = vpop.f32.mrf.mxu1  ;;  %9748 = vmatmul.mubr.msk.f32.gmra.mxu1 %vm83_vm2, %v13047_v46  ;;  %v2016_v21 = vpop.f32.mrf.mxu0  ;;  %8370 = vmatmul.mubr.msk.f32.gmra.mxu0 %vm83_vm2, %v13047_v46 }
 0x257   :  { %17534 = vst [vmem:[#allocation77_spill] sm:$0xff] %v13042_v58  ;;  %v13054_v12 = vadd.f32 %v2211_v18, %v12597_v22  ;;  %v13057_v14 = vadd.f32 %v2016_v21, %v12600_v37  ;;  %9750 = vmatprep.mubr.msk.f32.mxu1 %vm10636_vm1, %v17340_v32  ;;  %2974 = vmatprep.mubr.f32.mxu0 %v17340_v32  ;;  %v13068_v58 = vld [vmem:[%s17130_s0 + $0x88] sm:$0xff] }
 0x258   :  { %v9597_v53 = vpop.f32.mrf.mxu1  ;;  %v2018_v20 = vpop.f32.mrf.mxu0 }
 0x259   :  { %v13063_v6 = vadd.f32 %v2018_v20, %v12606_v56 }
 0x25a   :  { %v2216_v19 = vpop.f32.mrf.mxu1  ;;  %9751 = vmatmul.mubr.msk.f32.gmra.mxu1 %vm83_vm2, %v13068_v58  ;;  %v2022_v22 = vpop.f32.mrf.mxu0  ;;  %8371 = vmatmul.mubr.msk.f32.gmra.mxu0 %vm83_vm2, %v13068_v58 }
 0x25b   :  { %17535 = vst [vmem:[#allocation78_spill] sm:$0xff] %v13063_v6  ;;  %v13075_v37 = vadd.f32 %v2216_v19, %v12613_v11  ;;  %v13078_v18 = vadd.f32 %v2022_v22, %v12616_v44  ;;  %9753 = vmatprep.mubr.msk.f32.mxu1 %vm10636_vm1, %v17340_v32  ;;  %2980 = vmatprep.mubr.f32.mxu0 %v17340_v32  ;;  %v13089_v6 = vld [vmem:[%s17130_s0 + $0x90] sm:$0xff] }
 0x25c   :  { %v9600_v56 = vpop.f32.mrf.mxu1  ;;  %v2024_v21 = vpop.f32.mrf.mxu0 }
 0x25d   :  { %v13084_v53 = vadd.f32 %v2024_v21, %v12622_v48 }
 0x25e   :  { %v2221_v20 = vpop.f32.mrf.mxu1  ;;  %9754 = vmatmul.mubr.msk.f32.gmra.mxu1 %vm83_vm2, %v13089_v6  ;;  %v2028_v11 = vpop.f32.mrf.mxu0  ;;  %8372 = vmatmul.mubr.msk.f32.gmra.mxu0 %vm83_vm2, %v13089_v6 }
 0x25f   :  { %17536 = vst [vmem:[#allocation40_spill] sm:$0xff] %v13084_v53  ;;  %v13096_v44 = vadd.f32 %v2221_v20, %v12629_v7  ;;  %v13099_v19 = vadd.f32 %v2028_v11, %v12632_v1  ;;  %9756 = vmatprep.mubr.msk.f32.mxu1 %vm10636_vm1, %v17340_v32  ;;  %2986 = vmatprep.mubr.f32.mxu0 %v17340_v32  ;;  %v13110_v53 = vld [vmem:[%s17130_s0 + $0x98] sm:$0xff] }
 0x260   :  { %v9603_v48 = vpop.f32.mrf.mxu1  ;;  %v2030_v22 = vpop.f32.mrf.mxu0 }
 0x261   :  { %v13105_v56 = vadd.f32 %v2030_v22, %v12638_v0 }
 0x262   :  { %v2226_v21 = vpop.f32.mrf.mxu1  ;;  %9757 = vmatmul.mubr.msk.f32.gmra.mxu1 %vm83_vm2, %v13110_v53  ;;  %v2034_v7 = vpop.f32.mrf.mxu0  ;;  %8373 = vmatmul.mubr.msk.f32.gmra.mxu0 %vm83_vm2, %v13110_v53 }
 0x263   :  { %17537 = vst [vmem:[#allocation79_spill] sm:$0xff] %v13105_v56  ;;  %v13117_v1 = vadd.f32 %v2226_v21, %v12645_v42  ;;  %v13120_v20 = vadd.f32 %v2034_v7, %v12648_v5  ;;  %9759 = vmatprep.mubr.msk.f32.mxu1 %vm10636_vm1, %v17340_v32  ;;  %2992 = vmatprep.mubr.f32.mxu0 %v17340_v32  ;;  %v13131_v56 = vld [vmem:[%s17130_s0 + $0xa0] sm:$0xff] }
 0x264   :  { %v9606_v0 = vpop.f32.mrf.mxu1  ;;  %v2036_v11 = vpop.f32.mrf.mxu0 }
 0x265   :  { %v13126_v48 = vadd.f32 %v2036_v11, %v12654_v57 }
 0x266   :  { %v2231_v22 = vpop.f32.mrf.mxu1  ;;  %9760 = vmatmul.mubr.msk.f32.gmra.mxu1 %vm83_vm2, %v13131_v56  ;;  %v2040_v42 = vpop.f32.mrf.mxu0  ;;  %8374 = vmatmul.mubr.msk.f32.gmra.mxu0 %vm83_vm2, %v13131_v56 }
 0x267   :  { %17538 = vst [vmem:[#allocation41_spill] sm:$0xff] %v13126_v48  ;;  %v13138_v5 = vadd.f32 %v2231_v22, %v12661_v36  ;;  %v13141_v21 = vadd.f32 %v2040_v42, %v12664_v15  ;;  %9762 = vmatprep.mubr.msk.f32.mxu1 %vm10636_vm1, %v17340_v32  ;;  %2998 = vmatprep.mubr.f32.mxu0 %v17340_v32  ;;  %v13152_v48 = vld [vmem:[%s17130_s0 + $0xa8] sm:$0xff] }
 0x268   :  { %v9609_v57 = vpop.f32.mrf.mxu1  ;;  %v2042_v7 = vpop.f32.mrf.mxu0 }
 0x269   :  { %v13147_v0 = vadd.f32 %v2042_v7, %v12670_v30 }
 0x26a   :  { %v2236_v11 = vpop.f32.mrf.mxu1  ;;  %9763 = vmatmul.mubr.msk.f32.gmra.mxu1 %vm83_vm2, %v13152_v48  ;;  %v2046_v36 = vpop.f32.mrf.mxu0  ;;  %8375 = vmatmul.mubr.msk.f32.gmra.mxu0 %vm83_vm2, %v13152_v48 }
 0x26b   :  { %17539 = vst [vmem:[#allocation80_spill] sm:$0xff] %v13147_v0  ;;  %v13159_v15 = vadd.f32 %v2236_v11, %v12677_v62  ;;  %v13162_v22 = vadd.f32 %v2046_v36, %v12680_v3  ;;  %9765 = vmatprep.mubr.msk.f32.mxu1 %vm10636_vm1, %v17340_v32  ;;  %3004 = vmatprep.mubr.f32.mxu0 %v17340_v32  ;;  %v13173_v0 = vld [vmem:[%s17130_s0 + $0xb0] sm:$0xff] }
 0x26c   :  { %v9612_v30 = vpop.f32.mrf.mxu1  ;;  %v2048_v42 = vpop.f32.mrf.mxu0 }
 0x26d   :  { %17540 = vst [vmem:[#allocation42_spill] sm:$0xff] %v13159_v15  ;;  %17541 = vst [vmem:[#allocation81_spill] sm:$0xff] %v13162_v22  ;;  %v13168_v57 = vadd.f32 %v2048_v42, %v12686_v49  ;;  %v17545_v30 = vld [vmem:[#allocation25_spill] sm:$0xff]  ;;  %v13194_v22 = vld [vmem:[%s17130_s0 + $0xb8] sm:$0xff] }
 0x26e   :  { %v2241_v7 = vpop.f32.mrf.mxu1  ;;  %9766 = vmatmul.mubr.msk.f32.gmra.mxu1 %vm83_vm2, %v13173_v0  ;;  %v2052_v62 = vpop.f32.mrf.mxu0  ;;  %8376 = vmatmul.mubr.msk.f32.gmra.mxu0 %vm83_vm2, %v13173_v0  ;;  %17547 = vst [vmem:[#allocation45_spill] sm:$0xff] %v13194_v22  ;;  %v17554_v15 = vld [vmem:[#allocation29_spill] sm:$0xff] }
 0x26f   :  { %17542 = vst [vmem:[#allocation43_spill] sm:$0xff] %v13168_v57  ;;  %v13180_v3 = vadd.f32 %v2241_v7, %v12693_v38  ;;  %v13183_v11 = vadd.f32 %v2052_v62, %v12696_v39  ;;  %9768 = vmatprep.mubr.msk.f32.mxu1 %vm10636_vm1, %v17340_v32  ;;  %3010 = vmatprep.mubr.f32.mxu0 %v17340_v32  ;;  %v17548_v39 = vld [vmem:[#allocation65_spill] sm:$0xff]  ;;  %v17550_v62 = vld [vmem:[#allocation26_spill] sm:$0xff] }
 0x270   :  { %v9615_v49 = vpop.f32.mrf.mxu1  ;;  %v2054_v36 = vpop.f32.mrf.mxu0 }
 0x271   :  { %17543 = vst [vmem:[#allocation82_spill] sm:$0xff] %v13180_v3  ;;  %17544 = vst [vmem:[#allocation44_spill] sm:$0xff] %v13183_v11  ;;  %v13189_v42 = vadd.f32 %v2054_v36, %v17545_v30 }
 0x272   :  { %v2246_v57 = vpop.f32.mrf.mxu1  ;;  %9769 = vmatmul.mubr.msk.f32.gmra.mxu1 %vm83_vm2, %v13194_v22  ;;  %v2058_v38 = vpop.f32.mrf.mxu0  ;;  %8377 = vmatmul.mubr.msk.f32.gmra.mxu0 %vm83_vm2, %v13194_v22 }
 0x273   :  { %17546 = vst [vmem:[#allocation83_spill] sm:$0xff] %v13189_v42  ;;  %v13201_v7 = vadd.f32 %v2246_v57, %v17548_v39  ;;  %v13204_v49 = vadd.f32 %v2058_v38, %v17550_v62  ;;  %9771 = vmatprep.mubr.msk.f32.mxu1 %vm10636_vm1, %v17340_v32  ;;  %3016 = vmatprep.mubr.f32.mxu0 %v17340_v32  ;;  %v17552_v42 = vld [vmem:[#allocation66_spill] sm:$0xff]  ;;  %v17555_v57 = vld [vmem:[#allocation27_spill] sm:$0xff]  ;;  %v17556_v39 = vld [vmem:[#allocation28_spill] sm:$0xff] }
 0x274   :  { %v9618_v36 = vpop.f32.mrf.mxu1  ;;  %v2060_v30 = vpop.f32.mrf.mxu0 }
 0x275   :  { %17549 = vst [vmem:[#allocation84_spill] sm:$0xff] %v13201_v7  ;;  %17551 = vst [vmem:[#allocation87_spill] sm:$0xff] %v13204_v49  ;;  %v13210_v11 = vadd.f32 %v2060_v30, %v17552_v42  ;;  %v17558_v30 = vld [vmem:[#allocation67_spill] sm:$0xff] }
 0x276   :  { %v2251_v3 = vpop.f32.mrf.mxu1  ;;  %9772 = vmatmul.mubr.msk.f32.gmra.mxu1 %vm83_vm2, %v17554_v15  ;;  %v2064_v22 = vpop.f32.mrf.mxu0  ;;  %8378 = vmatmul.mubr.msk.f32.gmra.mxu0 %vm83_vm2, %v17554_v15  ;;  %v17560_v7 = vld [vmem:[#allocation31_spill] sm:$0xff] }
 0x277   :  { %17553 = vst [vmem:[#allocation46_spill] sm:$0xff] %v13210_v11  ;;  %v13217_v38 = vadd.f32 %v2251_v3, %v17555_v57  ;;  %v13220_v62 = vadd.f32 %v2064_v22, %v17556_v39  ;;  %9774 = vmatprep.mubr.msk.f32.mxu1 %vm10636_vm1, %v17340_v32  ;;  %3022 = vmatprep.mubr.f32.mxu0 %v17340_v32  ;;  %v17561_v22 = vld [vmem:[#allocation68_spill] sm:$0xff]  ;;  %v17563_v57 = vld [vmem:[#allocation30_spill] sm:$0xff] }
 0x278   :  { %v9621_v42 = vpop.f32.mrf.mxu1  ;;  %v2066_v36 = vpop.f32.mrf.mxu0 }
 0x279   :  { %17557 = vst [vmem:[#allocation85_spill] sm:$0xff] %v13220_v62  ;;  %v13226_v11 = vadd.f32 %v2066_v36, %v17558_v30  ;;  %v17565_v30 = vld [vmem:[#allocation69_spill] sm:$0xff] }
 0x27a   :  { %v2256_v49 = vpop.f32.mrf.mxu1  ;;  %9775 = vmatmul.mubr.msk.f32.gmra.mxu1 %vm83_vm2, %v17560_v7  ;;  %v2070_v15 = vpop.f32.mrf.mxu0  ;;  %8379 = vmatmul.mubr.msk.f32.gmra.mxu0 %vm83_vm2, %v17560_v7  ;;  %v13247_v7 = vld [vmem:[%s17130_s0 + $0xd0] sm:$0xff] }
 0x27b   :  { %17559 = vst [vmem:[#allocation47_spill] sm:$0xff] %v13226_v11  ;;  %v13233_v3 = vadd.f32 %v2256_v49, %v17561_v22  ;;  %v13236_v39 = vadd.f32 %v2070_v15, %v17563_v57  ;;  %9777 = vmatprep.mubr.msk.f32.mxu1 %vm10636_vm1, %v17340_v32  ;;  %3028 = vmatprep.mubr.f32.mxu0 %v17340_v32  ;;  %v17567_v22 = vld [vmem:[#allocation70_spill] sm:$0xff] }
 0x27c   :  { %v9624_v42 = vpop.f32.mrf.mxu1  ;;  %v2072_v36 = vpop.f32.mrf.mxu0 }
 0x27d   :  { %17562 = vst [vmem:[#allocation86_spill] sm:$0xff] %v13233_v3  ;;  %17564 = vst [vmem:[#allocation48_spill] sm:$0xff] %v13236_v39  ;;  %v13242_v11 = vadd.f32 %v2072_v36, %v17565_v30  ;;  %v17568_v30 = vld [vmem:[#allocation32_spill] sm:$0xff] }
 0x27e   :  { %v2261_v62 = vpop.f32.mrf.mxu1  ;;  %9778 = vmatmul.mubr.msk.f32.gmra.mxu1 %vm83_vm2, %v13247_v7  ;;  %v2076_v49 = vpop.f32.mrf.mxu0  ;;  %8380 = vmatmul.mubr.msk.f32.gmra.mxu0 %vm83_vm2, %v13247_v7 }
 0x27f   :  { %17566 = vst [vmem:[#allocation88_spill] sm:$0xff] %v13242_v11  ;;  %v13254_v15 = vadd.f32 %v2261_v62, %v12767_v35  ;;  %v13257_v57 = vadd.f32 %v2076_v49, %v17567_v22  ;;  %9780 = vmatprep.mubr.msk.f32.mxu1 %vm10636_vm1, %v17340_v32  ;;  %3034 = vmatprep.mubr.f32.mxu0 %v17340_v32  ;;  %v17570_v35 = vld [vmem:[#allocation71_spill] sm:$0xff]  ;;  %v17572_v49 = vld [vmem:[#allocation33_spill] sm:$0xff] }
 0x280   :  { %v9627_v42 = vpop.f32.mrf.mxu1  ;;  %v2078_v36 = vpop.f32.mrf.mxu0 }
 0x281   :  { %v13263_v11 = vadd.f32 %v2078_v36, %v17568_v30  ;;  %v13281_v42 = vld [vmem:[%s17130_s0 + $0xe0] sm:$0xff] }
 0x282   :  { %v2266_v39 = vpop.f32.mrf.mxu1  ;;  %9781 = vmatmul.mubr.msk.f32.gmra.mxu1 %vm83_vm2, %v12794_v61  ;;  %v2082_v3 = vpop.f32.mrf.mxu0  ;;  %8381 = vmatmul.mubr.msk.f32.gmra.mxu0 %vm83_vm2, %v12794_v61 }
 0x283   :  { %17569 = vst [vmem:[#allocation49_spill] sm:$0xff] %v13263_v11  ;;  %v13270_v62 = vadd.f32 %v2266_v39, %v17570_v35  ;;  %v13273_v22 = vadd.f32 %v2082_v3, %v17572_v49  ;;  %9783 = vmatprep.mubr.msk.f32.mxu1 %vm10636_vm1, %v17340_v32  ;;  %3040 = vmatprep.mubr.f32.mxu0 %v17340_v32  ;;  %v17574_v11 = vld [vmem:[#allocation72_spill] sm:$0xff]  ;;  %v17576_v49 = vld [vmem:[#allocation34_spill] sm:$0xff] }
 0x284   :  { %v9630_v36 = vpop.f32.mrf.mxu1  ;;  %v2084_v30 = vpop.f32.mrf.mxu0 }
 0x285   :  { %17571 = vst [vmem:[#allocation89_spill] sm:$0xff] %v13270_v62  ;;  %17573 = vst [vmem:[#allocation50_spill] sm:$0xff] %v13273_v22  ;;  %v13284_v61 = vadd.f32 %v2084_v30, %v17574_v11  ;;  %v8465_v30 = vld [vmem:[%s17129_s1 + $0x198] sm:$0xf] }
 0x286   :  { %v2271_v39 = vpop.f32.mrf.mxu1  ;;  %9784 = vmatmul.mubr.msk.f32.gmra.mxu1 %vm83_vm2, %v13281_v42  ;;  %v2088_v3 = vpop.f32.mrf.mxu0  ;;  %8382 = vmatmul.mubr.msk.f32.gmra.mxu0 %vm83_vm2, %v13281_v42 }
 0x287   :  { %17575 = vst [vmem:[#allocation3_spill] sm:$0xff] %v13284_v61  ;;  %v13291_v35 = vadd.f32 %v2271_v39, %v12804_v17  ;;  %v13294_v22 = vadd.f32 %v2088_v3, %v17576_v49  ;;  %9790 = vmatprep.mubr.msk.f32.mxu1 %vm10636_vm1, %v17340_v32  ;;  %3379 = vmatprep.mubr.f32.mxu0 %v17340_v32  ;;  %v17578_v61 = vld [vmem:[#allocation73_spill] sm:$0xff]  ;;  %v8467_v17 = vld [vmem:[%s17129_s1 + $0x1a8] sm:$0xf] }
 0x288   :  { %v9633_v11 = vpop.f32.mrf.mxu1  ;;  %v2090_v36 = vpop.f32.mrf.mxu0  ;;  %v8463_v49 = vld [vmem:[%s17129_s1 + $0x188] sm:$0xff] }
 0x289   :  { %17577 = vst [vmem:[#allocation4_spill] sm:$0xff] %v13294_v22  ;;  %v13303_v62 = vadd.f32 %v2090_v36, %v17578_v61 }
 0x28a   :  { %v2276_v39 = vpop.f32.mrf.mxu1  ;;  %9791 = vmatmul.mubr.msk.f32.vlgmr.msra.gmra.mxu1 %vm83_vm2, %v12853_v45  ;;  %v2094_v3 = vpop.f32.mrf.mxu0  ;;  %8415 = vmatmul.mubr.msk.f32.vlgmr.msra.gmra.mxu0 %vm83_vm2, %v12853_v45  ;;  %v17580_v45 = vld [vmem:[#allocation35_spill] sm:$0xff] }
 0x28b   :  { %17579 = vst [vmem:[#allocation51_spill] sm:$0xff] %v13303_v62  ;;  %v13316_v11 = vadd.f32 %v2276_v39, %v12830_v31  ;;  %v13319_v61 = vadd.f32 %v2094_v3, %v12833_v50  ;;  %8469 = vmatpush1.msk.msra.mxu0 %vm153_vm0, %v8465_v30  ;;  %9793 = vmatprep.mubr.msk.f32.mxu1 %vm10636_vm1, %v17340_v32  ;;  %v8462_v31 = vld [vmem:[%s17129_s1 + $0x180] sm:$0xff]  ;;  %v8464_v50 = vld [vmem:[%s17129_s1 + $0x190] sm:$0xff] }
 0x28c   :  { %v9636_v36 = vpop.f32.mrf.mxu1  ;;  %v2096_v62 = vpop.f32.mrf.mxu0  ;;  %3385 = vmatprep.mubr.f32.mxu0 %v17340_v32  ;;  %9860 = vmatpush3.msk.msra.mxu1 %vm153_vm0, %v8467_v17 }
 0x28d   :  { %v13327_v22 = vadd.f32 %v2096_v62, %v17580_v45  ;;  %3816 = vmatprep.subr.mxu0 %v8463_v49  ;;  %9861 = vmatprep.subr.mxu1 %v17340_v32  ;;  %v8521_v62 = vld [vmem:[%s17129_s1 + $0x1d0] sm:$0xf] }
 0x28e   :  { %v2281_v30 = vpop.f32.mrf.mxu1  ;;  %9794 = vmatmul.mubr.msk.f32.gmra.mxu1 %vm83_vm2, %v12879_v60  ;;  %v2100_v39 = vpop.f32.mrf.mxu0  ;;  %8416 = vmatmul.mubr.msk.f32.gmra.mxu0 %vm83_vm2, %v12879_v60 }
 0x28f   :  { %v13344_v17 = vadd.f32 %v2281_v30, %v12863_v2  ;;  %v13347_v3 = vadd.f32 %v2100_v39, %v12866_v10  ;;  %9796 = vmatprep.mubr.msk.f32.mxu1 %vm10636_vm1, %v17340_v32  ;;  %3391 = vmatprep.mubr.f32.mxu0 %v17340_v32  ;;  %v17581_v39 = vld [vmem:[#allocation74_spill] sm:$0xff] }
 0x290   :  { %v9639_v49 = vpop.f32.mrf.mxu1  ;;  %v2102_v36 = vpop.f32.mrf.mxu0  ;;  %3817 = vmatpush1.msra.mxu0 %v8462_v31  ;;  %9862 = vmatpush3.msra.mxu1 %v8464_v50 }
 0x291   :  { %v13353_v45 = vadd.f32 %v2102_v36, %v12872_v43  ;;  %8523 = vmatprep.subr.msk.mxu0 %vm153_vm0, %v8521_v62  ;;  %9932 = vmatprep.subr.mxu1 %v17340_v32 }
 0x292   :  { %v2642_v2 = vpop.f32.mrf.mxu1  ;;  %9797 = vmatmul.mubr.msk.f32.gmra.mxu1 %vm83_vm2, %v12900_v40  ;;  %v2439_v10 = vpop.f32.mrf.mxu0  ;;  %8417 = vmatmul.mubr.msk.f32.gmra.mxu0 %vm83_vm2, %v12900_v40 }
 0x293   :  { %v13362_v30 = vadd.f32 %v2642_v2, %v12886_v29  ;;  %v13365_v31 = vadd.f32 %v2439_v10, %v12889_v23  ;;  %9799 = vmatprep.mubr.msk.f32.mxu1 %vm10636_vm1, %v17340_v32  ;;  %3397 = vmatprep.mubr.f32.mxu0 %v17340_v32 }
 0x294   :  { %v9646_v43 = vpop.f32.mrf.mxu1  ;;  %v2441_v50 = vpop.f32.mrf.mxu0 }
 0x295   :  { %v13371_v62 = vadd.f32 %v2441_v50, %v17581_v39  ;;  %v17582_v43 = vld [vmem:[#allocation39_spill] sm:$0xff] }
 0x296   :  { %v2647_v49 = vpop.f32.mrf.mxu1  ;;  %9800 = vmatmul.mubr.msk.f32.gmra.mxu1 %vm83_vm2, %v12921_v16  ;;  %v2445_v36 = vpop.f32.mrf.mxu0  ;;  %8418 = vmatmul.mubr.msk.f32.gmra.mxu0 %vm83_vm2, %v12921_v16 }
 0x297   :  { %v13378_v29 = vadd.f32 %v2647_v49, %v12907_v47  ;;  %v13381_v23 = vadd.f32 %v2445_v36, %v12910_v26  ;;  %9802 = vmatprep.mubr.msk.f32.mxu1 %vm10636_vm1, %v17340_v32  ;;  %3403 = vmatprep.mubr.f32.mxu0 %v17340_v32 }
 0x298   :  { %v9649_v2 = vpop.f32.mrf.mxu1  ;;  %v2447_v10 = vpop.f32.mrf.mxu0 }
 0x299   :  { %v13387_v50 = vadd.f32 %v2447_v10, %v17582_v43  ;;  %v17583_v2 = vld [vmem:[#allocation36_spill] sm:$0xff] }
 0x29a   :  { %v2652_v39 = vpop.f32.mrf.mxu1  ;;  %9803 = vmatmul.mubr.msk.f32.gmra.mxu1 %vm83_vm2, %v12942_v24  ;;  %v2451_v16 = vpop.f32.mrf.mxu0  ;;  %8419 = vmatmul.mubr.msk.f32.gmra.mxu0 %vm83_vm2, %v12942_v24 }
 0x29b   :  { %v13394_v47 = vadd.f32 %v2652_v39, %v12928_v9  ;;  %v13397_v26 = vadd.f32 %v2451_v16, %v12931_v33  ;;  %9805 = vmatprep.mubr.msk.f32.mxu1 %vm10636_vm1, %v17340_v32  ;;  %3409 = vmatprep.mubr.f32.mxu0 %v17340_v32 }
 0x29c   :  { %v9652_v49 = vpop.f32.mrf.mxu1  ;;  %v2453_v36 = vpop.f32.mrf.mxu0 }
 0x29d   :  { %v13403_v10 = vadd.f32 %v2453_v36, %v17583_v2  ;;  %v17584_v49 = vld [vmem:[#allocation75_spill] sm:$0xff] }
 0x29e   :  { %v2657_v43 = vpop.f32.mrf.mxu1  ;;  %9806 = vmatmul.mubr.msk.f32.gmra.mxu1 %vm83_vm2, %v12963_v41  ;;  %v2457_v24 = vpop.f32.mrf.mxu0  ;;  %8420 = vmatmul.mubr.msk.f32.gmra.mxu0 %vm83_vm2, %v12963_v41 }
 0x29f   :  { %v13410_v9 = vadd.f32 %v2657_v43, %v12949_v55  ;;  %v13413_v33 = vadd.f32 %v2457_v24, %v12952_v28  ;;  %9808 = vmatprep.mubr.msk.f32.mxu1 %vm10636_vm1, %v17340_v32  ;;  %3415 = vmatprep.mubr.f32.mxu0 %v17340_v32 }
 0x2a0   :  { %v9655_v39 = vpop.f32.mrf.mxu1  ;;  %v2459_v16 = vpop.f32.mrf.mxu0 }
 0x2a1   :  { %v13419_v36 = vadd.f32 %v2459_v16, %v17584_v49  ;;  %v17585_v39 = vld [vmem:[#allocation37_spill] sm:$0xff] }
 0x2a2   :  { %v2662_v2 = vpop.f32.mrf.mxu1  ;;  %9809 = vmatmul.mubr.msk.f32.gmra.mxu1 %vm83_vm2, %v12984_v27  ;;  %v2463_v41 = vpop.f32.mrf.mxu0  ;;  %8421 = vmatmul.mubr.msk.f32.gmra.mxu0 %vm83_vm2, %v12984_v27 }
 0x2a3   :  { %v13426_v55 = vadd.f32 %v2662_v2, %v12970_v59  ;;  %v13429_v28 = vadd.f32 %v2463_v41, %v12973_v34  ;;  %9811 = vmatprep.mubr.msk.f32.mxu1 %vm10636_vm1, %v17340_v32  ;;  %3421 = vmatprep.mubr.f32.mxu0 %v17340_v32 }
 0x2a4   :  { %v9658_v43 = vpop.f32.mrf.mxu1  ;;  %v2465_v24 = vpop.f32.mrf.mxu0 }
 0x2a5   :  { %v13435_v16 = vadd.f32 %v2465_v24, %v17585_v39  ;;  %v17586_v43 = vld [vmem:[#allocation76_spill] sm:$0xff] }
 0x2a6   :  { %v2667_v49 = vpop.f32.mrf.mxu1  ;;  %9812 = vmatmul.mubr.msk.f32.gmra.mxu1 %vm83_vm2, %v13005_v25  ;;  %v2469_v27 = vpop.f32.mrf.mxu0  ;;  %8422 = vmatmul.mubr.msk.f32.gmra.mxu0 %vm83_vm2, %v13005_v25 }
 0x2a7   :  { %v13442_v59 = vadd.f32 %v2667_v49, %v12991_v63  ;;  %v13445_v34 = vadd.f32 %v2469_v27, %v12994_v54  ;;  %9814 = vmatprep.mubr.msk.f32.mxu1 %vm10636_vm1, %v17340_v32  ;;  %3427 = vmatprep.mubr.f32.mxu0 %v17340_v32 }
 0x2a8   :  { %v9661_v2 = vpop.f32.mrf.mxu1  ;;  %v2471_v41 = vpop.f32.mrf.mxu0 }
 0x2a9   :  { %v13451_v24 = vadd.f32 %v2471_v41, %v17586_v43  ;;  %v17587_v2 = vld [vmem:[#allocation38_spill] sm:$0xff] }
 0x2aa   :  { %v2672_v39 = vpop.f32.mrf.mxu1  ;;  %9815 = vmatmul.mubr.msk.f32.gmra.mxu1 %vm83_vm2, %v13026_v13  ;;  %v2475_v25 = vpop.f32.mrf.mxu0  ;;  %8423 = vmatmul.mubr.msk.f32.gmra.mxu0 %vm83_vm2, %v13026_v13 }
 0x2ab   :  { %v13458_v63 = vadd.f32 %v2672_v39, %v13012_v4  ;;  %v13461_v54 = vadd.f32 %v2475_v25, %v13015_v51  ;;  %9817 = vmatprep.mubr.msk.f32.mxu1 %vm10636_vm1, %v17340_v32  ;;  %3433 = vmatprep.mubr.f32.mxu0 %v17340_v32 }
 0x2ac   :  { %v9664_v49 = vpop.f32.mrf.mxu1  ;;  %v2477_v27 = vpop.f32.mrf.mxu0 }
 0x2ad   :  { %v13467_v41 = vadd.f32 %v2477_v27, %v17587_v2  ;;  %v17588_v49 = vld [vmem:[#allocation77_spill] sm:$0xff] }
 0x2ae   :  { %v2677_v43 = vpop.f32.mrf.mxu1  ;;  %9818 = vmatmul.mubr.msk.f32.gmra.mxu1 %vm83_vm2, %v13047_v46  ;;  %v2481_v13 = vpop.f32.mrf.mxu0  ;;  %8424 = vmatmul.mubr.msk.f32.gmra.mxu0 %vm83_vm2, %v13047_v46 }
 0x2af   :  { %v13474_v4 = vadd.f32 %v2677_v43, %v13033_v8  ;;  %v13477_v51 = vadd.f32 %v2481_v13, %v13036_v52  ;;  %9820 = vmatprep.mubr.msk.f32.mxu1 %vm10636_vm1, %v17340_v32  ;;  %3439 = vmatprep.mubr.f32.mxu0 %v17340_v32 }
 0x2b0   :  { %v9667_v39 = vpop.f32.mrf.mxu1  ;;  %v2483_v25 = vpop.f32.mrf.mxu0 }
 0x2b1   :  { %v13483_v27 = vadd.f32 %v2483_v25, %v17588_v49  ;;  %v17589_v39 = vld [vmem:[#allocation78_spill] sm:$0xff] }
 0x2b2   :  { %v2682_v2 = vpop.f32.mrf.mxu1  ;;  %9821 = vmatmul.mubr.msk.f32.gmra.mxu1 %vm83_vm2, %v13068_v58  ;;  %v2487_v46 = vpop.f32.mrf.mxu0  ;;  %8425 = vmatmul.mubr.msk.f32.gmra.mxu0 %vm83_vm2, %v13068_v58 }
 0x2b3   :  { %v13490_v8 = vadd.f32 %v2682_v2, %v13054_v12  ;;  %v13493_v52 = vadd.f32 %v2487_v46, %v13057_v14  ;;  %9823 = vmatprep.mubr.msk.f32.mxu1 %vm10636_vm1, %v17340_v32  ;;  %3445 = vmatprep.mubr.f32.mxu0 %v17340_v32 }
 0x2b4   :  { %v9670_v43 = vpop.f32.mrf.mxu1  ;;  %v2489_v13 = vpop.f32.mrf.mxu0 }
 0x2b5   :  { %v13499_v25 = vadd.f32 %v2489_v13, %v17589_v39  ;;  %v17590_v43 = vld [vmem:[#allocation40_spill] sm:$0xff] }
 0x2b6   :  { %v2687_v49 = vpop.f32.mrf.mxu1  ;;  %9824 = vmatmul.mubr.msk.f32.gmra.mxu1 %vm83_vm2, %v13089_v6  ;;  %v2493_v58 = vpop.f32.mrf.mxu0  ;;  %8426 = vmatmul.mubr.msk.f32.gmra.mxu0 %vm83_vm2, %v13089_v6 }
 0x2b7   :  { %v13506_v12 = vadd.f32 %v2687_v49, %v13075_v37  ;;  %v13509_v14 = vadd.f32 %v2493_v58, %v13078_v18  ;;  %9826 = vmatprep.mubr.msk.f32.mxu1 %vm10636_vm1, %v17340_v32  ;;  %3451 = vmatprep.mubr.f32.mxu0 %v17340_v32 }
 0x2b8   :  { %v9673_v2 = vpop.f32.mrf.mxu1  ;;  %v2495_v46 = vpop.f32.mrf.mxu0 }
 0x2b9   :  { %v13515_v13 = vadd.f32 %v2495_v46, %v17590_v43  ;;  %v17591_v2 = vld [vmem:[#allocation79_spill] sm:$0xff] }
 0x2ba   :  { %v2692_v39 = vpop.f32.mrf.mxu1  ;;  %9827 = vmatmul.mubr.msk.f32.gmra.mxu1 %vm83_vm2, %v13110_v53  ;;  %v2499_v6 = vpop.f32.mrf.mxu0  ;;  %8427 = vmatmul.mubr.msk.f32.gmra.mxu0 %vm83_vm2, %v13110_v53 }
 0x2bb   :  { %v13522_v37 = vadd.f32 %v2692_v39, %v13096_v44  ;;  %v13525_v18 = vadd.f32 %v2499_v6, %v13099_v19  ;;  %9829 = vmatprep.mubr.msk.f32.mxu1 %vm10636_vm1, %v17340_v32  ;;  %3457 = vmatprep.mubr.f32.mxu0 %v17340_v32 }
 0x2bc   :  { %v9676_v49 = vpop.f32.mrf.mxu1  ;;  %v2501_v58 = vpop.f32.mrf.mxu0 }
 0x2bd   :  { %v13531_v46 = vadd.f32 %v2501_v58, %v17591_v2  ;;  %v17592_v49 = vld [vmem:[#allocation41_spill] sm:$0xff] }
 0x2be   :  { %v2697_v43 = vpop.f32.mrf.mxu1  ;;  %9830 = vmatmul.mubr.msk.f32.gmra.mxu1 %vm83_vm2, %v13131_v56  ;;  %v2505_v53 = vpop.f32.mrf.mxu0  ;;  %8428 = vmatmul.mubr.msk.f32.gmra.mxu0 %vm83_vm2, %v13131_v56 }
 0x2bf   :  { %v13538_v44 = vadd.f32 %v2697_v43, %v13117_v1  ;;  %v13541_v19 = vadd.f32 %v2505_v53, %v13120_v20  ;;  %9832 = vmatprep.mubr.msk.f32.mxu1 %vm10636_vm1, %v17340_v32  ;;  %3463 = vmatprep.mubr.f32.mxu0 %v17340_v32 }
 0x2c0   :  { %v9679_v39 = vpop.f32.mrf.mxu1  ;;  %v2507_v6 = vpop.f32.mrf.mxu0 }
 0x2c1   :  { %v13547_v58 = vadd.f32 %v2507_v6, %v17592_v49  ;;  %v17595_v39 = vld [vmem:[#allocation80_spill] sm:$0xff] }
 0x2c2   :  { %v2702_v2 = vpop.f32.mrf.mxu1  ;;  %9833 = vmatmul.mubr.msk.f32.gmra.mxu1 %vm83_vm2, %v13152_v48  ;;  %v2511_v56 = vpop.f32.mrf.mxu0  ;;  %8429 = vmatmul.mubr.msk.f32.gmra.mxu0 %vm83_vm2, %v13152_v48 }
 0x2c3   :  { %v13554_v1 = vadd.f32 %v2702_v2, %v13138_v5  ;;  %v13557_v20 = vadd.f32 %v2511_v56, %v13141_v21  ;;  %9835 = vmatprep.mubr.msk.f32.mxu1 %vm10636_vm1, %v17340_v32  ;;  %3469 = vmatprep.mubr.f32.mxu0 %v17340_v32  ;;  %v17597_v5 = vld [vmem:[#allocation42_spill] sm:$0xff]  ;;  %v17598_v2 = vld [vmem:[#allocation81_spill] sm:$0xff] }
 0x2c4   :  { %v9682_v43 = vpop.f32.mrf.mxu1  ;;  %v2513_v53 = vpop.f32.mrf.mxu0 }
 0x2c5   :  { %17593 = vst [vmem:[#allocation5_spill] sm:$0xff] %v13554_v1  ;;  %17594 = vst [vmem:[#allocation52_spill] sm:$0xff] %v13557_v20  ;;  %v13563_v6 = vadd.f32 %v2513_v53, %v17595_v39  ;;  %v17600_v39 = vld [vmem:[#allocation43_spill] sm:$0xff]  ;;  %v17602_v1 = vld [vmem:[#allocation45_spill] sm:$0xff] }
 0x2c6   :  { %v2707_v49 = vpop.f32.mrf.mxu1  ;;  %9836 = vmatmul.mubr.msk.f32.gmra.mxu1 %vm83_vm2, %v13173_v0  ;;  %v2517_v48 = vpop.f32.mrf.mxu0  ;;  %8430 = vmatmul.mubr.msk.f32.gmra.mxu0 %vm83_vm2, %v13173_v0 }
 0x2c7   :  { %17596 = vst [vmem:[#allocation6_spill] sm:$0xff] %v13563_v6  ;;  %v13570_v21 = vadd.f32 %v2707_v49, %v17597_v5  ;;  %v13573_v56 = vadd.f32 %v2517_v48, %v17598_v2  ;;  %9838 = vmatprep.mubr.msk.f32.mxu1 %vm10636_vm1, %v17340_v32  ;;  %3475 = vmatprep.mubr.f32.mxu0 %v17340_v32  ;;  %v17603_v49 = vld [vmem:[#allocation82_spill] sm:$0xff]  ;;  %v17605_v5 = vld [vmem:[#allocation44_spill] sm:$0xff] }
 0x2c8   :  { %v9685_v43 = vpop.f32.mrf.mxu1  ;;  %v2519_v53 = vpop.f32.mrf.mxu0 }
 0x2c9   :  { %17599 = vst [vmem:[#allocation7_spill] sm:$0xff] %v13573_v56  ;;  %v13579_v6 = vadd.f32 %v2519_v53, %v17600_v39  ;;  %v17607_v39 = vld [vmem:[#allocation83_spill] sm:$0xff] }
 0x2ca   :  { %v2712_v20 = vpop.f32.mrf.mxu1  ;;  %9839 = vmatmul.mubr.msk.f32.gmra.mxu1 %vm83_vm2, %v17602_v1  ;;  %v2523_v0 = vpop.f32.mrf.mxu0  ;;  %8431 = vmatmul.mubr.msk.f32.gmra.mxu0 %vm83_vm2, %v17602_v1  ;;  %v13600_v1 = vld [vmem:[%s17130_s0 + $0xc0] sm:$0xff] }
 0x2cb   :  { %17601 = vst [vmem:[#allocation53_spill] sm:$0xff] %v13579_v6  ;;  %v13586_v48 = vadd.f32 %v2712_v20, %v17603_v49  ;;  %v13589_v2 = vadd.f32 %v2523_v0, %v17605_v5  ;;  %9841 = vmatprep.mubr.msk.f32.mxu1 %vm10636_vm1, %v17340_v32  ;;  %3481 = vmatprep.mubr.f32.mxu0 %v17340_v32  ;;  %17609 = vst [vmem:[#allocation10_spill] sm:$0xff] %v13600_v1  ;;  %v17610_v0 = vld [vmem:[#allocation84_spill] sm:$0xff]  ;;  %v17612_v5 = vld [vmem:[#allocation87_spill] sm:$0xff] }
 0x2cc   :  { %v9688_v43 = vpop.f32.mrf.mxu1  ;;  %v2525_v53 = vpop.f32.mrf.mxu0 }
 0x2cd   :  { %17604 = vst [vmem:[#allocation8_spill] sm:$0xff] %v13586_v48  ;;  %17606 = vst [vmem:[#allocation54_spill] sm:$0xff] %v13589_v2  ;;  %v13595_v6 = vadd.f32 %v2525_v53, %v17607_v39 }
 0x2ce   :  { %v2717_v56 = vpop.f32.mrf.mxu1  ;;  %9842 = vmatmul.mubr.msk.f32.gmra.mxu1 %vm83_vm2, %v13600_v1  ;;  %v2529_v20 = vpop.f32.mrf.mxu0  ;;  %8432 = vmatmul.mubr.msk.f32.gmra.mxu0 %vm83_vm2, %v13600_v1  ;;  %v13621_v1 = vld [vmem:[%s17130_s0 + $0xc8] sm:$0xff] }
 0x2cf   :  { %17608 = vst [vmem:[#allocation9_spill] sm:$0xff] %v13595_v6  ;;  %v13607_v49 = vadd.f32 %v2717_v56, %v17610_v0  ;;  %v13610_v43 = vadd.f32 %v2529_v20, %v17612_v5  ;;  %9844 = vmatprep.mubr.msk.f32.mxu1 %vm10636_vm1, %v17340_v32  ;;  %3487 = vmatprep.mubr.f32.mxu0 %v17340_v32  ;;  %v17614_v6 = vld [vmem:[#allocation46_spill] sm:$0xff]  ;;  %v17616_v0 = vld [vmem:[#allocation85_spill] sm:$0xff] }
 0x2d0   :  { %v9691_v53 = vpop.f32.mrf.mxu1  ;;  %v2531_v39 = vpop.f32.mrf.mxu0 }
 0x2d1   :  { %17611 = vst [vmem:[#allocation55_spill] sm:$0xff] %v13607_v49  ;;  %17613 = vst [vmem:[#allocation11_spill] sm:$0xff] %v13610_v43  ;;  %v13616_v2 = vadd.f32 %v2531_v39, %v17614_v6  ;;  %v17618_v39 = vld [vmem:[#allocation47_spill] sm:$0xff] }
 0x2d2   :  { %v2722_v48 = vpop.f32.mrf.mxu1  ;;  %9845 = vmatmul.mubr.msk.f32.gmra.mxu1 %vm83_vm2, %v13621_v1  ;;  %v2535_v56 = vpop.f32.mrf.mxu0  ;;  %8433 = vmatmul.mubr.msk.f32.gmra.mxu0 %vm83_vm2, %v13621_v1 }
 0x2d3   :  { %17615 = vst [vmem:[#allocation56_spill] sm:$0xff] %v13616_v2  ;;  %v13628_v20 = vadd.f32 %v2722_v48, %v13217_v38  ;;  %v13631_v5 = vadd.f32 %v2535_v56, %v17616_v0  ;;  %9847 = vmatprep.mubr.msk.f32.mxu1 %vm10636_vm1, %v17340_v32  ;;  %3493 = vmatprep.mubr.f32.mxu0 %v17340_v32  ;;  %v17620_v38 = vld [vmem:[#allocation86_spill] sm:$0xff]  ;;  %v17621_v56 = vld [vmem:[#allocation48_spill] sm:$0xff] }
 0x2d4   :  { %v9694_v6 = vpop.f32.mrf.mxu1  ;;  %v2537_v53 = vpop.f32.mrf.mxu0 }
 0x2d5   :  { %17617 = vst [vmem:[#allocation14_spill] sm:$0xff] %v13631_v5  ;;  %v13637_v2 = vadd.f32 %v2537_v53, %v17618_v39  ;;  %v17623_v39 = vld [vmem:[#allocation88_spill] sm:$0xff] }
 0x2d6   :  { %v2727_v43 = vpop.f32.mrf.mxu1  ;;  %9848 = vmatmul.mubr.msk.f32.gmra.mxu1 %vm83_vm2, %v13247_v7  ;;  %v2541_v49 = vpop.f32.mrf.mxu0  ;;  %8434 = vmatmul.mubr.msk.f32.gmra.mxu0 %vm83_vm2, %v13247_v7  ;;  %v13658_v7 = vld [vmem:[%s17130_s0 + $0xd8] sm:$0xff] }
 0x2d7   :  { %17619 = vst [vmem:[#allocation12_spill] sm:$0xff] %v13637_v2  ;;  %v13644_v48 = vadd.f32 %v2727_v43, %v17620_v38  ;;  %v13647_v0 = vadd.f32 %v2541_v49, %v17621_v56  ;;  %9850 = vmatprep.mubr.msk.f32.mxu1 %vm10636_vm1, %v17340_v32  ;;  %3499 = vmatprep.mubr.f32.mxu0 %v17340_v32 }
 0x2d8   :  { %v9697_v6 = vpop.f32.mrf.mxu1  ;;  %v2543_v53 = vpop.f32.mrf.mxu0 }
 0x2d9   :  { %17622 = vst [vmem:[#allocation13_spill] sm:$0xff] %v13647_v0  ;;  %v13653_v2 = vadd.f32 %v2543_v53, %v17623_v39  ;;  %v17625_v53 = vld [vmem:[#allocation49_spill] sm:$0xff] }
 0x2da   :  { %v2732_v5 = vpop.f32.mrf.mxu1  ;;  %9851 = vmatmul.mubr.msk.f32.gmra.mxu1 %vm83_vm2, %v13658_v7  ;;  %v2547_v49 = vpop.f32.mrf.mxu0  ;;  %8435 = vmatmul.mubr.msk.f32.gmra.mxu0 %vm83_vm2, %v13658_v7 }
 0x2db   :  { %17624 = vst [vmem:[#allocation57_spill] sm:$0xff] %v13653_v2  ;;  %v13665_v43 = vadd.f32 %v2732_v5, %v13254_v15  ;;  %v13668_v38 = vadd.f32 %v2547_v49, %v13257_v57  ;;  %9853 = vmatprep.mubr.msk.f32.mxu1 %vm10636_vm1, %v17340_v32  ;;  %3505 = vmatprep.mubr.f32.mxu0 %v17340_v32  ;;  %v17627_v15 = vld [vmem:[#allocation89_spill] sm:$0xff]  ;;  %v17629_v5 = vld [vmem:[#allocation50_spill] sm:$0xff] }
 0x2dc   :  { %v9700_v56 = vpop.f32.mrf.mxu1  ;;  %v2549_v6 = vpop.f32.mrf.mxu0 }
 0x2dd   :  { %v13674_v39 = vadd.f32 %v2549_v6, %v17625_v53  ;;  %v13692_v56 = vld [vmem:[%s17130_s0 + $0xe8] sm:$0xff] }
 0x2de   :  { %v2737_v2 = vpop.f32.mrf.mxu1  ;;  %9854 = vmatmul.mubr.msk.f32.gmra.mxu1 %vm83_vm2, %v13281_v42  ;;  %v2553_v0 = vpop.f32.mrf.mxu0  ;;  %8436 = vmatmul.mubr.msk.f32.gmra.mxu0 %vm83_vm2, %v13281_v42 }
 0x2df   :  { %17626 = vst [vmem:[#allocation59_spill] sm:$0xff] %v13674_v39  ;;  %v13681_v57 = vadd.f32 %v2737_v2, %v17627_v15  ;;  %v13684_v49 = vadd.f32 %v2553_v0, %v17629_v5  ;;  %9856 = vmatprep.mubr.msk.f32.mxu1 %vm10636_vm1, %v17340_v32  ;;  %3511 = vmatprep.mubr.f32.mxu0 %v17340_v32  ;;  %v17631_v39 = vld [vmem:[#allocation3_spill] sm:$0xff]  ;;  %v17633_v5 = vld [vmem:[#allocation4_spill] sm:$0xff] }
 0x2e0   :  { %v9703_v6 = vpop.f32.mrf.mxu1  ;;  %v2555_v53 = vpop.f32.mrf.mxu0 }
 0x2e1   :  { %17628 = vst [vmem:[#allocation58_spill] sm:$0xff] %v13681_v57  ;;  %17630 = vst [vmem:[#allocation15_spill] sm:$0xff] %v13684_v49  ;;  %v13695_v42 = vadd.f32 %v2555_v53, %v17631_v39  ;;  %v8520_v53 = vld [vmem:[%s17129_s1 + $0x1c8] sm:$0xf] }
 0x2e2   :  { %v2742_v2 = vpop.f32.mrf.mxu1  ;;  %9857 = vmatmul.mubr.msk.f32.gmra.mxu1 %vm83_vm2, %v13692_v56  ;;  %v2559_v0 = vpop.f32.mrf.mxu0  ;;  %8437 = vmatmul.mubr.msk.f32.gmra.mxu0 %vm83_vm2, %v13692_v56 }
 0x2e3   :  { %17632 = vst [vmem:[#allocation16_spill] sm:$0xff] %v13695_v42  ;;  %v13702_v15 = vadd.f32 %v2742_v2, %v13291_v35  ;;  %v13705_v49 = vadd.f32 %v2559_v0, %v17633_v5  ;;  %9863 = vmatprep.mubr.msk.f32.mxu1 %vm10636_vm1, %v17340_v32  ;;  %3850 = vmatprep.mubr.f32.mxu0 %v17340_v32  ;;  %v17634_v42 = vld [vmem:[#allocation51_spill] sm:$0xff]  ;;  %v8522_v35 = vld [vmem:[%s17129_s1 + $0x1d8] sm:$0xf] }
 0x2e4   :  { %v9706_v39 = vpop.f32.mrf.mxu1  ;;  %v2561_v6 = vpop.f32.mrf.mxu0  ;;  %v8518_v5 = vld [vmem:[%s17129_s1 + $0x1b8] sm:$0xff] }
 0x2e5   :  { %v13714_v57 = vadd.f32 %v2561_v6, %v17634_v42 }
 0x2e6   :  { %v2747_v2 = vpop.f32.mrf.mxu1  ;;  %9864 = vmatmul.mubr.msk.f32.vlgmr.msra.gmra.mxu1 %vm83_vm2, %v12879_v60  ;;  %v2565_v0 = vpop.f32.mrf.mxu0  ;;  %8470 = vmatmul.mubr.msk.f32.vlgmr.msra.gmra.mxu0 %vm83_vm2, %v12879_v60 }
 0x2e7   :  { %17635 = vst [vmem:[#allocation17_spill] sm:$0xff] %v13714_v57  ;;  %v13727_v39 = vadd.f32 %v2747_v2, %v13316_v11  ;;  %v13730_v42 = vadd.f32 %v2565_v0, %v13319_v61  ;;  %8524 = vmatpush1.msk.msra.mxu0 %vm153_vm0, %v8520_v53  ;;  %9866 = vmatprep.mubr.msk.f32.mxu1 %vm10636_vm1, %v17340_v32  ;;  %v8517_v11 = vld [vmem:[%s17129_s1 + $0x1b0] sm:$0xff]  ;;  %v8519_v61 = vld [vmem:[%s17129_s1 + $0x1c0] sm:$0xff] }
 0x2e8   :  { %v9709_v6 = vpop.f32.mrf.mxu1  ;;  %v2567_v57 = vpop.f32.mrf.mxu0  ;;  %3856 = vmatprep.mubr.f32.mxu0 %v17340_v32  ;;  %9933 = vmatpush3.msk.msra.mxu1 %vm153_vm0, %v8522_v35 }
 0x2e9   :  { %v13738_v60 = vadd.f32 %v2567_v57, %v13327_v22  ;;  %4287 = vmatprep.subr.mxu0 %v8518_v5  ;;  %9934 = vmatprep.subr.mxu1 %v17340_v32 }
 0x2ea   :  { %v2752_v53 = vpop.f32.mrf.mxu1  ;;  %9867 = vmatmul.mubr.msk.f32.gmra.mxu1 %vm83_vm2, %v12900_v40  ;;  %v2571_v2 = vpop.f32.mrf.mxu0  ;;  %8471 = vmatmul.mubr.msk.f32.gmra.mxu0 %vm83_vm2, %v12900_v40 }
 0x2eb   :  { %v13752_v22 = vadd.f32 %v2752_v53, %v13344_v17  ;;  %v13755_v57 = vadd.f32 %v2571_v2, %v13347_v3  ;;  %9869 = vmatprep.mubr.msk.f32.mxu1 %vm10636_vm1, %v17340_v32  ;;  %3862 = vmatprep.mubr.f32.mxu0 %v17340_v32  ;;  %v13768_v17 = vld [vmem:[%s17130_s0 + $0x50] sm:$0xff] }
 0x2ec   :  { %v9712_v35 = vpop.f32.mrf.mxu1  ;;  %v2573_v0 = vpop.f32.mrf.mxu0  ;;  %4288 = vmatpush1.msra.mxu0 %v8517_v11  ;;  %9935 = vmatpush3.msra.mxu1 %v8519_v61 }
 0x2ed   :  { %v13761_v5 = vadd.f32 %v2573_v0, %v13353_v45  ;;  %5188 = vmatprep.subr.mxu0 %v17340_v32  ;;  %10005 = vmatprep.subr.mxu1 %v17340_v32  ;;  %v13789_v35 = vld [vmem:[%s17130_s0 + $0x58] sm:$0xff] }
 0x2ee   :  { %v3113_v40 = vpop.f32.mrf.mxu1  ;;  %9870 = vmatmul.mubr.msk.f32.gmra.mxu1 %vm83_vm2, %v13768_v17  ;;  %v2910_v3 = vpop.f32.mrf.mxu0  ;;  %8472 = vmatmul.mubr.msk.f32.gmra.mxu0 %vm83_vm2, %v13768_v17 }
 0x2ef   :  { %v13775_v45 = vadd.f32 %v3113_v40, %v13362_v30  ;;  %v13778_v6 = vadd.f32 %v2910_v3, %v13365_v31  ;;  %9872 = vmatprep.mubr.msk.f32.mxu1 %vm10636_vm1, %v17340_v32  ;;  %3868 = vmatprep.mubr.f32.mxu0 %v17340_v32 }
 0x2f0   :  { %v9719_v11 = vpop.f32.mrf.mxu1  ;;  %v2912_v61 = vpop.f32.mrf.mxu0 }
 0x2f1   :  { %v13784_v53 = vadd.f32 %v2912_v61, %v13371_v62  ;;  %v13810_v61 = vld [vmem:[%s17130_s0 + $0x60] sm:$0xff] }
 0x2f2   :  { %v3118_v2 = vpop.f32.mrf.mxu1  ;;  %9873 = vmatmul.mubr.msk.f32.gmra.mxu1 %vm83_vm2, %v13789_v35  ;;  %v2916_v30 = vpop.f32.mrf.mxu0  ;;  %8473 = vmatmul.mubr.msk.f32.gmra.mxu0 %vm83_vm2, %v13789_v35 }
 0x2f3   :  { %v13796_v31 = vadd.f32 %v3118_v2, %v13378_v29  ;;  %v13799_v0 = vadd.f32 %v2916_v30, %v13381_v23  ;;  %9875 = vmatprep.mubr.msk.f32.mxu1 %vm10636_vm1, %v17340_v32  ;;  %3874 = vmatprep.mubr.f32.mxu0 %v17340_v32 }
 0x2f4   :  { %v9722_v62 = vpop.f32.mrf.mxu1  ;;  %v2918_v40 = vpop.f32.mrf.mxu0 }
 0x2f5   :  { %v13805_v3 = vadd.f32 %v2918_v40, %v13387_v50 }
 0x2f6   :  { %v3123_v11 = vpop.f32.mrf.mxu1  ;;  %9876 = vmatmul.mubr.msk.f32.gmra.mxu1 %vm83_vm2, %v13810_v61  ;;  %v2922_v29 = vpop.f32.mrf.mxu0  ;;  %8474 = vmatmul.mubr.msk.f32.gmra.mxu0 %vm83_vm2, %v13810_v61 }
 0x2f7   :  { %17636 = vst [vmem:[#allocation60_spill] sm:$0xff] %v13805_v3  ;;  %v13817_v23 = vadd.f32 %v3123_v11, %v13394_v47  ;;  %v13820_v2 = vadd.f32 %v2922_v29, %v13397_v26  ;;  %9878 = vmatprep.mubr.msk.f32.mxu1 %vm10636_vm1, %v17340_v32  ;;  %3880 = vmatprep.mubr.f32.mxu0 %v17340_v32  ;;  %v13831_v3 = vld [vmem:[%s17130_s0 + $0x68] sm:$0xff] }
 0x2f8   :  { %v9725_v50 = vpop.f32.mrf.mxu1  ;;  %v2924_v30 = vpop.f32.mrf.mxu0 }
 0x2f9   :  { %v13826_v62 = vadd.f32 %v2924_v30, %v13403_v10 }
 0x2fa   :  { %v3128_v40 = vpop.f32.mrf.mxu1  ;;  %9879 = vmatmul.mubr.msk.f32.gmra.mxu1 %vm83_vm2, %v13831_v3  ;;  %v2928_v47 = vpop.f32.mrf.mxu0  ;;  %8475 = vmatmul.mubr.msk.f32.gmra.mxu0 %vm83_vm2, %v13831_v3 }
 0x2fb   :  { %17637 = vst [vmem:[#allocation18_spill] sm:$0xff] %v13826_v62  ;;  %v13838_v26 = vadd.f32 %v3128_v40, %v13410_v9  ;;  %v13841_v11 = vadd.f32 %v2928_v47, %v13413_v33  ;;  %9881 = vmatprep.mubr.msk.f32.mxu1 %vm10636_vm1, %v17340_v32  ;;  %3886 = vmatprep.mubr.f32.mxu0 %v17340_v32  ;;  %v13852_v62 = vld [vmem:[%s17130_s0 + $0x70] sm:$0xff] }
 0x2fc   :  { %v9728_v10 = vpop.f32.mrf.mxu1  ;;  %v2930_v29 = vpop.f32.mrf.mxu0 }
 0x2fd   :  { %v13847_v50 = vadd.f32 %v2930_v29, %v13419_v36 }
 0x2fe   :  { %v3133_v30 = vpop.f32.mrf.mxu1  ;;  %9882 = vmatmul.mubr.msk.f32.gmra.mxu1 %vm83_vm2, %v13852_v62  ;;  %v2934_v9 = vpop.f32.mrf.mxu0  ;;  %8476 = vmatmul.mubr.msk.f32.gmra.mxu0 %vm83_vm2, %v13852_v62 }
 0x2ff   :  { %17638 = vst [vmem:[#allocation19_spill] sm:$0xff] %v13847_v50  ;;  %v13859_v33 = vadd.f32 %v3133_v30, %v13426_v55  ;;  %v13862_v40 = vadd.f32 %v2934_v9, %v13429_v28  ;;  %9884 = vmatprep.mubr.msk.f32.mxu1 %vm10636_vm1, %v17340_v32  ;;  %3892 = vmatprep.mubr.f32.mxu0 %v17340_v32  ;;  %v13873_v50 = vld [vmem:[%s17130_s0 + $0x78] sm:$0xff] }
 0x300   :  { %v9731_v36 = vpop.f32.mrf.mxu1  ;;  %v2936_v47 = vpop.f32.mrf.mxu0 }
 0x301   :  { %v13868_v10 = vadd.f32 %v2936_v47, %v13435_v16 }
 0x302   :  { %v3138_v29 = vpop.f32.mrf.mxu1  ;;  %9885 = vmatmul.mubr.msk.f32.gmra.mxu1 %vm83_vm2, %v13873_v50  ;;  %v2940_v55 = vpop.f32.mrf.mxu0  ;;  %8477 = vmatmul.mubr.msk.f32.gmra.mxu0 %vm83_vm2, %v13873_v50 }
 0x303   :  { %17639 = vst [vmem:[#allocation61_spill] sm:$0xff] %v13868_v10  ;;  %v13880_v28 = vadd.f32 %v3138_v29, %v13442_v59  ;;  %v13883_v30 = vadd.f32 %v2940_v55, %v13445_v34  ;;  %9887 = vmatprep.mubr.msk.f32.mxu1 %vm10636_vm1, %v17340_v32  ;;  %3898 = vmatprep.mubr.f32.mxu0 %v17340_v32  ;;  %v13894_v10 = vld [vmem:[%s17130_s0 + $0x80] sm:$0xff] }
 0x304   :  { %v9734_v16 = vpop.f32.mrf.mxu1  ;;  %v2942_v9 = vpop.f32.mrf.mxu0 }
 0x305   :  { %v13889_v36 = vadd.f32 %v2942_v9, %v13451_v24 }
 0x306   :  { %v3143_v47 = vpop.f32.mrf.mxu1  ;;  %9888 = vmatmul.mubr.msk.f32.gmra.mxu1 %vm83_vm2, %v13894_v10  ;;  %v2946_v59 = vpop.f32.mrf.mxu0  ;;  %8478 = vmatmul.mubr.msk.f32.gmra.mxu0 %vm83_vm2, %v13894_v10 }
 0x307   :  { %17640 = vst [vmem:[#allocation20_spill] sm:$0xff] %v13889_v36  ;;  %v13901_v34 = vadd.f32 %v3143_v47, %v13458_v63  ;;  %v13904_v29 = vadd.f32 %v2946_v59, %v13461_v54  ;;  %9890 = vmatprep.mubr.msk.f32.mxu1 %vm10636_vm1, %v17340_v32  ;;  %3904 = vmatprep.mubr.f32.mxu0 %v17340_v32  ;;  %v13915_v36 = vld [vmem:[%s17130_s0 + $0x88] sm:$0xff] }
 0x308   :  { %v9737_v24 = vpop.f32.mrf.mxu1  ;;  %v2948_v55 = vpop.f32.mrf.mxu0 }
 0x309   :  { %v13910_v16 = vadd.f32 %v2948_v55, %v13467_v41 }
 0x30a   :  { %v3148_v9 = vpop.f32.mrf.mxu1  ;;  %9891 = vmatmul.mubr.msk.f32.gmra.mxu1 %vm83_vm2, %v13915_v36  ;;  %v2952_v63 = vpop.f32.mrf.mxu0  ;;  %8479 = vmatmul.mubr.msk.f32.gmra.mxu0 %vm83_vm2, %v13915_v36 }
 0x30b   :  { %17641 = vst [vmem:[#allocation22_spill] sm:$0xff] %v13910_v16  ;;  %v13922_v54 = vadd.f32 %v3148_v9, %v13474_v4  ;;  %v13925_v47 = vadd.f32 %v2952_v63, %v13477_v51  ;;  %9893 = vmatprep.mubr.msk.f32.mxu1 %vm10636_vm1, %v17340_v32  ;;  %3910 = vmatprep.mubr.f32.mxu0 %v17340_v32  ;;  %v13936_v16 = vld [vmem:[%s17130_s0 + $0x90] sm:$0xff] }
 0x30c   :  { %v9740_v41 = vpop.f32.mrf.mxu1  ;;  %v2954_v59 = vpop.f32.mrf.mxu0 }
 0x30d   :  { %v13931_v24 = vadd.f32 %v2954_v59, %v13483_v27 }
 0x30e   :  { %v3153_v55 = vpop.f32.mrf.mxu1  ;;  %9894 = vmatmul.mubr.msk.f32.gmra.mxu1 %vm83_vm2, %v13936_v16  ;;  %v2958_v4 = vpop.f32.mrf.mxu0  ;;  %8480 = vmatmul.mubr.msk.f32.gmra.mxu0 %vm83_vm2, %v13936_v16 }
 0x30f   :  { %17642 = vst [vmem:[#allocation62_spill] sm:$0xff] %v13931_v24  ;;  %v13943_v51 = vadd.f32 %v3153_v55, %v13490_v8  ;;  %v13946_v9 = vadd.f32 %v2958_v4, %v13493_v52  ;;  %9896 = vmatprep.mubr.msk.f32.mxu1 %vm10636_vm1, %v17340_v32  ;;  %3916 = vmatprep.mubr.f32.mxu0 %v17340_v32  ;;  %v13957_v24 = vld [vmem:[%s17130_s0 + $0x98] sm:$0xff] }
 0x310   :  { %v9743_v27 = vpop.f32.mrf.mxu1  ;;  %v2960_v63 = vpop.f32.mrf.mxu0 }
 0x311   :  { %v13952_v41 = vadd.f32 %v2960_v63, %v13499_v25 }
 0x312   :  { %v3158_v59 = vpop.f32.mrf.mxu1  ;;  %9897 = vmatmul.mubr.msk.f32.gmra.mxu1 %vm83_vm2, %v13957_v24  ;;  %v2964_v8 = vpop.f32.mrf.mxu0  ;;  %8481 = vmatmul.mubr.msk.f32.gmra.mxu0 %vm83_vm2, %v13957_v24 }
 0x313   :  { %17643 = vst [vmem:[#allocation21_spill] sm:$0xff] %v13952_v41  ;;  %v13964_v52 = vadd.f32 %v3158_v59, %v13506_v12  ;;  %v13967_v55 = vadd.f32 %v2964_v8, %v13509_v14  ;;  %9899 = vmatprep.mubr.msk.f32.mxu1 %vm10636_vm1, %v17340_v32  ;;  %3922 = vmatprep.mubr.f32.mxu0 %v17340_v32  ;;  %v13978_v41 = vld [vmem:[%s17130_s0 + $0xa0] sm:$0xff] }
 0x314   :  { %v9746_v25 = vpop.f32.mrf.mxu1  ;;  %v2966_v4 = vpop.f32.mrf.mxu0 }
 0x315   :  { %v13973_v27 = vadd.f32 %v2966_v4, %v13515_v13 }
 0x316   :  { %v3163_v63 = vpop.f32.mrf.mxu1  ;;  %9900 = vmatmul.mubr.msk.f32.gmra.mxu1 %vm83_vm2, %v13978_v41  ;;  %v2970_v12 = vpop.f32.mrf.mxu0  ;;  %8482 = vmatmul.mubr.msk.f32.gmra.mxu0 %vm83_vm2, %v13978_v41 }
 0x317   :  { %17644 = vst [vmem:[#allocation63_spill] sm:$0xff] %v13973_v27  ;;  %v13985_v14 = vadd.f32 %v3163_v63, %v13522_v37  ;;  %v13988_v59 = vadd.f32 %v2970_v12, %v13525_v18  ;;  %9902 = vmatprep.mubr.msk.f32.mxu1 %vm10636_vm1, %v17340_v32  ;;  %3928 = vmatprep.mubr.f32.mxu0 %v17340_v32  ;;  %v13999_v27 = vld [vmem:[%s17130_s0 + $0xa8] sm:$0xff] }
 0x318   :  { %v9749_v13 = vpop.f32.mrf.mxu1  ;;  %v2972_v8 = vpop.f32.mrf.mxu0 }
 0x319   :  { %v13994_v25 = vadd.f32 %v2972_v8, %v13531_v46 }
 0x31a   :  { %v3168_v4 = vpop.f32.mrf.mxu1  ;;  %9903 = vmatmul.mubr.msk.f32.gmra.mxu1 %vm83_vm2, %v13999_v27  ;;  %v2976_v37 = vpop.f32.mrf.mxu0  ;;  %8483 = vmatmul.mubr.msk.f32.gmra.mxu0 %vm83_vm2, %v13999_v27 }
 0x31b   :  { %17645 = vst [vmem:[#allocation23_spill] sm:$0xff] %v13994_v25  ;;  %v14006_v18 = vadd.f32 %v3168_v4, %v13538_v44  ;;  %v14009_v63 = vadd.f32 %v2976_v37, %v13541_v19  ;;  %9905 = vmatprep.mubr.msk.f32.mxu1 %vm10636_vm1, %v17340_v32  ;;  %3934 = vmatprep.mubr.f32.mxu0 %v17340_v32  ;;  %v14020_v25 = vld [vmem:[%s17130_s0 + $0xb0] sm:$0xff]  ;;  %v17652_v37 = vld [vmem:[#allocation52_spill] sm:$0xff] }
 0x31c   :  { %v9752_v46 = vpop.f32.mrf.mxu1  ;;  %v2978_v12 = vpop.f32.mrf.mxu0  ;;  %17649 = vst [vmem:[#allocation65_spill] sm:$0xff] %v14020_v25  ;;  %v17650_v19 = vld [vmem:[#allocation5_spill] sm:$0xff] }
 0x31d   :  { %17646 = vst [vmem:[#allocation64_spill] sm:$0xff] %v14006_v18  ;;  %17647 = vst [vmem:[#allocation24_spill] sm:$0xff] %v14009_v63  ;;  %v14015_v13 = vadd.f32 %v2978_v12, %v13547_v58 }
 0x31e   :  { %v3173_v8 = vpop.f32.mrf.mxu1  ;;  %9906 = vmatmul.mubr.msk.f32.gmra.mxu1 %vm83_vm2, %v14020_v25  ;;  %v2982_v44 = vpop.f32.mrf.mxu0  ;;  %8484 = vmatmul.mubr.msk.f32.gmra.mxu0 %vm83_vm2, %v14020_v25  ;;  %v14041_v25 = vld [vmem:[%s17130_s0 + $0xb8] sm:$0xff] }
 0x31f   :  { %17648 = vst [vmem:[#allocation25_spill] sm:$0xff] %v14015_v13  ;;  %v14027_v4 = vadd.f32 %v3173_v8, %v17650_v19  ;;  %v14030_v46 = vadd.f32 %v2982_v44, %v17652_v37  ;;  %9908 = vmatprep.mubr.msk.f32.mxu1 %vm10636_vm1, %v17340_v32  ;;  %3940 = vmatprep.mubr.f32.mxu0 %v17340_v32  ;;  %v17654_v13 = vld [vmem:[#allocation6_spill] sm:$0xff]  ;;  %17656 = vst [vmem:[#allocation27_spill] sm:$0xff] %v14041_v25  ;;  %v17657_v19 = vld [vmem:[#allocation7_spill] sm:$0xff] }
 0x320   :  { %v9755_v58 = vpop.f32.mrf.mxu1  ;;  %v2984_v12 = vpop.f32.mrf.mxu0 }
 0x321   :  { %17651 = vst [vmem:[#allocation26_spill] sm:$0xff] %v14027_v4  ;;  %17653 = vst [vmem:[#allocation66_spill] sm:$0xff] %v14030_v46  ;;  %v14036_v63 = vadd.f32 %v2984_v12, %v17654_v13  ;;  %v17659_v12 = vld [vmem:[#allocation53_spill] sm:$0xff]  ;;  %v17661_v4 = vld [vmem:[#allocation10_spill] sm:$0xff] }
 0x322   :  { %v3178_v18 = vpop.f32.mrf.mxu1  ;;  %9909 = vmatmul.mubr.msk.f32.gmra.mxu1 %vm83_vm2, %v14041_v25  ;;  %v2988_v8 = vpop.f32.mrf.mxu0  ;;  %8485 = vmatmul.mubr.msk.f32.gmra.mxu0 %vm83_vm2, %v14041_v25 }
 0x323   :  { %17655 = vst [vmem:[#allocation29_spill] sm:$0xff] %v14036_v63  ;;  %v14048_v44 = vadd.f32 %v3178_v18, %v13570_v21  ;;  %v14051_v37 = vadd.f32 %v2988_v8, %v17657_v19  ;;  %9911 = vmatprep.mubr.msk.f32.mxu1 %vm10636_vm1, %v17340_v32  ;;  %3946 = vmatprep.mubr.f32.mxu0 %v17340_v32  ;;  %v17662_v21 = vld [vmem:[#allocation8_spill] sm:$0xff]  ;;  %v17663_v8 = vld [vmem:[#allocation54_spill] sm:$0xff] }
 0x324   :  { %v9758_v13 = vpop.f32.mrf.mxu1  ;;  %v2990_v58 = vpop.f32.mrf.mxu0 }
 0x325   :  { %17658 = vst [vmem:[#allocation28_spill] sm:$0xff] %v14051_v37  ;;  %v14057_v63 = vadd.f32 %v2990_v58, %v17659_v12  ;;  %v17665_v12 = vld [vmem:[#allocation9_spill] sm:$0xff] }
 0x326   :  { %v3183_v46 = vpop.f32.mrf.mxu1  ;;  %9912 = vmatmul.mubr.msk.f32.gmra.mxu1 %vm83_vm2, %v17661_v4  ;;  %v2994_v25 = vpop.f32.mrf.mxu0  ;;  %8486 = vmatmul.mubr.msk.f32.gmra.mxu0 %vm83_vm2, %v17661_v4 }
 0x327   :  { %17660 = vst [vmem:[#allocation67_spill] sm:$0xff] %v14057_v63  ;;  %v14064_v18 = vadd.f32 %v3183_v46, %v17662_v21  ;;  %v14067_v19 = vadd.f32 %v2994_v25, %v17663_v8  ;;  %9914 = vmatprep.mubr.msk.f32.mxu1 %vm10636_vm1, %v17340_v32  ;;  %3952 = vmatprep.mubr.f32.mxu0 %v17340_v32  ;;  %v17667_v25 = vld [vmem:[#allocation55_spill] sm:$0xff] }
 0x328   :  { %v9761_v13 = vpop.f32.mrf.mxu1  ;;  %v2996_v58 = vpop.f32.mrf.mxu0  ;;  %v17669_v21 = vld [vmem:[#allocation11_spill] sm:$0xff] }
 0x329   :  { %17664 = vst [vmem:[#allocation31_spill] sm:$0xff] %v14067_v19  ;;  %v14073_v63 = vadd.f32 %v2996_v58, %v17665_v12  ;;  %v17671_v12 = vld [vmem:[#allocation56_spill] sm:$0xff] }
 0x32a   :  { %v3188_v37 = vpop.f32.mrf.mxu1  ;;  %9915 = vmatmul.mubr.msk.f32.gmra.mxu1 %vm83_vm2, %v13621_v1  ;;  %v3000_v4 = vpop.f32.mrf.mxu0  ;;  %8487 = vmatmul.mubr.msk.f32.gmra.mxu0 %vm83_vm2, %v13621_v1  ;;  %v14094_v1 = vld [vmem:[%s17130_s0 + $0xd0] sm:$0xff] }
 0x32b   :  { %17666 = vst [vmem:[#allocation68_spill] sm:$0xff] %v14073_v63  ;;  %v14080_v46 = vadd.f32 %v3188_v37, %v17667_v25  ;;  %v14083_v8 = vadd.f32 %v3000_v4, %v17669_v21  ;;  %9917 = vmatprep.mubr.msk.f32.mxu1 %vm10636_vm1, %v17340_v32  ;;  %3958 = vmatprep.mubr.f32.mxu0 %v17340_v32  ;;  %v17673_v25 = vld [vmem:[#allocation14_spill] sm:$0xff] }
 0x32c   :  { %v9764_v13 = vpop.f32.mrf.mxu1  ;;  %v3002_v58 = vpop.f32.mrf.mxu0 }
 0x32d   :  { %17668 = vst [vmem:[#allocation30_spill] sm:$0xff] %v14080_v46  ;;  %17670 = vst [vmem:[#allocation69_spill] sm:$0xff] %v14083_v8  ;;  %v14089_v63 = vadd.f32 %v3002_v58, %v17671_v12  ;;  %v17674_v12 = vld [vmem:[#allocation12_spill] sm:$0xff] }
 0x32e   :  { %v3193_v19 = vpop.f32.mrf.mxu1  ;;  %9918 = vmatmul.mubr.msk.f32.gmra.mxu1 %vm83_vm2, %v14094_v1  ;;  %v3006_v37 = vpop.f32.mrf.mxu0  ;;  %8488 = vmatmul.mubr.msk.f32.gmra.mxu0 %vm83_vm2, %v14094_v1 }
 0x32f   :  { %17672 = vst [vmem:[#allocation70_spill] sm:$0xff] %v14089_v63  ;;  %v14101_v4 = vadd.f32 %v3193_v19, %v13628_v20  ;;  %v14104_v21 = vadd.f32 %v3006_v37, %v17673_v25  ;;  %9920 = vmatprep.mubr.msk.f32.mxu1 %vm10636_vm1, %v17340_v32  ;;  %3964 = vmatprep.mubr.f32.mxu0 %v17340_v32  ;;  %v17676_v19 = vld [vmem:[#allocation13_spill] sm:$0xff] }
 0x330   :  { %v9767_v13 = vpop.f32.mrf.mxu1  ;;  %v3008_v58 = vpop.f32.mrf.mxu0 }
 0x331   :  { %v14110_v63 = vadd.f32 %v3008_v58, %v17674_v12  ;;  %v17678_v58 = vld [vmem:[#allocation57_spill] sm:$0xff] }
 0x332   :  { %v3198_v8 = vpop.f32.mrf.mxu1  ;;  %9921 = vmatmul.mubr.msk.f32.gmra.mxu1 %vm83_vm2, %v13658_v7  ;;  %v3012_v46 = vpop.f32.mrf.mxu0  ;;  %8489 = vmatmul.mubr.msk.f32.gmra.mxu0 %vm83_vm2, %v13658_v7  ;;  %v14131_v7 = vld [vmem:[%s17130_s0 + $0xe0] sm:$0xff] }
 0x333   :  { %17675 = vst [vmem:[#allocation32_spill] sm:$0xff] %v14110_v63  ;;  %v14117_v20 = vadd.f32 %v3198_v8, %v13644_v48  ;;  %v14120_v37 = vadd.f32 %v3012_v46, %v17676_v19  ;;  %9923 = vmatprep.mubr.msk.f32.mxu1 %vm10636_vm1, %v17340_v32  ;;  %3970 = vmatprep.mubr.f32.mxu0 %v17340_v32 }
 0x334   :  { %v9770_v25 = vpop.f32.mrf.mxu1  ;;  %v3014_v13 = vpop.f32.mrf.mxu0 }
 0x335   :  { %17677 = vst [vmem:[#allocation71_spill] sm:$0xff] %v14120_v37  ;;  %v14126_v12 = vadd.f32 %v3014_v13, %v17678_v58  ;;  %v17680_v13 = vld [vmem:[#allocation59_spill] sm:$0xff] }
 0x336   :  { %v3203_v63 = vpop.f32.mrf.mxu1  ;;  %9924 = vmatmul.mubr.msk.f32.gmra.mxu1 %vm83_vm2, %v14131_v7  ;;  %v3018_v48 = vpop.f32.mrf.mxu0  ;;  %8490 = vmatmul.mubr.msk.f32.gmra.mxu0 %vm83_vm2, %v14131_v7 }
 0x337   :  { %17679 = vst [vmem:[#allocation33_spill] sm:$0xff] %v14126_v12  ;;  %v14138_v46 = vadd.f32 %v3203_v63, %v13665_v43  ;;  %v14141_v8 = vadd.f32 %v3018_v48, %v13668_v38  ;;  %9926 = vmatprep.mubr.msk.f32.mxu1 %vm10636_vm1, %v17340_v32  ;;  %3976 = vmatprep.mubr.f32.mxu0 %v17340_v32  ;;  %v17682_v43 = vld [vmem:[#allocation58_spill] sm:$0xff]  ;;  %v17683_v63 = vld [vmem:[#allocation15_spill] sm:$0xff] }
 0x338   :  { %v9773_v19 = vpop.f32.mrf.mxu1  ;;  %v3020_v25 = vpop.f32.mrf.mxu0 }
 0x339   :  { %v14147_v58 = vadd.f32 %v3020_v25, %v17680_v13  ;;  %v14165_v19 = vld [vmem:[%s17130_s0 + $0xf0] sm:$0xff] }
 0x33a   :  { %v3208_v12 = vpop.f32.mrf.mxu1  ;;  %9927 = vmatmul.mubr.msk.f32.gmra.mxu1 %vm83_vm2, %v13692_v56  ;;  %v3024_v37 = vpop.f32.mrf.mxu0  ;;  %8491 = vmatmul.mubr.msk.f32.gmra.mxu0 %vm83_vm2, %v13692_v56 }
 0x33b   :  { %17681 = vst [vmem:[#allocation72_spill] sm:$0xff] %v14147_v58  ;;  %v14154_v38 = vadd.f32 %v3208_v12, %v17682_v43  ;;  %v14157_v48 = vadd.f32 %v3024_v37, %v17683_v63  ;;  %9929 = vmatprep.mubr.msk.f32.mxu1 %vm10636_vm1, %v17340_v32  ;;  %3982 = vmatprep.mubr.f32.mxu0 %v17340_v32  ;;  %v17685_v58 = vld [vmem:[#allocation16_spill] sm:$0xff] }
 0x33c   :  { %v9776_v25 = vpop.f32.mrf.mxu1  ;;  %v3026_v13 = vpop.f32.mrf.mxu0 }
 0x33d   :  { %17684 = vst [vmem:[#allocation34_spill] sm:$0xff] %v14157_v48  ;;  %v14168_v56 = vadd.f32 %v3026_v13, %v17685_v58  ;;  %v17688_v13 = vld [vmem:[#allocation17_spill] sm:$0xff]  ;;  %v8587_v48 = vld [vmem:[%s17131_s4 + $0x1f8] sm:$0xff] }
 0x33e   :  { %v3213_v12 = vpop.f32.mrf.mxu1  ;;  %9930 = vmatmul.mubr.msk.f32.gmra.mxu1 %vm83_vm2, %v14165_v19  ;;  %v3030_v37 = vpop.f32.mrf.mxu0  ;;  %8492 = vmatmul.mubr.msk.f32.gmra.mxu0 %vm83_vm2, %v14165_v19 }
 0x33f   :  { %17686 = vst [vmem:[#allocation73_spill] sm:$0xff] %v14168_v56  ;;  %v14175_v43 = vadd.f32 %v3213_v12, %v13702_v15  ;;  %v14178_v63 = vadd.f32 %v3030_v37, %v13705_v49  ;;  %9936 = vmatprep.mubr.msk.f32.mxu1 %vm10636_vm1, %v17340_v32  ;;  %4321 = vmatprep.mubr.f32.mxu0 %v17340_v32  ;;  %v8619_v15 = vld [vmem:[%s17131_s4 + $0x2f8] sm:$0xff]  ;;  %v10630_v12 = vld [vmem:[%s17130_s0 + $0x48] sm:$0xff] }
 0x340   :  { %v9779_v58 = vpop.f32.mrf.mxu1  ;;  %v3032_v25 = vpop.f32.mrf.mxu0 }
 0x341   :  { %17687 = vst [vmem:[#allocation35_spill] sm:$0xff] %v14178_v63  ;;  %v14184_v56 = vadd.f32 %v3032_v25, %v17688_v13 }
 0x342   :  { %v3218_v49 = vpop.f32.mrf.mxu1  ;;  %9937 = vmatmul.mubr.msk.f32.vlgmr.msra.gmra.mxu1 %vm83_vm2, %v10630_v12  ;;  %v3036_v37 = vpop.f32.mrf.mxu0  ;;  %8525 = vmatmul.mubr.msk.f32.vlgmr.msra.gmra.mxu0 %vm83_vm2, %v10630_v12 }
 0x343   :  { %17689 = vst [vmem:[#allocation74_spill] sm:$0xff] %v14184_v56  ;;  %v14198_v58 = vadd.f32 %v3218_v49, %v13727_v39  ;;  %v14201_v25 = vadd.f32 %v3036_v37, %v13730_v42  ;;  %9939 = vmatprep.mubr.msk.f32.mxu1 %vm10636_vm1, %v17340_v32  ;;  %4327 = vmatprep.mubr.f32.mxu0 %v17340_v32  ;;  %v8586_v39 = vld [vmem:[%s17131_s4 + $0x1f0] sm:$0xff] }
 0x344   :  { %v9782_v13 = vpop.f32.mrf.mxu1  ;;  %v3038_v56 = vpop.f32.mrf.mxu0  ;;  %5189 = vmatpush1.msra.mxu0 %v8587_v48  ;;  %10006 = vmatpush3.msra.mxu1 %v8619_v15  ;;  %v8618_v42 = vld [vmem:[%s17131_s4 + $0x2f0] sm:$0xff] }
 0x345   :  { %v14207_v63 = vadd.f32 %v3038_v56, %v13738_v60  ;;  %5190 = vmatprep.subr.mxu0 %v17340_v32  ;;  %10007 = vmatprep.subr.mxu1 %v17340_v32 }
 0x346   :  { %v3223_v49 = vpop.f32.mrf.mxu1  ;;  %9940 = vmatmul.mubr.msk.f32.gmra.mxu1 %vm83_vm2, %v13768_v17  ;;  %v3042_v48 = vpop.f32.mrf.mxu0  ;;  %8526 = vmatmul.mubr.msk.f32.gmra.mxu0 %vm83_vm2, %v13768_v17 }
 0x347   :  { %17690 = vst [vmem:[#allocation39_spill] sm:$0xff] %v14207_v63  ;;  %v14222_v60 = vadd.f32 %v3223_v49, %v13752_v22  ;;  %v14225_v56 = vadd.f32 %v3042_v48, %v13755_v57  ;;  %9942 = vmatprep.mubr.msk.f32.mxu1 %vm10636_vm1, %v17340_v32  ;;  %4333 = vmatprep.mubr.f32.mxu0 %v17340_v32  ;;  %v8585_v22 = vld [vmem:[%s17131_s4 + $0x1e8] sm:$0xff] }
 0x348   :  { %v9785_v15 = vpop.f32.mrf.mxu1  ;;  %v3044_v12 = vpop.f32.mrf.mxu0  ;;  %5191 = vmatpush1.msra.mxu0 %v8586_v39  ;;  %10008 = vmatpush3.msra.mxu1 %v8618_v42  ;;  %v8617_v57 = vld [vmem:[%s17131_s4 + $0x2e8] sm:$0xff] }
 0x349   :  { %v14231_v37 = vadd.f32 %v3044_v12, %v13761_v5  ;;  %5192 = vmatprep.subr.mxu0 %v17340_v32  ;;  %10009 = vmatprep.subr.mxu1 %v17340_v32 }
 0x34a   :  { %v3584_v17 = vpop.f32.mrf.mxu1  ;;  %9943 = vmatmul.mubr.msk.f32.gmra.mxu1 %vm83_vm2, %v13789_v35  ;;  %v3381_v13 = vpop.f32.mrf.mxu0  ;;  %8527 = vmatmul.mubr.msk.f32.gmra.mxu0 %vm83_vm2, %v13789_v35 }
 0x34b   :  { %17691 = vst [vmem:[#allocation36_spill] sm:$0xff] %v14231_v37  ;;  %v14246_v5 = vadd.f32 %v3584_v17, %v13775_v45  ;;  %v14249_v39 = vadd.f32 %v3381_v13, %v13778_v6  ;;  %9945 = vmatprep.mubr.msk.f32.mxu1 %vm10636_vm1, %v17340_v32  ;;  %4339 = vmatprep.mubr.f32.mxu0 %v17340_v32  ;;  %v8584_v45 = vld [vmem:[%s17131_s4 + $0x1e0] sm:$0xff]  ;;  %v17692_v17 = vld [vmem:[#allocation60_spill] sm:$0xff] }
 0x34c   :  { %v9792_v42 = vpop.f32.mrf.mxu1  ;;  %v3383_v49 = vpop.f32.mrf.mxu0  ;;  %5193 = vmatpush1.msra.mxu0 %v8585_v22  ;;  %10010 = vmatpush3.msra.mxu1 %v8617_v57  ;;  %v8616_v6 = vld [vmem:[%s17131_s4 + $0x2e0] sm:$0xff] }
 0x34d   :  { %v14255_v48 = vadd.f32 %v3383_v49, %v13784_v53  ;;  %5194 = vmatprep.subr.mxu0 %v17340_v32  ;;  %10011 = vmatprep.subr.mxu1 %v17340_v32 }
 0x34e   :  { %v3589_v35 = vpop.f32.mrf.mxu1  ;;  %9946 = vmatmul.mubr.msk.f32.gmra.mxu1 %vm83_vm2, %v13810_v61  ;;  %v3387_v15 = vpop.f32.mrf.mxu0  ;;  %8528 = vmatmul.mubr.msk.f32.gmra.mxu0 %vm83_vm2, %v13810_v61 }
 0x34f   :  { %v14270_v53 = vadd.f32 %v3589_v35, %v13796_v31  ;;  %v14273_v12 = vadd.f32 %v3387_v15, %v13799_v0  ;;  %9948 = vmatprep.mubr.msk.f32.mxu1 %vm10636_vm1, %v17340_v32  ;;  %4345 = vmatprep.mubr.f32.mxu0 %v17340_v32  ;;  %v8583_v31 = vld [vmem:[%s17131_s4 + $0x1d8] sm:$0xff] }
 0x350   :  { %v9795_v22 = vpop.f32.mrf.mxu1  ;;  %v3389_v57 = vpop.f32.mrf.mxu0  ;;  %5195 = vmatpush1.msra.mxu0 %v8584_v45  ;;  %10012 = vmatpush3.msra.mxu1 %v8616_v6  ;;  %v8615_v0 = vld [vmem:[%s17131_s4 + $0x2d8] sm:$0xff] }
 0x351   :  { %v14279_v13 = vadd.f32 %v3389_v57, %v17692_v17  ;;  %5196 = vmatprep.subr.mxu0 %v17340_v32  ;;  %10013 = vmatprep.subr.mxu1 %v17340_v32  ;;  %v17693_v15 = vld [vmem:[#allocation18_spill] sm:$0xff] }
 0x352   :  { %v3594_v61 = vpop.f32.mrf.mxu1  ;;  %9949 = vmatmul.mubr.msk.f32.gmra.mxu1 %vm83_vm2, %v13831_v3  ;;  %v3393_v42 = vpop.f32.mrf.mxu0  ;;  %8529 = vmatmul.mubr.msk.f32.gmra.mxu0 %vm83_vm2, %v13831_v3  ;;  %v8582_v3 = vld [vmem:[%s17131_s4 + $0x1d0] sm:$0xff] }
 0x353   :  { %v14294_v49 = vadd.f32 %v3594_v61, %v13817_v23  ;;  %v14297_v45 = vadd.f32 %v3393_v42, %v13820_v2  ;;  %9951 = vmatprep.mubr.msk.f32.mxu1 %vm10636_vm1, %v17340_v32  ;;  %4351 = vmatprep.mubr.f32.mxu0 %v17340_v32  ;;  %v8614_v23 = vld [vmem:[%s17131_s4 + $0x2d0] sm:$0xff]  ;;  %v17694_v42 = vld [vmem:[#allocation19_spill] sm:$0xff] }
 0x354   :  { %v9798_v6 = vpop.f32.mrf.mxu1  ;;  %v3395_v35 = vpop.f32.mrf.mxu0  ;;  %5197 = vmatpush1.msra.mxu0 %v8583_v31  ;;  %10014 = vmatpush3.msra.mxu1 %v8615_v0 }
 0x355   :  { %v14303_v22 = vadd.f32 %v3395_v35, %v17693_v15  ;;  %5198 = vmatprep.subr.mxu0 %v17340_v32  ;;  %10015 = vmatprep.subr.mxu1 %v17340_v32 }
 0x356   :  { %v3599_v2 = vpop.f32.mrf.mxu1  ;;  %9952 = vmatmul.mubr.msk.f32.gmra.mxu1 %vm83_vm2, %v13852_v62  ;;  %v3399_v57 = vpop.f32.mrf.mxu0  ;;  %8530 = vmatmul.mubr.msk.f32.gmra.mxu0 %vm83_vm2, %v13852_v62  ;;  %v8581_v62 = vld [vmem:[%s17131_s4 + $0x1c8] sm:$0xff] }
 0x357   :  { %v14318_v17 = vadd.f32 %v3599_v2, %v13838_v26  ;;  %v14321_v31 = vadd.f32 %v3399_v57, %v13841_v11  ;;  %9954 = vmatprep.mubr.msk.f32.mxu1 %vm10636_vm1, %v17340_v32  ;;  %4357 = vmatprep.mubr.f32.mxu0 %v17340_v32  ;;  %v8613_v26 = vld [vmem:[%s17131_s4 + $0x2c8] sm:$0xff]  ;;  %v17696_v57 = vld [vmem:[#allocation61_spill] sm:$0xff] }
 0x358   :  { %v9801_v0 = vpop.f32.mrf.mxu1  ;;  %v3401_v61 = vpop.f32.mrf.mxu0  ;;  %5199 = vmatpush1.msra.mxu0 %v8582_v3  ;;  %10016 = vmatpush3.msra.mxu1 %v8614_v23 }
 0x359   :  { %v14327_v6 = vadd.f32 %v3401_v61, %v17694_v42  ;;  %5200 = vmatprep.subr.mxu0 %v17340_v32  ;;  %10017 = vmatprep.subr.mxu1 %v17340_v32 }
 0x35a   :  { %v3604_v11 = vpop.f32.mrf.mxu1  ;;  %9955 = vmatmul.mubr.msk.f32.gmra.mxu1 %vm83_vm2, %v13873_v50  ;;  %v3405_v35 = vpop.f32.mrf.mxu0  ;;  %8531 = vmatmul.mubr.msk.f32.gmra.mxu0 %vm83_vm2, %v13873_v50  ;;  %v8580_v50 = vld [vmem:[%s17131_s4 + $0x1c0] sm:$0xff] }
 0x35b   :  { %17695 = vst [vmem:[#allocation75_spill] sm:$0xff] %v14327_v6  ;;  %v14342_v15 = vadd.f32 %v3604_v11, %v13859_v33  ;;  %v14345_v3 = vadd.f32 %v3405_v35, %v13862_v40  ;;  %9957 = vmatprep.mubr.msk.f32.mxu1 %vm10636_vm1, %v17340_v32  ;;  %4363 = vmatprep.mubr.f32.mxu0 %v17340_v32  ;;  %v8612_v33 = vld [vmem:[%s17131_s4 + $0x2c0] sm:$0xff]  ;;  %v17698_v35 = vld [vmem:[#allocation20_spill] sm:$0xff] }
 0x35c   :  { %v9804_v23 = vpop.f32.mrf.mxu1  ;;  %v3407_v2 = vpop.f32.mrf.mxu0  ;;  %5201 = vmatpush1.msra.mxu0 %v8581_v62  ;;  %10018 = vmatpush3.msra.mxu1 %v8613_v26 }
 0x35d   :  { %v14351_v0 = vadd.f32 %v3407_v2, %v17696_v57  ;;  %5202 = vmatprep.subr.mxu0 %v17340_v32  ;;  %10019 = vmatprep.subr.mxu1 %v17340_v32 }
 0x35e   :  { %v3609_v40 = vpop.f32.mrf.mxu1  ;;  %9958 = vmatmul.mubr.msk.f32.gmra.mxu1 %vm83_vm2, %v13894_v10  ;;  %v3411_v61 = vpop.f32.mrf.mxu0  ;;  %8532 = vmatmul.mubr.msk.f32.gmra.mxu0 %vm83_vm2, %v13894_v10  ;;  %v8579_v10 = vld [vmem:[%s17131_s4 + $0x1b8] sm:$0xff] }
 0x35f   :  { %17697 = vst [vmem:[#allocation37_spill] sm:$0xff] %v14351_v0  ;;  %v14366_v42 = vadd.f32 %v3609_v40, %v13880_v28  ;;  %v14369_v62 = vadd.f32 %v3411_v61, %v13883_v30  ;;  %9960 = vmatprep.mubr.msk.f32.mxu1 %vm10636_vm1, %v17340_v32  ;;  %4369 = vmatprep.mubr.f32.mxu0 %v17340_v32 }
 0x360   :  { %v9807_v26 = vpop.f32.mrf.mxu1  ;;  %v3413_v11 = vpop.f32.mrf.mxu0  ;;  %5203 = vmatpush1.msra.mxu0 %v8580_v50  ;;  %10020 = vmatpush3.msra.mxu1 %v8612_v33  ;;  %v8611_v50 = vld [vmem:[%s17131_s4 + $0x2b8] sm:$0xff] }
 0x361   :  { %v14375_v23 = vadd.f32 %v3413_v11, %v17698_v35  ;;  %5204 = vmatprep.subr.mxu0 %v17340_v32  ;;  %10021 = vmatprep.subr.mxu1 %v17340_v32 }
 0x362   :  { %v3614_v28 = vpop.f32.mrf.mxu1  ;;  %9961 = vmatmul.mubr.msk.f32.gmra.mxu1 %vm83_vm2, %v13915_v36  ;;  %v3417_v30 = vpop.f32.mrf.mxu0  ;;  %8533 = vmatmul.mubr.msk.f32.gmra.mxu0 %vm83_vm2, %v13915_v36  ;;  %v17700_v36 = vld [vmem:[#allocation22_spill] sm:$0xff] }
 0x363   :  { %17699 = vst [vmem:[#allocation76_spill] sm:$0xff] %v14375_v23  ;;  %v14387_v2 = vadd.f32 %v3614_v28, %v13901_v34  ;;  %v14390_v57 = vadd.f32 %v3417_v30, %v13904_v29  ;;  %9963 = vmatprep.mubr.msk.f32.mxu1 %vm10636_vm1, %v17340_v32  ;;  %4375 = vmatprep.mubr.f32.mxu0 %v17340_v32  ;;  %v8578_v34 = vld [vmem:[%s17131_s4 + $0x1b0] sm:$0xff] }
 0x364   :  { %v9810_v33 = vpop.f32.mrf.mxu1  ;;  %v3419_v40 = vpop.f32.mrf.mxu0  ;;  %5205 = vmatpush1.msra.mxu0 %v8579_v10  ;;  %10022 = vmatpush3.msra.mxu1 %v8611_v50  ;;  %v8610_v30 = vld [vmem:[%s17131_s4 + $0x2b0] sm:$0xff]  ;;  %v17702_v50 = vld [vmem:[#allocation62_spill] sm:$0xff] }
 0x365   :  { %v14399_v61 = vadd.f32 %v3419_v40, %v17700_v36  ;;  %5206 = vmatprep.subr.mxu0 %v17340_v32  ;;  %10023 = vmatprep.subr.mxu1 %v17340_v32 }
 0x366   :  { %v3619_v29 = vpop.f32.mrf.mxu1  ;;  %9964 = vmatmul.mubr.msk.f32.gmra.mxu1 %vm83_vm2, %v13936_v16  ;;  %v3423_v26 = vpop.f32.mrf.mxu0  ;;  %8534 = vmatmul.mubr.msk.f32.gmra.mxu0 %vm83_vm2, %v13936_v16 }
 0x367   :  { %17701 = vst [vmem:[#allocation38_spill] sm:$0xff] %v14399_v61  ;;  %v14411_v11 = vadd.f32 %v3619_v29, %v13922_v54  ;;  %v14414_v35 = vadd.f32 %v3423_v26, %v13925_v47  ;;  %9966 = vmatprep.mubr.msk.f32.mxu1 %vm10636_vm1, %v17340_v32  ;;  %4381 = vmatprep.mubr.f32.mxu0 %v17340_v32  ;;  %v8577_v54 = vld [vmem:[%s17131_s4 + $0x1a8] sm:$0xff]  ;;  %v17704_v26 = vld [vmem:[#allocation21_spill] sm:$0xff] }
 0x368   :  { %v9813_v10 = vpop.f32.mrf.mxu1  ;;  %v3425_v28 = vpop.f32.mrf.mxu0  ;;  %5207 = vmatpush1.msra.mxu0 %v8578_v34  ;;  %10024 = vmatpush3.msra.mxu1 %v8610_v30 }
 0x369   :  { %v14423_v16 = vadd.f32 %v3425_v28, %v17702_v50  ;;  %5208 = vmatprep.subr.mxu0 %v17340_v32  ;;  %10025 = vmatprep.subr.mxu1 %v17340_v32  ;;  %v8609_v50 = vld [vmem:[%s17131_s4 + $0x2a8] sm:$0xff] }
 0x36a   :  { %v3624_v47 = vpop.f32.mrf.mxu1  ;;  %9967 = vmatmul.mubr.msk.f32.gmra.mxu1 %vm83_vm2, %v13957_v24  ;;  %v3429_v33 = vpop.f32.mrf.mxu0  ;;  %8535 = vmatmul.mubr.msk.f32.gmra.mxu0 %vm83_vm2, %v13957_v24  ;;  %v8576_v24 = vld [vmem:[%s17131_s4 + $0x1a0] sm:$0xff] }
 0x36b   :  { %17703 = vst [vmem:[#allocation77_spill] sm:$0xff] %v14423_v16  ;;  %v14434_v40 = vadd.f32 %v3624_v47, %v13943_v51  ;;  %v14437_v36 = vadd.f32 %v3429_v33, %v13946_v9  ;;  %9969 = vmatprep.mubr.msk.f32.mxu1 %vm10636_vm1, %v17340_v32  ;;  %4387 = vmatprep.mubr.f32.mxu0 %v17340_v32 }
 0x36c   :  { %v9816_v34 = vpop.f32.mrf.mxu1  ;;  %v3431_v29 = vpop.f32.mrf.mxu0  ;;  %5209 = vmatpush1.msra.mxu0 %v8577_v54  ;;  %10026 = vmatpush3.msra.mxu1 %v8609_v50  ;;  %v17708_v50 = vld [vmem:[#allocation23_spill] sm:$0xff] }
 0x36d   :  { %v14444_v10 = vadd.f32 %v3431_v29, %v17704_v26  ;;  %5210 = vmatprep.subr.mxu0 %v17340_v32  ;;  %10027 = vmatprep.subr.mxu1 %v17340_v32 }
 0x36e   :  { %v3629_v51 = vpop.f32.mrf.mxu1  ;;  %9970 = vmatmul.mubr.msk.f32.gmra.mxu1 %vm83_vm2, %v13978_v41  ;;  %v3435_v9 = vpop.f32.mrf.mxu0  ;;  %8536 = vmatmul.mubr.msk.f32.gmra.mxu0 %vm83_vm2, %v13978_v41  ;;  %v17706_v41 = vld [vmem:[#allocation63_spill] sm:$0xff] }
 0x36f   :  { %17705 = vst [vmem:[#allocation78_spill] sm:$0xff] %v14444_v10  ;;  %v14455_v28 = vadd.f32 %v3629_v51, %v13964_v52  ;;  %v14458_v30 = vadd.f32 %v3435_v9, %v13967_v55  ;;  %9972 = vmatprep.mubr.msk.f32.mxu1 %vm10636_vm1, %v17340_v32  ;;  %4393 = vmatprep.mubr.f32.mxu0 %v17340_v32  ;;  %v8575_v52 = vld [vmem:[%s17131_s4 + $0x198] sm:$0xff]  ;;  %v8608_v9 = vld [vmem:[%s17131_s4 + $0x2a0] sm:$0xff] }
 0x370   :  { %v9819_v54 = vpop.f32.mrf.mxu1  ;;  %v3437_v47 = vpop.f32.mrf.mxu0  ;;  %5211 = vmatpush1.msra.mxu0 %v8576_v24  ;;  %10028 = vmatpush3.msra.mxu1 %v8608_v9  ;;  %v17713_v9 = vld [vmem:[#allocation25_spill] sm:$0xff] }
 0x371   :  { %v14467_v33 = vadd.f32 %v3437_v47, %v17706_v41  ;;  %5212 = vmatprep.subr.mxu0 %v17340_v32  ;;  %v17710_v54 = vld [vmem:[#allocation65_spill] sm:$0xff]  ;;  %v17711_v41 = vld [vmem:[#allocation64_spill] sm:$0xff]  ;;  %10029 = vmatprep.subr.mxu1 %v17340_v32 }
 0x372   :  { %v3634_v55 = vpop.f32.mrf.mxu1  ;;  %9973 = vmatmul.mubr.msk.f32.gmra.mxu1 %vm83_vm2, %v13999_v27  ;;  %v3441_v34 = vpop.f32.mrf.mxu0  ;;  %8537 = vmatmul.mubr.msk.f32.gmra.mxu0 %vm83_vm2, %v13999_v27 }
 0x373   :  { %17707 = vst [vmem:[#allocation40_spill] sm:$0xff] %v14467_v33  ;;  %v14479_v29 = vadd.f32 %v3634_v55, %v13985_v14  ;;  %v14482_v26 = vadd.f32 %v3441_v34, %v13988_v59  ;;  %9975 = vmatprep.mubr.msk.f32.mxu1 %vm10636_vm1, %v17340_v32  ;;  %4399 = vmatprep.mubr.f32.mxu0 %v17340_v32  ;;  %v8574_v14 = vld [vmem:[%s17131_s4 + $0x190] sm:$0xff]  ;;  %v17712_v55 = vld [vmem:[#allocation24_spill] sm:$0xff] }
 0x374   :  { %v9822_v24 = vpop.f32.mrf.mxu1  ;;  %v3443_v51 = vpop.f32.mrf.mxu0  ;;  %5213 = vmatpush1.msra.mxu0 %v8575_v52 }
 0x375   :  { %v14491_v27 = vadd.f32 %v3443_v51, %v17708_v50  ;;  %5214 = vmatprep.subr.mxu0 %v17340_v32 }
 0x376   :  { %v3639_v59 = vpop.f32.mrf.mxu1  ;;  %9976 = vmatmul.mubr.msk.f32.gmra.mxu1 %vm83_vm2, %v17710_v54  ;;  %v3447_v47 = vpop.f32.mrf.mxu0  ;;  %8538 = vmatmul.mubr.msk.f32.gmra.mxu0 %vm83_vm2, %v17710_v54  ;;  %v8607_v54 = vld [vmem:[%s17131_s4 + $0x298] sm:$0xff] }
 0x377   :  { %17709 = vst [vmem:[#allocation79_spill] sm:$0xff] %v14491_v27  ;;  %v14502_v52 = vadd.f32 %v3639_v59, %v17711_v41  ;;  %v14505_v34 = vadd.f32 %v3447_v47, %v17712_v55  ;;  %9978 = vmatprep.mubr.msk.f32.mxu1 %vm10636_vm1, %v17340_v32  ;;  %4405 = vmatprep.mubr.f32.mxu0 %v17340_v32  ;;  %v8573_v59 = vld [vmem:[%s17131_s4 + $0x188] sm:$0xff]  ;;  %v17715_v41 = vld [vmem:[#allocation27_spill] sm:$0xff]  ;;  %v17716_v55 = vld [vmem:[#allocation26_spill] sm:$0xff] }
 0x378   :  { %v9825_v24 = vpop.f32.mrf.mxu1  ;;  %v3449_v51 = vpop.f32.mrf.mxu0  ;;  %5215 = vmatpush1.msra.mxu0 %v8574_v14  ;;  %10030 = vmatpush3.msra.mxu1 %v8607_v54  ;;  %v8606_v54 = vld [vmem:[%s17131_s4 + $0x290] sm:$0xff] }
 0x379   :  { %v14512_v50 = vadd.f32 %v3449_v51, %v17713_v9  ;;  %5216 = vmatprep.subr.mxu0 %v17340_v32  ;;  %v17717_v51 = vld [vmem:[#allocation66_spill] sm:$0xff]  ;;  %10031 = vmatprep.subr.mxu1 %v17340_v32 }
 0x37a   :  { %v3644_v47 = vpop.f32.mrf.mxu1  ;;  %9979 = vmatmul.mubr.msk.f32.gmra.mxu1 %vm83_vm2, %v17715_v41  ;;  %v3453_v14 = vpop.f32.mrf.mxu0  ;;  %8539 = vmatmul.mubr.msk.f32.gmra.mxu0 %vm83_vm2, %v17715_v41 }
 0x37b   :  { %17714 = vst [vmem:[#allocation41_spill] sm:$0xff] %v14512_v50  ;;  %v14526_v24 = vadd.f32 %v3644_v47, %v17716_v55  ;;  %v14529_v9 = vadd.f32 %v3453_v14, %v17717_v51  ;;  %9981 = vmatprep.mubr.msk.f32.mxu1 %vm10636_vm1, %v17340_v32  ;;  %4411 = vmatprep.mubr.f32.mxu0 %v17340_v32  ;;  %v17718_v50 = vld [vmem:[#allocation29_spill] sm:$0xff]  ;;  %v8572_v47 = vld [vmem:[%s17131_s4 + $0x180] sm:$0xff] }
 0x37c   :  { %v9828_v37 = vpop.f32.mrf.mxu1  ;;  %v3455_v63 = vpop.f32.mrf.mxu0  ;;  %5217 = vmatpush1.msra.mxu0 %v8573_v59  ;;  %v10631_v14 = vld [vmem:[%s17130_s0 + $0xc0] sm:$0xff]  ;;  %10032 = vmatpush3.msra.mxu1 %v8606_v54 }
 0x37d   :  { %v14535_v27 = vadd.f32 %v3455_v63, %v17718_v50  ;;  %5218 = vmatprep.subr.mxu0 %v17340_v32  ;;  %v17720_v50 = vld [vmem:[#allocation28_spill] sm:$0xff]  ;;  %10033 = vmatprep.subr.mxu1 %v17340_v32 }
 0x37e   :  { %v3649_v41 = vpop.f32.mrf.mxu1  ;;  %9982 = vmatmul.mubr.msk.f32.gmra.mxu1 %vm83_vm2, %v10631_v14  ;;  %v3459_v37 = vpop.f32.mrf.mxu0  ;;  %8540 = vmatmul.mubr.msk.f32.gmra.mxu0 %vm83_vm2, %v10631_v14  ;;  %v10632_v14 = vld [vmem:[%s17130_s0 + $0xc8] sm:$0xff] }
 0x37f   :  { %17719 = vst [vmem:[#allocation80_spill] sm:$0xff] %v14535_v27  ;;  %v14548_v63 = vadd.f32 %v3649_v41, %v14048_v44  ;;  %v14551_v59 = vadd.f32 %v3459_v37, %v17720_v50  ;;  %9984 = vmatprep.mubr.msk.f32.mxu1 %vm10636_vm1, %v17340_v32  ;;  %4417 = vmatprep.mubr.f32.mxu0 %v17340_v32  ;;  %v8603_v44 = vld [vmem:[%s17131_s4 + $0x278] sm:$0xff]  ;;  %v17722_v50 = vld [vmem:[#allocation31_spill] sm:$0xff] }
 0x380   :  { %v9831_v55 = vpop.f32.mrf.mxu1  ;;  %v14559_v51 = vpop.f32.mrf.mxu0  ;;  %5219 = vmatpush1.msra.mxu0 %v8572_v47 }
 0x381   :  { %17721 = vst [vmem:[#allocation42_spill] sm:$0xff] %v14559_v51  ;;  %5220 = vmatprep.subr.mxu0 %v17340_v32 }
 0x382   :  { %v3654_v41 = vpop.f32.mrf.mxu1  ;;  %9985 = vmatmul.mubr.msk.f32.gmra.mxu1 %vm83_vm2, %v10632_v14  ;;  %v3465_v37 = vpop.f32.mrf.mxu0  ;;  %8541 = vmatmul.mubr.msk.f32.gmra.mxu0 %vm83_vm2, %v10632_v14  ;;  %v8602_v14 = vld [vmem:[%s17131_s4 + $0x270] sm:$0xff] }
 0x383   :  { %v14572_v47 = vadd.f32 %v3654_v41, %v14064_v18  ;;  %v14575_v54 = vadd.f32 %v3465_v37, %v17722_v50  ;;  %9987 = vmatprep.mubr.msk.f32.mxu1 %vm10636_vm1, %v17340_v32  ;;  %4423 = vmatprep.mubr.f32.mxu0 %v17340_v32  ;;  %v17724_v37 = vld [vmem:[#allocation30_spill] sm:$0xff] }
 0x384   :  { %v9834_v55 = vpop.f32.mrf.mxu1  ;;  %v14580_v51 = vpop.f32.mrf.mxu0  ;;  %5221 = vmatpush2.msra.mxu0 %v8603_v44  ;;  %v8605_v44 = vld [vmem:[%s17131_s4 + $0x288] sm:$0xff] }
 0x385   :  { %17723 = vst [vmem:[#allocation81_spill] sm:$0xff] %v14580_v51  ;;  %5222 = vmatprep.subr.mxu0 %v17340_v32  ;;  %v17725_v55 = vld [vmem:[#allocation69_spill] sm:$0xff]  ;;  %10034 = vmatpush3.msra.mxu1 %v8605_v44 }
 0x386   :  { %v3659_v18 = vpop.f32.mrf.mxu1  ;;  %9988 = vmatmul.mubr.msk.f32.gmra.mxu1 %vm83_vm2, %v14094_v1  ;;  %v3471_v41 = vpop.f32.mrf.mxu0  ;;  %8542 = vmatmul.mubr.msk.f32.gmra.mxu0 %vm83_vm2, %v14094_v1  ;;  %v8601_v1 = vld [vmem:[%s17131_s4 + $0x268] sm:$0xff] }
 0x387   :  { %v14591_v50 = vadd.f32 %v3659_v18, %v17724_v37  ;;  %v14594_v51 = vadd.f32 %v3471_v41, %v17725_v55  ;;  %9990 = vmatprep.mubr.msk.f32.mxu1 %vm10636_vm1, %v17340_v32  ;;  %4429 = vmatprep.mubr.f32.mxu0 %v17340_v32  ;;  %v8604_v18 = vld [vmem:[%s17131_s4 + $0x280] sm:$0xff] }
 0x388   :  { %v9837_v27 = vpop.f32.mrf.mxu1  ;;  %v14602_v33 = vpop.f32.mrf.mxu0  ;;  %5223 = vmatpush2.msra.mxu0 %v8602_v14  ;;  %10035 = vmatprep.subr.mxu1 %v17340_v32 }
 0x389   :  { %17726 = vst [vmem:[#allocation43_spill] sm:$0xff] %v14602_v33  ;;  %5224 = vmatprep.subr.mxu0 %v17340_v32  ;;  %v10633_v27 = vld [vmem:[%s17130_s0 + $0xd8] sm:$0xff]  ;;  %10036 = vmatpush3.msra.mxu1 %v8604_v18 }
 0x38a   :  { %v3664_v41 = vpop.f32.mrf.mxu1  ;;  %9991 = vmatmul.mubr.msk.f32.gmra.mxu1 %vm83_vm2, %v10633_v27  ;;  %v3477_v14 = vpop.f32.mrf.mxu0  ;;  %8543 = vmatmul.mubr.msk.f32.gmra.mxu0 %vm83_vm2, %v10633_v27 }
 0x38b   :  { %v14618_v37 = vadd.f32 %v3664_v41, %v14101_v4  ;;  %v14621_v55 = vadd.f32 %v3477_v14, %v14104_v21  ;;  %9993 = vmatprep.mubr.msk.f32.mxu1 %vm10636_vm1, %v17340_v32  ;;  %4435 = vmatprep.mubr.f32.mxu0 %v17340_v32  ;;  %v8600_v4 = vld [vmem:[%s17131_s4 + $0x260] sm:$0xff] }
 0x38c   :  { %v9840_v44 = vpop.f32.mrf.mxu1  ;;  %v14626_v33 = vpop.f32.mrf.mxu0  ;;  %5225 = vmatpush2.msra.mxu0 %v8601_v1  ;;  %10100 = vmatprep.subr.mxu1 %v17340_v32  ;;  %v17728_v1 = vld [vmem:[#allocation71_spill] sm:$0xff] }
 0x38d   :  { %17727 = vst [vmem:[#allocation45_spill] sm:$0xff] %v14626_v33  ;;  %5226 = vmatprep.subr.mxu0 %v17340_v32 }
 0x38e   :  { %v3669_v21 = vpop.f32.mrf.mxu1  ;;  %9994 = vmatmul.mubr.msk.f32.gmra.mxu1 %vm83_vm2, %v14131_v7  ;;  %v3483_v41 = vpop.f32.mrf.mxu0  ;;  %8544 = vmatmul.mubr.msk.f32.gmra.mxu0 %vm83_vm2, %v14131_v7  ;;  %v8599_v7 = vld [vmem:[%s17131_s4 + $0x258] sm:$0xff] }
 0x38f   :  { %v14638_v27 = vadd.f32 %v3669_v21, %v14117_v20  ;;  %v14641_v18 = vadd.f32 %v3483_v41, %v17728_v1  ;;  %9996 = vmatprep.mubr.msk.f32.mxu1 %vm10636_vm1, %v17340_v32  ;;  %4441 = vmatprep.mubr.f32.mxu0 %v17340_v32  ;;  %v10634_v21 = vld [vmem:[%s17130_s0 + $0xe8] sm:$0xff] }
 0x390   :  { %v9843_v14 = vpop.f32.mrf.mxu1  ;;  %v14646_v44 = vpop.f32.mrf.mxu0  ;;  %5227 = vmatpush2.msra.mxu0 %v8600_v4 }
 0x391   :  { %17729 = vst [vmem:[#allocation82_spill] sm:$0xff] %v14646_v44  ;;  %5228 = vmatprep.subr.mxu0 %v17340_v32 }
 0x392   :  { %v3674_v20 = vpop.f32.mrf.mxu1  ;;  %9997 = vmatmul.mubr.msk.f32.gmra.mxu1 %vm83_vm2, %v10634_v21  ;;  %v3489_v41 = vpop.f32.mrf.mxu0  ;;  %8545 = vmatmul.mubr.msk.f32.gmra.mxu0 %vm83_vm2, %v10634_v21  ;;  %v8598_v21 = vld [vmem:[%s17131_s4 + $0x250] sm:$0xff] }
 0x393   :  { %v14658_v1 = vadd.f32 %v3674_v20, %v14138_v46  ;;  %v14661_v4 = vadd.f32 %v3489_v41, %v14141_v8  ;;  %9999 = vmatprep.mubr.msk.f32.mxu1 %vm10636_vm1, %v17340_v32  ;;  %4447 = vmatprep.mubr.f32.mxu0 %v17340_v32  ;;  %v17731_v41 = vld [vmem:[#allocation34_spill] sm:$0xff] }
 0x394   :  { %v9846_v14 = vpop.f32.mrf.mxu1  ;;  %v14666_v44 = vpop.f32.mrf.mxu0  ;;  %5229 = vmatpush2.msra.mxu0 %v8599_v7  ;;  %v69_v7 = vld [vmem:[%s17130_s0 + $0xf8] sm:$0xff] }
 0x395   :  { %17730 = vst [vmem:[#allocation44_spill] sm:$0xff] %v14666_v44  ;;  %5230 = vmatprep.subr.mxu0 %v17340_v32 }
 0x396   :  { %v3679_v46 = vpop.f32.mrf.mxu1  ;;  %10000 = vmatmul.mubr.msk.f32.gmra.mxu1 %vm83_vm2, %v14165_v19  ;;  %v3495_v8 = vpop.f32.mrf.mxu0  ;;  %8546 = vmatmul.mubr.msk.f32.gmra.mxu0 %vm83_vm2, %v14165_v19 }
 0x397   :  { %v14677_v20 = vadd.f32 %v3679_v46, %v14154_v38  ;;  %v14680_v14 = vadd.f32 %v3495_v8, %v17731_v41  ;;  %10002 = vmatprep.mubr.msk.f32.mxu1 %vm10636_vm1, %v17340_v32  ;;  %4453 = vmatprep.mubr.f32.mxu0 %v17340_v32  ;;  %v8597_v38 = vld [vmem:[%s17131_s4 + $0x248] sm:$0xff]  ;;  %v8596_v8 = vld [vmem:[%s17131_s4 + $0x240] sm:$0xff] }
 0x398   :  { %v9849_v44 = vpop.f32.mrf.mxu1  ;;  %v14688_v33 = vpop.f32.mrf.mxu0  ;;  %5231 = vmatpush2.msra.mxu0 %v8598_v21  ;;  %v17733_v21 = vld [vmem:[#allocation35_spill] sm:$0xff] }
 0x399   :  { %17732 = vst [vmem:[#allocation83_spill] sm:$0xff] %v14688_v33  ;;  %5232 = vmatprep.subr.mxu0 %v17340_v32 }
 0x39a   :  { %v3684_v19 = vpop.f32.mrf.mxu1  ;;  %10003 = vmatmul.mubr.msk.f32.gmra.mxu1 %vm83_vm2, %v69_v7  ;;  %v3501_v46 = vpop.f32.mrf.mxu0  ;;  %8547 = vmatmul.mubr.msk.f32.gmra.mxu0 %vm83_vm2, %v69_v7  ;;  %v8595_v7 = vld [vmem:[%s17131_s4 + $0x238] sm:$0xff] }
 0x39b   :  { %v14700_v44 = vadd.f32 %v3684_v19, %v14175_v43  ;;  %v14703_v41 = vadd.f32 %v3501_v46, %v17733_v21  ;;  %5233 = vmatpush2.msra.mxu0 %v8597_v38  ;;  %10037 = vmatprep.mubr.msk.f32.mxu1 %vm10636_vm1, %v17340_v32  ;;  %v8594_v38 = vld [vmem:[%s17131_s4 + $0x230] sm:$0xff] }
 0x39c   :  { %v9852_v33 = vpop.f32.mrf.mxu1  ;;  %v14707_v10 = vpop.f32.mrf.mxu0  ;;  %5234 = vmatprep.subr.mxu0 %v17340_v32 }
 0x39d   :  { %17734 = vst [vmem:[#allocation84_spill] sm:$0xff] %v14707_v10  ;;  %5235 = vmatpush2.msra.mxu0 %v8596_v8  ;;  %v8593_v8 = vld [vmem:[%s17131_s4 + $0x228] sm:$0xff] }
 0x39e   :  { %v3689_v16 = vpop.f32.mrf.mxu1  ;;  %v3507_v43 = vpop.f32.mrf.mxu0  ;;  %5236 = vmatprep.subr.mxu0 %v17340_v32 }
 0x39f   :  { %v14718_v19 = vadd.f32 %v3689_v16, %v14198_v58  ;;  %v14721_v33 = vadd.f32 %v3507_v43, %v14201_v25  ;;  %5237 = vmatpush2.msra.mxu0 %v8595_v7  ;;  %v8592_v58 = vld [vmem:[%s17131_s4 + $0x220] sm:$0xff] }
 0x3a0   :  { %v9855_v46 = vpop.f32.mrf.mxu1  ;;  %v14723_v21 = vpop.f32.mrf.mxu0  ;;  %5238 = vmatprep.subr.mxu0 %v17340_v32 }
 0x3a1   :  { %17735 = vst [vmem:[#allocation87_spill] sm:$0xff] %v14723_v21  ;;  %5239 = vmatpush2.msra.mxu0 %v8594_v38  ;;  %v8591_v38 = vld [vmem:[%s17131_s4 + $0x218] sm:$0xff] }
 0x3a2   :  { %v3694_v10 = vpop.f32.mrf.mxu1  ;;  %v3513_v61 = vpop.f32.mrf.mxu0  ;;  %5240 = vmatprep.subr.mxu0 %v17340_v32 }
 0x3a3   :  { %v14734_v25 = vadd.f32 %v3694_v10, %v14222_v60  ;;  %v14737_v16 = vadd.f32 %v3513_v61, %v14225_v56  ;;  %5241 = vmatpush2.msra.mxu0 %v8593_v8  ;;  %v8590_v60 = vld [vmem:[%s17131_s4 + $0x210] sm:$0xff] }
 0x3a4   :  { %v9858_v7 = vpop.f32.mrf.mxu1  ;;  %v14739_v43 = vpop.f32.mrf.mxu0  ;;  %5242 = vmatprep.subr.mxu0 %v17340_v32 }
 0x3a5   :  { %17736 = vst [vmem:[#allocation46_spill] sm:$0xff] %v14739_v43  ;;  %5243 = vmatpush2.msra.mxu0 %v8592_v58  ;;  %v8589_v58 = vld [vmem:[%s17131_s4 + $0x208] sm:$0xff] }
 0x3a6   :  { %v4055_v46 = vpop.f32.mrf.mxu1  ;;  %v3852_v21 = vpop.f32.mrf.mxu0  ;;  %5244 = vmatprep.subr.mxu0 %v17340_v32 }
 0x3a7   :  { %v14750_v56 = vadd.f32 %v4055_v46, %v14246_v5  ;;  %v14753_v61 = vadd.f32 %v3852_v21, %v14249_v39  ;;  %5245 = vmatpush2.msra.mxu0 %v8591_v38  ;;  %v8588_v5 = vld [vmem:[%s17131_s4 + $0x200] sm:$0xff] }
 0x3a8   :  { %v9865_v10 = vpop.f32.mrf.mxu1  ;;  %v14755_v8 = vpop.f32.mrf.mxu0  ;;  %5246 = vmatprep.subr.mxu0 %v17340_v32 }
 0x3a9   :  { %5247 = vmatpush2.msra.mxu0 %v8590_v60 }
 0x3aa   :  { %v4060_v7 = vpop.f32.mrf.mxu1  ;;  %v3858_v43 = vpop.f32.mrf.mxu0  ;;  %5248 = vmatprep.subr.mxu0 %v17340_v32 }
 0x3ab   :  { %v14766_v39 = vadd.f32 %v4060_v7, %v14270_v53  ;;  %v14769_v21 = vadd.f32 %v3858_v43, %v14273_v12  ;;  %5249 = vmatpush2.msra.mxu0 %v8589_v58 }
 0x3ac   :  { %v9868_v38 = vpop.f32.mrf.mxu1  ;;  %v14771_v46 = vpop.f32.mrf.mxu0  ;;  %5250 = vmatprep.subr.mxu0 %v17340_v32 }
 0x3ad   :  { %5251 = vmatpush2.msra.mxu0 %v8588_v5 }
 0x3ae   :  { %v4065_v60 = vpop.f32.mrf.mxu1  ;;  %v3864_v10 = vpop.f32.mrf.mxu0  ;;  %5528 = vmatprep.subr.mxu0 %v17340_v32 }
 0x3af   :  { %v14776_v23 = vadd.f32 %v4065_v60, %v14294_v49  ;;  %v14779_v53 = vadd.f32 %v3864_v10, %v14297_v45 }
 0x3b0   :  { %v9871_v7 = vpop.f32.mrf.mxu1  ;;  %v14781_v12 = vpop.f32.mrf.mxu0 }
 0x3b1   :  { %17737 = vst [vmem:[#allocation85_spill] sm:$0xff] %v14779_v53 }
 0x3b2   :  { %v4070_v43 = vpop.f32.mrf.mxu1  ;;  %v3870_v58 = vpop.f32.mrf.mxu0 }
 0x3b3   :  { %v14784_v38 = vadd.f32 %v4070_v43, %v14318_v17  ;;  %v14787_v5 = vadd.f32 %v3870_v58, %v14321_v31 }
 0x3b4   :  { %v9874_v0 = vpop.f32.mrf.mxu1  ;;  %v14789_v6 = vpop.f32.mrf.mxu0 }
 0x3b5   :  { %17738 = vst [vmem:[#allocation47_spill] sm:$0xff] %v14787_v5 }
 0x3b6   :  { %v4075_v32 = vpop.f32.mrf.mxu1  ;;  %v3876_v49 = vpop.f32.mrf.mxu0 }
 0x3b7   :  { %v14792_v60 = vadd.f32 %v4075_v32, %v14342_v15  ;;  %v14795_v45 = vadd.f32 %v3876_v49, %v14345_v3 }
 0x3b8   :  { %v9877_v10 = vpop.f32.mrf.mxu1  ;;  %v14797_v7 = vpop.f32.mrf.mxu0 }
 0x3b9   :  { %17739 = vst [vmem:[#allocation86_spill] sm:$0xff] %v14795_v45 }
 0x3ba   :  { %v4080_v53 = vpop.f32.mrf.mxu1  ;;  %v3882_v17 = vpop.f32.mrf.mxu0 }
 0x3bb   :  { %v14800_v43 = vadd.f32 %v4080_v53, %v14366_v42  ;;  %v14803_v31 = vadd.f32 %v3882_v17, %v14369_v62 }
 0x3bc   :  { %v9880_v0 = vpop.f32.mrf.mxu1  ;;  %v14805_v58 = vpop.f32.mrf.mxu0 }
 0x3bd   :  { %17740 = vst [vmem:[#allocation48_spill] sm:$0xff] %v14803_v31 }
 0x3be   :  { %v4085_v5 = vpop.f32.mrf.mxu1  ;;  %v3888_v32 = vpop.f32.mrf.mxu0 }
 0x3bf   :  { %v14808_v15 = vadd.f32 %v4085_v5, %v14387_v2  ;;  %v14811_v3 = vadd.f32 %v3888_v32, %v14390_v57 }
 0x3c0   :  { %v9883_v49 = vpop.f32.mrf.mxu1  ;;  %v14813_v10 = vpop.f32.mrf.mxu0 }
 0x3c1   :  { %17741 = vst [vmem:[#allocation88_spill] sm:$0xff] %v14811_v3 }
 0x3c2   :  { %v4090_v45 = vpop.f32.mrf.mxu1  ;;  %v3894_v42 = vpop.f32.mrf.mxu0 }
 0x3c3   :  { %v14816_v53 = vadd.f32 %v4090_v45, %v14411_v11  ;;  %v14819_v62 = vadd.f32 %v3894_v42, %v14414_v35 }
 0x3c4   :  { %v9886_v17 = vpop.f32.mrf.mxu1  ;;  %v14821_v0 = vpop.f32.mrf.mxu0 }
 0x3c5   :  { %17742 = vst [vmem:[#allocation49_spill] sm:$0xff] %v14819_v62 }
 0x3c6   :  { %v4095_v31 = vpop.f32.mrf.mxu1  ;;  %v3900_v2 = vpop.f32.mrf.mxu0 }
 0x3c7   :  { %v14824_v5 = vadd.f32 %v4095_v31, %v14434_v40  ;;  %v14827_v57 = vadd.f32 %v3900_v2, %v14437_v36 }
 0x3c8   :  { %v9889_v32 = vpop.f32.mrf.mxu1  ;;  %v14829_v49 = vpop.f32.mrf.mxu0 }
 0x3c9   :  { %17743 = vst [vmem:[#allocation89_spill] sm:$0xff] %v14827_v57 }
 0x3ca   :  { %v4100_v3 = vpop.f32.mrf.mxu1  ;;  %v3906_v11 = vpop.f32.mrf.mxu0 }
 0x3cb   :  { %v14832_v45 = vadd.f32 %v4100_v3, %v14455_v28  ;;  %v14835_v35 = vadd.f32 %v3906_v11, %v14458_v30 }
 0x3cc   :  { %v9892_v42 = vpop.f32.mrf.mxu1  ;;  %v14837_v17 = vpop.f32.mrf.mxu0 }
 0x3cd   :  { %17744 = vst [vmem:[#allocation50_spill] sm:$0xff] %v14835_v35 }
 0x3ce   :  { %v4105_v62 = vpop.f32.mrf.mxu1  ;;  %v3912_v40 = vpop.f32.mrf.mxu0 }
 0x3cf   :  { %v14840_v31 = vadd.f32 %v4105_v62, %v14479_v29  ;;  %v14843_v36 = vadd.f32 %v3912_v40, %v14482_v26 }
 0x3d0   :  { %v9895_v2 = vpop.f32.mrf.mxu1  ;;  %v14845_v32 = vpop.f32.mrf.mxu0 }
 0x3d1   :  { %17745 = vst [vmem:[#allocation3_spill] sm:$0xff] %v14843_v36 }
 0x3d2   :  { %v4110_v57 = vpop.f32.mrf.mxu1  ;;  %v3918_v28 = vpop.f32.mrf.mxu0 }
 0x3d3   :  { %v14848_v3 = vadd.f32 %v4110_v57, %v14502_v52  ;;  %v14851_v30 = vadd.f32 %v3918_v28, %v14505_v34 }
 0x3d4   :  { %v9898_v11 = vpop.f32.mrf.mxu1  ;;  %v14853_v42 = vpop.f32.mrf.mxu0 }
 0x3d5   :  { %17746 = vst [vmem:[#allocation4_spill] sm:$0xff] %v14851_v30 }
 0x3d6   :  { %v4115_v35 = vpop.f32.mrf.mxu1  ;;  %v3924_v29 = vpop.f32.mrf.mxu0 }
 0x3d7   :  { %v14856_v62 = vadd.f32 %v4115_v35, %v14526_v24  ;;  %v14859_v26 = vadd.f32 %v3924_v29, %v14529_v9 }
 0x3d8   :  { %v9901_v40 = vpop.f32.mrf.mxu1  ;;  %v14861_v2 = vpop.f32.mrf.mxu0 }
 0x3d9   :  { %17747 = vst [vmem:[#allocation51_spill] sm:$0xff] %v14859_v26 }
 0x3da   :  { %v4120_v36 = vpop.f32.mrf.mxu1  ;;  %v3930_v52 = vpop.f32.mrf.mxu0 }
 0x3db   :  { %v14864_v57 = vadd.f32 %v4120_v36, %v14548_v63  ;;  %v14867_v34 = vadd.f32 %v3930_v52, %v14551_v59 }
 0x3dc   :  { %v9904_v28 = vpop.f32.mrf.mxu1  ;;  %v14869_v11 = vpop.f32.mrf.mxu0 }
 0x3dd   :  { %17748 = vst [vmem:[#allocation5_spill] sm:$0xff] %v14867_v34 }
 0x3de   :  { %v4125_v30 = vpop.f32.mrf.mxu1  ;;  %v3936_v24 = vpop.f32.mrf.mxu0 }
 0x3df   :  { %v14872_v35 = vadd.f32 %v4125_v30, %v14572_v47  ;;  %v14875_v9 = vadd.f32 %v3936_v24, %v14575_v54 }
 0x3e0   :  { %v9907_v29 = vpop.f32.mrf.mxu1  ;;  %v14877_v40 = vpop.f32.mrf.mxu0 }
 0x3e1   :  { %17749 = vst [vmem:[#allocation52_spill] sm:$0xff] %v14875_v9 }
 0x3e2   :  { %v4130_v26 = vpop.f32.mrf.mxu1  ;;  %v3942_v63 = vpop.f32.mrf.mxu0 }
 0x3e3   :  { %v14880_v36 = vadd.f32 %v4130_v26, %v14591_v50  ;;  %v14883_v59 = vadd.f32 %v3942_v63, %v14594_v51 }
 0x3e4   :  { %v9910_v52 = vpop.f32.mrf.mxu1  ;;  %v14885_v28 = vpop.f32.mrf.mxu0 }
 0x3e5   :  { %17750 = vst [vmem:[#allocation6_spill] sm:$0xff] %v14883_v59 }
 0x3e6   :  { %v4135_v34 = vpop.f32.mrf.mxu1  ;;  %v3948_v47 = vpop.f32.mrf.mxu0 }
 0x3e7   :  { %v14888_v30 = vadd.f32 %v4135_v34, %v14618_v37  ;;  %v14891_v54 = vadd.f32 %v3948_v47, %v14621_v55 }
 0x3e8   :  { %v9913_v24 = vpop.f32.mrf.mxu1  ;;  %v14893_v29 = vpop.f32.mrf.mxu0 }
 0x3e9   :  { %17751 = vst [vmem:[#allocation7_spill] sm:$0xff] %v14891_v54 }
 0x3ea   :  { %v4140_v9 = vpop.f32.mrf.mxu1  ;;  %v3954_v50 = vpop.f32.mrf.mxu0 }
 0x3eb   :  { %v14896_v26 = vadd.f32 %v4140_v9, %v14638_v27  ;;  %v14899_v51 = vadd.f32 %v3954_v50, %v14641_v18 }
 0x3ec   :  { %v9916_v63 = vpop.f32.mrf.mxu1  ;;  %v14901_v52 = vpop.f32.mrf.mxu0 }
 0x3ed   :  { %17752 = vst [vmem:[#allocation53_spill] sm:$0xff] %v14899_v51  ;;  %v4711_v51 = vlaneseq }
 0x3ee   :  { %v4145_v59 = vpop.f32.mrf.mxu1  ;;  %v3960_v37 = vpop.f32.mrf.mxu0 }
 0x3ef   :  { %v14904_v34 = vadd.f32 %v4145_v59, %v14658_v1  ;;  %v14907_v55 = vadd.f32 %v3960_v37, %v14661_v4 }
 0x3f0   :  { %v9919_v47 = vpop.f32.mrf.mxu1  ;;  %v14909_v24 = vpop.f32.mrf.mxu0 }
 0x3f1   :  { %17753 = vst [vmem:[#allocation10_spill] sm:$0xff] %v14904_v34  ;;  %17754 = vst [vmem:[#allocation8_spill] sm:$0xff] %v14907_v55 }
 0x3f2   :  { %v4150_v54 = vpop.f32.mrf.mxu1  ;;  %v3966_v27 = vpop.f32.mrf.mxu0 }
 0x3f3   :  { %v14912_v9 = vadd.f32 %v4150_v54, %v14677_v20  ;;  %v14915_v18 = vadd.f32 %v3966_v27, %v14680_v14  ;;  %v4712_v20 = vshrl.u32 %v4711_v51, 7 }
 0x3f4   :  { %v9922_v50 = vpop.f32.mrf.mxu1  ;;  %v14917_v63 = vpop.f32.mrf.mxu0 }
 0x3f5   :  { %17755 = vst [vmem:[#allocation54_spill] sm:$0xff] %v14912_v9  ;;  %17756 = vst [vmem:[#allocation9_spill] sm:$0xff] %v14915_v18 }
 0x3f6   :  { %17757 = vst [vmem:[#allocation55_spill] sm:$0xff] %v14917_v63  ;;  %v4155_v1 = vpop.f32.mrf.mxu1  ;;  %v3972_v59 = vpop.f32.mrf.mxu0 }
 0x3f7   :  { %v14920_v4 = vadd.f32 %v4155_v1, %v14700_v44  ;;  %v14923_v37 = vadd.f32 %v3972_v59, %v14703_v41  ;;  %v4721_v44 = vsub.s32 2, %v4712_v20  ;;  %v4713_v1 = vsub.s32 0, %v4712_v20  ;;  %v4709_v59 = vld [vmem:[%s17132_s2] sm:$0x7] }
 0x3f8   :  { %v9925_v47 = vpop.f32.mrf.mxu1  ;;  %v14925_v55 = vpop.f32.mrf.mxu0 }
 0x3f9   :  { %17758 = vst [vmem:[#allocation11_spill] sm:$0xff] %v14920_v4  ;;  %17759 = vst [vmem:[#allocation56_spill] sm:$0xff] %v14923_v37 }
 0x3fa   :  { %17760 = vst [vmem:[#allocation14_spill] sm:$0xff] %v14925_v55  ;;  %v4160_v54 = vpop.f32.mrf.mxu1  ;;  %v3978_v9 = vpop.f32.mrf.mxu0 }
 0x3fb   :  { %v14928_v14 = vadd.f32 %v4160_v54, %v14718_v19  ;;  %v14931_v27 = vadd.f32 %v3978_v9, %v14721_v33  ;;  %v4795_v33 = vld [vmem:[%s17133_s3] sm:$0x7]  ;;  %v4717_v9 = vsub.s32 1, %v4712_v20 }
 0x3fc   :  { %v9928_v50 = vpop.f32.mrf.mxu1  ;;  %v14933_v18 = vpop.f32.mrf.mxu0  ;;  %v14961_v20 = vrot.slane %v4795_v33, %v4713_v1 }
 0x3fd   :  { %17761 = vst [vmem:[#allocation12_spill] sm:$0xff] %v14928_v14  ;;  %17762 = vst [vmem:[#allocation13_spill] sm:$0xff] %v14931_v27  ;;  %v14949_v50 = vrot.slane %v4709_v59, %v4721_v44  ;;  %v14953_v14 = vrot.slane %v4795_v33, %v4721_v44  ;;  %v14965_v34 = vrot.slane %v4795_v33, %v4717_v9 }
 0x3fe   :  { %17763 = vst [vmem:[#allocation57_spill] sm:$0xff] %v14933_v18  ;;  %v4165_v4 = vpop.f32.mrf.mxu1  ;;  %v3984_v41 = vpop.f32.mrf.mxu0  ;;  %v14951_v18 = vrot.slane %v4709_v59, %v4713_v1  ;;  %17771 = vst [vmem:[#allocation19_spill] sm:$0xff] %v14961_v20 }
 0x3ff   :  { %v14939_v51 = vadd.f32 %v4165_v4, %v14734_v25  ;;  %v14942_v19 = vadd.f32 %v3984_v41, %v14737_v16  ;;  %17767 = vst [vmem:[#allocation16_spill] sm:$0xff] %v14949_v50  ;;  %17769 = vst [vmem:[#allocation60_spill] sm:$0xff] %v14953_v14  ;;  %v4170_v16 = vadd.f32 %v14755_v8, %v14255_v48 }
 0x400   :  { %v9931_v47 = vpop.f32.mrf.mxu1  ;;  %v14947_v54 = vpop.f32.mrf.mxu0  ;;  %17768 = vst [vmem:[#allocation17_spill] sm:$0xff] %v14951_v18  ;;  %17772 = vst [vmem:[#allocation61_spill] sm:$0xff] %v14965_v34  ;;  %v4173_v48 = vadd.f32 %v14771_v46, %v14279_v13  ;;  %v5135_v13 = vld [vmem:[%s17131_s4 + $0x178] sm:$0xff]  ;;  %v4176_v46 = vadd.f32 %v14781_v12, %v14303_v22  ;;  %v5134_v22 = vld [vmem:[%s17131_s4 + $0x170] sm:$0xff] }
 0x401   :  { %17764 = vst [vmem:[#allocation59_spill] sm:$0xff] %v14939_v51  ;;  %17765 = vst [vmem:[#allocation58_spill] sm:$0xff] %v14942_v19  ;;  %v14959_v19 = vrot.slane %v4709_v59, %v4717_v9 }
 0x402   :  { %17766 = vst [vmem:[#allocation15_spill] sm:$0xff] %v14947_v54  ;;  %v4526_v27 = vpop.f32.mrf.mxu1  ;;  %v4323_v25 = vpop.f32.mrf.mxu0 }
 0x403   :  { %v4642_v4 = vadd.f32 %v4526_v27, %v14750_v56  ;;  %v4640_v41 = vadd.f32 %v4323_v25, %v14753_v61  ;;  %17770 = vst [vmem:[#allocation18_spill] sm:$0xff] %v14959_v19 }
 0x404   :  { %v9938_v47 = vpop.f32.mrf.mxu1  ;;  %v4325_v54 = vpop.f32.mrf.mxu0 }
 0x405   :  { %v4728_v51 = vmul.f32 %v14949_v50, %v4642_v4  ;;  %v4726_v37 = vmul.f32 %v14951_v18, %v4640_v41  ;;  %v4641_v44 = vadd.f32 %v4325_v54, %v4170_v16  ;;  %v17773_v4 = vld [vmem:[#allocation85_spill] sm:$0xff] }
 0x406   :  { %v4531_v55 = vpop.f32.mrf.mxu1  ;;  %v4329_v63 = vpop.f32.mrf.mxu0 }
 0x407   :  { %v14970_v56 = vadd.f32 %v14953_v14, %v4728_v51  ;;  %v4727_v61 = vmul.f32 %v14959_v19, %v4641_v44  ;;  %v4645_v8 = vadd.f32 %v4531_v55, %v14766_v39  ;;  %v14975_v27 = vadd.f32 %v14961_v20, %v4726_v37 }
 0x408   :  { %v4643_v1 = vadd.f32 %v4329_v63, %v14769_v21  ;;  %v9941_v59 = vpop.f32.mrf.mxu1  ;;  %v4331_v54 = vpop.f32.mrf.mxu0 }
 0x409   :  { %v17170_v33 = vmax.f32 %v14970_v56, 0.0  ;;  %v4731_v9 = vmul.f32 %v14949_v50, %v4645_v8  ;;  %v4644_v25 = vadd.f32 %v4331_v54, %v4173_v48  ;;  %v14987_v21 = vadd.f32 %v14965_v34, %v4727_v61 }
 0x40a   :  { %v4729_v39 = vmul.f32 %v14951_v18, %v4643_v1  ;;  %v4536_v55 = vpop.f32.mrf.mxu1  ;;  %v4335_v37 = vpop.f32.mrf.mxu0  ;;  %v17168_v12 = vmax.f32 %v14975_v27, 0.0  ;;  %v17774_v8 = vmov 0.0  }
 0x40b   :  { %v4817_v63 = vadd.f32 %v14953_v14, %v4731_v9  ;;  %v4730_v51 = vmul.f32 %v14959_v19, %v4644_v25  ;;  %v4648_v16 = vadd.f32 %v4536_v55, %v14776_v23  ;;  %v4646_v41 = vadd.f32 %v4335_v37, %v17773_v4  ;;  %10038 = vmatmul.mubr.f32.vlgmr.msra.gmra.mxu1 %v17170_v33  ;;  %v5103_v9 = vld [vmem:[%s17131_s4 + $0x78] sm:$0xff] }
 0x40c   :  { %v4815_v47 = vadd.f32 %v14961_v20, %v4729_v39  ;;  %v9944_v44 = vpop.f32.mrf.mxu1  ;;  %v4337_v48 = vpop.f32.mrf.mxu0  ;;  %v17169_v61 = vmax.f32 %v14987_v21, 0.0  ;;  %10040 = vmatprep.mubr.msk.f32.mxu1 %vm10636_vm1, %v17774_v8  ;;  %10101 = vmatpush3.msra.mxu1 %v5135_v13 }
 0x40d   :  { %v15003_v23 = vmax.f32 %v4817_v63, 0.0  ;;  %v4734_v1 = vmul.f32 %v14949_v50, %v4648_v16  ;;  %v4732_v59 = vmul.f32 %v14951_v18, %v4646_v41  ;;  %v4647_v54 = vadd.f32 %v4337_v48, %v4176_v46  ;;  %10102 = vmatprep.subr.mxu1 %v17774_v8  ;;  %v5102_v63 = vld [vmem:[%s17131_s4 + $0x70] sm:$0xff]  ;;  %v17775_v16 = vld [vmem:[#allocation75_spill] sm:$0xff] }
 0x40e   :  { %v4541_v25 = vpop.f32.mrf.mxu1  ;;  %5252 = vmatprep.mubr.f32.mxu0 %v17169_v61  ;;  %v4341_v39 = vpop.f32.mrf.mxu0  ;;  %v4816_v13 = vadd.f32 %v14965_v34, %v4730_v51  ;;  %10103 = vmatpush3.msra.mxu1 %v5134_v22  ;;  %v4179_v4 = vadd.f32 %v14789_v6, %v17775_v16  ;;  %v17776_v51 = vld [vmem:[#allocation47_spill] sm:$0xff]  ;;  %v5101_v6 = vld [vmem:[%s17131_s4 + $0x68] sm:$0xff] }
 0x40f   :  { %v4820_v55 = vadd.f32 %v14953_v14, %v4734_v1  ;;  %v4733_v37 = vmul.f32 %v14959_v19, %v4647_v54  ;;  %v4651_v46 = vadd.f32 %v4541_v25, %v14784_v38  ;;  %5253 = vmatmul.mubr.f32.vlgmr.msra.gmra.mxu0 %v17168_v12  ;;  %v4818_v41 = vadd.f32 %v14961_v20, %v4732_v59  ;;  %v17777_v59 = vld [vmem:[#allocation37_spill] sm:$0xff] }
 0x410   :  { %v4649_v22 = vadd.f32 %v4341_v39, %v17776_v51  ;;  %10041 = vmatmul.mubr.f32.gmra.mxu1 %v15003_v23  ;;  %v9947_v44 = vpop.f32.mrf.mxu1  ;;  %5529 = vmatpush1.msra.mxu0 %v5103_v9  ;;  %v4343_v48 = vpop.f32.mrf.mxu0  ;;  %v15027_v38 = vmax.f32 %v4816_v13, 0.0  ;;  %v15029_v1 = vmax.f32 %v4815_v47, 0.0  ;;  %v4182_v9 = vadd.f32 %v14797_v7, %v17777_v59  ;;  %v17778_v51 = vld [vmem:[#allocation86_spill] sm:$0xff] }
 0x411   :  { %v15031_v54 = vmax.f32 %v4820_v55, 0.0  ;;  %v4819_v25 = vadd.f32 %v14965_v34, %v4733_v37  ;;  %v4737_v12 = vmul.f32 %v14949_v50, %v4651_v46  ;;  %10043 = vmatprep.mubr.msk.f32.mxu1 %vm10636_vm1, %v17774_v8  ;;  %5530 = vmatprep.subr.mxu0 %v17774_v8  ;;  %v4650_v39 = vadd.f32 %v4343_v48, %v4179_v4 }
 0x412   :  { %v4735_v47 = vmul.f32 %v14951_v18, %v4649_v22  ;;  %v4546_v13 = vpop.f32.mrf.mxu1  ;;  %5257 = vmatprep.mubr.f32.mxu0 %v15027_v38  ;;  %v4347_v55 = vpop.f32.mrf.mxu0  ;;  %5531 = vmatpush1.msra.mxu0 %v5102_v63  ;;  %v15052_v7 = vmax.f32 %v4818_v41, 0.0  ;;  %v5100_v41 = vld [vmem:[%s17131_s4 + $0x60] sm:$0xff] }
 0x413   :  { %v15045_v37 = vmax.f32 %v4819_v25, 0.0  ;;  %v4823_v46 = vadd.f32 %v14953_v14, %v4737_v12  ;;  %v4654_v16 = vadd.f32 %v4546_v13, %v14792_v60  ;;  %v4652_v44 = vadd.f32 %v4347_v55, %v17778_v51  ;;  %5258 = vmatmul.mubr.f32.gmra.mxu0 %v15029_v1  ;;  %5532 = vmatprep.subr.mxu0 %v17774_v8 }
 0x414   :  { %v4821_v4 = vadd.f32 %v14961_v20, %v4735_v47  ;;  %v4736_v22 = vmul.f32 %v14959_v19, %v4650_v39  ;;  %10044 = vmatmul.mubr.f32.gmra.mxu1 %v15031_v54  ;;  %v9950_v63 = vpop.f32.mrf.mxu1  ;;  %v4349_v48 = vpop.f32.mrf.mxu0  ;;  %5533 = vmatpush1.msra.mxu0 %v5101_v6 }
 0x415   :  { %v15057_v12 = vmax.f32 %v4823_v46, 0.0  ;;  %v4740_v60 = vmul.f32 %v14949_v50, %v4654_v16  ;;  %v4738_v25 = vmul.f32 %v14951_v18, %v4652_v44  ;;  %v4653_v59 = vadd.f32 %v4349_v48, %v4182_v9  ;;  %5262 = vmatprep.mubr.f32.mxu0 %v15045_v37  ;;  %10046 = vmatprep.mubr.msk.f32.mxu1 %vm10636_vm1, %v17774_v8  ;;  %v5099_v46 = vld [vmem:[%s17131_s4 + $0x58] sm:$0xff]  ;;  %v17779_v16 = vld [vmem:[#allocation76_spill] sm:$0xff] }
 0x416   :  { %v4822_v47 = vadd.f32 %v14965_v34, %v4736_v22  ;;  %v4551_v39 = vpop.f32.mrf.mxu1  ;;  %v4353_v6 = vpop.f32.mrf.mxu0  ;;  %5534 = vmatprep.subr.mxu0 %v17774_v8  ;;  %10104 = vmatprep.subr.mxu1 %v17774_v8  ;;  %v4185_v51 = vadd.f32 %v14805_v58, %v17779_v16  ;;  %v17780_v63 = vld [vmem:[#allocation48_spill] sm:$0xff] }
 0x417   :  { %v4826_v13 = vadd.f32 %v14953_v14, %v4740_v60  ;;  %v4739_v9 = vmul.f32 %v14959_v19, %v4653_v59  ;;  %v4657_v55 = vadd.f32 %v4551_v39, %v14800_v43  ;;  %5263 = vmatmul.mubr.f32.gmra.mxu0 %v15052_v7  ;;  %v4824_v22 = vadd.f32 %v14961_v20, %v4738_v25  ;;  %v5133_v59 = vld [vmem:[%s17131_s4 + $0x168] sm:$0xff]  ;;  %v17782_v25 = vld [vmem:[#allocation38_spill] sm:$0xff] }
 0x418   :  { %v15079_v44 = vmax.f32 %v4822_v47, 0.0  ;;  %v4655_v48 = vadd.f32 %v4353_v6, %v17780_v63  ;;  %10047 = vmatmul.mubr.f32.gmra.mxu1 %v15057_v12  ;;  %v9953_v60 = vpop.f32.mrf.mxu1  ;;  %5535 = vmatpush1.msra.mxu0 %v5100_v41  ;;  %v4355_v43 = vpop.f32.mrf.mxu0  ;;  %v15087_v39 = vmax.f32 %v4821_v4, 0.0  ;;  %v4188_v41 = vadd.f32 %v14813_v10, %v17782_v25  ;;  %v5098_v10 = vld [vmem:[%s17131_s4 + $0x50] sm:$0xff] }
 0x419   :  { %v15089_v61 = vmax.f32 %v4826_v13, 0.0  ;;  %v4825_v58 = vadd.f32 %v14965_v34, %v4739_v9  ;;  %v4743_v47 = vmul.f32 %v14949_v50, %v4657_v55  ;;  %10049 = vmatprep.mubr.msk.f32.mxu1 %vm10636_vm1, %v17774_v8  ;;  %5536 = vmatprep.subr.mxu0 %v17774_v8  ;;  %v4656_v16 = vadd.f32 %v4355_v43, %v4185_v51  ;;  %v17784_v60 = vld [vmem:[#allocation88_spill] sm:$0xff] }
 0x41a   :  { %v4741_v6 = vmul.f32 %v14951_v18, %v4655_v48  ;;  %v4556_v63 = vpop.f32.mrf.mxu1  ;;  %5267 = vmatprep.mubr.f32.mxu0 %v15079_v44  ;;  %v4359_v4 = vpop.f32.mrf.mxu0  ;;  %5537 = vmatpush1.msra.mxu0 %v5099_v46  ;;  %v15109_v51 = vmax.f32 %v4824_v22, 0.0 }
 0x41b   :  { %17781 = vst [vmem:[#allocation20_spill] sm:$0xff] %v15089_v61  ;;  %v15100_v13 = vmax.f32 %v4825_v58, 0.0  ;;  %v4829_v9 = vadd.f32 %v14953_v14, %v4743_v47  ;;  %v4660_v55 = vadd.f32 %v4556_v63, %v14808_v15  ;;  %v4658_v33 = vadd.f32 %v4359_v4, %v17784_v60  ;;  %5268 = vmatmul.mubr.f32.gmra.mxu0 %v15087_v39 }
 0x41c   :  { %10105 = vmatpush3.msra.mxu1 %v5133_v59  ;;  %17785 = vst [vmem:[#allocation62_spill] sm:$0xff] %v15109_v51  ;;  %v4742_v48 = vmul.f32 %v14959_v19, %v4656_v16  ;;  %v9956_v46 = vpop.f32.mrf.mxu1  ;;  %v4361_v43 = vpop.f32.mrf.mxu0  ;;  %5538 = vmatprep.subr.mxu0 %v17774_v8  ;;  %v4827_v58 = vadd.f32 %v14961_v20, %v4741_v6  ;;  %v5097_v6 = vld [vmem:[%s17131_s4 + $0x48] sm:$0xff] }
 0x41d   :  { %17783 = vst [vmem:[#allocation22_spill] sm:$0xff] %v15100_v13  ;;  %10050 = vmatmul.mubr.f32.gmra.mxu1 %v15089_v61  ;;  %v15114_v15 = vmax.f32 %v4829_v9, 0.0  ;;  %v4746_v59 = vmul.f32 %v14949_v50, %v4660_v55  ;;  %v4659_v47 = vadd.f32 %v4361_v43, %v4188_v41  ;;  %5272 = vmatprep.mubr.f32.mxu0 %v15100_v13  ;;  %v5132_v41 = vld [vmem:[%s17131_s4 + $0x160] sm:$0xff]  ;;  %v17790_v43 = vld [vmem:[#allocation49_spill] sm:$0xff] }
 0x41e   :  { %10052 = vmatprep.mubr.msk.f32.mxu1 %vm10636_vm1, %v17774_v8  ;;  %v4828_v22 = vadd.f32 %v14965_v34, %v4742_v48  ;;  %v4744_v25 = vmul.f32 %v14951_v18, %v4658_v33  ;;  %v4561_v16 = vpop.f32.mrf.mxu1  ;;  %5539 = vmatpush1.msra.mxu0 %v5098_v10  ;;  %v4365_v63 = vpop.f32.mrf.mxu0  ;;  %v17787_v33 = vld [vmem:[#allocation77_spill] sm:$0xff]  ;;  %v17788_v10 = vld [vmem:[#allocation78_spill] sm:$0xff]  ;;  %v15143_v61 = vmax.f32 %v4827_v58, 0.0 }
 0x41f   :  { %17786 = vst [vmem:[#allocation21_spill] sm:$0xff] %v15114_v15  ;;  %10106 = vmatprep.subr.mxu1 %v17774_v8  ;;  %v4832_v4 = vadd.f32 %v14953_v14, %v4746_v59  ;;  %v4745_v9 = vmul.f32 %v14959_v19, %v4659_v47  ;;  %v4663_v55 = vadd.f32 %v4561_v16, %v14816_v53 }
 0x420   :  { %5273 = vmatmul.mubr.f32.gmra.mxu0 %v15109_v51  ;;  %v4191_v60 = vadd.f32 %v14821_v0, %v17787_v33  ;;  %v4194_v48 = vadd.f32 %v14829_v49, %v17788_v10  ;;  %v15138_v46 = vmax.f32 %v4828_v22, 0.0  ;;  %v4661_v13 = vadd.f32 %v4365_v63, %v17790_v43  ;;  %5540 = vmatprep.subr.mxu0 %v17774_v8  ;;  %v9959_v59 = vpop.f32.mrf.mxu1  ;;  %v4367_v47 = vpop.f32.mrf.mxu0  ;;  %v5096_v49 = vld [vmem:[%s17131_s4 + $0x40] sm:$0xff] }
 0x421   :  { %10053 = vmatmul.mubr.f32.gmra.mxu1 %v15114_v15  ;;  %v15145_v53 = vmax.f32 %v4832_v4, 0.0  ;;  %v4831_v16 = vadd.f32 %v14965_v34, %v4745_v9  ;;  %v4749_v0 = vmul.f32 %v14949_v50, %v4663_v55  ;;  %5541 = vmatpush1.msra.mxu0 %v5097_v6  ;;  %v4830_v22 = vadd.f32 %v14961_v20, %v4744_v25  ;;  %v17792_v9 = vld [vmem:[#allocation89_spill] sm:$0xff]  ;;  %v5131_v55 = vld [vmem:[%s17131_s4 + $0x158] sm:$0xff] }
 0x422   :  { %17789 = vst [vmem:[#allocation63_spill] sm:$0xff] %v15138_v46  ;;  %10107 = vmatpush3.msra.mxu1 %v5132_v41  ;;  %v4747_v63 = vmul.f32 %v14951_v18, %v4661_v13  ;;  %v4662_v33 = vadd.f32 %v4367_v47, %v4191_v60  ;;  %v4566_v10 = vpop.f32.mrf.mxu1  ;;  %5277 = vmatprep.mubr.f32.mxu0 %v15138_v46  ;;  %v4371_v58 = vpop.f32.mrf.mxu0  ;;  %v5095_v13 = vld [vmem:[%s17131_s4 + $0x38] sm:$0xff] }
 0x423   :  { %17791 = vst [vmem:[#allocation23_spill] sm:$0xff] %v15145_v53  ;;  %10055 = vmatprep.mubr.msk.f32.mxu1 %vm10636_vm1, %v17774_v8  ;;  %v15157_v4 = vmax.f32 %v4831_v16, 0.0  ;;  %v4835_v6 = vadd.f32 %v14953_v14, %v4749_v0  ;;  %v4666_v41 = vadd.f32 %v4566_v10, %v14824_v5  ;;  %5542 = vmatprep.subr.mxu0 %v17774_v8  ;;  %v15177_v0 = vmax.f32 %v4830_v22, 0.0  ;;  %v17793_v22 = vld [vmem:[#allocation40_spill] sm:$0xff] }
 0x424   :  { %v4664_v25 = vadd.f32 %v4371_v58, %v17792_v9  ;;  %5278 = vmatmul.mubr.f32.gmra.mxu0 %v15143_v61  ;;  %v4748_v60 = vmul.f32 %v14959_v19, %v4662_v33  ;;  %v9962_v5 = vpop.f32.mrf.mxu1  ;;  %v4373_v43 = vpop.f32.mrf.mxu0  ;;  %10108 = vmatprep.subr.mxu1 %v17774_v8  ;;  %v4833_v10 = vadd.f32 %v14961_v20, %v4747_v63 }
 0x425   :  { %10056 = vmatmul.mubr.f32.gmra.mxu1 %v15145_v53  ;;  %5543 = vmatpush1.msra.mxu0 %v5096_v49  ;;  %v15172_v59 = vmax.f32 %v4835_v6, 0.0  ;;  %v4752_v47 = vmul.f32 %v14949_v50, %v4666_v41  ;;  %v4665_v16 = vadd.f32 %v4373_v43, %v4194_v48  ;;  %v5094_v48 = vld [vmem:[%s17131_s4 + $0x30] sm:$0xff]  ;;  %v4197_v63 = vadd.f32 %v14837_v17, %v17793_v22  ;;  %v17796_v43 = vld [vmem:[#allocation79_spill] sm:$0xff] }
 0x426   :  { %5544 = vmatprep.subr.mxu0 %v17774_v8  ;;  %v4834_v33 = vadd.f32 %v14965_v34, %v4748_v60  ;;  %v4750_v58 = vmul.f32 %v14951_v18, %v4664_v25  ;;  %10109 = vmatpush3.msra.mxu1 %v5131_v55  ;;  %v4571_v49 = vpop.f32.mrf.mxu1  ;;  %v4377_v6 = vpop.f32.mrf.mxu0 }
 0x427   :  { %5545 = vmatpush1.msra.mxu0 %v5095_v13  ;;  %v4838_v9 = vadd.f32 %v14953_v14, %v4752_v47  ;;  %v4751_v41 = vmul.f32 %v14959_v19, %v4665_v16  ;;  %v4669_v5 = vadd.f32 %v4571_v49, %v14832_v45  ;;  %5282 = vmatprep.mubr.f32.mxu0 %v15157_v4  ;;  %v17795_v13 = vld [vmem:[#allocation50_spill] sm:$0xff] }
 0x428   :  { %v15191_v25 = vmax.f32 %v4834_v33, 0.0  ;;  %10058 = vmatprep.mubr.msk.f32.mxu1 %vm10636_vm1, %v17774_v8  ;;  %v4667_v55 = vadd.f32 %v4377_v6, %v17795_v13  ;;  %5283 = vmatmul.mubr.f32.gmra.mxu0 %v15177_v0  ;;  %v9965_v60 = vpop.f32.mrf.mxu1  ;;  %v4379_v45 = vpop.f32.mrf.mxu0  ;;  %v4200_v47 = vadd.f32 %v14845_v32, %v17796_v43  ;;  %v15205_v33 = vmax.f32 %v4833_v10, 0.0  ;;  %v17798_v10 = vld [vmem:[#allocation3_spill] sm:$0xff] }
 0x429   :  { %v15199_v16 = vmax.f32 %v4838_v9, 0.0  ;;  %v4837_v49 = vadd.f32 %v14965_v34, %v4751_v41  ;;  %v4755_v17 = vmul.f32 %v14949_v50, %v4669_v5  ;;  %10059 = vmatmul.mubr.f32.gmra.mxu1 %v15172_v59  ;;  %5546 = vmatprep.subr.mxu0 %v17774_v8  ;;  %v4836_v6 = vadd.f32 %v14961_v20, %v4750_v58  ;;  %v5093_v9 = vld [vmem:[%s17131_s4 + $0x28] sm:$0xff]  ;;  %v5092_v43 = vld [vmem:[%s17131_s4 + $0x20] sm:$0xff] }
 0x42a   :  { %17794 = vst [vmem:[#allocation65_spill] sm:$0xff] %v15191_v25  ;;  %17797 = vst [vmem:[#allocation64_spill] sm:$0xff] %v15205_v33  ;;  %v4753_v22 = vmul.f32 %v14951_v18, %v4667_v55  ;;  %5547 = vmatpush1.msra.mxu0 %v5094_v48  ;;  %v4668_v13 = vadd.f32 %v4379_v45, %v4197_v63  ;;  %v4576_v60 = vpop.f32.mrf.mxu1  ;;  %5287 = vmatprep.mubr.f32.mxu0 %v15191_v25  ;;  %v4383_v32 = vpop.f32.mrf.mxu0  ;;  %v5130_v48 = vld [vmem:[%s17131_s4 + $0x150] sm:$0xff] }
 0x42b   :  { %v4841_v41 = vadd.f32 %v14953_v14, %v4755_v17  ;;  %v4672_v5 = vadd.f32 %v4576_v60, %v14840_v31  ;;  %10061 = vmatprep.mubr.msk.f32.mxu1 %vm10636_vm1, %v17774_v8  ;;  %5548 = vmatprep.subr.mxu0 %v17774_v8  ;;  %v4670_v58 = vadd.f32 %v4383_v32, %v17798_v10  ;;  %v15222_v63 = vmax.f32 %v4837_v49, 0.0 }
 0x42c   :  { %v4754_v55 = vmul.f32 %v14959_v19, %v4668_v13  ;;  %10110 = vmatprep.subr.mxu1 %v17774_v8  ;;  %5288 = vmatmul.mubr.f32.gmra.mxu0 %v15205_v33  ;;  %v9968_v31 = vpop.f32.mrf.mxu1  ;;  %v4385_v45 = vpop.f32.mrf.mxu0  ;;  %v15234_v32 = vmax.f32 %v4836_v6, 0.0  ;;  %v4839_v13 = vadd.f32 %v14961_v20, %v4753_v22  ;;  %v17801_v6 = vld [vmem:[#allocation41_spill] sm:$0xff] }
 0x42d   :  { %17799 = vst [vmem:[#allocation24_spill] sm:$0xff] %v15222_v63  ;;  %v15230_v17 = vmax.f32 %v4841_v41, 0.0  ;;  %v4758_v60 = vmul.f32 %v14949_v50, %v4672_v5  ;;  %10062 = vmatmul.mubr.f32.gmra.mxu1 %v15199_v16  ;;  %5549 = vmatpush1.msra.mxu0 %v5093_v9  ;;  %v4671_v49 = vadd.f32 %v4385_v45, %v4200_v47 }
 0x42e   :  { %v4840_v10 = vadd.f32 %v14965_v34, %v4754_v55  ;;  %10111 = vmatpush3.msra.mxu1 %v5130_v48  ;;  %5550 = vmatprep.subr.mxu0 %v17774_v8  ;;  %v4581_v31 = vpop.f32.mrf.mxu1  ;;  %v4389_v33 = vpop.f32.mrf.mxu0  ;;  %v4756_v25 = vmul.f32 %v14951_v18, %v4670_v58  ;;  %v4203_v9 = vadd.f32 %v14853_v42, %v17801_v6  ;;  %v17803_v48 = vld [vmem:[#allocation4_spill] sm:$0xff]  ;;  %v5091_v58 = vld [vmem:[%s17131_s4 + $0x18] sm:$0xff] }
 0x42f   :  { %17800 = vst [vmem:[#allocation25_spill] sm:$0xff] %v15230_v17  ;;  %v4844_v41 = vadd.f32 %v14953_v14, %v4758_v60  ;;  %v4757_v5 = vmul.f32 %v14959_v19, %v4671_v49  ;;  %5551 = vmatpush1.msra.mxu0 %v5092_v43  ;;  %v4675_v47 = vadd.f32 %v4581_v31, %v14848_v3  ;;  %v5129_v3 = vld [vmem:[%s17131_s4 + $0x148] sm:$0xff] }
 0x430   :  { %v15245_v22 = vmax.f32 %v4840_v10, 0.0  ;;  %5292 = vmatprep.mubr.f32.mxu0 %v15222_v63  ;;  %10064 = vmatprep.mubr.msk.f32.mxu1 %vm10636_vm1, %v17774_v8  ;;  %v4673_v55 = vadd.f32 %v4389_v33, %v17803_v48  ;;  %v9971_v45 = vpop.f32.mrf.mxu1  ;;  %v4391_v43 = vpop.f32.mrf.mxu0  ;;  %v17804_v49 = vld [vmem:[#allocation80_spill] sm:$0xff] }
 0x431   :  { %v4843_v42 = vadd.f32 %v14965_v34, %v4757_v5  ;;  %v4761_v60 = vmul.f32 %v14949_v50, %v4675_v47  ;;  %5293 = vmatmul.mubr.f32.gmra.mxu0 %v15234_v32  ;;  %10065 = vmatmul.mubr.f32.gmra.mxu1 %v15230_v17  ;;  %v4206_v33 = vadd.f32 %v14861_v2, %v17804_v49  ;;  %v15263_v10 = vmax.f32 %v4844_v41, 0.0  ;;  %v5090_v2 = vld [vmem:[%s17131_s4 + $0x10] sm:$0xff] }
 0x432   :  { %17802 = vst [vmem:[#allocation27_spill] sm:$0xff] %v15245_v22  ;;  %5552 = vmatprep.subr.mxu0 %v17774_v8  ;;  %10112 = vmatprep.subr.mxu1 %v17774_v8  ;;  %v4674_v31 = vadd.f32 %v4391_v43, %v4203_v9  ;;  %v4586_v6 = vpop.f32.mrf.mxu1  ;;  %v4395_v48 = vpop.f32.mrf.mxu0  ;;  %v15267_v45 = vmax.f32 %v4839_v13, 0.0  ;;  %v4842_v5 = vadd.f32 %v14961_v20, %v4756_v25  ;;  %v17807_v25 = vld [vmem:[#allocation51_spill] sm:$0xff] }
 0x433   :  { %17805 = vst [vmem:[#allocation26_spill] sm:$0xff] %v15263_v10  ;;  %v4847_v47 = vadd.f32 %v14953_v14, %v4761_v60  ;;  %5553 = vmatpush1.msra.mxu0 %v5091_v58  ;;  %10113 = vmatpush3.msra.mxu1 %v5129_v3  ;;  %v4678_v17 = vadd.f32 %v4586_v6, %v14856_v62  ;;  %v17808_v3 = vld [vmem:[#allocation67_spill] sm:$0xff]  ;;  %v17809_v60 = vld [vmem:[#allocation42_spill] sm:$0xff]  ;;  %v15283_v49 = vmax.f32 %v4843_v42, 0.0 }
 0x434   :  { %17806 = vst [vmem:[#allocation66_spill] sm:$0xff] %v15267_v45  ;;  %v4759_v41 = vmul.f32 %v14951_v18, %v4673_v55  ;;  %v4760_v9 = vmul.f32 %v14959_v19, %v4674_v31  ;;  %5297 = vmatprep.mubr.f32.mxu0 %v15245_v22  ;;  %10067 = vmatprep.mubr.msk.f32.mxu1 %vm10636_vm1, %v17774_v8  ;;  %v9974_v43 = vpop.f32.mrf.mxu1  ;;  %v4397_v58 = vpop.f32.mrf.mxu0  ;;  %v5089_v31 = vld [vmem:[%s17131_s4 + $0x8] sm:$0xff] }
 0x435   :  { %v4676_v13 = vadd.f32 %v4395_v48, %v17807_v25  ;;  %v3738_v62 = vadd.f32 %v17809_v60, %v17808_v3  ;;  %17810 = vst [vmem:[#allocation29_spill] sm:$0xff] %v15283_v49  ;;  %v4764_v6 = vmul.f32 %v14949_v50, %v4678_v17  ;;  %5554 = vmatprep.subr.mxu0 %v17774_v8  ;;  %v5128_v48 = vld [vmem:[%s17131_s4 + $0x140] sm:$0xff]  ;;  %v17811_v25 = vld [vmem:[#allocation68_spill] sm:$0xff]  ;;  %v17812_v43 = vld [vmem:[#allocation81_spill] sm:$0xff]  ;;  %v15296_v42 = vmax.f32 %v4847_v47, 0.0 }
 0x436   :  { %5298 = vmatmul.mubr.f32.gmra.mxu0 %v15267_v45  ;;  %v4677_v55 = vadd.f32 %v4397_v58, %v4206_v33  ;;  %v3741_v3 = vadd.f32 %v17812_v43, %v17811_v25  ;;  %v4846_v17 = vadd.f32 %v14965_v34, %v4760_v9  ;;  %10068 = vmatmul.mubr.f32.gmra.mxu1 %v15263_v10  ;;  %v4591_v60 = vpop.f32.mrf.mxu1  ;;  %v4401_v33 = vpop.f32.mrf.mxu0  ;;  %v15301_v45 = vmax.f32 %v4842_v5, 0.0 }
 0x437   :  { %17813 = vst [vmem:[#allocation28_spill] sm:$0xff] %v15296_v42  ;;  %5555 = vmatpush1.msra.mxu0 %v5090_v2  ;;  %v4209_v58 = vadd.f32 %v14869_v11, %v3738_v62  ;;  %v4850_v22 = vadd.f32 %v14953_v14, %v4764_v6  ;;  %10114 = vmatprep.subr.mxu1 %v17774_v8 }
 0x438   :  { %5556 = vmatprep.subr.mxu0 %v17774_v8  ;;  %v4763_v47 = vmul.f32 %v14959_v19, %v4677_v55  ;;  %v4845_v25 = vadd.f32 %v14961_v20, %v4759_v41  ;;  %v15308_v9 = vmax.f32 %v4846_v17, 0.0  ;;  %v4762_v2 = vmul.f32 %v14951_v18, %v4676_v13  ;;  %10115 = vmatpush3.msra.mxu1 %v5128_v48  ;;  %v9977_v5 = vpop.f32.mrf.mxu1  ;;  %v4403_v62 = vpop.f32.mrf.mxu0  ;;  %v17814_v55 = vld [vmem:[#allocation5_spill] sm:$0xff]  ;;  %v5088_v41 = vld [vmem:[%s17131_s4] sm:$0xff] }
 0x439   :  { %5557 = vmatpush1.msra.mxu0 %v5089_v31  ;;  %v4681_v11 = vadd.f32 %v4591_v60, %v14864_v57  ;;  %5302 = vmatprep.mubr.f32.mxu0 %v15283_v49  ;;  %v4679_v43 = vadd.f32 %v4401_v33, %v17814_v55  ;;  %v4680_v13 = vadd.f32 %v4403_v62, %v4209_v58  ;;  %v17815_v31 = vld [vmem:[#allocation70_spill] sm:$0xff]  ;;  %v17816_v48 = vld [vmem:[#allocation43_spill] sm:$0xff]  ;;  %v15326_v49 = vmax.f32 %v4850_v22, 0.0  ;;  %v17818_v55 = vld [vmem:[#allocation52_spill] sm:$0xff] }
 0x43a   :  { %v4849_v6 = vadd.f32 %v14965_v34, %v4763_v47  ;;  %10070 = vmatprep.mubr.msk.f32.mxu1 %vm10636_vm1, %v17774_v8  ;;  %v3744_v17 = vadd.f32 %v17816_v48, %v17815_v31  ;;  %5303 = vmatmul.mubr.f32.gmra.mxu0 %v15301_v45  ;;  %v4596_v60 = vpop.f32.mrf.mxu1  ;;  %v4407_v47 = vpop.f32.mrf.mxu0  ;;  %v4212_v5 = vadd.f32 %v14877_v40, %v3741_v3  ;;  %v5127_v62 = vld [vmem:[%s17131_s4 + $0x138] sm:$0xff]  ;;  %v15344_v48 = vmax.f32 %v4845_v25, 0.0 }
 0x43b   :  { %v4767_v57 = vmul.f32 %v14949_v50, %v4681_v11  ;;  %10071 = vmatmul.mubr.f32.gmra.mxu1 %v15296_v42  ;;  %5558 = vmatprep.subr.mxu0 %v17774_v8  ;;  %v4766_v33 = vmul.f32 %v14959_v19, %v4680_v13  ;;  %v4684_v58 = vadd.f32 %v4596_v60, %v14872_v35  ;;  %v5119_v11 = vld [vmem:[%s17131_s4 + $0xf8] sm:$0xff] }
 0x43c   :  { %10116 = vmatprep.subr.mxu1 %v17774_v8  ;;  %v4848_v40 = vadd.f32 %v14961_v20, %v4762_v2  ;;  %v15339_v22 = vmax.f32 %v4849_v6, 0.0  ;;  %5559 = vmatpush1.msra.mxu0 %v5088_v41  ;;  %v4682_v13 = vadd.f32 %v4407_v47, %v17818_v55  ;;  %v9980_v35 = vpop.f32.mrf.mxu1  ;;  %v4409_v31 = vpop.f32.mrf.mxu0  ;;  %v4765_v60 = vmul.f32 %v14951_v18, %v4679_v43  ;;  %v5118_v41 = vld [vmem:[%s17131_s4 + $0xf0] sm:$0xff] }
 0x43d   :  { %v4853_v3 = vadd.f32 %v14953_v14, %v4767_v57  ;;  %5307 = vmatprep.mubr.f32.mxu0 %v15308_v9  ;;  %v4852_v42 = vadd.f32 %v14965_v34, %v4766_v33  ;;  %5560 = vmatprep.subr.mxu0 %v17774_v8  ;;  %v4770_v2 = vmul.f32 %v14949_v50, %v4684_v58 }
 0x43e   :  { %17817 = vst [vmem:[#allocation31_spill] sm:$0xff] %v15339_v22  ;;  %10073 = vmatprep.mubr.msk.f32.mxu1 %vm10636_vm1, %v17774_v8  ;;  %5561 = vmatpush2.msra.mxu0 %v5119_v11  ;;  %v4683_v6 = vadd.f32 %v4409_v31, %v4212_v5  ;;  %v4601_v25 = vpop.f32.mrf.mxu1  ;;  %v4413_v57 = vpop.f32.mrf.mxu0  ;;  %v4215_v43 = vadd.f32 %v14885_v28, %v3744_v17  ;;  %v17820_v11 = vld [vmem:[#allocation32_spill] sm:$0xff]  ;;  %v17821_v5 = vld [vmem:[#allocation45_spill] sm:$0xff]  ;;  %v15364_v55 = vmax.f32 %v4848_v40, 0.0 }
 0x43f   :  { %10117 = vmatpush3.msra.mxu1 %v5127_v62  ;;  %v15356_v47 = vmax.f32 %v4853_v3, 0.0  ;;  %v4856_v33 = vadd.f32 %v14953_v14, %v4770_v2  ;;  %5308 = vmatmul.mubr.f32.gmra.mxu0 %v15344_v48  ;;  %v4687_v58 = vadd.f32 %v4601_v25, %v14880_v36  ;;  %v3747_v62 = vadd.f32 %v17821_v5, %v17820_v11  ;;  %v5117_v40 = vld [vmem:[%s17131_s4 + $0xe8] sm:$0xff] }
 0x440   :  { %10074 = vmatmul.mubr.f32.gmra.mxu1 %v15326_v49  ;;  %17822 = vst [vmem:[#allocation69_spill] sm:$0xff] %v15364_v55  ;;  %v4768_v35 = vmul.f32 %v14951_v18, %v4682_v13  ;;  %5562 = vmatprep.subr.mxu0 %v17774_v8  ;;  %v4769_v28 = vmul.f32 %v14959_v19, %v4683_v6  ;;  %v9983_v17 = vpop.f32.mrf.mxu1  ;;  %v4415_v3 = vpop.f32.mrf.mxu0  ;;  %v15371_v2 = vmax.f32 %v4852_v42, 0.0  ;;  %v5126_v13 = vld [vmem:[%s17131_s4 + $0x130] sm:$0xff] }
 0x441   :  { %17819 = vst [vmem:[#allocation30_spill] sm:$0xff] %v15356_v47  ;;  %5312 = vmatprep.mubr.f32.mxu0 %v15339_v22  ;;  %v4851_v31 = vadd.f32 %v14961_v20, %v4765_v60  ;;  %5563 = vmatpush2.msra.mxu0 %v5118_v41  ;;  %v4773_v36 = vmul.f32 %v14949_v50, %v4687_v58  ;;  %v17823_v60 = vld [vmem:[#allocation6_spill] sm:$0xff]  ;;  %v15387_v5 = vmax.f32 %v4856_v33, 0.0 }
 0x442   :  { %10076 = vmatprep.mubr.msk.f32.mxu1 %vm10636_vm1, %v17774_v8  ;;  %v4686_v6 = vadd.f32 %v4415_v3, %v4215_v43  ;;  %v4218_v25 = vadd.f32 %v14893_v29, %v3747_v62  ;;  %v4855_v42 = vadd.f32 %v14965_v34, %v4769_v28  ;;  %v4685_v41 = vadd.f32 %v4413_v57, %v17823_v60  ;;  %v4606_v58 = vpop.f32.mrf.mxu1  ;;  %v4419_v11 = vpop.f32.mrf.mxu0  ;;  %v5116_v57 = vld [vmem:[%s17131_s4 + $0xe0] sm:$0xff]  ;;  %v17825_v62 = vld [vmem:[#allocation33_spill] sm:$0xff]  ;;  %v17826_v28 = vld [vmem:[#allocation82_spill] sm:$0xff] }
 0x443   :  { %5564 = vmatprep.subr.mxu0 %v17774_v8  ;;  %10118 = vmatprep.subr.mxu1 %v17774_v8  ;;  %17824 = vst [vmem:[#allocation71_spill] sm:$0xff] %v15387_v5  ;;  %v4859_v17 = vadd.f32 %v14953_v14, %v4773_v36  ;;  %v4690_v43 = vadd.f32 %v4606_v58, %v14888_v30  ;;  %v17827_v36 = vld [vmem:[#allocation7_spill] sm:$0xff] }
 0x444   :  { %5313 = vmatmul.mubr.f32.gmra.mxu0 %v15364_v55  ;;  %10077 = vmatmul.mubr.f32.gmra.mxu1 %v15356_v47  ;;  %v4772_v29 = vmul.f32 %v14959_v19, %v4686_v6  ;;  %v3750_v3 = vadd.f32 %v17826_v28, %v17825_v62  ;;  %v4854_v33 = vadd.f32 %v14961_v20, %v4768_v35  ;;  %v9986_v55 = vpop.f32.mrf.mxu1  ;;  %v4421_v22 = vpop.f32.mrf.mxu0  ;;  %v15401_v47 = vmax.f32 %v4851_v31, 0.0  ;;  %v5125_v31 = vld [vmem:[%s17131_s4 + $0x128] sm:$0xff] }
 0x445   :  { %5565 = vmatpush2.msra.mxu0 %v5117_v40  ;;  %10119 = vmatpush3.msra.mxu1 %v5126_v13  ;;  %v4688_v60 = vadd.f32 %v4419_v11, %v17827_v36  ;;  %v4776_v30 = vmul.f32 %v14949_v50, %v4690_v43  ;;  %v4689_v58 = vadd.f32 %v4421_v22, %v4218_v25  ;;  %v15407_v62 = vmax.f32 %v4855_v42, 0.0  ;;  %v5115_v55 = vld [vmem:[%s17131_s4 + $0xd8] sm:$0xff]  ;;  %v17830_v11 = vld [vmem:[#allocation72_spill] sm:$0xff] }
 0x446   :  { %v4858_v6 = vadd.f32 %v14965_v34, %v4772_v29  ;;  %5566 = vmatprep.subr.mxu0 %v17774_v8  ;;  %5317 = vmatprep.mubr.f32.mxu0 %v15371_v2  ;;  %v4771_v35 = vmul.f32 %v14951_v18, %v4685_v41  ;;  %v4611_v40 = vpop.f32.mrf.mxu1  ;;  %v4425_v13 = vpop.f32.mrf.mxu0  ;;  %v4221_v22 = vadd.f32 %v14901_v52, %v3750_v3  ;;  %v15419_v25 = vmax.f32 %v4859_v17, 0.0  ;;  %v17831_v29 = vld [vmem:[#allocation44_spill] sm:$0xff] }
 0x447   :  { %17828 = vst [vmem:[#allocation34_spill] sm:$0xff] %v15407_v62  ;;  %10079 = vmatprep.mubr.msk.f32.mxu1 %vm10636_vm1, %v17774_v8  ;;  %5567 = vmatpush2.msra.mxu0 %v5116_v57  ;;  %v4775_v42 = vmul.f32 %v14959_v19, %v4689_v58  ;;  %v4693_v41 = vadd.f32 %v4611_v40, %v14896_v26  ;;  %v15427_v57 = vmax.f32 %v4854_v33, 0.0 }
 0x448   :  { %17829 = vst [vmem:[#allocation35_spill] sm:$0xff] %v15419_v25  ;;  %5318 = vmatmul.mubr.f32.gmra.mxu0 %v15401_v47  ;;  %10080 = vmatmul.mubr.f32.gmra.mxu1 %v15387_v5  ;;  %v3753_v43 = vadd.f32 %v17831_v29, %v17830_v11  ;;  %v4862_v28 = vadd.f32 %v14953_v14, %v4776_v30  ;;  %v9989_v52 = vpop.f32.mrf.mxu1  ;;  %v4427_v17 = vpop.f32.mrf.mxu0  ;;  %v15433_v3 = vmax.f32 %v4858_v6, 0.0  ;;  %v5114_v6 = vld [vmem:[%s17131_s4 + $0xd0] sm:$0xff]  ;;  %v17836_v29 = vld [vmem:[#allocation83_spill] sm:$0xff] }
 0x449   :  { %v4774_v36 = vmul.f32 %v14951_v18, %v4688_v60  ;;  %5568 = vmatprep.subr.mxu0 %v17774_v8  ;;  %10120 = vmatprep.subr.mxu1 %v17774_v8  ;;  %v4861_v58 = vadd.f32 %v14965_v34, %v4775_v42  ;;  %v4779_v26 = vmul.f32 %v14949_v50, %v4693_v41  ;;  %v17833_v60 = vld [vmem:[#allocation53_spill] sm:$0xff] }
 0x44a   :  { %17832 = vst [vmem:[#allocation85_spill] sm:$0xff] %v15433_v3  ;;  %5569 = vmatpush2.msra.mxu0 %v5115_v55  ;;  %10121 = vmatpush3.msra.mxu1 %v5125_v31  ;;  %v4692_v33 = vadd.f32 %v4427_v17, %v4221_v22  ;;  %v4857_v40 = vadd.f32 %v14961_v20, %v4771_v35  ;;  %v4616_v11 = vpop.f32.mrf.mxu1  ;;  %v4431_v42 = vpop.f32.mrf.mxu0  ;;  %v17834_v31 = vld [vmem:[#allocation10_spill] sm:$0xff]  ;;  %v17835_v41 = vld [vmem:[#allocation73_spill] sm:$0xff]  ;;  %v17838_v17 = vld [vmem:[#allocation84_spill] sm:$0xff] }
 0x44b   :  { %5322 = vmatprep.mubr.f32.mxu0 %v15407_v62  ;;  %10082 = vmatprep.mubr.msk.f32.mxu1 %vm10636_vm1, %v17774_v8  ;;  %v4691_v30 = vadd.f32 %v4425_v13, %v17833_v60  ;;  %v4224_v55 = vadd.f32 %v14909_v24, %v3753_v43  ;;  %v4696_v22 = vadd.f32 %v4616_v11, %v17834_v31  ;;  %v17837_v13 = vld [vmem:[#allocation74_spill] sm:$0xff]  ;;  %v15454_v62 = vmax.f32 %v4862_v28, 0.0  ;;  %v5113_v24 = vld [vmem:[%s17131_s4 + $0xc8] sm:$0xff]  ;;  %v5124_v43 = vld [vmem:[%s17131_s4 + $0x120] sm:$0xff] }
 0x44c   :  { %5323 = vmatmul.mubr.f32.gmra.mxu0 %v15427_v57  ;;  %10083 = vmatmul.mubr.f32.gmra.mxu1 %v15419_v25  ;;  %v4778_v35 = vmul.f32 %v14959_v19, %v4692_v33  ;;  %v3756_v52 = vadd.f32 %v17836_v29, %v17835_v41  ;;  %v3759_v60 = vadd.f32 %v17838_v17, %v17837_v13  ;;  %v9992_v33 = vpop.f32.mrf.mxu1  ;;  %v4433_v11 = vpop.f32.mrf.mxu0  ;;  %v15466_v28 = vmax.f32 %v4861_v58, 0.0  ;;  %v17843_v25 = vld [vmem:[#allocation55_spill] sm:$0xff] }
 0x44d   :  { %17839 = vst [vmem:[#allocation75_spill] sm:$0xff] %v15454_v62  ;;  %v4865_v5 = vadd.f32 %v14953_v14, %v4779_v26  ;;  %5570 = vmatprep.subr.mxu0 %v17774_v8  ;;  %10122 = vmatprep.subr.mxu1 %v17774_v8  ;;  %v4860_v31 = vadd.f32 %v14961_v20, %v4774_v36  ;;  %v15470_v29 = vmax.f32 %v4857_v40, 0.0  ;;  %v17842_v36 = vld [vmem:[#allocation8_spill] sm:$0xff] }
 0x44e   :  { %17840 = vst [vmem:[#allocation47_spill] sm:$0xff] %v15466_v28  ;;  %5571 = vmatpush2.msra.mxu0 %v5114_v6  ;;  %v4782_v26 = vmul.f32 %v14949_v50, %v4696_v22  ;;  %5327 = vmatprep.mubr.f32.mxu0 %v15433_v3  ;;  %v4695_v41 = vadd.f32 %v4433_v11, %v4224_v55  ;;  %v4621_v33 = vpop.f32.mrf.mxu1  ;;  %v4437_v6 = vpop.f32.mrf.mxu0  ;;  %v17844_v55 = vld [vmem:[#allocation54_spill] sm:$0xff] }
 0x44f   :  { %17841 = vst [vmem:[#allocation37_spill] sm:$0xff] %v15470_v29  ;;  %v4777_v13 = vmul.f32 %v14951_v18, %v4691_v30  ;;  %v4864_v17 = vadd.f32 %v14965_v34, %v4778_v35  ;;  %5572 = vmatprep.subr.mxu0 %v17774_v8  ;;  %10085 = vmatprep.mubr.msk.f32.mxu1 %vm10636_vm1, %v17774_v8  ;;  %v5112_v30 = vld [vmem:[%s17131_s4 + $0xc0] sm:$0xff]  ;;  %v15484_v11 = vmax.f32 %v4865_v5, 0.0 }
 0x450   :  { %v4694_v58 = vadd.f32 %v4431_v42, %v17842_v36  ;;  %v4227_v22 = vadd.f32 %v17843_v25, %v3756_v52  ;;  %5573 = vmatpush2.msra.mxu0 %v5113_v24  ;;  %10123 = vmatpush3.msra.mxu1 %v5124_v43  ;;  %v4781_v40 = vmul.f32 %v14959_v19, %v4695_v41  ;;  %v9995_v42 = vpop.f32.mrf.mxu1  ;;  %v4439_v25 = vpop.f32.mrf.mxu0  ;;  %v17846_v52 = vld [vmem:[#allocation14_spill] sm:$0xff]  ;;  %v15490_v43 = vmax.f32 %v4860_v31, 0.0 }
 0x451   :  { %v4699_v35 = vadd.f32 %v4621_v33, %v17844_v55  ;;  %17845 = vst [vmem:[#allocation86_spill] sm:$0xff] %v15484_v11  ;;  %v4868_v3 = vadd.f32 %v14953_v14, %v4782_v26  ;;  %5328 = vmatmul.mubr.f32.gmra.mxu0 %v15470_v29  ;;  %10086 = vmatmul.mubr.f32.gmra.mxu1 %v15454_v62  ;;  %v15496_v26 = vmax.f32 %v4864_v17, 0.0  ;;  %v5111_v55 = vld [vmem:[%s17131_s4 + $0xb8] sm:$0xff] }
 0x452   :  { %v4230_v24 = vadd.f32 %v17846_v52, %v3759_v60  ;;  %17847 = vst [vmem:[#allocation76_spill] sm:$0xff] %v15490_v43  ;;  %5574 = vmatprep.subr.mxu0 %v17774_v8  ;;  %5332 = vmatprep.mubr.f32.mxu0 %v15466_v28  ;;  %v4698_v5 = vadd.f32 %v4439_v25, %v4227_v22  ;;  %v17849_v60 = vld [vmem:[#allocation9_spill] sm:$0xff]  ;;  %v5123_v22 = vld [vmem:[%s17131_s4 + $0x118] sm:$0xff] }
 0x453   :  { %v4785_v41 = vmul.f32 %v14949_v50, %v4699_v35  ;;  %v4863_v36 = vadd.f32 %v14961_v20, %v4777_v13  ;;  %17848 = vst [vmem:[#allocation48_spill] sm:$0xff] %v15496_v26  ;;  %v4780_v33 = vmul.f32 %v14951_v18, %v4694_v58  ;;  %5575 = vmatpush2.msra.mxu0 %v5112_v30  ;;  %v4626_v35 = vpop.f32.mrf.mxu1  ;;  %v4443_v13 = vpop.f32.mrf.mxu0  ;;  %v17850_v30 = vld [vmem:[#allocation11_spill] sm:$0xff]  ;;  %v15513_v42 = vmax.f32 %v4868_v3, 0.0  ;;  %v5110_v25 = vld [vmem:[%s17131_s4 + $0xb0] sm:$0xff] }
 0x454   :  { %10088 = vmatprep.mubr.msk.f32.mxu1 %vm10636_vm1, %v17774_v8  ;;  %v4697_v31 = vadd.f32 %v4437_v6, %v17849_v60  ;;  %v4867_v17 = vadd.f32 %v14965_v34, %v4781_v40  ;;  %5576 = vmatprep.subr.mxu0 %v17774_v8  ;;  %v4784_v58 = vmul.f32 %v14959_v19, %v4698_v5 }
 0x455   :  { %10124 = vmatprep.subr.mxu1 %v17774_v8  ;;  %v4702_v6 = vadd.f32 %v4626_v35, %v17850_v30  ;;  %17851 = vst [vmem:[#allocation38_spill] sm:$0xff] %v15513_v42  ;;  %5333 = vmatmul.mubr.f32.gmra.mxu0 %v15490_v43  ;;  %v9998_v52 = vpop.f32.mrf.mxu1  ;;  %v4445_v40 = vpop.f32.mrf.mxu0  ;;  %v4871_v60 = vadd.f32 %v14953_v14, %v4785_v41  ;;  %v15522_v35 = vmax.f32 %v4863_v36, 0.0  ;;  %v5109_v36 = vld [vmem:[%s17131_s4 + $0xa8] sm:$0xff] }
 0x456   :  { %10089 = vmatmul.mubr.f32.gmra.mxu1 %v15484_v11  ;;  %5577 = vmatpush2.msra.mxu0 %v5111_v55  ;;  %v4701_v28 = vadd.f32 %v4445_v40, %v4230_v24  ;;  %v4866_v3 = vadd.f32 %v14961_v20, %v4780_v33  ;;  %v4783_v30 = vmul.f32 %v14951_v18, %v4697_v31  ;;  %v17852_v11 = vld [vmem:[#allocation56_spill] sm:$0xff]  ;;  %v15529_v41 = vmax.f32 %v4867_v17, 0.0 }
 0x457   :  { %10125 = vmatpush3.msra.mxu1 %v5123_v22  ;;  %v4788_v5 = vmul.f32 %v14949_v50, %v4702_v6  ;;  %5578 = vmatprep.subr.mxu0 %v17774_v8  ;;  %v4700_v52 = vadd.f32 %v4443_v13, %v17852_v11  ;;  %v4631_v43 = vpop.f32.mrf.mxu1  ;;  %v4449_v62 = vpop.f32.mrf.mxu0  ;;  %v4870_v55 = vadd.f32 %v14965_v34, %v4784_v58  ;;  %v5122_v11 = vld [vmem:[%s17131_s4 + $0x110] sm:$0xff]  ;;  %v17854_v33 = vld [vmem:[#allocation12_spill] sm:$0xff]  ;;  %v15551_v58 = vmax.f32 %v4871_v60, 0.0 }
 0x458   :  { %5337 = vmatprep.mubr.f32.mxu0 %v15496_v26  ;;  %17853 = vst [vmem:[#allocation88_spill] sm:$0xff] %v15529_v41  ;;  %10091 = vmatprep.mubr.msk.f32.mxu1 %vm10636_vm1, %v17774_v8  ;;  %v4787_v24 = vmul.f32 %v14959_v19, %v4701_v28  ;;  %v15542_v31 = vadd.f32 %v4631_v43, %v17854_v33  ;;  %v17855_v22 = vld [vmem:[#allocation13_spill] sm:$0xff]  ;;  %v15556_v43 = vmax.f32 %v4866_v3, 0.0  ;;  %v17859_v3 = vld [vmem:[#allocation59_spill] sm:$0xff]  ;;  %v17889_v50 = vld [vmem:[#allocation86_spill] sm:$0xff] }
 0x459   :  { %5579 = vmatpush2.msra.mxu0 %v5110_v25  ;;  %v15547_v13 = vadd.f32 %v4449_v62, %v17855_v22  ;;  %v10001_v17 = vpop.f32.mrf.mxu1  ;;  %v15549_v28 = vpop.f32.mrf.mxu0  ;;  %17857 = vst [vmem:[#allocation78_spill] sm:$0xff] %v15551_v58  ;;  %v4874_v6 = vadd.f32 %v14953_v14, %v4788_v5  ;;  %10126 = vmatprep.subr.mxu1 %v17774_v8  ;;  %v5108_v62 = vld [vmem:[%s17131_s4 + $0xa0] sm:$0xff]  ;;  %v15562_v60 = vmax.f32 %v4870_v55, 0.0  ;;  %v8641_v14 = vld [vmem:[%s17131_s4 + $0x3a8] sm:$0xff] }
 0x45a   :  { %5338 = vmatmul.mubr.f32.gmra.mxu0 %v15522_v35  ;;  %10092 = vmatmul.mubr.f32.gmra.mxu1 %v15513_v42  ;;  %17858 = vst [vmem:[#allocation49_spill] sm:$0xff] %v15556_v43  ;;  %v4869_v25 = vadd.f32 %v14961_v20, %v4783_v30  ;;  %v4786_v5 = vmul.f32 %v14951_v18, %v4700_v52  ;;  %v5107_v52 = vld [vmem:[%s17131_s4 + $0x98] sm:$0xff]  ;;  %v17885_v18 = vld [vmem:[#allocation85_spill] sm:$0xff]  ;;  %v17888_v19 = vld [vmem:[#allocation76_spill] sm:$0xff] }
 0x45b   :  { %17856 = vst [vmem:[#allocation77_spill] sm:$0xff] %v15547_v13  ;;  %5580 = vmatprep.subr.mxu0 %v17774_v8  ;;  %10127 = vmatpush3.msra.mxu1 %v5122_v11  ;;  %v4636_v40 = vpop.f32.mrf.mxu1  ;;  %v4455_v33 = vpop.f32.mrf.mxu0  ;;  %v4873_v22 = vadd.f32 %v14965_v34, %v4787_v24  ;;  %v15577_v17 = vmax.f32 %v4874_v6, 0.0  ;;  %v5121_v24 = vld [vmem:[%s17131_s4 + $0x108] sm:$0xff]  ;;  %v17884_v34 = vld [vmem:[#allocation35_spill] sm:$0xff] }
 0x45c   :  { %5581 = vmatpush2.msra.mxu0 %v5109_v36  ;;  %5342 = vmatprep.mubr.f32.mxu0 %v15529_v41  ;;  %v15570_v30 = vadd.f32 %v4636_v40, %v17859_v3  ;;  %v17861_v36 = vld [vmem:[#allocation58_spill] sm:$0xff]  ;;  %v15588_v40 = vmax.f32 %v4869_v25, 0.0  ;;  %v4872_v6 = vadd.f32 %v14961_v20, %v4786_v5  ;;  %v5120_v25 = vld [vmem:[%s17131_s4 + $0x100] sm:$0xff] }
 0x45d   :  { %10094 = vmatprep.mubr.msk.f32.mxu1 %vm10636_vm1, %v17774_v8  ;;  %5582 = vmatprep.subr.mxu0 %v17774_v8  ;;  %v15575_v11 = vadd.f32 %v4455_v33, %v17861_v36  ;;  %v10004_v55 = vpop.f32.mrf.mxu1  ;;  %17863 = vst [vmem:[#allocation50_spill] sm:$0xff] %v15577_v17  ;;  %v15591_v33 = vmax.f32 %v4873_v22, 0.0  ;;  %v5105_v22 = vld [vmem:[%s17131_s4 + $0x88] sm:$0xff]  ;;  %v5104_v3 = vld [vmem:[%s17131_s4 + $0x80] sm:$0xff]  ;;  %v8635_v36 = vld [vmem:[%s17131_s4 + $0x378] sm:$0xff] }
 0x45e   :  { %17860 = vst [vmem:[#allocation89_spill] sm:$0xff] %v15570_v30  ;;  %5343 = vmatmul.mubr.f32.gmra.mxu0 %v15556_v43  ;;  %10095 = vmatmul.mubr.f32.gmra.mxu1 %v15551_v58  ;;  %17864 = vst [vmem:[#allocation79_spill] sm:$0xff] %v15588_v40  ;;  %v15606_v5 = vmax.f32 %v4872_v6, 0.0  ;;  %v8667_v55 = vld [vmem:[%s17131_s4 + $0x478] sm:$0xff]  ;;  %v8634_v6 = vld [vmem:[%s17131_s4 + $0x370] sm:$0xff] }
 0x45f   :  { %17862 = vst [vmem:[#allocation40_spill] sm:$0xff] %v15575_v11  ;;  %5583 = vmatpush2.msra.mxu0 %v5108_v62  ;;  %10128 = vmatprep.subr.mxu1 %v17774_v8  ;;  %17865 = vst [vmem:[#allocation3_spill] sm:$0xff] %v15591_v33  ;;  %v5106_v62 = vld [vmem:[%s17131_s4 + $0x90] sm:$0xff]  ;;  %v17878_v11 = vld [vmem:[#allocation28_spill] sm:$0xff] }
 0x460   :  { %5584 = vmatprep.subr.mxu0 %v17774_v8  ;;  %5347 = vmatprep.mubr.f32.mxu0 %v15562_v60  ;;  %17866 = vst [vmem:[#allocation41_spill] sm:$0xff] %v15606_v5  ;;  %v8647_v30 = vld [vmem:[%s17131_s4 + $0x3d8] sm:$0xff]  ;;  %v17887_v13 = vld [vmem:[#allocation47_spill] sm:$0xff] }
 0x461   :  { %10097 = vmatprep.mubr.msk.f32.mxu1 %vm10636_vm1, %v17774_v8  ;;  %5585 = vmatpush2.msra.mxu0 %v5107_v52  ;;  %v17867_v52 = vmax.f32 %v14970_v56, 0.0  ;;  %v8633_v56 = vld [vmem:[%s17131_s4 + $0x368] sm:$0xff]  ;;  %v17881_v20 = vld [vmem:[#allocation30_spill] sm:$0xff] }
 0x462   :  { %10129 = vmatpush3.msra.mxu1 %v5121_v24  ;;  %5348 = vmatmul.mubr.f32.gmra.mxu0 %v15588_v40  ;;  %v17868_v24 = vmax.f32 %v14987_v21, 0.0  ;;  %v8666_v21 = vld [vmem:[%s17131_s4 + $0x470] sm:$0xff] }
 0x463   :  { %10098 = vmatmul.mubr.f32.gmra.mxu1 %v15577_v17  ;;  %5586 = vmatprep.subr.mxu0 %v17774_v8  ;;  %v8644_v17 = vld [vmem:[%s17131_s4 + $0x3c0] sm:$0xff] }
 0x464   :  { %10130 = vmatprep.subr.mxu1 %v17774_v8  ;;  %5587 = vmatpush2.msra.mxu0 %v5106_v62  ;;  %v17869_v62 = vmax.f32 %v14975_v27, 0.0  ;;  %v8632_v27 = vld [vmem:[%s17131_s4 + $0x360] sm:$0xff] }
 0x465   :  { %5352 = vmatprep.mubr.f32.mxu0 %v15591_v33  ;;  %5588 = vmatprep.subr.mxu0 %v17774_v8  ;;  %v8657_v33 = vld [vmem:[%s17131_s4 + $0x428] sm:$0xff] }
 0x466   :  { %10131 = vmatpush3.msra.mxu1 %v5120_v25  ;;  %10132 = vmatprep.mubr.msk.f32.mxu1 %vm10636_vm1, %v17774_v8  ;;  %v8631_v25 = vld [vmem:[%s17131_s4 + $0x358] sm:$0xff] }
 0x467   :  { %5353 = vmatmul.mubr.f32.gmra.mxu0 %v15606_v5  ;;  %10133 = vmatmul.mubr.f32.vlgmr.msra.gmra.mxu1 %v17774_v8  ;;  %v17880_v5 = vld [vmem:[#allocation69_spill] sm:$0xff] }
 0x468   :  { %5589 = vmatpush2.msra.mxu0 %v5105_v22  ;;  %5592 = vmatprep.mubr.f32.mxu0 %v17774_v8  ;;  %v8665_v22 = vld [vmem:[%s17131_s4 + $0x468] sm:$0xff] }
 0x469   :  { %5590 = vmatprep.subr.mxu0 %v17774_v8  ;;  %10135 = vmatprep.mubr.msk.f32.mxu1 %vm10636_vm1, %v17774_v8 }
 0x46a   :  { %5591 = vmatpush2.msra.mxu0 %v5104_v3  ;;  %10195 = vmatprep.subr.mxu1 %v17774_v8  ;;  %v8630_v3 = vld [vmem:[%s17131_s4 + $0x350] sm:$0xff] }
 0x46b   :  { %5593 = vmatmul.mubr.f32.vlgmr.msra.gmra.mxu0 %v17774_v8  ;;  %5980 = vmatprep.subr.mxu0 %v17774_v8 }
 0x46c   :  { %10136 = vmatmul.mubr.f32.gmra.mxu1 %v17867_v52  ;;  %5597 = vmatprep.mubr.f32.mxu0 %v17868_v24  ;;  %v8664_v52 = vld [vmem:[%s17131_s4 + $0x460] sm:$0xff]  ;;  %v17871_v24 = vld [vmem:[#allocation22_spill] sm:$0xff] }
 0x46d   :  { %5981 = vmatpush1.msra.mxu0 %v8635_v36  ;;  %10196 = vmatpush3.msra.mxu1 %v8667_v55  ;;  %v8629_v36 = vld [vmem:[%s17131_s4 + $0x348] sm:$0xff] }
 0x46e   :  { %10138 = vmatprep.mubr.msk.f32.mxu1 %vm10636_vm1, %v17774_v8  ;;  %5982 = vmatprep.subr.mxu0 %v17774_v8  ;;  %v17870_v55 = vld [vmem:[#allocation20_spill] sm:$0xff] }
 0x46f   :  { %5598 = vmatmul.mubr.f32.gmra.mxu0 %v17869_v62  ;;  %10197 = vmatprep.subr.mxu1 %v17774_v8  ;;  %v8627_v62 = vld [vmem:[%s17131_s4 + $0x338] sm:$0xff] }
 0x470   :  { %10139 = vmatmul.mubr.f32.gmra.mxu1 %v15003_v23  ;;  %5983 = vmatpush1.msra.mxu0 %v8634_v6  ;;  %v8628_v6 = vld [vmem:[%s17131_s4 + $0x340] sm:$0xff] }
 0x471   :  { %5602 = vmatprep.mubr.f32.mxu0 %v15027_v38  ;;  %5984 = vmatprep.subr.mxu0 %v17774_v8 }
 0x472   :  { %10141 = vmatprep.mubr.msk.f32.mxu1 %vm10636_vm1, %v17774_v8  ;;  %5985 = vmatpush1.msra.mxu0 %v8633_v56  ;;  %v8663_v56 = vld [vmem:[%s17131_s4 + $0x458] sm:$0xff] }
 0x473   :  { %10198 = vmatpush3.msra.mxu1 %v8666_v21  ;;  %5603 = vmatmul.mubr.f32.gmra.mxu0 %v15029_v1  ;;  %v8626_v21 = vld [vmem:[%s17131_s4 + $0x330] sm:$0xff] }
 0x474   :  { %10142 = vmatmul.mubr.f32.gmra.mxu1 %v15031_v54  ;;  %5986 = vmatprep.subr.mxu0 %v17774_v8 }
 0x475   :  { %5607 = vmatprep.mubr.f32.mxu0 %v15045_v37  ;;  %5987 = vmatpush1.msra.mxu0 %v8632_v27  ;;  %v8625_v27 = vld [vmem:[%s17131_s4 + $0x328] sm:$0xff] }
 0x476   :  { %10144 = vmatprep.mubr.msk.f32.mxu1 %vm10636_vm1, %v17774_v8  ;;  %5988 = vmatprep.subr.mxu0 %v17774_v8 }
 0x477   :  { %10199 = vmatprep.subr.mxu1 %v17774_v8  ;;  %5608 = vmatmul.mubr.f32.gmra.mxu0 %v15052_v7 }
 0x478   :  { %10145 = vmatmul.mubr.f32.gmra.mxu1 %v15057_v12  ;;  %5989 = vmatpush1.msra.mxu0 %v8631_v25  ;;  %v8662_v25 = vld [vmem:[%s17131_s4 + $0x450] sm:$0xff] }
 0x479   :  { %10200 = vmatpush3.msra.mxu1 %v8665_v22  ;;  %5612 = vmatprep.mubr.f32.mxu0 %v15079_v44  ;;  %v8624_v22 = vld [vmem:[%s17131_s4 + $0x320] sm:$0xff] }
 0x47a   :  { %5990 = vmatprep.subr.mxu0 %v17774_v8  ;;  %10147 = vmatprep.mubr.msk.f32.mxu1 %vm10636_vm1, %v17774_v8 }
 0x47b   :  { %5991 = vmatpush1.msra.mxu0 %v8630_v3  ;;  %10201 = vmatprep.subr.mxu1 %v17774_v8  ;;  %v17872_v3 = vld [vmem:[#allocation65_spill] sm:$0xff] }
 0x47c   :  { %5613 = vmatmul.mubr.f32.gmra.mxu0 %v15087_v39  ;;  %10148 = vmatmul.mubr.f32.gmra.mxu1 %v17870_v55 }
 0x47d   :  { %5992 = vmatprep.subr.mxu0 %v17774_v8  ;;  %5617 = vmatprep.mubr.f32.mxu0 %v17871_v24 }
 0x47e   :  { %5993 = vmatpush1.msra.mxu0 %v8629_v36  ;;  %10202 = vmatpush3.msra.mxu1 %v8664_v52  ;;  %v8623_v36 = vld [vmem:[%s17131_s4 + $0x318] sm:$0xff]  ;;  %v17873_v52 = vld [vmem:[#allocation64_spill] sm:$0xff] }
 0x47f   :  { %10150 = vmatprep.mubr.msk.f32.mxu1 %vm10636_vm1, %v17774_v8  ;;  %5994 = vmatprep.subr.mxu0 %v17774_v8 }
 0x480   :  { %5618 = vmatmul.mubr.f32.gmra.mxu0 %v15109_v51  ;;  %10151 = vmatmul.mubr.f32.gmra.mxu1 %v15114_v15 }
 0x481   :  { %5995 = vmatpush1.msra.mxu0 %v8628_v6  ;;  %5622 = vmatprep.mubr.f32.mxu0 %v15138_v46  ;;  %v8661_v6 = vld [vmem:[%s17131_s4 + $0x448] sm:$0xff] }
 0x482   :  { %5996 = vmatprep.subr.mxu0 %v17774_v8  ;;  %10203 = vmatprep.subr.mxu1 %v17774_v8 }
 0x483   :  { %5997 = vmatpush1.msra.mxu0 %v8627_v62  ;;  %10204 = vmatpush3.msra.mxu1 %v8663_v56  ;;  %v8622_v62 = vld [vmem:[%s17131_s4 + $0x310] sm:$0xff]  ;;  %v8621_v56 = vld [vmem:[%s17131_s4 + $0x308] sm:$0xff] }
 0x484   :  { %10153 = vmatprep.mubr.msk.f32.mxu1 %vm10636_vm1, %v17774_v8  ;;  %5623 = vmatmul.mubr.f32.gmra.mxu0 %v15143_v61 }
 0x485   :  { %10154 = vmatmul.mubr.f32.gmra.mxu1 %v15145_v53  ;;  %5998 = vmatprep.subr.mxu0 %v17774_v8 }
 0x486   :  { %5627 = vmatprep.mubr.f32.mxu0 %v15157_v4  ;;  %5999 = vmatpush1.msra.mxu0 %v8626_v21  ;;  %v17874_v21 = vld [vmem:[#allocation25_spill] sm:$0xff] }
 0x487   :  { %10156 = vmatprep.mubr.msk.f32.mxu1 %vm10636_vm1, %v17774_v8  ;;  %6000 = vmatprep.subr.mxu0 %v17774_v8 }
 0x488   :  { %10205 = vmatprep.subr.mxu1 %v17774_v8  ;;  %5628 = vmatmul.mubr.f32.gmra.mxu0 %v15177_v0 }
 0x489   :  { %10157 = vmatmul.mubr.f32.gmra.mxu1 %v15172_v59  ;;  %6001 = vmatpush1.msra.mxu0 %v8625_v27  ;;  %v8660_v27 = vld [vmem:[%s17131_s4 + $0x440] sm:$0xff] }
 0x48a   :  { %10206 = vmatpush3.msra.mxu1 %v8662_v25  ;;  %5632 = vmatprep.mubr.f32.mxu0 %v17872_v3  ;;  %v17875_v25 = vld [vmem:[#allocation27_spill] sm:$0xff] }
 0x48b   :  { %6002 = vmatprep.subr.mxu0 %v17774_v8  ;;  %10159 = vmatprep.mubr.msk.f32.mxu1 %vm10636_vm1, %v17774_v8 }
 0x48c   :  { %6003 = vmatpush1.msra.mxu0 %v8624_v22  ;;  %10207 = vmatprep.subr.mxu1 %v17774_v8  ;;  %v8620_v22 = vld [vmem:[%s17131_s4 + $0x300] sm:$0xff] }
 0x48d   :  { %5633 = vmatmul.mubr.f32.gmra.mxu0 %v17873_v52  ;;  %10160 = vmatmul.mubr.f32.gmra.mxu1 %v15199_v16 }
 0x48e   :  { %6004 = vmatprep.subr.mxu0 %v17774_v8  ;;  %5637 = vmatprep.mubr.f32.mxu0 %v15222_v63 }
 0x48f   :  { %6005 = vmatpush1.msra.mxu0 %v8623_v36  ;;  %10208 = vmatpush3.msra.mxu1 %v8661_v6  ;;  %v17876_v36 = vld [vmem:[#allocation66_spill] sm:$0xff]  ;;  %v17877_v6 = vld [vmem:[#allocation29_spill] sm:$0xff] }
 0x490   :  { %10162 = vmatprep.mubr.msk.f32.mxu1 %vm10636_vm1, %v17774_v8  ;;  %6006 = vmatprep.subr.mxu0 %v17774_v8 }
 0x491   :  { %5638 = vmatmul.mubr.f32.gmra.mxu0 %v15234_v32  ;;  %10163 = vmatmul.mubr.f32.gmra.mxu1 %v17874_v21 }
 0x492   :  { %6007 = vmatpush1.msra.mxu0 %v8622_v62  ;;  %5642 = vmatprep.mubr.f32.mxu0 %v17875_v25  ;;  %v8651_v62 = vld [vmem:[%s17131_s4 + $0x3f8] sm:$0xff] }
 0x493   :  { %6008 = vmatprep.subr.mxu0 %v17774_v8  ;;  %10209 = vmatprep.subr.mxu1 %v17774_v8 }
 0x494   :  { %6009 = vmatpush1.msra.mxu0 %v8621_v56  ;;  %10210 = vmatpush3.msra.mxu1 %v8660_v27  ;;  %v8659_v56 = vld [vmem:[%s17131_s4 + $0x438] sm:$0xff]  ;;  %v8650_v27 = vld [vmem:[%s17131_s4 + $0x3f0] sm:$0xff] }
 0x495   :  { %10165 = vmatprep.mubr.msk.f32.mxu1 %vm10636_vm1, %v17774_v8  ;;  %5643 = vmatmul.mubr.f32.gmra.mxu0 %v17876_v36 }
 0x496   :  { %10166 = vmatmul.mubr.f32.gmra.mxu1 %v15263_v10  ;;  %6010 = vmatprep.subr.mxu0 %v17774_v8 }
 0x497   :  { %5647 = vmatprep.mubr.f32.mxu0 %v17877_v6  ;;  %6011 = vmatpush1.msra.mxu0 %v8620_v22  ;;  %v8649_v22 = vld [vmem:[%s17131_s4 + $0x3e8] sm:$0xff] }
 0x498   :  { %10211 = vmatprep.subr.mxu1 %v17774_v8  ;;  %6012 = vmatprep.subr.mxu0 %v17774_v8 }
 0x499   :  { %10168 = vmatprep.mubr.msk.f32.mxu1 %vm10636_vm1, %v17774_v8  ;;  %6013 = vmatpush2.msra.mxu0 %v8651_v62  ;;  %v8658_v62 = vld [vmem:[%s17131_s4 + $0x430] sm:$0xff] }
 0x49a   :  { %10212 = vmatpush3.msra.mxu1 %v8659_v56  ;;  %5648 = vmatmul.mubr.f32.gmra.mxu0 %v15301_v45  ;;  %v8648_v56 = vld [vmem:[%s17131_s4 + $0x3e0] sm:$0xff] }
 0x49b   :  { %10169 = vmatmul.mubr.f32.gmra.mxu1 %v17878_v11  ;;  %5652 = vmatprep.mubr.f32.mxu0 %v15308_v9 }
 0x49c   :  { %6014 = vmatprep.subr.mxu0 %v17774_v8  ;;  %10171 = vmatprep.mubr.msk.f32.mxu1 %vm10636_vm1, %v17774_v8 }
 0x49d   :  { %6015 = vmatpush2.msra.mxu0 %v8650_v27  ;;  %10213 = vmatprep.subr.mxu1 %v17774_v8  ;;  %v17879_v27 = vld [vmem:[#allocation31_spill] sm:$0xff] }
 0x49e   :  { %6016 = vmatprep.subr.mxu0 %v17774_v8  ;;  %5653 = vmatmul.mubr.f32.gmra.mxu0 %v15344_v48 }
 0x49f   :  { %10172 = vmatmul.mubr.f32.gmra.mxu1 %v15326_v49  ;;  %5657 = vmatprep.mubr.f32.mxu0 %v17879_v27 }
 0x4a0   :  { %6017 = vmatpush2.msra.mxu0 %v8649_v22  ;;  %10214 = vmatpush3.msra.mxu1 %v8658_v62  ;;  %v8646_v22 = vld [vmem:[%s17131_s4 + $0x3d0] sm:$0xff]  ;;  %v17882_v62 = vld [vmem:[#allocation71_spill] sm:$0xff] }
 0x4a1   :  { %6018 = vmatprep.subr.mxu0 %v17774_v8  ;;  %10174 = vmatprep.mubr.msk.f32.mxu1 %vm10636_vm1, %v17774_v8 }
 0x4a2   :  { %6019 = vmatpush2.msra.mxu0 %v8648_v56  ;;  %10215 = vmatprep.subr.mxu1 %v17774_v8  ;;  %v17883_v56 = vld [vmem:[#allocation34_spill] sm:$0xff] }
 0x4a3   :  { %5658 = vmatmul.mubr.f32.gmra.mxu0 %v17880_v5  ;;  %10175 = vmatmul.mubr.f32.gmra.mxu1 %v17881_v20 }
 0x4a4   :  { %5662 = vmatprep.mubr.f32.mxu0 %v15371_v2  ;;  %6020 = vmatprep.subr.mxu0 %v17774_v8 }
 0x4a5   :  { %6021 = vmatpush2.msra.mxu0 %v8647_v30  ;;  %10216 = vmatpush3.msra.mxu1 %v8657_v33  ;;  %v8645_v30 = vld [vmem:[%s17131_s4 + $0x3c8] sm:$0xff]  ;;  %v8656_v33 = vld [vmem:[%s17131_s4 + $0x420] sm:$0xff] }
 0x4a6   :  { %10177 = vmatprep.mubr.msk.f32.mxu1 %vm10636_vm1, %v17774_v8  ;;  %6022 = vmatprep.subr.mxu0 %v17774_v8 }
 0x4a7   :  { %5663 = vmatmul.mubr.f32.gmra.mxu0 %v15401_v47  ;;  %10178 = vmatmul.mubr.f32.gmra.mxu1 %v17882_v62 }
 0x4a8   :  { %5667 = vmatprep.mubr.f32.mxu0 %v17883_v56  ;;  %6023 = vmatpush2.msra.mxu0 %v8646_v22  ;;  %v8643_v22 = vld [vmem:[%s17131_s4 + $0x3b8] sm:$0xff] }
 0x4a9   :  { %10217 = vmatprep.subr.mxu1 %v17774_v8  ;;  %6024 = vmatprep.subr.mxu0 %v17774_v8 }
 0x4aa   :  { %10180 = vmatprep.mubr.msk.f32.mxu1 %vm10636_vm1, %v17774_v8  ;;  %6025 = vmatpush2.msra.mxu0 %v8645_v30  ;;  %v8655_v30 = vld [vmem:[%s17131_s4 + $0x418] sm:$0xff] }
 0x4ab   :  { %10218 = vmatpush3.msra.mxu1 %v8656_v33  ;;  %5668 = vmatmul.mubr.f32.gmra.mxu0 %v15427_v57  ;;  %v17886_v33 = vld [vmem:[#allocation75_spill] sm:$0xff] }
 0x4ac   :  { %10181 = vmatmul.mubr.f32.gmra.mxu1 %v17884_v34  ;;  %5672 = vmatprep.mubr.f32.mxu0 %v17885_v18 }
 0x4ad   :  { %6026 = vmatprep.subr.mxu0 %v17774_v8  ;;  %10183 = vmatprep.mubr.msk.f32.mxu1 %vm10636_vm1, %v17774_v8 }
 0x4ae   :  { %6027 = vmatpush2.msra.mxu0 %v8644_v17  ;;  %10219 = vmatprep.subr.mxu1 %v17774_v8  ;;  %v8642_v17 = vld [vmem:[%s17131_s4 + $0x3b0] sm:$0xff] }
 0x4af   :  { %6028 = vmatprep.subr.mxu0 %v17774_v8  ;;  %5673 = vmatmul.mubr.f32.gmra.mxu0 %v15470_v29 }
 0x4b0   :  { %10184 = vmatmul.mubr.f32.gmra.mxu1 %v17886_v33  ;;  %6029 = vmatpush2.msra.mxu0 %v8643_v22  ;;  %v8654_v22 = vld [vmem:[%s17131_s4 + $0x410] sm:$0xff] }
 0x4b1   :  { %10220 = vmatpush3.msra.mxu1 %v8655_v30  ;;  %5677 = vmatprep.mubr.f32.mxu0 %v17887_v13  ;;  %v8640_v30 = vld [vmem:[%s17131_s4 + $0x3a0] sm:$0xff] }
 0x4b2   :  { %6030 = vmatprep.subr.mxu0 %v17774_v8  ;;  %10186 = vmatprep.mubr.msk.f32.mxu1 %vm10636_vm1, %v17774_v8 }
 0x4b3   :  { %6031 = vmatpush2.msra.mxu0 %v8642_v17  ;;  %10221 = vmatprep.subr.mxu1 %v17774_v8  ;;  %v8639_v17 = vld [vmem:[%s17131_s4 + $0x398] sm:$0xff] }
 0x4b4   :  { %5678 = vmatmul.mubr.f32.gmra.mxu0 %v17888_v19  ;;  %10187 = vmatmul.mubr.f32.gmra.mxu1 %v17889_v50 }
 0x4b5   :  { %5682 = vmatprep.mubr.f32.mxu0 %v15496_v26  ;;  %6032 = vmatprep.subr.mxu0 %v17774_v8 }
 0x4b6   :  { %6033 = vmatpush2.msra.mxu0 %v8641_v14  ;;  %10222 = vmatpush3.msra.mxu1 %v8654_v22  ;;  %v8653_v14 = vld [vmem:[%s17131_s4 + $0x408] sm:$0xff]  ;;  %v8638_v22 = vld [vmem:[%s17131_s4 + $0x390] sm:$0xff] }
 0x4b7   :  { %10189 = vmatprep.mubr.msk.f32.mxu1 %vm10636_vm1, %v17774_v8  ;;  %6034 = vmatprep.subr.mxu0 %v17774_v8 }
 0x4b8   :  { %5683 = vmatmul.mubr.f32.gmra.mxu0 %v15522_v35  ;;  %10190 = vmatmul.mubr.f32.gmra.mxu1 %v15513_v42 }
 0x4b9   :  { %6035 = vmatpush2.msra.mxu0 %v8640_v30  ;;  %5687 = vmatprep.mubr.f32.mxu0 %v15529_v41  ;;  %v8652_v30 = vld [vmem:[%s17131_s4 + $0x400] sm:$0xff] }
 0x4ba   :  { %6036 = vmatprep.subr.mxu0 %v17774_v8  ;;  %10223 = vmatprep.subr.mxu1 %v17774_v8 }
 0x4bb   :  { %10192 = vmatprep.mubr.msk.f32.mxu1 %vm10636_vm1, %v17774_v8  ;;  %6037 = vmatpush2.msra.mxu0 %v8639_v17  ;;  %v8637_v17 = vld [vmem:[%s17131_s4 + $0x388] sm:$0xff] }
 0x4bc   :  { %10224 = vmatpush3.msra.mxu1 %v8653_v14  ;;  %5688 = vmatmul.mubr.f32.gmra.mxu0 %v15556_v43  ;;  %v8636_v14 = vld [vmem:[%s17131_s4 + $0x380] sm:$0xff] }
 0x4bd   :  { %10193 = vmatmul.mubr.f32.gmra.mxu1 %v15551_v58  ;;  %5692 = vmatprep.mubr.f32.mxu0 %v15562_v60 }
 0x4be   :  { %6038 = vmatprep.subr.mxu0 %v17774_v8  ;;  %10225 = vmatprep.subr.mxu1 %v17774_v8 }
 0x4bf   :  { %6039 = vmatpush2.msra.mxu0 %v8638_v22  ;;  %10226 = vmatpush3.msra.mxu1 %v8652_v30  ;;  %v8683_v22 = vld [vmem:[%s17131_s4 + $0x4f8] sm:$0xff]  ;;  %v8714_v30 = vld [vmem:[%s17131_s4 + $0x5f0] sm:$0xff] }
 0x4c0   :  { %6040 = vmatprep.subr.mxu0 %v17774_v8  ;;  %10227 = vmatprep.mubr.msk.f32.mxu1 %vm10636_vm1, %v17774_v8 }
 0x4c1   :  { %5693 = vmatmul.mubr.f32.gmra.mxu0 %v15588_v40  ;;  %10228 = vmatmul.mubr.f32.vlgmr.msra.gmra.mxu1 %v15003_v23  ;;  %v8715_v23 = vld [vmem:[%s17131_s4 + $0x5f8] sm:$0xff] }
 0x4c2   :  { %6041 = vmatpush2.msra.mxu0 %v8637_v17  ;;  %6044 = vmatprep.mubr.f32.mxu0 %v15027_v38  ;;  %v8682_v38 = vld [vmem:[%s17131_s4 + $0x4f0] sm:$0xff]  ;;  %v8680_v17 = vld [vmem:[%s17131_s4 + $0x4e0] sm:$0xff] }
 0x4c3   :  { %6042 = vmatprep.subr.mxu0 %v17774_v8  ;;  %10230 = vmatprep.mubr.msk.f32.mxu1 %vm10636_vm1, %v17774_v8 }
 0x4c4   :  { %6043 = vmatpush2.msra.mxu0 %v8636_v14  ;;  %10290 = vmatprep.subr.mxu1 %v17774_v8 }
 0x4c5   :  { %6045 = vmatmul.mubr.f32.vlgmr.msra.gmra.mxu0 %v15029_v1  ;;  %6453 = vmatprep.subr.mxu0 %v17774_v8  ;;  %v8681_v1 = vld [vmem:[%s17131_s4 + $0x4e8] sm:$0xff] }
 0x4c6   :  { %10231 = vmatmul.mubr.f32.gmra.mxu1 %v15031_v54  ;;  %6049 = vmatprep.mubr.f32.mxu0 %v15045_v37 }
 0x4c7   :  { %6454 = vmatpush1.msra.mxu0 %v8683_v22  ;;  %10291 = vmatpush3.msra.mxu1 %v8715_v23  ;;  %v15959_v22 = vpop.f32.mrf.mxu0 }
 0x4c8   :  { %10233 = vmatprep.mubr.msk.f32.mxu1 %vm10636_vm1, %v17774_v8  ;;  %6455 = vmatprep.subr.mxu0 %v17774_v8  ;;  %17890 = vst [vmem:[#allocation4_spill] sm:$0xff] %v15959_v22 }
 0x4c9   :  { %6050 = vmatmul.mubr.f32.gmra.mxu0 %v15052_v7  ;;  %10292 = vmatprep.subr.mxu1 %v17774_v8 }
 0x4ca   :  { %10234 = vmatmul.mubr.f32.gmra.mxu1 %v15057_v12  ;;  %6456 = vmatpush1.msra.mxu0 %v8682_v38  ;;  %v8679_v38 = vld [vmem:[%s17131_s4 + $0x4d8] sm:$0xff] }
 0x4cb   :  { %6054 = vmatprep.mubr.f32.mxu0 %v15079_v44  ;;  %6457 = vmatprep.subr.mxu0 %v17774_v8  ;;  %v5424_v14 = vpop.f32.mrf.mxu1 }
 0x4cc   :  { %10236 = vmatprep.mubr.msk.f32.mxu1 %vm10636_vm1, %v17774_v8  ;;  %6458 = vmatpush1.msra.mxu0 %v8681_v1  ;;  %v8713_v1 = vld [vmem:[%s17131_s4 + $0x5e8] sm:$0xff] }
 0x4cd   :  { %10293 = vmatpush3.msra.mxu1 %v8714_v30  ;;  %6055 = vmatmul.mubr.f32.gmra.mxu0 %v15087_v39  ;;  %v10039_v23 = vpop.f32.mrf.mxu1 }
 0x4ce   :  { %10237 = vmatmul.mubr.f32.gmra.mxu1 %v17870_v55  ;;  %6459 = vmatprep.subr.mxu0 %v17774_v8 }
 0x4cf   :  { %6059 = vmatprep.mubr.f32.mxu0 %v17871_v24  ;;  %6460 = vmatpush1.msra.mxu0 %v8680_v17  ;;  %v5254_v30 = vpop.f32.mrf.mxu0  ;;  %v8678_v17 = vld [vmem:[%s17131_s4 + $0x4d0] sm:$0xff] }
 0x4d0   :  { %10239 = vmatprep.mubr.msk.f32.mxu1 %vm10636_vm1, %v17774_v8  ;;  %6461 = vmatprep.subr.mxu0 %v17774_v8  ;;  %v15978_v23 = vadd.f32 %v5424_v14, %v5254_v30  ;;  %v5429_v22 = vpop.f32.mrf.mxu1 }
 0x4d1   :  { %10294 = vmatprep.subr.mxu1 %v17774_v8  ;;  %6060 = vmatmul.mubr.f32.gmra.mxu0 %v15109_v51  ;;  %v5256_v24 = vpop.f32.mrf.mxu0 }
 0x4d2   :  { %10240 = vmatmul.mubr.f32.gmra.mxu1 %v15114_v15  ;;  %6462 = vmatpush1.msra.mxu0 %v8679_v38  ;;  %v10042_v55 = vpop.f32.mrf.mxu1  ;;  %v8677_v15 = vld [vmem:[%s17131_s4 + $0x4c8] sm:$0xff]  ;;  %v8712_v24 = vld [vmem:[%s17131_s4 + $0x5e0] sm:$0xff] }
 0x4d3   :  { %10295 = vmatpush3.msra.mxu1 %v8713_v1  ;;  %6064 = vmatprep.mubr.f32.mxu0 %v15138_v46  ;;  %v5259_v51 = vpop.f32.mrf.mxu0  ;;  %v8676_v1 = vld [vmem:[%s17131_s4 + $0x4c0] sm:$0xff] }
 0x4d4   :  { %6463 = vmatprep.subr.mxu0 %v17774_v8  ;;  %10242 = vmatprep.mubr.msk.f32.mxu1 %vm10636_vm1, %v17774_v8  ;;  %v15992_v14 = vadd.f32 %v5429_v22, %v5259_v51  ;;  %v5434_v55 = vpop.f32.mrf.mxu1  ;;  %v8675_v22 = vld [vmem:[%s17131_s4 + $0x4b8] sm:$0xff] }
 0x4d5   :  { %6464 = vmatpush1.msra.mxu0 %v8678_v17  ;;  %10296 = vmatprep.subr.mxu1 %v17774_v8  ;;  %v5261_v38 = vpop.f32.mrf.mxu0 }
 0x4d6   :  { %6065 = vmatmul.mubr.f32.gmra.mxu0 %v15143_v61  ;;  %10243 = vmatmul.mubr.f32.gmra.mxu1 %v15145_v53  ;;  %17891 = vst [vmem:[#allocation80_spill] sm:$0xff] %v15992_v14  ;;  %v10045_v30 = vpop.f32.mrf.mxu1 }
 0x4d7   :  { %6465 = vmatprep.subr.mxu0 %v17774_v8  ;;  %6069 = vmatprep.mubr.f32.mxu0 %v15157_v4  ;;  %v5264_v51 = vpop.f32.mrf.mxu0 }
 0x4d8   :  { %6466 = vmatpush1.msra.mxu0 %v8677_v15  ;;  %10297 = vmatpush3.msra.mxu1 %v8712_v24  ;;  %v16007_v17 = vadd.f32 %v5434_v55, %v5264_v51  ;;  %v5439_v15 = vpop.f32.mrf.mxu1  ;;  %v8711_v24 = vld [vmem:[%s17131_s4 + $0x5d8] sm:$0xff]  ;;  %v8674_v55 = vld [vmem:[%s17131_s4 + $0x4b0] sm:$0xff] }
 0x4d9   :  { %10245 = vmatprep.mubr.msk.f32.mxu1 %vm10636_vm1, %v17774_v8  ;;  %6467 = vmatprep.subr.mxu0 %v17774_v8  ;;  %v5266_v38 = vpop.f32.mrf.mxu0 }
 0x4da   :  { %6070 = vmatmul.mubr.f32.gmra.mxu0 %v15177_v0  ;;  %10246 = vmatmul.mubr.f32.gmra.mxu1 %v15172_v59  ;;  %v10048_v30 = vpop.f32.mrf.mxu1 }
 0x4db   :  { %6468 = vmatpush1.msra.mxu0 %v8676_v1  ;;  %6074 = vmatprep.mubr.f32.mxu0 %v17872_v3  ;;  %v5269_v14 = vpop.f32.mrf.mxu0 }
 0x4dc   :  { %6469 = vmatprep.subr.mxu0 %v17774_v8  ;;  %10298 = vmatprep.subr.mxu1 %v17774_v8  ;;  %v16021_v1 = vadd.f32 %v5439_v15, %v5269_v14  ;;  %v8673_v14 = vld [vmem:[%s17131_s4 + $0x4a8] sm:$0xff]  ;;  %v8710_v15 = vld [vmem:[%s17131_s4 + $0x5d0] sm:$0xff] }
 0x4dd   :  { %6470 = vmatpush1.msra.mxu0 %v8675_v22  ;;  %10299 = vmatpush3.msra.mxu1 %v8711_v24  ;;  %v5444_v51 = vpop.f32.mrf.mxu1  ;;  %v5271_v38 = vpop.f32.mrf.mxu0 }
 0x4de   :  { %10248 = vmatprep.mubr.msk.f32.mxu1 %vm10636_vm1, %v17774_v8  ;;  %17892 = vst [vmem:[#allocation51_spill] sm:$0xff] %v16021_v1  ;;  %6075 = vmatmul.mubr.f32.gmra.mxu0 %v17873_v52 }
 0x4df   :  { %10249 = vmatmul.mubr.f32.gmra.mxu1 %v15199_v16  ;;  %6471 = vmatprep.subr.mxu0 %v17774_v8  ;;  %v10051_v22 = vpop.f32.mrf.mxu1 }
 0x4e0   :  { %6079 = vmatprep.mubr.f32.mxu0 %v15222_v63  ;;  %6472 = vmatpush1.msra.mxu0 %v8674_v55  ;;  %v5274_v24 = vpop.f32.mrf.mxu0  ;;  %v8672_v55 = vld [vmem:[%s17131_s4 + $0x4a0] sm:$0xff] }
 0x4e1   :  { %10251 = vmatprep.mubr.msk.f32.mxu1 %vm10636_vm1, %v17774_v8  ;;  %6473 = vmatprep.subr.mxu0 %v17774_v8  ;;  %v16037_v30 = vadd.f32 %v5444_v51, %v5274_v24  ;;  %v5449_v38 = vpop.f32.mrf.mxu1  ;;  %v8671_v51 = vld [vmem:[%s17131_s4 + $0x498] sm:$0xff] }
 0x4e2   :  { %10300 = vmatprep.subr.mxu1 %v17774_v8  ;;  %6080 = vmatmul.mubr.f32.gmra.mxu0 %v15234_v32  ;;  %v5276_v22 = vpop.f32.mrf.mxu0 }
 0x4e3   :  { %17893 = vst [vmem:[#allocation67_spill] sm:$0xff] %v16037_v30  ;;  %10252 = vmatmul.mubr.f32.gmra.mxu1 %v17874_v21  ;;  %6474 = vmatpush1.msra.mxu0 %v8673_v14  ;;  %v10054_v1 = vpop.f32.mrf.mxu1 }
 0x4e4   :  { %10301 = vmatpush3.msra.mxu1 %v8710_v15  ;;  %6084 = vmatprep.mubr.f32.mxu0 %v17875_v25  ;;  %v5279_v63 = vpop.f32.mrf.mxu0  ;;  %v8709_v1 = vld [vmem:[%s17131_s4 + $0x5c8] sm:$0xff] }
 0x4e5   :  { %6475 = vmatprep.subr.mxu0 %v17774_v8  ;;  %10254 = vmatprep.mubr.msk.f32.mxu1 %vm10636_vm1, %v17774_v8  ;;  %v16051_v24 = vadd.f32 %v5449_v38, %v5279_v63  ;;  %v5454_v30 = vpop.f32.mrf.mxu1  ;;  %v8670_v63 = vld [vmem:[%s17131_s4 + $0x490] sm:$0xff] }
 0x4e6   :  { %6476 = vmatpush1.msra.mxu0 %v8672_v55  ;;  %v5281_v14 = vpop.f32.mrf.mxu0  ;;  %10302 = vmatprep.subr.mxu1 %v17774_v8  ;;  %v8669_v55 = vld [vmem:[%s17131_s4 + $0x488] sm:$0xff] }
 0x4e7   :  { %17894 = vst [vmem:[#allocation42_spill] sm:$0xff] %v16051_v24  ;;  %6085 = vmatmul.mubr.f32.gmra.mxu0 %v17876_v36  ;;  %10255 = vmatmul.mubr.f32.gmra.mxu1 %v15263_v10  ;;  %v10057_v15 = vpop.f32.mrf.mxu1 }
 0x4e8   :  { %6477 = vmatprep.subr.mxu0 %v17774_v8  ;;  %6089 = vmatprep.mubr.f32.mxu0 %v17877_v6  ;;  %v5284_v38 = vpop.f32.mrf.mxu0 }
 0x4e9   :  { %6478 = vmatpush1.msra.mxu0 %v8671_v51  ;;  %10303 = vmatpush3.msra.mxu1 %v8709_v1  ;;  %v16071_v22 = vadd.f32 %v5454_v30, %v5284_v38  ;;  %v5459_v51 = vpop.f32.mrf.mxu1  ;;  %v8708_v1 = vld [vmem:[%s17131_s4 + $0x5c0] sm:$0xff] }
 0x4ea   :  { %10257 = vmatprep.mubr.msk.f32.mxu1 %vm10636_vm1, %v17774_v8  ;;  %6479 = vmatprep.subr.mxu0 %v17774_v8  ;;  %v5286_v14 = vpop.f32.mrf.mxu0  ;;  %v8668_v30 = vld [vmem:[%s17131_s4 + $0x480] sm:$0xff] }
 0x4eb   :  { %6090 = vmatmul.mubr.f32.gmra.mxu0 %v15301_v45  ;;  %10258 = vmatmul.mubr.f32.gmra.mxu1 %v17878_v11  ;;  %v10060_v15 = vpop.f32.mrf.mxu1 }
 0x4ec   :  { %6480 = vmatpush1.msra.mxu0 %v8670_v63  ;;  %6094 = vmatprep.mubr.f32.mxu0 %v15308_v9  ;;  %v5289_v24 = vpop.f32.mrf.mxu0 }
 0x4ed   :  { %6481 = vmatprep.subr.mxu0 %v17774_v8  ;;  %10304 = vmatprep.subr.mxu1 %v17774_v8  ;;  %v16085_v63 = vadd.f32 %v5459_v51, %v5289_v24  ;;  %v5464_v38 = vpop.f32.mrf.mxu1 }
 0x4ee   :  { %6482 = vmatpush1.msra.mxu0 %v8669_v55  ;;  %10305 = vmatpush3.msra.mxu1 %v8708_v1  ;;  %v5291_v14 = vpop.f32.mrf.mxu0  ;;  %v8699_v55 = vld [vmem:[%s17131_s4 + $0x578] sm:$0xff] }
 0x4ef   :  { %10260 = vmatprep.mubr.msk.f32.mxu1 %vm10636_vm1, %v17774_v8  ;;  %17895 = vst [vmem:[#allocation68_spill] sm:$0xff] %v16085_v63  ;;  %6095 = vmatmul.mubr.f32.gmra.mxu0 %v15344_v48  ;;  %v8707_v1 = vld [vmem:[%s17131_s4 + $0x5b8] sm:$0xff]  ;;  %v10063_v24 = vpop.f32.mrf.mxu1  ;;  %v8698_v14 = vld [vmem:[%s17131_s4 + $0x570] sm:$0xff] }
 0x4f0   :  { %10261 = vmatmul.mubr.f32.gmra.mxu1 %v15326_v49  ;;  %6483 = vmatprep.subr.mxu0 %v17774_v8 }
 0x4f1   :  { %6099 = vmatprep.mubr.f32.mxu0 %v17879_v27  ;;  %6484 = vmatpush1.msra.mxu0 %v8668_v30  ;;  %v5294_v51 = vpop.f32.mrf.mxu0  ;;  %v5469_v15 = vpop.f32.mrf.mxu1 }
 0x4f2   :  { %10306 = vmatprep.subr.mxu1 %v17774_v8  ;;  %6485 = vmatprep.subr.mxu0 %v17774_v8  ;;  %v16104_v63 = vadd.f32 %v5464_v38, %v5294_v51 }
 0x4f3   :  { %10263 = vmatprep.mubr.msk.f32.mxu1 %vm10636_vm1, %v17774_v8  ;;  %6486 = vmatpush2.msra.mxu0 %v8699_v55  ;;  %v5296_v30 = vpop.f32.mrf.mxu0  ;;  %v10066_v24 = vpop.f32.mrf.mxu1  ;;  %v8697_v55 = vld [vmem:[%s17131_s4 + $0x568] sm:$0xff] }
 0x4f4   :  { %10307 = vmatpush3.msra.mxu1 %v8707_v1  ;;  %17896 = vst [vmem:[#allocation81_spill] sm:$0xff] %v16104_v63  ;;  %6100 = vmatmul.mubr.f32.gmra.mxu0 %v17880_v5  ;;  %v8706_v1 = vld [vmem:[%s17131_s4 + $0x5b0] sm:$0xff] }
 0x4f5   :  { %10264 = vmatmul.mubr.f32.gmra.mxu1 %v17881_v20  ;;  %6104 = vmatprep.mubr.f32.mxu0 %v15371_v2 }
 0x4f6   :  { %6487 = vmatprep.subr.mxu0 %v17774_v8  ;;  %10266 = vmatprep.mubr.msk.f32.mxu1 %vm10636_vm1, %v17774_v8  ;;  %v5299_v38 = vpop.f32.mrf.mxu0  ;;  %v5474_v30 = vpop.f32.mrf.mxu1 }
 0x4f7   :  { %6488 = vmatpush2.msra.mxu0 %v8698_v14  ;;  %10308 = vmatprep.subr.mxu1 %v17774_v8  ;;  %v16120_v51 = vadd.f32 %v5469_v15, %v5299_v38  ;;  %v8696_v14 = vld [vmem:[%s17131_s4 + $0x560] sm:$0xff]  ;;  %v8695_v15 = vld [vmem:[%s17131_s4 + $0x558] sm:$0xff] }
 0x4f8   :  { %6489 = vmatprep.subr.mxu0 %v17774_v8  ;;  %6105 = vmatmul.mubr.f32.gmra.mxu0 %v15401_v47  ;;  %v5301_v24 = vpop.f32.mrf.mxu0  ;;  %v10069_v63 = vpop.f32.mrf.mxu1 }
 0x4f9   :  { %17897 = vst [vmem:[#allocation5_spill] sm:$0xff] %v16120_v51  ;;  %10267 = vmatmul.mubr.f32.gmra.mxu1 %v17882_v62  ;;  %6109 = vmatprep.mubr.f32.mxu0 %v17883_v56  ;;  %v8705_v63 = vld [vmem:[%s17131_s4 + $0x5a8] sm:$0xff]  ;;  %v8694_v24 = vld [vmem:[%s17131_s4 + $0x550] sm:$0xff] }
 0x4fa   :  { %6490 = vmatpush2.msra.mxu0 %v8697_v55  ;;  %10309 = vmatpush3.msra.mxu1 %v8706_v1  ;;  %v5304_v38 = vpop.f32.mrf.mxu0 }
 0x4fb   :  { %6491 = vmatprep.subr.mxu0 %v17774_v8  ;;  %10269 = vmatprep.mubr.msk.f32.mxu1 %vm10636_vm1, %v17774_v8  ;;  %v5479_v51 = vpop.f32.mrf.mxu1  ;;  %v16139_v55 = vadd.f32 %v5474_v30, %v5304_v38 }
 0x4fc   :  { %6492 = vmatpush2.msra.mxu0 %v8696_v14  ;;  %v5306_v1 = vpop.f32.mrf.mxu0  ;;  %10310 = vmatprep.subr.mxu1 %v17774_v8 }
 0x4fd   :  { %6110 = vmatmul.mubr.f32.gmra.mxu0 %v15427_v57  ;;  %10270 = vmatmul.mubr.f32.gmra.mxu1 %v17884_v34  ;;  %17898 = vst [vmem:[#allocation70_spill] sm:$0xff] %v16139_v55  ;;  %v10072_v14 = vpop.f32.mrf.mxu1 }
 0x4fe   :  { %6114 = vmatprep.mubr.f32.mxu0 %v17885_v18  ;;  %6493 = vmatprep.subr.mxu0 %v17774_v8 }
 0x4ff   :  { %6494 = vmatpush2.msra.mxu0 %v8695_v15  ;;  %10311 = vmatpush3.msra.mxu1 %v8705_v63  ;;  %v5309_v30 = vpop.f32.mrf.mxu0  ;;  %v8693_v15 = vld [vmem:[%s17131_s4 + $0x548] sm:$0xff]  ;;  %v8704_v63 = vld [vmem:[%s17131_s4 + $0x5a0] sm:$0xff] }
 0x500   :  { %10272 = vmatprep.mubr.msk.f32.mxu1 %vm10636_vm1, %v17774_v8  ;;  %v5484_v38 = vpop.f32.mrf.mxu1  ;;  %6495 = vmatprep.subr.mxu0 %v17774_v8  ;;  %v16159_v1 = vadd.f32 %v5479_v51, %v5309_v30  ;;  %v17900_v51 = vld [vmem:[#allocation39_spill] sm:$0xff] }
 0x501   :  { %6115 = vmatmul.mubr.f32.gmra.mxu0 %v15470_v29  ;;  %10273 = vmatmul.mubr.f32.gmra.mxu1 %v17886_v33  ;;  %v5311_v14 = vpop.f32.mrf.mxu0  ;;  %v17901_v30 = vld [vmem:[#allocation87_spill] sm:$0xff] }
 0x502   :  { %6119 = vmatprep.mubr.f32.mxu0 %v17887_v13  ;;  %17899 = vst [vmem:[#allocation43_spill] sm:$0xff] %v16159_v1  ;;  %6496 = vmatpush2.msra.mxu0 %v8694_v24  ;;  %v10075_v55 = vpop.f32.mrf.mxu1  ;;  %v8692_v13 = vld [vmem:[%s17131_s4 + $0x540] sm:$0xff]  ;;  %v3762_v24 = vadd.f32 %v17901_v30, %v17900_v51  ;;  %v17902_v14 = vld [vmem:[#allocation57_spill] sm:$0xff]  ;;  %v8691_v51 = vld [vmem:[%s17131_s4 + $0x538] sm:$0xff] }
 0x503   :  { %10312 = vmatprep.subr.mxu1 %v17774_v8  ;;  %6497 = vmatprep.subr.mxu0 %v17774_v8 }
 0x504   :  { %10275 = vmatprep.mubr.msk.f32.mxu1 %vm10636_vm1, %v17774_v8  ;;  %6498 = vmatpush2.msra.mxu0 %v8693_v15  ;;  %v5314_v33 = vpop.f32.mrf.mxu0  ;;  %v5489_v29 = vpop.f32.mrf.mxu1  ;;  %v4233_v1 = vadd.f32 %v17902_v14, %v3762_v24 }
 0x505   :  { %10313 = vmatpush3.msra.mxu1 %v8704_v63  ;;  %6120 = vmatmul.mubr.f32.gmra.mxu0 %v17888_v19  ;;  %v16172_v55 = vadd.f32 %v5484_v38, %v5314_v33  ;;  %v8703_v33 = vld [vmem:[%s17131_s4 + $0x598] sm:$0xff] }
 0x506   :  { %10276 = vmatmul.mubr.f32.gmra.mxu1 %v17889_v50  ;;  %6124 = vmatprep.mubr.f32.mxu0 %v15496_v26  ;;  %v5316_v15 = vpop.f32.mrf.mxu0  ;;  %v10078_v63 = vpop.f32.mrf.mxu1  ;;  %v4704_v24 = vadd.f32 %v15549_v28, %v4233_v1  ;;  %v17904_v28 = vld [vmem:[#allocation16_spill] sm:$0xff] }
 0x507   :  { %6499 = vmatprep.subr.mxu0 %v17774_v8  ;;  %10278 = vmatprep.mubr.msk.f32.mxu1 %vm10636_vm1, %v17774_v8  ;;  %v4791_v1 = vmul.f32 %v17904_v28, %v15542_v31  ;;  %v8702_v31 = vld [vmem:[%s17131_s4 + $0x590] sm:$0xff] }
 0x508   :  { %6500 = vmatpush2.msra.mxu0 %v8692_v13  ;;  %10314 = vmatprep.subr.mxu1 %v17774_v8  ;;  %v5319_v38 = vpop.f32.mrf.mxu0  ;;  %v5494_v30 = vpop.f32.mrf.mxu1  ;;  %v8690_v13 = vld [vmem:[%s17131_s4 + $0x530] sm:$0xff] }
 0x509   :  { %6501 = vmatprep.subr.mxu0 %v17774_v8  ;;  %6125 = vmatmul.mubr.f32.gmra.mxu0 %v15522_v35  ;;  %v16193_v15 = vadd.f32 %v5489_v29, %v5319_v38  ;;  %v8689_v29 = vld [vmem:[%s17131_s4 + $0x528] sm:$0xff] }
 0x50a   :  { %10279 = vmatmul.mubr.f32.gmra.mxu1 %v15513_v42  ;;  %6502 = vmatpush2.msra.mxu0 %v8691_v51  ;;  %v5321_v63 = vpop.f32.mrf.mxu0  ;;  %v10081_v14 = vpop.f32.mrf.mxu1 }
 0x50b   :  { %17903 = vst [vmem:[#allocation52_spill] sm:$0xff] %v16193_v15  ;;  %10315 = vmatpush3.msra.mxu1 %v8703_v33  ;;  %6129 = vmatprep.mubr.f32.mxu0 %v15529_v41  ;;  %v17905_v33 = vld [vmem:[#allocation18_spill] sm:$0xff] }
 0x50c   :  { %6503 = vmatprep.subr.mxu0 %v17774_v8  ;;  %10281 = vmatprep.mubr.msk.f32.mxu1 %vm10636_vm1, %v17774_v8  ;;  %v5324_v38 = vpop.f32.mrf.mxu0  ;;  %v5499_v51 = vpop.f32.mrf.mxu1  ;;  %v4790_v63 = vmul.f32 %v17905_v33, %v4704_v24  ;;  %v8688_v24 = vld [vmem:[%s17131_s4 + $0x520] sm:$0xff]  ;;  %v17907_v33 = vld [vmem:[#allocation60_spill] sm:$0xff] }
 0x50d   :  { %6504 = vmatpush2.msra.mxu0 %v8690_v13  ;;  %v16210_v14 = vadd.f32 %v5494_v30, %v5324_v38  ;;  %10316 = vmatprep.subr.mxu1 %v17774_v8  ;;  %v4877_v15 = vadd.f32 %v17907_v33, %v4791_v1  ;;  %v17910_v30 = vld [vmem:[#allocation61_spill] sm:$0xff]  ;;  %v8687_v1 = vld [vmem:[%s17131_s4 + $0x518] sm:$0xff] }
 0x50e   :  { %6130 = vmatmul.mubr.f32.gmra.mxu0 %v15556_v43  ;;  %10282 = vmatmul.mubr.f32.gmra.mxu1 %v15551_v58  ;;  %v5326_v13 = vpop.f32.mrf.mxu0  ;;  %v10084_v28 = vpop.f32.mrf.mxu1  ;;  %v17908_v58 = vld [vmem:[#allocation77_spill] sm:$0xff] }
 0x50f   :  { %17906 = vst [vmem:[#allocation32_spill] sm:$0xff] %v16210_v14  ;;  %6134 = vmatprep.mubr.f32.mxu0 %v15562_v60  ;;  %6505 = vmatprep.subr.mxu0 %v17774_v8  ;;  %v17909_v43 = vld [vmem:[#allocation17_spill] sm:$0xff]  ;;  %v4876_v28 = vadd.f32 %v17910_v30, %v4790_v63  ;;  %v17911_v13 = vld [vmem:[#allocation50_spill] sm:$0xff]  ;;  %v16237_v33 = vmax.f32 %v4877_v15, 0.0  ;;  %v17913_v14 = vld [vmem:[#allocation19_spill] sm:$0xff] }
 0x510   :  { %6506 = vmatpush2.msra.mxu0 %v8689_v29  ;;  %v4789_v41 = vmul.f32 %v17909_v43, %v17908_v58  ;;  %10317 = vmatpush3.msra.mxu1 %v8702_v31  ;;  %v8701_v58 = vld [vmem:[%s17131_s4 + $0x588] sm:$0xff]  ;;  %v17912_v43 = vld [vmem:[#allocation3_spill] sm:$0xff] }
 0x511   :  { %10284 = vmatprep.mubr.msk.f32.mxu1 %vm10636_vm1, %v17774_v8  ;;  %6507 = vmatprep.subr.mxu0 %v17774_v8  ;;  %v5329_v29 = vpop.f32.mrf.mxu0  ;;  %v5504_v38 = vpop.f32.mrf.mxu1 }
 0x512   :  { %6135 = vmatmul.mubr.f32.gmra.mxu0 %v15588_v40  ;;  %10285 = vmatmul.mubr.f32.gmra.mxu1 %v17911_v13  ;;  %v16233_v31 = vadd.f32 %v5499_v51, %v5329_v29  ;;  %v16243_v13 = vmax.f32 %v4876_v28, 0.0  ;;  %v8686_v51 = vld [vmem:[%s17131_s4 + $0x510] sm:$0xff] }
 0x513   :  { %6508 = vmatpush2.msra.mxu0 %v8688_v24  ;;  %6139 = vmatprep.mubr.f32.mxu0 %v17912_v43  ;;  %v5331_v63 = vpop.f32.mrf.mxu0  ;;  %v10087_v30 = vpop.f32.mrf.mxu1  ;;  %v4875_v24 = vadd.f32 %v17913_v14, %v4789_v41  ;;  %v8700_v41 = vld [vmem:[%s17131_s4 + $0x580] sm:$0xff]  ;;  %v8685_v14 = vld [vmem:[%s17131_s4 + $0x508] sm:$0xff] }
 0x514   :  { %6509 = vmatprep.subr.mxu0 %v17774_v8  ;;  %10318 = vmatprep.subr.mxu1 %v17774_v8  ;;  %v17914_v30 = vld [vmem:[#allocation41_spill] sm:$0xff] }
 0x515   :  { %10287 = vmatprep.mubr.msk.f32.mxu1 %vm10636_vm1, %v17774_v8  ;;  %6510 = vmatpush2.msra.mxu0 %v8687_v1  ;;  %v5334_v29 = vpop.f32.mrf.mxu0 }
 0x516   :  { %10319 = vmatpush3.msra.mxu1 %v8701_v58  ;;  %v5509_v63 = vpop.f32.mrf.mxu1  ;;  %6140 = vmatmul.mubr.f32.gmra.mxu0 %v17914_v30  ;;  %v16253_v15 = vadd.f32 %v5504_v38, %v5334_v29  ;;  %v16257_v58 = vmax.f32 %v4875_v24, 0.0  ;;  %v8684_v24 = vld [vmem:[%s17131_s4 + $0x500] sm:$0xff] }
 0x517   :  { %10288 = vmatmul.mubr.f32.gmra.mxu1 %v16237_v33  ;;  %6144 = vmatprep.mubr.f32.mxu0 %v16243_v13  ;;  %v5336_v28 = vpop.f32.mrf.mxu0 }
 0x518   :  { %17915 = vst [vmem:[#allocation45_spill] sm:$0xff] %v16253_v15  ;;  %6511 = vmatprep.subr.mxu0 %v17774_v8  ;;  %v10090_v1 = vpop.f32.mrf.mxu1  ;;  %10320 = vmatprep.subr.mxu1 %v17774_v8 }
 0x519   :  { %6512 = vmatpush2.msra.mxu0 %v8686_v51  ;;  %10321 = vmatpush3.msra.mxu1 %v8700_v41  ;;  %v8731_v41 = vld [vmem:[%s17131_s4 + $0x678] sm:$0xff] }
 0x51a   :  { %6513 = vmatprep.subr.mxu0 %v17774_v8  ;;  %v5339_v38 = vpop.f32.mrf.mxu0  ;;  %v5514_v29 = vpop.f32.mrf.mxu1  ;;  %10322 = vmatprep.mubr.msk.f32.mxu1 %vm10636_vm1, %v17774_v8 }
 0x51b   :  { %6145 = vmatmul.mubr.f32.gmra.mxu0 %v16257_v58  ;;  %v16270_v51 = vadd.f32 %v5509_v63, %v5339_v38  ;;  %10323 = vmatmul.mubr.f32.vlgmr.msra.gmra.mxu1 %v15031_v54  ;;  %v8763_v54 = vld [vmem:[%s17131_s4 + $0x778] sm:$0xff] }
 0x51c   :  { %6514 = vmatpush2.msra.mxu0 %v8685_v14  ;;  %v5341_v28 = vpop.f32.mrf.mxu0  ;;  %v10093_v1 = vpop.f32.mrf.mxu1  ;;  %6517 = vmatprep.mubr.f32.mxu0 %v15045_v37 }
 0x51d   :  { %6515 = vmatprep.subr.mxu0 %v17774_v8  ;;  %10325 = vmatprep.mubr.msk.f32.mxu1 %vm10636_vm1, %v17774_v8  ;;  %v8729_v28 = vld [vmem:[%s17131_s4 + $0x668] sm:$0xff]  ;;  %v8762_v1 = vld [vmem:[%s17131_s4 + $0x770] sm:$0xff] }
 0x51e   :  { %6516 = vmatpush2.msra.mxu0 %v8684_v24  ;;  %v5344_v15 = vpop.f32.mrf.mxu0  ;;  %v5519_v14 = vpop.f32.mrf.mxu1  ;;  %10385 = vmatprep.subr.mxu1 %v17774_v8  ;;  %v17916_v24 = vld [vmem:[#allocation20_spill] sm:$0xff] }
 0x51f   :  { %6518 = vmatmul.mubr.f32.vlgmr.msra.gmra.mxu0 %v15052_v7  ;;  %6926 = vmatprep.subr.mxu0 %v17774_v8  ;;  %v16285_v37 = vadd.f32 %v5514_v29, %v5344_v15  ;;  %v8730_v7 = vld [vmem:[%s17131_s4 + $0x670] sm:$0xff] }
 0x520   :  { %10326 = vmatmul.mubr.f32.gmra.mxu1 %v15057_v12  ;;  %v5346_v63 = vpop.f32.mrf.mxu0  ;;  %6522 = vmatprep.mubr.f32.mxu0 %v15079_v44  ;;  %v10096_v38 = vpop.f32.mrf.mxu1 }
 0x521   :  { %6927 = vmatpush1.msra.mxu0 %v8731_v41  ;;  %10386 = vmatpush3.msra.mxu1 %v8763_v54  ;;  %v17918_v54 = vld [vmem:[#allocation22_spill] sm:$0xff] }
 0x522   :  { %10328 = vmatprep.mubr.msk.f32.mxu1 %vm10636_vm1, %v17774_v8  ;;  %6928 = vmatprep.subr.mxu0 %v17774_v8  ;;  %v5349_v15 = vpop.f32.mrf.mxu0 }
 0x523   :  { %6523 = vmatmul.mubr.f32.gmra.mxu0 %v15087_v39  ;;  %v5524_v29 = vpop.f32.mrf.mxu1  ;;  %v16304_v41 = vadd.f32 %v5519_v14, %v5349_v15  ;;  %10387 = vmatprep.subr.mxu1 %v17774_v8  ;;  %v17919_v14 = vld [vmem:[#allocation62_spill] sm:$0xff]  ;;  %v17920_v15 = vld [vmem:[#allocation21_spill] sm:$0xff] }
 0x524   :  { %10329 = vmatmul.mubr.f32.gmra.mxu1 %v17916_v24  ;;  %6929 = vmatpush1.msra.mxu0 %v8730_v7  ;;  %v5351_v63 = vpop.f32.mrf.mxu0  ;;  %v8728_v7 = vld [vmem:[%s17131_s4 + $0x660] sm:$0xff] }
 0x525   :  { %17917 = vst [vmem:[#allocation6_spill] sm:$0xff] %v16304_v41  ;;  %6527 = vmatprep.mubr.f32.mxu0 %v17918_v54  ;;  %6930 = vmatprep.subr.mxu0 %v17774_v8  ;;  %v10099_v38 = vpop.f32.mrf.mxu1 }
 0x526   :  { %10331 = vmatprep.mubr.msk.f32.mxu1 %vm10636_vm1, %v17774_v8  ;;  %6931 = vmatpush1.msra.mxu0 %v8729_v28  ;;  %v8727_v28 = vld [vmem:[%s17131_s4 + $0x658] sm:$0xff] }
 0x527   :  { %10388 = vmatpush3.msra.mxu1 %v8762_v1  ;;  %v5354_v24 = vpop.f32.mrf.mxu0  ;;  %6528 = vmatmul.mubr.f32.gmra.mxu0 %v17919_v14  ;;  %v5764_v63 = vpop.f32.mrf.mxu1  ;;  %v8761_v1 = vld [vmem:[%s17131_s4 + $0x768] sm:$0xff] }
 0x528   :  { %10332 = vmatmul.mubr.f32.gmra.mxu1 %v17920_v15  ;;  %v16316_v41 = vadd.f32 %v5524_v29, %v5354_v24  ;;  %6932 = vmatprep.subr.mxu0 %v17774_v8 }
 0x529   :  { %6532 = vmatprep.mubr.f32.mxu0 %v15138_v46  ;;  %v5356_v38 = vpop.f32.mrf.mxu0  ;;  %6933 = vmatpush1.msra.mxu0 %v8728_v7  ;;  %v10134_v29 = vpop.f32.mrf.mxu1  ;;  %v8726_v7 = vld [vmem:[%s17131_s4 + $0x650] sm:$0xff] }
 0x52a   :  { %17921 = vst [vmem:[#allocation33_spill] sm:$0xff] %v16316_v41  ;;  %10334 = vmatprep.mubr.msk.f32.mxu1 %vm10636_vm1, %v17774_v8  ;;  %6934 = vmatprep.subr.mxu0 %v17774_v8 }
 0x52b   :  { %10389 = vmatprep.subr.mxu1 %v17774_v8  ;;  %v5594_v24 = vpop.f32.mrf.mxu0  ;;  %6533 = vmatmul.mubr.f32.gmra.mxu0 %v15143_v61 }
 0x52c   :  { %10335 = vmatmul.mubr.f32.gmra.mxu1 %v15145_v53  ;;  %v5595_v38 = vadd.f32 %v5594_v24, %v15978_v23  ;;  %v5769_v41 = vpop.f32.mrf.mxu1  ;;  %6935 = vmatpush1.msra.mxu0 %v8727_v28  ;;  %v8725_v53 = vld [vmem:[%s17131_s4 + $0x648] sm:$0xff]  ;;  %v8724_v24 = vld [vmem:[%s17131_s4 + $0x640] sm:$0xff] }
 0x52d   :  { %10390 = vmatpush3.msra.mxu1 %v8761_v1  ;;  %v5596_v46 = vpop.f32.mrf.mxu0  ;;  %6537 = vmatprep.mubr.f32.mxu0 %v15157_v4 }
 0x52e   :  { %6936 = vmatprep.subr.mxu0 %v17774_v8  ;;  %v16338_v29 = vadd.f32 %v5764_v63, %v5595_v38  ;;  %v10137_v15 = vpop.f32.mrf.mxu1  ;;  %10337 = vmatprep.mubr.msk.f32.mxu1 %vm10636_vm1, %v17774_v8  ;;  %v8760_v46 = vld [vmem:[%s17131_s4 + $0x760] sm:$0xff]  ;;  %v17922_v63 = vld [vmem:[#allocation80_spill] sm:$0xff] }
 0x52f   :  { %6937 = vmatpush1.msra.mxu0 %v8726_v7  ;;  %v5599_v23 = vpop.f32.mrf.mxu0  ;;  %10391 = vmatprep.subr.mxu1 %v17774_v8 }
 0x530   :  { %6538 = vmatmul.mubr.f32.gmra.mxu0 %v15177_v0  ;;  %10338 = vmatmul.mubr.f32.gmra.mxu1 %v15172_v59  ;;  %v5600_v28 = vadd.f32 %v5599_v23, %v17922_v63  ;;  %v5774_v15 = vpop.f32.mrf.mxu1  ;;  %v8723_v23 = vld [vmem:[%s17131_s4 + $0x638] sm:$0xff] }
 0x531   :  { %6938 = vmatprep.subr.mxu0 %v17774_v8  ;;  %v5601_v1 = vpop.f32.mrf.mxu0  ;;  %6542 = vmatprep.mubr.f32.mxu0 %v17872_v3 }
 0x532   :  { %6939 = vmatpush1.msra.mxu0 %v8725_v53  ;;  %v16357_v7 = vadd.f32 %v5769_v41, %v5600_v28  ;;  %v10140_v38 = vpop.f32.mrf.mxu1  ;;  %10392 = vmatpush3.msra.mxu1 %v8760_v46  ;;  %v8759_v41 = vld [vmem:[%s17131_s4 + $0x758] sm:$0xff]  ;;  %v17924_v28 = vld [vmem:[#allocation24_spill] sm:$0xff] }
 0x533   :  { %10340 = vmatprep.mubr.msk.f32.mxu1 %vm10636_vm1, %v17774_v8  ;;  %6940 = vmatprep.subr.mxu0 %v17774_v8  ;;  %v5604_v53 = vpop.f32.mrf.mxu0 }
 0x534   :  { %17923 = vst [vmem:[#allocation82_spill] sm:$0xff] %v16357_v7  ;;  %6543 = vmatmul.mubr.f32.gmra.mxu0 %v17873_v52  ;;  %v5779_v63 = vpop.f32.mrf.mxu1  ;;  %10341 = vmatmul.mubr.f32.gmra.mxu1 %v15199_v16  ;;  %v5605_v46 = vadd.f32 %v5604_v53, %v16007_v17 }
 0x535   :  { %6941 = vmatpush1.msra.mxu0 %v8724_v24  ;;  %6547 = vmatprep.mubr.f32.mxu0 %v17924_v28  ;;  %v5606_v1 = vpop.f32.mrf.mxu0  ;;  %v8722_v24 = vld [vmem:[%s17131_s4 + $0x630] sm:$0xff] }
 0x536   :  { %6942 = vmatprep.subr.mxu0 %v17774_v8  ;;  %v10143_v38 = vpop.f32.mrf.mxu1  ;;  %10393 = vmatprep.subr.mxu1 %v17774_v8  ;;  %v16374_v7 = vadd.f32 %v5774_v15, %v5605_v46  ;;  %v17926_v1 = vld [vmem:[#allocation51_spill] sm:$0xff]  ;;  %v8758_v46 = vld [vmem:[%s17131_s4 + $0x750] sm:$0xff] }
 0x537   :  { %6943 = vmatpush1.msra.mxu0 %v8723_v23  ;;  %10394 = vmatpush3.msra.mxu1 %v8759_v41  ;;  %v5609_v17 = vpop.f32.mrf.mxu0  ;;  %v8721_v41 = vld [vmem:[%s17131_s4 + $0x628] sm:$0xff] }
 0x538   :  { %17925 = vst [vmem:[#allocation7_spill] sm:$0xff] %v16374_v7  ;;  %10343 = vmatprep.mubr.msk.f32.mxu1 %vm10636_vm1, %v17774_v8  ;;  %v5784_v53 = vpop.f32.mrf.mxu1  ;;  %6548 = vmatmul.mubr.f32.gmra.mxu0 %v15234_v32  ;;  %v5610_v38 = vadd.f32 %v5609_v17, %v17926_v1 }
 0x539   :  { %10344 = vmatmul.mubr.f32.gmra.mxu1 %v17874_v21  ;;  %6944 = vmatprep.subr.mxu0 %v17774_v8  ;;  %v5611_v15 = vpop.f32.mrf.mxu0 }
 0x53a   :  { %6552 = vmatprep.mubr.f32.mxu0 %v17875_v25  ;;  %v10146_v23 = vpop.f32.mrf.mxu1  ;;  %6945 = vmatpush1.msra.mxu0 %v8722_v24  ;;  %v16394_v7 = vadd.f32 %v5779_v63, %v5610_v38  ;;  %v8720_v24 = vld [vmem:[%s17131_s4 + $0x620] sm:$0xff] }
 0x53b   :  { %10346 = vmatprep.mubr.msk.f32.mxu1 %vm10636_vm1, %v17774_v8  ;;  %6946 = vmatprep.subr.mxu0 %v17774_v8  ;;  %v17928_v15 = vld [vmem:[#allocation67_spill] sm:$0xff] }
 0x53c   :  { %17927 = vst [vmem:[#allocation72_spill] sm:$0xff] %v16394_v7  ;;  %10395 = vmatprep.subr.mxu1 %v17774_v8  ;;  %v5614_v17 = vpop.f32.mrf.mxu0  ;;  %v5789_v1 = vpop.f32.mrf.mxu1  ;;  %6553 = vmatmul.mubr.f32.gmra.mxu0 %v17876_v36 }
 0x53d   :  { %10347 = vmatmul.mubr.f32.gmra.mxu1 %v15263_v10  ;;  %v5615_v23 = vadd.f32 %v5614_v17, %v17928_v15  ;;  %6947 = vmatpush1.msra.mxu0 %v8721_v41  ;;  %v8719_v10 = vld [vmem:[%s17131_s4 + $0x618] sm:$0xff]  ;;  %v8757_v41 = vld [vmem:[%s17131_s4 + $0x748] sm:$0xff]  ;;  %v8718_v15 = vld [vmem:[%s17131_s4 + $0x610] sm:$0xff] }
 0x53e   :  { %10396 = vmatpush3.msra.mxu1 %v8758_v46  ;;  %v5616_v63 = vpop.f32.mrf.mxu0  ;;  %v10149_v38 = vpop.f32.mrf.mxu1  ;;  %6557 = vmatprep.mubr.f32.mxu0 %v17877_v6  ;;  %v17929_v46 = vld [vmem:[#allocation42_spill] sm:$0xff] }
 0x53f   :  { %6948 = vmatprep.subr.mxu0 %v17774_v8  ;;  %v16406_v7 = vadd.f32 %v5784_v53, %v5615_v23  ;;  %10349 = vmatprep.mubr.msk.f32.mxu1 %vm10636_vm1, %v17774_v8 }
 0x540   :  { %6949 = vmatpush1.msra.mxu0 %v8720_v24  ;;  %v5619_v36 = vpop.f32.mrf.mxu0  ;;  %v5794_v17 = vpop.f32.mrf.mxu1  ;;  %10397 = vmatprep.subr.mxu1 %v17774_v8 }
 0x541   :  { %6558 = vmatmul.mubr.f32.gmra.mxu0 %v15301_v45  ;;  %10350 = vmatmul.mubr.f32.gmra.mxu1 %v17878_v11  ;;  %v5620_v53 = vadd.f32 %v5619_v36, %v17929_v46  ;;  %v8717_v36 = vld [vmem:[%s17131_s4 + $0x608] sm:$0xff] }
 0x542   :  { %6950 = vmatprep.subr.mxu0 %v17774_v8  ;;  %v5621_v24 = vpop.f32.mrf.mxu0  ;;  %6562 = vmatprep.mubr.f32.mxu0 %v15308_v9  ;;  %v10152_v63 = vpop.f32.mrf.mxu1 }
 0x543   :  { %6951 = vmatpush1.msra.mxu0 %v8719_v10  ;;  %v16425_v23 = vadd.f32 %v5789_v1, %v5620_v53  ;;  %10398 = vmatpush3.msra.mxu1 %v8757_v41  ;;  %v8756_v1 = vld [vmem:[%s17131_s4 + $0x740] sm:$0xff] }
 0x544   :  { %10352 = vmatprep.mubr.msk.f32.mxu1 %vm10636_vm1, %v17774_v8  ;;  %6952 = vmatprep.subr.mxu0 %v17774_v8  ;;  %v5624_v10 = vpop.f32.mrf.mxu0 }
 0x545   :  { %6563 = vmatmul.mubr.f32.gmra.mxu0 %v15344_v48  ;;  %v5799_v38 = vpop.f32.mrf.mxu1  ;;  %10353 = vmatmul.mubr.f32.gmra.mxu1 %v15326_v49  ;;  %v5625_v41 = vadd.f32 %v5624_v10, %v16071_v22  ;;  %v17931_v10 = vld [vmem:[#allocation68_spill] sm:$0xff] }
 0x546   :  { %6953 = vmatpush1.msra.mxu0 %v8718_v15  ;;  %6567 = vmatprep.mubr.f32.mxu0 %v17879_v27  ;;  %v5626_v46 = vpop.f32.mrf.mxu0  ;;  %v8716_v15 = vld [vmem:[%s17131_s4 + $0x600] sm:$0xff] }
 0x547   :  { %6954 = vmatprep.subr.mxu0 %v17774_v8  ;;  %v10155_v53 = vpop.f32.mrf.mxu1  ;;  %10399 = vmatprep.subr.mxu1 %v17774_v8  ;;  %v16442_v24 = vadd.f32 %v5794_v17, %v5625_v41  ;;  %v8747_v17 = vld [vmem:[%s17131_s4 + $0x6f8] sm:$0xff] }
 0x548   :  { %6955 = vmatpush1.msra.mxu0 %v8717_v36  ;;  %10400 = vmatpush3.msra.mxu1 %v8756_v1  ;;  %v5629_v22 = vpop.f32.mrf.mxu0  ;;  %v8755_v36 = vld [vmem:[%s17131_s4 + $0x738] sm:$0xff] }
 0x549   :  { %17930 = vst [vmem:[#allocation44_spill] sm:$0xff] %v16442_v24  ;;  %10355 = vmatprep.mubr.msk.f32.mxu1 %vm10636_vm1, %v17774_v8  ;;  %v5804_v63 = vpop.f32.mrf.mxu1  ;;  %6568 = vmatmul.mubr.f32.gmra.mxu0 %v17880_v5  ;;  %v5630_v46 = vadd.f32 %v5629_v22, %v17931_v10  ;;  %v8746_v24 = vld [vmem:[%s17131_s4 + $0x6f0] sm:$0xff] }
 0x54a   :  { %10356 = vmatmul.mubr.f32.gmra.mxu1 %v17881_v20  ;;  %6956 = vmatprep.subr.mxu0 %v17774_v8  ;;  %v5631_v1 = vpop.f32.mrf.mxu0 }
 0x54b   :  { %6572 = vmatprep.mubr.f32.mxu0 %v15371_v2  ;;  %v10158_v41 = vpop.f32.mrf.mxu1  ;;  %6957 = vmatpush1.msra.mxu0 %v8716_v15  ;;  %v16461_v53 = vadd.f32 %v5799_v38, %v5630_v46  ;;  %v17933_v1 = vld [vmem:[#allocation81_spill] sm:$0xff] }
 0x54c   :  { %10401 = vmatprep.subr.mxu1 %v17774_v8  ;;  %6958 = vmatprep.subr.mxu0 %v17774_v8 }
 0x54d   :  { %17932 = vst [vmem:[#allocation53_spill] sm:$0xff] %v16461_v53  ;;  %10358 = vmatprep.mubr.msk.f32.mxu1 %vm10636_vm1, %v17774_v8  ;;  %v5634_v22 = vpop.f32.mrf.mxu0  ;;  %v5809_v10 = vpop.f32.mrf.mxu1  ;;  %6959 = vmatpush2.msra.mxu0 %v8747_v17  ;;  %v8745_v17 = vld [vmem:[%s17131_s4 + $0x6e8] sm:$0xff] }
 0x54e   :  { %10402 = vmatpush3.msra.mxu1 %v8755_v36  ;;  %v5635_v41 = vadd.f32 %v5634_v22, %v17933_v1  ;;  %6573 = vmatmul.mubr.f32.gmra.mxu0 %v15401_v47  ;;  %v8754_v22 = vld [vmem:[%s17131_s4 + $0x730] sm:$0xff] }
 0x54f   :  { %10359 = vmatmul.mubr.f32.gmra.mxu1 %v17882_v62  ;;  %v5636_v38 = vpop.f32.mrf.mxu0  ;;  %v10161_v15 = vpop.f32.mrf.mxu1  ;;  %6577 = vmatprep.mubr.f32.mxu0 %v17883_v56  ;;  %v17935_v1 = vld [vmem:[#allocation5_spill] sm:$0xff] }
 0x550   :  { %6960 = vmatprep.subr.mxu0 %v17774_v8  ;;  %v16474_v46 = vadd.f32 %v5804_v63, %v5635_v41  ;;  %10361 = vmatprep.mubr.msk.f32.mxu1 %vm10636_vm1, %v17774_v8 }
 0x551   :  { %6961 = vmatpush2.msra.mxu0 %v8746_v24  ;;  %v5639_v36 = vpop.f32.mrf.mxu0  ;;  %10403 = vmatprep.subr.mxu1 %v17774_v8  ;;  %v5814_v41 = vpop.f32.mrf.mxu1  ;;  %v8744_v24 = vld [vmem:[%s17131_s4 + $0x6e0] sm:$0xff] }
 0x552   :  { %17934 = vst [vmem:[#allocation10_spill] sm:$0xff] %v16474_v46  ;;  %6962 = vmatprep.subr.mxu0 %v17774_v8  ;;  %v5640_v63 = vadd.f32 %v5639_v36, %v17935_v1  ;;  %6578 = vmatmul.mubr.f32.gmra.mxu0 %v15427_v57  ;;  %v8743_v36 = vld [vmem:[%s17131_s4 + $0x6d8] sm:$0xff] }
 0x553   :  { %10362 = vmatmul.mubr.f32.gmra.mxu1 %v17884_v34  ;;  %v5641_v38 = vpop.f32.mrf.mxu0  ;;  %6582 = vmatprep.mubr.f32.mxu0 %v17885_v18  ;;  %v10164_v46 = vpop.f32.mrf.mxu1  ;;  %v17938_v18 = vld [vmem:[#allocation75_spill] sm:$0xff] }
 0x554   :  { %6963 = vmatpush2.msra.mxu0 %v8745_v17  ;;  %v16493_v15 = vadd.f32 %v5809_v10, %v5640_v63  ;;  %10404 = vmatpush3.msra.mxu1 %v8754_v22  ;;  %v17937_v38 = vld [vmem:[#allocation37_spill] sm:$0xff]  ;;  %v8753_v10 = vld [vmem:[%s17131_s4 + $0x728] sm:$0xff]  ;;  %v17939_v46 = vld [vmem:[#allocation70_spill] sm:$0xff] }
 0x555   :  { %6964 = vmatprep.subr.mxu0 %v17774_v8  ;;  %10364 = vmatprep.mubr.msk.f32.mxu1 %vm10636_vm1, %v17774_v8  ;;  %v5644_v1 = vpop.f32.mrf.mxu0  ;;  %v17940_v22 = vld [vmem:[#allocation47_spill] sm:$0xff] }
 0x556   :  { %17936 = vst [vmem:[#allocation73_spill] sm:$0xff] %v16493_v15  ;;  %6965 = vmatpush2.msra.mxu0 %v8744_v24  ;;  %v5819_v53 = vpop.f32.mrf.mxu1  ;;  %v5645_v17 = vadd.f32 %v5644_v1, %v17939_v46  ;;  %10405 = vmatprep.subr.mxu1 %v17774_v8 }
 0x557   :  { %6583 = vmatmul.mubr.f32.gmra.mxu0 %v17937_v38  ;;  %10365 = vmatmul.mubr.f32.gmra.mxu1 %v17938_v18  ;;  %v5646_v63 = vpop.f32.mrf.mxu0  ;;  %v8742_v18 = vld [vmem:[%s17131_s4 + $0x6d0] sm:$0xff] }
 0x558   :  { %6587 = vmatprep.mubr.f32.mxu0 %v17940_v22  ;;  %6966 = vmatprep.subr.mxu0 %v17774_v8  ;;  %v10167_v24 = vpop.f32.mrf.mxu1  ;;  %v16510_v15 = vadd.f32 %v5814_v41, %v5645_v17  ;;  %v8741_v41 = vld [vmem:[%s17131_s4 + $0x6c8] sm:$0xff] }
 0x559   :  { %6967 = vmatpush2.msra.mxu0 %v8743_v36  ;;  %10406 = vmatpush3.msra.mxu1 %v8753_v10  ;;  %v8752_v36 = vld [vmem:[%s17131_s4 + $0x720] sm:$0xff] }
 0x55a   :  { %17941 = vst [vmem:[#allocation83_spill] sm:$0xff] %v16510_v15  ;;  %10367 = vmatprep.mubr.msk.f32.mxu1 %vm10636_vm1, %v17774_v8  ;;  %v5649_v1 = vpop.f32.mrf.mxu0  ;;  %6968 = vmatprep.subr.mxu0 %v17774_v8  ;;  %v17942_v10 = vld [vmem:[#allocation43_spill] sm:$0xff] }
 0x55b   :  { %6588 = vmatmul.mubr.f32.gmra.mxu0 %v17888_v19  ;;  %10368 = vmatmul.mubr.f32.gmra.mxu1 %v17889_v50  ;;  %v5824_v46 = vpop.f32.mrf.mxu1  ;;  %v5650_v17 = vadd.f32 %v5649_v1, %v17942_v10  ;;  %v17945_v10 = vld [vmem:[#allocation46_spill] sm:$0xff] }
 0x55c   :  { %6592 = vmatprep.mubr.f32.mxu0 %v15496_v26  ;;  %6969 = vmatpush2.msra.mxu0 %v8742_v18  ;;  %v5651_v63 = vpop.f32.mrf.mxu0  ;;  %v8740_v26 = vld [vmem:[%s17131_s4 + $0x6c0] sm:$0xff]  ;;  %v17944_v18 = vld [vmem:[#allocation36_spill] sm:$0xff] }
 0x55d   :  { %10407 = vmatprep.subr.mxu1 %v17774_v8  ;;  %v10170_v24 = vpop.f32.mrf.mxu1  ;;  %6970 = vmatprep.subr.mxu0 %v17774_v8  ;;  %v16532_v15 = vadd.f32 %v5819_v53, %v5650_v17  ;;  %v3765_v19 = vadd.f32 %v17945_v10, %v17944_v18  ;;  %v8739_v18 = vld [vmem:[%s17131_s4 + $0x6b8] sm:$0xff] }
 0x55e   :  { %10370 = vmatprep.mubr.msk.f32.mxu1 %vm10636_vm1, %v17774_v8  ;;  %6971 = vmatpush2.msra.mxu0 %v8741_v41  ;;  %v5654_v50 = vpop.f32.mrf.mxu0  ;;  %v17946_v24 = vld [vmem:[#allocation88_spill] sm:$0xff] }
 0x55f   :  { %17943 = vst [vmem:[#allocation74_spill] sm:$0xff] %v16532_v15  ;;  %10408 = vmatpush3.msra.mxu1 %v8752_v36  ;;  %v5829_v1 = vpop.f32.mrf.mxu1  ;;  %6593 = vmatmul.mubr.f32.gmra.mxu0 %v15522_v35  ;;  %v5655_v63 = vadd.f32 %v5654_v50, %v16172_v55  ;;  %v17947_v36 = vld [vmem:[#allocation15_spill] sm:$0xff]  ;;  %v8751_v50 = vld [vmem:[%s17131_s4 + $0x718] sm:$0xff]  ;;  %v8738_v15 = vld [vmem:[%s17131_s4 + $0x6b0] sm:$0xff] }
 0x560   :  { %10371 = vmatmul.mubr.f32.gmra.mxu1 %v15513_v42  ;;  %6597 = vmatprep.mubr.f32.mxu0 %v17946_v24  ;;  %v5656_v53 = vpop.f32.mrf.mxu0  ;;  %v4236_v17 = vadd.f32 %v17947_v36, %v3765_v19  ;;  %v17951_v36 = vld [vmem:[#allocation78_spill] sm:$0xff]  ;;  %v17952_v24 = vld [vmem:[#allocation52_spill] sm:$0xff] }
 0x561   :  { %6972 = vmatprep.subr.mxu0 %v17774_v8  ;;  %v10173_v41 = vpop.f32.mrf.mxu1  ;;  %10373 = vmatprep.mubr.msk.f32.mxu1 %vm10636_vm1, %v17774_v8  ;;  %v16553_v55 = vadd.f32 %v5824_v46, %v5655_v63 }
 0x562   :  { %6973 = vmatpush2.msra.mxu0 %v8740_v26  ;;  %10409 = vmatprep.subr.mxu1 %v17774_v8  ;;  %v17949_v26 = vld [vmem:[#allocation4_spill] sm:$0xff]  ;;  %v17950_v41 = vld [vmem:[#allocation49_spill] sm:$0xff] }
 0x563   :  { %17948 = vst [vmem:[#allocation84_spill] sm:$0xff] %v16553_v55  ;;  %6974 = vmatprep.subr.mxu0 %v17774_v8  ;;  %v5659_v10 = vpop.f32.mrf.mxu0  ;;  %v5834_v19 = vpop.f32.mrf.mxu1  ;;  %v4707_v53 = vadd.f32 %v17949_v26, %v4236_v17  ;;  %6598 = vmatmul.mubr.f32.gmra.mxu0 %v17950_v41  ;;  %v17954_v17 = vld [vmem:[#allocation89_spill] sm:$0xff]  ;;  %v17955_v26 = vld [vmem:[#allocation16_spill] sm:$0xff] }
 0x564   :  { %10374 = vmatmul.mubr.f32.gmra.mxu1 %v17951_v36  ;;  %v5660_v42 = vadd.f32 %v5659_v10, %v17952_v24  ;;  %6975 = vmatpush2.msra.mxu0 %v8739_v18  ;;  %v4794_v41 = vmul.f32 %v17955_v26, %v17954_v17  ;;  %v8737_v24 = vld [vmem:[%s17131_s4 + $0x6a8] sm:$0xff]  ;;  %v17956_v10 = vld [vmem:[#allocation18_spill] sm:$0xff] }
 0x565   :  { %10410 = vmatpush3.msra.mxu1 %v8751_v50  ;;  %v5661_v46 = vpop.f32.mrf.mxu0  ;;  %v10176_v63 = vpop.f32.mrf.mxu1  ;;  %6602 = vmatprep.mubr.f32.mxu0 %v15562_v60 }
 0x566   :  { %6976 = vmatprep.subr.mxu0 %v17774_v8  ;;  %v16566_v55 = vadd.f32 %v5829_v1, %v5660_v42  ;;  %10376 = vmatprep.mubr.msk.f32.mxu1 %vm10636_vm1, %v17774_v8  ;;  %v4793_v46 = vmul.f32 %v17956_v10, %v4707_v53  ;;  %v17957_v63 = vld [vmem:[#allocation50_spill] sm:$0xff]  ;;  %v8750_v42 = vld [vmem:[%s17131_s4 + $0x710] sm:$0xff]  ;;  %v17958_v1 = vld [vmem:[#allocation32_spill] sm:$0xff] }
 0x567   :  { %6977 = vmatpush2.msra.mxu0 %v8738_v15  ;;  %v5664_v18 = vpop.f32.mrf.mxu0  ;;  %v5839_v50 = vpop.f32.mrf.mxu1  ;;  %10411 = vmatprep.subr.mxu1 %v17774_v8  ;;  %v8736_v53 = vld [vmem:[%s17131_s4 + $0x6a0] sm:$0xff] }
 0x568   :  { %17953 = vst [vmem:[#allocation8_spill] sm:$0xff] %v16566_v55  ;;  %6603 = vmatmul.mubr.f32.gmra.mxu0 %v15588_v40  ;;  %10377 = vmatmul.mubr.f32.gmra.mxu1 %v17957_v63  ;;  %v5665_v17 = vadd.f32 %v5664_v18, %v17958_v1  ;;  %v17959_v55 = vld [vmem:[#allocation60_spill] sm:$0xff]  ;;  %v17961_v18 = vld [vmem:[#allocation17_spill] sm:$0xff] }
 0x569   :  { %6607 = vmatprep.mubr.f32.mxu0 %v17912_v43  ;;  %6978 = vmatprep.subr.mxu0 %v17774_v8  ;;  %v5666_v15 = vpop.f32.mrf.mxu0  ;;  %v10179_v26 = vpop.f32.mrf.mxu1  ;;  %v16591_v63 = vadd.f32 %v17959_v55, %v4794_v41  ;;  %v17960_v40 = vld [vmem:[#allocation40_spill] sm:$0xff] }
 0x56a   :  { %6979 = vmatpush2.msra.mxu0 %v8737_v24  ;;  %v16588_v10 = vadd.f32 %v5834_v19, %v5665_v17  ;;  %v4792_v1 = vmul.f32 %v17961_v18, %v17960_v40  ;;  %10412 = vmatpush3.msra.mxu1 %v8750_v42  ;;  %v17962_v24 = vld [vmem:[#allocation61_spill] sm:$0xff]  ;;  %v8735_v40 = vld [vmem:[%s17131_s4 + $0x698] sm:$0xff]  ;;  %v8749_v55 = vld [vmem:[%s17131_s4 + $0x708] sm:$0xff] }
 0x56b   :  { %10379 = vmatprep.mubr.msk.f32.mxu1 %vm10636_vm1, %v17774_v8  ;;  %6980 = vmatprep.subr.mxu0 %v17774_v8  ;;  %v16600_v15 = vadd.f32 %v17962_v24, %v4793_v46  ;;  %v5669_v26 = vpop.f32.mrf.mxu0  ;;  %v17257_v17 = vmax.f32 %v16591_v63, 0.0  ;;  %v17963_v18 = vld [vmem:[#allocation19_spill] sm:$0xff] }
 0x56c   :  { %6608 = vmatmul.mubr.f32.gmra.mxu0 %v17914_v30  ;;  %v5844_v19 = vpop.f32.mrf.mxu1  ;;  %10380 = vmatmul.mubr.f32.gmra.mxu1 %v16237_v33  ;;  %v5670_v41 = vadd.f32 %v5669_v26, %v16233_v31  ;;  %v8734_v26 = vld [vmem:[%s17131_s4 + $0x690] sm:$0xff] }
 0x56d   :  { %6981 = vmatpush2.msra.mxu0 %v8736_v53  ;;  %6612 = vmatprep.mubr.f32.mxu0 %v16243_v13  ;;  %v5671_v46 = vpop.f32.mrf.mxu0  ;;  %v16614_v53 = vadd.f32 %v17963_v18, %v4792_v1  ;;  %v4948_v31 = vmax.f32 %v16600_v15, 0.0  ;;  %v17965_v1 = vld [vmem:[#allocation45_spill] sm:$0xff] }
 0x56e   :  { %6982 = vmatprep.subr.mxu0 %v17774_v8  ;;  %v10182_v42 = vpop.f32.mrf.mxu1  ;;  %10413 = vmatprep.subr.mxu1 %v17774_v8  ;;  %v16619_v24 = vadd.f32 %v5839_v50, %v5670_v41  ;;  %v8748_v50 = vld [vmem:[%s17131_s4 + $0x700] sm:$0xff] }
 0x56f   :  { %10382 = vmatprep.mubr.msk.f32.mxu1 %vm10636_vm1, %v17774_v8  ;;  %6983 = vmatpush2.msra.mxu0 %v8735_v40  ;;  %v5674_v46 = vpop.f32.mrf.mxu0  ;;  %v4947_v18 = vmax.f32 %v16614_v53, 0.0  ;;  %v7368_v53 = vld [vmem:[%s17134_s7 + $0x10] sm:$0xff] }
 0x570   :  { %17964 = vst [vmem:[#allocation55_spill] sm:$0xff] %v16619_v24  ;;  %10414 = vmatpush3.msra.mxu1 %v8749_v55  ;;  %v5849_v42 = vpop.f32.mrf.mxu1  ;;  %6613 = vmatmul.mubr.f32.gmra.mxu0 %v16257_v58  ;;  %v5675_v40 = vadd.f32 %v5674_v46, %v17965_v1 }
 0x571   :  { %10383 = vmatmul.mubr.f32.gmra.mxu1 %v17257_v17  ;;  %6617 = vmatprep.mubr.f32.mxu0 %v4948_v31  ;;  %v5676_v55 = vpop.f32.mrf.mxu0  ;;  %v8733_v17 = vld [vmem:[%s17131_s4 + $0x688] sm:$0xff] }
 0x572   :  { %6984 = vmatprep.subr.mxu0 %v17774_v8  ;;  %v10185_v41 = vpop.f32.mrf.mxu1  ;;  %10415 = vmatprep.subr.mxu1 %v17774_v8  ;;  %v16640_v24 = vadd.f32 %v5844_v19, %v5675_v40 }
 0x573   :  { %6985 = vmatpush2.msra.mxu0 %v8734_v26  ;;  %10416 = vmatpush3.msra.mxu1 %v8748_v50  ;;  %v8732_v26 = vld [vmem:[%s17131_s4 + $0x680] sm:$0xff] }
 0x574   :  { %6986 = vmatprep.subr.mxu0 %v17774_v8  ;;  %v5679_v46 = vpop.f32.mrf.mxu0  ;;  %v5854_v1 = vpop.f32.mrf.mxu1  ;;  %10417 = vmatprep.mubr.msk.f32.mxu1 %vm10636_vm1, %v17774_v8 }
 0x575   :  { %6618 = vmatmul.mubr.f32.gmra.mxu0 %v4947_v18  ;;  %v5680_v55 = vadd.f32 %v5679_v46, %v16270_v51  ;;  %10418 = vmatmul.mubr.f32.vlgmr.msra.gmra.mxu1 %v15057_v12  ;;  %v17966_v12 = vld [vmem:[#allocation20_spill] sm:$0xff] }
 0x576   :  { %6987 = vmatpush2.msra.mxu0 %v8733_v17  ;;  %v5681_v19 = vpop.f32.mrf.mxu0  ;;  %v10188_v40 = vpop.f32.mrf.mxu1  ;;  %6990 = vmatprep.mubr.f32.mxu0 %v15079_v44 }
 0x577   :  { %6988 = vmatprep.subr.mxu0 %v17774_v8  ;;  %v16654_v50 = vadd.f32 %v5849_v42, %v5680_v55  ;;  %10420 = vmatprep.mubr.msk.f32.mxu1 %vm10636_vm1, %v17774_v8  ;;  %v17968_v55 = vld [vmem:[#allocation63_spill] sm:$0xff]  ;;  %v17969_v19 = vld [vmem:[#allocation6_spill] sm:$0xff] }
 0x578   :  { %6989 = vmatpush2.msra.mxu0 %v8732_v26  ;;  %v5684_v41 = vpop.f32.mrf.mxu0  ;;  %v5859_v17 = vpop.f32.mrf.mxu1  ;;  %10491 = vmatprep.subr.mxu1 %v17774_v8  ;;  %v17967_v26 = vld [vmem:[#allocation21_spill] sm:$0xff] }
 0x579   :  { %6991 = vmatmul.mubr.f32.vlgmr.msra.gmra.mxu0 %v15087_v39  ;;  %v5685_v51 = vadd.f32 %v5684_v41, %v16285_v37  ;;  %10480 = vmatprep.subr.mxu0 %v17774_v8 }
 0x57a   :  { %10421 = vmatmul.mubr.f32.gmra.mxu1 %v17966_v12  ;;  %6995 = vmatprep.mubr.f32.mxu0 %v17918_v54  ;;  %v5686_v44 = vpop.f32.mrf.mxu0  ;;  %v10191_v46 = vpop.f32.mrf.mxu1  ;;  %v17970_v12 = vld [vmem:[#allocation23_spill] sm:$0xff] }
 0x57b   :  { %10423 = vmatprep.mubr.msk.f32.mxu1 %vm10636_vm1, %v17774_v8  ;;  %v16665_v42 = vadd.f32 %v5854_v1, %v5685_v51 }
 0x57c   :  { %v5689_v39 = vpop.f32.mrf.mxu0 }
 0x57d   :  { %6996 = vmatmul.mubr.f32.gmra.mxu0 %v17919_v14  ;;  %v5864_v37 = vpop.f32.mrf.mxu1  ;;  %v5690_v40 = vadd.f32 %v5689_v39, %v17969_v19  ;;  %v17971_v14 = vld [vmem:[#allocation33_spill] sm:$0xff] }
 0x57e   :  { %10424 = vmatmul.mubr.f32.gmra.mxu1 %v17967_v26  ;;  %7000 = vmatprep.mubr.f32.mxu0 %v17968_v55  ;;  %v5691_v54 = vpop.f32.mrf.mxu0 }
 0x57f   :  { %10426 = vmatprep.mubr.msk.f32.mxu1 %vm10636_vm1, %v17774_v8  ;;  %v10194_v41 = vpop.f32.mrf.mxu1  ;;  %v16674_v1 = vadd.f32 %v5859_v17, %v5690_v40 }
 0x580   :  { %v17972_v41 = vld [vmem:[#allocation82_spill] sm:$0xff] }
 0x581   :  { %7001 = vmatmul.mubr.f32.gmra.mxu0 %v15143_v61  ;;  %v5694_v51 = vpop.f32.mrf.mxu0  ;;  %v6216_v46 = vpop.f32.mrf.mxu1 }
 0x582   :  { %10427 = vmatmul.mubr.f32.gmra.mxu1 %v17970_v12  ;;  %7005 = vmatprep.mubr.f32.mxu0 %v15157_v4  ;;  %v5695_v44 = vadd.f32 %v5694_v51, %v17971_v14 }
 0x583   :  { %10429 = vmatprep.mubr.msk.f32.mxu1 %vm10636_vm1, %v17774_v8  ;;  %v5696_v39 = vpop.f32.mrf.mxu0  ;;  %v10229_v55 = vpop.f32.mrf.mxu1 }
 0x584   :  { %v16682_v26 = vadd.f32 %v5864_v37, %v5695_v44  ;;  %v17973_v44 = vld [vmem:[#allocation66_spill] sm:$0xff] }
 0x585   :  { %7006 = vmatmul.mubr.f32.gmra.mxu0 %v15177_v0  ;;  %v6046_v17 = vpop.f32.mrf.mxu0  ;;  %v17975_v55 = vld [vmem:[#allocation26_spill] sm:$0xff] }
 0x586   :  { %10430 = vmatmul.mubr.f32.gmra.mxu1 %v15172_v59  ;;  %7010 = vmatprep.mubr.f32.mxu0 %v17872_v3  ;;  %v6217_v61 = vadd.f32 %v6216_v46, %v6046_v17  ;;  %v6221_v19 = vpop.f32.mrf.mxu1  ;;  %v17974_v46 = vld [vmem:[#allocation7_spill] sm:$0xff] }
 0x587   :  { %10432 = vmatprep.mubr.msk.f32.mxu1 %vm10636_vm1, %v17774_v8  ;;  %v6048_v4 = vpop.f32.mrf.mxu0 }
 0x588   :  { %v16690_v40 = vadd.f32 %v6217_v61, %v16338_v29  ;;  %v10232_v54 = vpop.f32.mrf.mxu1 }
 0x589   :  { %7011 = vmatmul.mubr.f32.gmra.mxu0 %v17873_v52  ;;  %v6051_v37 = vpop.f32.mrf.mxu0 }
 0x58a   :  { %10433 = vmatmul.mubr.f32.gmra.mxu1 %v15199_v16  ;;  %7015 = vmatprep.mubr.f32.mxu0 %v17924_v28  ;;  %v6222_v59 = vadd.f32 %v6221_v19, %v6051_v37  ;;  %v6226_v0 = vpop.f32.mrf.mxu1  ;;  %v17976_v19 = vld [vmem:[#allocation72_spill] sm:$0xff] }
 0x58b   :  { %10435 = vmatprep.mubr.msk.f32.mxu1 %vm10636_vm1, %v17774_v8  ;;  %v6053_v3 = vpop.f32.mrf.mxu0 }
 0x58c   :  { %v16698_v51 = vadd.f32 %v6222_v59, %v17972_v41  ;;  %v10235_v12 = vpop.f32.mrf.mxu1 }
 0x58d   :  { %7016 = vmatmul.mubr.f32.gmra.mxu0 %v15234_v32  ;;  %v6056_v52 = vpop.f32.mrf.mxu0 }
 0x58e   :  { %10436 = vmatmul.mubr.f32.gmra.mxu1 %v17874_v21  ;;  %7020 = vmatprep.mubr.f32.mxu0 %v17875_v25  ;;  %v6231_v16 = vpop.f32.mrf.mxu1  ;;  %v6227_v29 = vadd.f32 %v6226_v0, %v6056_v52 }
 0x58f   :  { %10438 = vmatprep.mubr.msk.f32.mxu1 %vm10636_vm1, %v17774_v8  ;;  %v6058_v28 = vpop.f32.mrf.mxu0 }
 0x590   :  { %v10238_v14 = vpop.f32.mrf.mxu1  ;;  %v16707_v39 = vadd.f32 %v6227_v29, %v17974_v46 }
 0x591   :  { %7021 = vmatmul.mubr.f32.gmra.mxu0 %v17973_v44  ;;  %v6061_v32 = vpop.f32.mrf.mxu0 }
 0x592   :  { %10439 = vmatmul.mubr.f32.gmra.mxu1 %v17975_v55  ;;  %7025 = vmatprep.mubr.f32.mxu0 %v17877_v6  ;;  %v6236_v21 = vpop.f32.mrf.mxu1  ;;  %v6232_v25 = vadd.f32 %v6231_v16, %v6061_v32 }
 0x593   :  { %10441 = vmatprep.mubr.msk.f32.mxu1 %vm10636_vm1, %v17774_v8  ;;  %v6063_v17 = vpop.f32.mrf.mxu0 }
 0x594   :  { %v10241_v61 = vpop.f32.mrf.mxu1  ;;  %v16715_v4 = vadd.f32 %v6232_v25, %v17976_v19 }
 0x595   :  { %7026 = vmatmul.mubr.f32.gmra.mxu0 %v15301_v45 }
 0x596   :  { %10442 = vmatmul.mubr.f32.gmra.mxu1 %v17878_v11  ;;  %7030 = vmatprep.mubr.f32.mxu0 %v15308_v9  ;;  %v6066_v54 = vpop.f32.mrf.mxu0  ;;  %v6241_v37 = vpop.f32.mrf.mxu1 }
 0x597   :  { %10444 = vmatprep.mubr.msk.f32.mxu1 %vm10636_vm1, %v17774_v8  ;;  %v6237_v6 = vadd.f32 %v6236_v21, %v6066_v54  ;;  %v8769_v54 = vld [vmem:[%s17134_s7 + $0x38] sm:$0xff] }
 0x598   :  { %v6068_v59 = vpop.f32.mrf.mxu0  ;;  %v10244_v0 = vpop.f32.mrf.mxu1  ;;  %10481 = vmatpush3.msra.mxu0 %v8769_v54 }
 0x599   :  { %7031 = vmatmul.mubr.f32.gmra.mxu0 %v15344_v48  ;;  %v16723_v3 = vadd.f32 %v6237_v6, %v16406_v7  ;;  %v17983_v6 = vld [vmem:[#allocation86_spill] sm:$0xff]  ;;  %v17984_v59 = vld [vmem:[#allocation48_spill] sm:$0xff]  ;;  %10482 = vmatprep.subr.mxu0 %v17774_v8 }
 0x59a   :  { %10445 = vmatmul.mubr.f32.gmra.mxu1 %v15326_v49  ;;  %7035 = vmatprep.mubr.f32.mxu0 %v17879_v27  ;;  %v6071_v45 = vpop.f32.mrf.mxu0  ;;  %v6246_v11 = vpop.f32.mrf.mxu1 }
 0x59b   :  { %10447 = vmatprep.mubr.msk.f32.mxu1 %vm10636_vm1, %v17774_v8  ;;  %v6242_v9 = vadd.f32 %v6241_v37, %v6071_v45 }
 0x59c   :  { %v6073_v41 = vpop.f32.mrf.mxu0  ;;  %v10247_v48 = vpop.f32.mrf.mxu1 }
 0x59d   :  { %7036 = vmatmul.mubr.f32.gmra.mxu0 %v17880_v5  ;;  %v16731_v12 = vadd.f32 %v6242_v9, %v16425_v23  ;;  %v17977_v5 = vld [vmem:[#allocation44_spill] sm:$0xff]  ;;  %v17986_v48 = vld [vmem:[#allocation38_spill] sm:$0xff] }
 0x59e   :  { %10448 = vmatmul.mubr.f32.gmra.mxu1 %v17881_v20  ;;  %7040 = vmatprep.mubr.f32.mxu0 %v15371_v2  ;;  %v6076_v49 = vpop.f32.mrf.mxu0 }
 0x59f   :  { %10450 = vmatprep.mubr.msk.f32.mxu1 %vm10636_vm1, %v17774_v8  ;;  %v6251_v27 = vpop.f32.mrf.mxu1  ;;  %v6247_v7 = vadd.f32 %v6246_v11, %v6076_v49  ;;  %v17987_v49 = vld [vmem:[#allocation88_spill] sm:$0xff] }
 0x5a0   :  { %v6078_v52 = vpop.f32.mrf.mxu0 }
 0x5a1   :  { %7041 = vmatmul.mubr.f32.gmra.mxu0 %v15401_v47  ;;  %v10250_v16 = vpop.f32.mrf.mxu1  ;;  %v16741_v23 = vadd.f32 %v6247_v7, %v17977_v5  ;;  %v17978_v47 = vld [vmem:[#allocation85_spill] sm:$0xff]  ;;  %v17988_v52 = vld [vmem:[#allocation83_spill] sm:$0xff]  ;;  %v7369_v5 = vld [vmem:[%s17134_s7 + $0x18] sm:$0xff] }
 0x5a2   :  { %10451 = vmatmul.mubr.f32.gmra.mxu1 %v17882_v62  ;;  %7045 = vmatprep.mubr.f32.mxu0 %v17883_v56  ;;  %v6081_v20 = vpop.f32.mrf.mxu0  ;;  %v17979_v62 = vld [vmem:[#allocation53_spill] sm:$0xff] }
 0x5a3   :  { %10453 = vmatprep.mubr.msk.f32.mxu1 %vm10636_vm1, %v17774_v8  ;;  %v6256_v2 = vpop.f32.mrf.mxu1  ;;  %v6252_v29 = vadd.f32 %v6251_v27, %v6081_v20  ;;  %v17989_v20 = vld [vmem:[#allocation49_spill] sm:$0xff]  ;;  %10492 = vmatpush3.msra.mxu1 %v7369_v5 }
 0x5a4   :  { %v6083_v28 = vpop.f32.mrf.mxu0  ;;  %10493 = vmatprep.subr.mxu1 %v17774_v8 }
 0x5a5   :  { %7046 = vmatmul.mubr.f32.gmra.mxu0 %v15427_v57  ;;  %v10253_v14 = vpop.f32.mrf.mxu1  ;;  %v16749_v44 = vadd.f32 %v6252_v29, %v17979_v62  ;;  %v17980_v57 = vld [vmem:[#allocation75_spill] sm:$0xff]  ;;  %10494 = vmatpush3.msra.mxu1 %v7368_v53 }
 0x5a6   :  { %10454 = vmatmul.mubr.f32.gmra.mxu1 %v17884_v34  ;;  %7050 = vmatprep.mubr.f32.mxu0 %v17978_v47  ;;  %v17981_v34 = vld [vmem:[#allocation10_spill] sm:$0xff] }
 0x5a7   :  { %10456 = vmatprep.mubr.msk.f32.mxu1 %vm10636_vm1, %v17774_v8  ;;  %v6086_v56 = vpop.f32.mrf.mxu0  ;;  %v6261_v46 = vpop.f32.mrf.mxu1  ;;  %v17990_v47 = vld [vmem:[#allocation74_spill] sm:$0xff]  ;;  %10495 = vmatprep.subr.mxu1 %v17774_v8 }
 0x5a8   :  { %v6257_v55 = vadd.f32 %v6256_v2, %v6086_v56  ;;  %v17991_v56 = vld [vmem:[#allocation79_spill] sm:$0xff] }
 0x5a9   :  { %7051 = vmatmul.mubr.f32.gmra.mxu0 %v17937_v38  ;;  %v6088_v32 = vpop.f32.mrf.mxu0  ;;  %v10256_v21 = vpop.f32.mrf.mxu1  ;;  %v17982_v38 = vld [vmem:[#allocation76_spill] sm:$0xff] }
 0x5aa   :  { %10457 = vmatmul.mubr.f32.gmra.mxu1 %v17980_v57  ;;  %7055 = vmatprep.mubr.f32.mxu0 %v17940_v22  ;;  %v16757_v25 = vadd.f32 %v6257_v55, %v17981_v34  ;;  %v17985_v22 = vld [vmem:[#allocation73_spill] sm:$0xff]  ;;  %v17992_v32 = vld [vmem:[#allocation50_spill] sm:$0xff]  ;;  %v17993_v57 = vld [vmem:[#allocation84_spill] sm:$0xff] }
 0x5ab   :  { %10459 = vmatprep.mubr.msk.f32.mxu1 %vm10636_vm1, %v17774_v8  ;;  %v6091_v17 = vpop.f32.mrf.mxu0  ;;  %v6266_v19 = vpop.f32.mrf.mxu1 }
 0x5ac   :  { %v6262_v61 = vadd.f32 %v6261_v46, %v6091_v17 }
 0x5ad   :  { %7056 = vmatmul.mubr.f32.gmra.mxu0 %v17982_v38  ;;  %v6093_v37 = vpop.f32.mrf.mxu0  ;;  %v10259_v45 = vpop.f32.mrf.mxu1  ;;  %v17994_v38 = vld [vmem:[#allocation8_spill] sm:$0xff] }
 0x5ae   :  { %10460 = vmatmul.mubr.f32.gmra.mxu1 %v17983_v6  ;;  %7060 = vmatprep.mubr.f32.mxu0 %v17984_v59  ;;  %v16768_v0 = vadd.f32 %v6262_v61, %v17985_v22 }
 0x5af   :  { %10462 = vmatprep.mubr.msk.f32.mxu1 %vm10636_vm1, %v17774_v8  ;;  %v6096_v9 = vpop.f32.mrf.mxu0 }
 0x5b0   :  { %v6271_v11 = vpop.f32.mrf.mxu1  ;;  %v6267_v41 = vadd.f32 %v6266_v19, %v6096_v9 }
 0x5b1   :  { %7061 = vmatmul.mubr.f32.gmra.mxu0 %v15522_v35  ;;  %v6098_v27 = vpop.f32.mrf.mxu0 }
 0x5b2   :  { %10463 = vmatmul.mubr.f32.gmra.mxu1 %v17986_v48  ;;  %7065 = vmatprep.mubr.f32.mxu0 %v17987_v49  ;;  %v10262_v7 = vpop.f32.mrf.mxu1  ;;  %v16779_v16 = vadd.f32 %v6267_v41, %v17988_v52  ;;  %v7367_v49 = vld [vmem:[%s17134_s7 + $0x8] sm:$0xff]  ;;  %v8768_v52 = vld [vmem:[%s17134_s7 + $0x30] sm:$0xff] }
 0x5b3   :  { %10465 = vmatprep.mubr.msk.f32.mxu1 %vm10636_vm1, %v17774_v8  ;;  %10496 = vmatpush3.msra.mxu1 %v7367_v49 }
 0x5b4   :  { %v6101_v35 = vpop.f32.mrf.mxu0  ;;  %10483 = vmatpush3.msra.mxu0 %v8768_v52  ;;  %10497 = vmatprep.subr.mxu1 %v17774_v8 }
 0x5b5   :  { %7066 = vmatmul.mubr.f32.gmra.mxu0 %v17989_v20  ;;  %v6276_v2 = vpop.f32.mrf.mxu1  ;;  %v6272_v29 = vadd.f32 %v6271_v11, %v6101_v35  ;;  %v17996_v11 = vld [vmem:[#allocation55_spill] sm:$0xff]  ;;  %10484 = vmatprep.subr.mxu0 %v17774_v8 }
 0x5b6   :  { %10466 = vmatmul.mubr.f32.gmra.mxu1 %v17951_v36  ;;  %7070 = vmatprep.mubr.f32.mxu0 %v15562_v60  ;;  %v6103_v28 = vpop.f32.mrf.mxu0  ;;  %v7366_v20 = vld [vmem:[%s17134_s7] sm:$0xff] }
 0x5b7   :  { %10468 = vmatprep.mubr.msk.f32.mxu1 %vm10636_vm1, %v17774_v8  ;;  %v10265_v14 = vpop.f32.mrf.mxu1  ;;  %v16791_v62 = vadd.f32 %v6272_v29, %v17990_v47  ;;  %10498 = vmatpush3.msra.mxu1 %v7366_v20 }
 0x5b8   :  { %v6106_v46 = vpop.f32.mrf.mxu0  ;;  %10513 = vmatprep.subr.mxu1 %v17774_v8 }
 0x5b9   :  { %7071 = vmatmul.mubr.f32.gmra.mxu0 %v17991_v56  ;;  %v6281_v55 = vpop.f32.mrf.mxu1  ;;  %v6277_v60 = vadd.f32 %v6276_v2, %v6106_v46 }
 0x5ba   :  { %10469 = vmatmul.mubr.f32.gmra.mxu1 %v17992_v32  ;;  %7075 = vmatprep.mubr.f32.mxu0 %v17912_v43  ;;  %v6108_v36 = vpop.f32.mrf.mxu0 }
 0x5bb   :  { %10471 = vmatprep.mubr.msk.f32.mxu1 %vm10636_vm1, %v17774_v8  ;;  %v10268_v21 = vpop.f32.mrf.mxu1  ;;  %v16799_v34 = vadd.f32 %v6277_v60, %v17993_v57  ;;  %v8767_v57 = vld [vmem:[%s17134_s7 + $0x28] sm:$0xff] }
 0x5bc   :  { %10485 = vmatpush3.msra.mxu0 %v8767_v57 }
 0x5bd   :  { %7076 = vmatmul.mubr.f32.gmra.mxu0 %v17914_v30  ;;  %v6111_v17 = vpop.f32.mrf.mxu0  ;;  %v6286_v61 = vpop.f32.mrf.mxu1  ;;  %v17995_v30 = vmax.f32 %v16591_v63, 0.0  ;;  %10486 = vmatprep.subr.mxu0 %v17774_v8 }
 0x5be   :  { %10472 = vmatmul.mubr.f32.gmra.mxu1 %v16237_v33  ;;  %7080 = vmatprep.mubr.f32.mxu0 %v16243_v13  ;;  %v6282_v19 = vadd.f32 %v6281_v55, %v6111_v17 }
 0x5bf   :  { %10474 = vmatprep.mubr.msk.f32.mxu1 %vm10636_vm1, %v17774_v8  ;;  %v6113_v43 = vpop.f32.mrf.mxu0  ;;  %v10271_v54 = vpop.f32.mrf.mxu1 }
 0x5c0   :  { %v16807_v37 = vadd.f32 %v6282_v19, %v17994_v38 }
 0x5c1   :  { %7081 = vmatmul.mubr.f32.gmra.mxu0 %v16257_v58  ;;  %v6116_v6 = vpop.f32.mrf.mxu0  ;;  %v6291_v59 = vpop.f32.mrf.mxu1 }
 0x5c2   :  { %10475 = vmatmul.mubr.f32.gmra.mxu1 %v17995_v30  ;;  %7085 = vmatprep.mubr.f32.mxu0 %v4948_v31  ;;  %v6287_v33 = vadd.f32 %v6286_v61, %v6116_v6 }
 0x5c3   :  { %10477 = vmatprep.mubr.msk.f32.mxu1 %vm10636_vm1, %v17774_v8  ;;  %v6118_v13 = vpop.f32.mrf.mxu0  ;;  %v10274_v22 = vpop.f32.mrf.mxu1 }
 0x5c4   :  { %v16817_v45 = vadd.f32 %v6287_v33, %v16588_v10 }
 0x5c5   :  { %7086 = vmatmul.mubr.f32.gmra.mxu0 %v4947_v18  ;;  %v6121_v58 = vpop.f32.mrf.mxu0 }
 0x5c6   :  { %7090 = vmatprep.mubr.f32.mxu0 %v17774_v8  ;;  %10478 = vmatmul.mubr.f32.gmra.mxu1 %v17774_v8  ;;  %v6296_v63 = vpop.f32.mrf.mxu1  ;;  %v6292_v15 = vadd.f32 %v6291_v59, %v6121_v58 }
 0x5c7   :  { %10499 = vmatprep.mubr.msk.f32.mxu1 %vm10636_vm1, %v17774_v8  ;;  %v6123_v31 = vpop.f32.mrf.mxu0 }
 0x5c8   :  { %v10277_v9 = vpop.f32.mrf.mxu1  ;;  %v16827_v10 = vadd.f32 %v6292_v15, %v17996_v11 }
 0x5c9   :  { %7091 = vmatmul.mubr.f32.gmra.mxu0 %v17774_v8  ;;  %v6126_v18 = vpop.f32.mrf.mxu0 }
 0x5ca   :  { %v6301_v41 = vpop.f32.mrf.mxu1  ;;  %10488 = vmatprep.mubr.msk.f32.mxu0 %vm10636_vm1, %v17774_v8  ;;  %v6297_v48 = vadd.f32 %v6296_v63, %v6126_v18 }
 0x5cb   :  { %v6128_v27 = vpop.f32.mrf.mxu0 }
 0x5cc   :  { %v10280_v7 = vpop.f32.mrf.mxu1  ;;  %v16842_v5 = vadd.f32 %v6297_v48, %v16640_v24 }
 0x5ce   :  { %v6131_v35 = vpop.f32.mrf.mxu0  ;;  %v6306_v2 = vpop.f32.mrf.mxu1 }
 0x5cf   :  { %v6302_v29 = vadd.f32 %v6301_v41, %v6131_v35 }
 0x5d0   :  { %v6133_v28 = vpop.f32.mrf.mxu0  ;;  %v10283_v14 = vpop.f32.mrf.mxu1 }
 0x5d1   :  { %v16851_v24 = vadd.f32 %v6302_v29, %v16654_v50  ;;  %v8766_v50 = vld [vmem:[%s17134_s7 + $0x20] sm:$0xff] }
 0x5d2   :  { %v6136_v47 = vpop.f32.mrf.mxu0  ;;  %v6311_v46 = vpop.f32.mrf.mxu1  ;;  %10487 = vmatpush3.msra.mxu0 %v8766_v50 }
 0x5d3   :  { %v6307_v56 = vadd.f32 %v6306_v2, %v6136_v47  ;;  %10502 = vmatprep.subr.mxu0 %v17774_v8 }
 0x5d4   :  { %v6138_v55 = vpop.f32.mrf.mxu0  ;;  %v10286_v60 = vpop.f32.mrf.mxu1 }
 0x5d5   :  { %v16854_v32 = vadd.f32 %v6307_v56, %v16665_v42 }
 0x5d6   :  { %v6141_v36 = vpop.f32.mrf.mxu0 }
 0x5d7   :  { %v6316_v21 = vpop.f32.mrf.mxu1  ;;  %v6312_v17 = vadd.f32 %v6311_v46, %v6141_v36 }
 0x5d8   :  { %v6143_v61 = vpop.f32.mrf.mxu0 }
 0x5d9   :  { %v10289_v19 = vpop.f32.mrf.mxu1  ;;  %v16864_v42 = vadd.f32 %v6312_v17, %v16674_v1 }
 0x5db   :  { %v6146_v43 = vpop.f32.mrf.mxu0  ;;  %v6689_v38 = vpop.f32.mrf.mxu1 }
 0x5dc   :  { %v6317_v54 = vadd.f32 %v6316_v21, %v6146_v43 }
 0x5dd   :  { %v6148_v6 = vpop.f32.mrf.mxu0  ;;  %v10324_v30 = vpop.f32.mrf.mxu1 }
 0x5de   :  { %v16868_v59 = vadd.f32 %v6317_v54, %v16682_v26 }
 0x5df   :  { %v6519_v33 = vpop.f32.mrf.mxu0 }
 0x5e0   :  { %v6690_v13 = vadd.f32 %v6689_v38, %v6519_v33  ;;  %v6694_v22 = vpop.f32.mrf.mxu1 }
 0x5e1   :  { %v6521_v58 = vpop.f32.mrf.mxu0 }
 0x5e2   :  { %v16871_v63 = vadd.f32 %v6690_v13, %v16690_v40  ;;  %v10327_v1 = vpop.f32.mrf.mxu1 }
 0x5e3   :  { %v6524_v15 = vpop.f32.mrf.mxu0 }
 0x5e4   :  { %v6695_v31 = vadd.f32 %v6694_v22, %v6524_v15  ;;  %v6699_v9 = vpop.f32.mrf.mxu1 }
 0x5e5   :  { %v6526_v11 = vpop.f32.mrf.mxu0 }
 0x5e6   :  { %v16874_v53 = vadd.f32 %v6695_v31, %v16698_v51  ;;  %v10330_v18 = vpop.f32.mrf.mxu1 }
 0x5e7   :  { %v6529_v41 = vpop.f32.mrf.mxu0 }
 0x5e8   :  { %v6704_v26 = vpop.f32.mrf.mxu1  ;;  %v6700_v48 = vadd.f32 %v6699_v9, %v6529_v41 }
 0x5e9   :  { %v6531_v49 = vpop.f32.mrf.mxu0 }
 0x5ea   :  { %v10333_v27 = vpop.f32.mrf.mxu1  ;;  %v16877_v7 = vadd.f32 %v6700_v48, %v16707_v39 }
 0x5eb   :  { %v6534_v52 = vpop.f32.mrf.mxu0 }
 0x5ec   :  { %v6709_v40 = vpop.f32.mrf.mxu1  ;;  %v6705_v20 = vadd.f32 %v6704_v26, %v6534_v52 }
 0x5ed   :  { %v6536_v35 = vpop.f32.mrf.mxu0 }
 0x5ee   :  { %v10336_v2 = vpop.f32.mrf.mxu1  ;;  %v16880_v29 = vadd.f32 %v6705_v20, %v16715_v4 }
 0x5f0   :  { %v6539_v28 = vpop.f32.mrf.mxu0  ;;  %v6714_v51 = vpop.f32.mrf.mxu1 }
 0x5f1   :  { %v6710_v14 = vadd.f32 %v6709_v40, %v6539_v28 }
 0x5f2   :  { %v6541_v47 = vpop.f32.mrf.mxu0  ;;  %v10339_v56 = vpop.f32.mrf.mxu1 }
 0x5f3   :  { %v16883_v46 = vadd.f32 %v6710_v14, %v16723_v3 }
 0x5f4   :  { %v6544_v55 = vpop.f32.mrf.mxu0  ;;  %v6719_v39 = vpop.f32.mrf.mxu1 }
 0x5f5   :  { %v6715_v60 = vadd.f32 %v6714_v51, %v6544_v55 }
 0x5f6   :  { %v6546_v36 = vpop.f32.mrf.mxu0  ;;  %v10342_v57 = vpop.f32.mrf.mxu1 }
 0x5f7   :  { %v16886_v21 = vadd.f32 %v6715_v60, %v16731_v12 }
 0x5f8   :  { %v6549_v17 = vpop.f32.mrf.mxu0 }
 0x5f9   :  { %v6724_v61 = vpop.f32.mrf.mxu1  ;;  %v6720_v4 = vadd.f32 %v6719_v39, %v6549_v17 }
 0x5fa   :  { %v6551_v19 = vpop.f32.mrf.mxu0 }
 0x5fb   :  { %v10345_v50 = vpop.f32.mrf.mxu1  ;;  %v16889_v43 = vadd.f32 %v6720_v4, %v16741_v23 }
 0x5fc   :  { %v6554_v54 = vpop.f32.mrf.mxu0 }
 0x5fd   :  { %v6729_v38 = vpop.f32.mrf.mxu1  ;;  %v6725_v3 = vadd.f32 %v6724_v61, %v6554_v54 }
 0x5fe   :  { %v6556_v6 = vpop.f32.mrf.mxu0 }
 0x5ff   :  { %v10348_v30 = vpop.f32.mrf.mxu1  ;;  %v16892_v33 = vadd.f32 %v6725_v3, %v16749_v44 }
 0x601   :  { %v6559_v13 = vpop.f32.mrf.mxu0  ;;  %v6734_v12 = vpop.f32.mrf.mxu1 }
 0x602   :  { %v6730_v22 = vadd.f32 %v6729_v38, %v6559_v13 }
 0x603   :  { %v6561_v58 = vpop.f32.mrf.mxu0  ;;  %v10351_v1 = vpop.f32.mrf.mxu1 }
 0x604   :  { %v16895_v15 = vadd.f32 %v6730_v22, %v16757_v25 }
 0x605   :  { %v6564_v31 = vpop.f32.mrf.mxu0  ;;  %v6739_v23 = vpop.f32.mrf.mxu1 }
 0x606   :  { %v6735_v9 = vadd.f32 %v6734_v12, %v6564_v31 }
 0x607   :  { %v6566_v11 = vpop.f32.mrf.mxu0  ;;  %v10354_v41 = vpop.f32.mrf.mxu1 }
 0x608   :  { %v16898_v18 = vadd.f32 %v6735_v9, %v16768_v0 }
 0x609   :  { %v6569_v26 = vpop.f32.mrf.mxu0 }
 0x60a   :  { %v6744_v48 = vpop.f32.mrf.mxu1  ;;  %v6740_v44 = vadd.f32 %v6739_v23, %v6569_v26 }
 0x60b   :  { %v6571_v49 = vpop.f32.mrf.mxu0 }
 0x60c   :  { %v10357_v27 = vpop.f32.mrf.mxu1  ;;  %v16901_v52 = vadd.f32 %v6740_v44, %v16779_v16 }
 0x60e   :  { %v6574_v40 = vpop.f32.mrf.mxu0 }
 0x60f   :  { %v6749_v20 = vpop.f32.mrf.mxu1  ;;  %v6745_v25 = vadd.f32 %v6744_v48, %v6574_v40 }
 0x610   :  { %v6576_v35 = vpop.f32.mrf.mxu0 }
 0x611   :  { %v10360_v2 = vpop.f32.mrf.mxu1  ;;  %v16904_v28 = vadd.f32 %v6745_v25, %v16791_v62 }
 0x612   :  { %v6579_v51 = vpop.f32.mrf.mxu0 }
 0x613   :  { %v6754_v0 = vpop.f32.mrf.mxu1  ;;  %v6750_v14 = vadd.f32 %v6749_v20, %v6579_v51 }
 0x614   :  { %v6581_v47 = vpop.f32.mrf.mxu0 }
 0x615   :  { %v10363_v56 = vpop.f32.mrf.mxu1  ;;  %v16907_v55 = vadd.f32 %v6750_v14, %v16799_v34 }
 0x617   :  { %v6584_v60 = vpop.f32.mrf.mxu0  ;;  %v6759_v39 = vpop.f32.mrf.mxu1 }
 0x618   :  { %v6755_v16 = vadd.f32 %v6754_v0, %v6584_v60 }
 0x619   :  { %v6586_v36 = vpop.f32.mrf.mxu0  ;;  %v10366_v57 = vpop.f32.mrf.mxu1 }
 0x61a   :  { %v16910_v17 = vadd.f32 %v6755_v16, %v16807_v37  ;;  %v16936_v36 = vld [vmem:[%s17135_s5] ss:$0 sm:$0xff] }
 0x61b   :  { %v6589_v61 = vpop.f32.mrf.mxu0  ;;  %v6764_v4 = vpop.f32.mrf.mxu1 }
 0x61c   :  { %v6760_v62 = vadd.f32 %v6759_v39, %v6589_v61 }
 0x61d   :  { %v6591_v19 = vpop.f32.mrf.mxu0  ;;  %v10369_v50 = vpop.f32.mrf.mxu1 }
 0x61e   :  { %v16913_v54 = vadd.f32 %v6760_v62, %v16817_v45 }
 0x61f   :  { %v6594_v38 = vpop.f32.mrf.mxu0 }
 0x620   :  { %v6769_v3 = vpop.f32.mrf.mxu1  ;;  %v6765_v34 = vadd.f32 %v6764_v4, %v6594_v38 }
 0x621   :  { %v6596_v6 = vpop.f32.mrf.mxu0 }
 0x622   :  { %v10372_v30 = vpop.f32.mrf.mxu1  ;;  %v16916_v13 = vadd.f32 %v6765_v34, %v16827_v10 }
 0x623   :  { %v6599_v12 = vpop.f32.mrf.mxu0 }
 0x624   :  { %v6774_v22 = vpop.f32.mrf.mxu1  ;;  %v6770_v37 = vadd.f32 %v6769_v3, %v6599_v12 }
 0x625   :  { %v6601_v58 = vpop.f32.mrf.mxu0 }
 0x626   :  { %v10375_v1 = vpop.f32.mrf.mxu1  ;;  %v16919_v31 = vadd.f32 %v6770_v37, %v16842_v5 }
 0x628   :  { %v6604_v9 = vpop.f32.mrf.mxu0  ;;  %v6779_v23 = vpop.f32.mrf.mxu1 }
 0x629   :  { %v6775_v45 = vadd.f32 %v6774_v22, %v6604_v9 }
 0x62a   :  { %v6606_v11 = vpop.f32.mrf.mxu0  ;;  %v10378_v41 = vpop.f32.mrf.mxu1 }
 0x62b   :  { %v16922_v26 = vadd.f32 %v6775_v45, %v16851_v24 }
 0x62c   :  { %v6609_v48 = vpop.f32.mrf.mxu0  ;;  %v6784_v10 = vpop.f32.mrf.mxu1 }
 0x62d   :  { %v6780_v44 = vadd.f32 %v6779_v23, %v6609_v48 }
 0x62e   :  { %v6611_v49 = vpop.f32.mrf.mxu0  ;;  %v10381_v40 = vpop.f32.mrf.mxu1 }
 0x62f   :  { %v16925_v27 = vadd.f32 %v6780_v44, %v16854_v32 }
 0x630   :  { %v6614_v20 = vpop.f32.mrf.mxu0 }
 0x631   :  { %v6789_v25 = vpop.f32.mrf.mxu1  ;;  %v6785_v5 = vadd.f32 %v6784_v10, %v6614_v20 }
 0x632   :  { %v6616_v35 = vpop.f32.mrf.mxu0 }
 0x633   :  { %v10384_v2 = vpop.f32.mrf.mxu1  ;;  %v16928_v51 = vadd.f32 %v6785_v5, %v16864_v42 }
 0x635   :  { %v6619_v0 = vpop.f32.mrf.mxu0  ;;  %v7162_v24 = vpop.f32.mrf.mxu1 }
 0x636   :  { %v6790_v14 = vadd.f32 %v6789_v25, %v6619_v0 }
 0x637   :  { %v6621_v47 = vpop.f32.mrf.mxu0  ;;  %v10419_v60 = vpop.f32.mrf.mxu1 }
 0x638   :  { %v16931_v56 = vadd.f32 %v6790_v14, %v16868_v59  ;;  %v16943_v59 = vld [vmem:[%s17136_s6] ss:$0 sm:$0xff]  ;;  %v8780_v60 = vld [vmem:[%s17134_s7 + $0x78] sm:$0xff] }
 0x639   :  { %v6992_v39 = vpop.f32.mrf.mxu0 }
 0x63a   :  { %v7163_v32 = vadd.f32 %v7162_v24, %v6992_v39  ;;  %v7167_v16 = vpop.f32.mrf.mxu1 }
 0x63b   :  { %v6994_v57 = vpop.f32.mrf.mxu0 }
 0x63c   :  { %v7266_v42 = vadd.f32 %v7163_v32, %v16871_v63  ;;  %v10422_v61 = vpop.f32.mrf.mxu1 }
 0x63d   :  { %v6997_v4 = vpop.f32.mrf.mxu0 }
 0x63e   :  { %v7294_v62 = vmul.f32 %v16936_v36, %v7266_v42  ;;  %v7168_v19 = vadd.f32 %v7167_v16, %v6997_v4  ;;  %v7172_v50 = vpop.f32.mrf.mxu1  ;;  %v8779_v42 = vld [vmem:[%s17134_s7 + $0x70] sm:$0xff] }
 0x63f   :  { %v6999_v38 = vpop.f32.mrf.mxu0 }
 0x640   :  { %v7267_v3 = vadd.f32 %v7168_v19, %v16874_v53  ;;  %v10425_v34 = vpop.f32.mrf.mxu1  ;;  %v7322_v30 = vadd.f32 %v16943_v59, %v7294_v62  ;;  %v8778_v19 = vld [vmem:[%s17134_s7 + $0x68] sm:$0xff] }
 0x641   :  { %v7002_v6 = vpop.f32.mrf.mxu0 }
 0x642   :  { %v7295_v63 = vmul.f32 %v16936_v36, %v7267_v3  ;;  %v7173_v12 = vadd.f32 %v7172_v50, %v7002_v6  ;;  %v7177_v22 = vpop.f32.mrf.mxu1  ;;  %v7343_v45 = vmax.f32 %v7322_v30, 0.0 }
 0x643   :  { %v7004_v37 = vpop.f32.mrf.mxu0 }
 0x644   :  { %v7323_v58 = vadd.f32 %v16943_v59, %v7295_v63  ;;  %v7268_v1 = vadd.f32 %v7173_v12, %v16877_v7  ;;  %v10428_v9 = vpop.f32.mrf.mxu1 }
 0x645   :  { %v7007_v23 = vpop.f32.mrf.mxu0 }
 0x646   :  { %v7344_v11 = vmax.f32 %v7323_v58, 0.0  ;;  %v7296_v41 = vmul.f32 %v16936_v36, %v7268_v1  ;;  %v7178_v53 = vadd.f32 %v7177_v22, %v7007_v23  ;;  %v7182_v48 = vpop.f32.mrf.mxu1 }
 0x647   :  { %v7009_v44 = vpop.f32.mrf.mxu0 }
 0x648   :  { %v7364_v10 = vmax.f32 %v7343_v45, %v7344_v11  ;;  %v7324_v49 = vadd.f32 %v16943_v59, %v7296_v41  ;;  %v7269_v40 = vadd.f32 %v7178_v53, %v16880_v29  ;;  %v10431_v20 = vpop.f32.mrf.mxu1 }
 0x649   :  { %v7012_v25 = vpop.f32.mrf.mxu0 }
 0x64a   :  { %v7345_v5 = vmax.f32 %v7324_v49, 0.0  ;;  %v7297_v35 = vmul.f32 %v16936_v36, %v7269_v40  ;;  %v7183_v7 = vadd.f32 %v7182_v48, %v7012_v25  ;;  %v7187_v2 = vpop.f32.mrf.mxu1 }
 0x64b   :  { %v7014_v0 = vpop.f32.mrf.mxu0 }
 0x64c   :  { %v7365_v14 = vmax.f32 %v7364_v10, %v7345_v5  ;;  %v7270_v24 = vadd.f32 %v7183_v7, %v16883_v46  ;;  %v10434_v47 = vpop.f32.mrf.mxu1  ;;  %v7325_v29 = vadd.f32 %v16943_v59, %v7297_v35  ;;  %v8774_v5 = vld [vmem:[%s17134_s7 + $0x50] sm:$0xff]  ;;  %v8773_v0 = vld [vmem:[%s17134_s7 + $0x48] sm:$0xff] }
 0x64d   :  { %v7017_v39 = vpop.f32.mrf.mxu0 }
 0x64e   :  { %v7298_v32 = vmul.f32 %v16936_v36, %v7270_v24  ;;  %v7188_v16 = vadd.f32 %v7187_v2, %v7017_v39  ;;  %v7192_v57 = vpop.f32.mrf.mxu1  ;;  %10500 = vmatmul.mubr.msk.f32.vlgmr.msra.gmra.mxu1 %vm7377_vm3, %v7365_v14  ;;  %v7346_v38 = vmax.f32 %v7325_v29, 0.0 }
 0x64f   :  { %v7019_v61 = vpop.f32.mrf.mxu0  ;;  %10514 = vmatpush3.msra.mxu1 %v8780_v60  ;;  %10521 = vmatprep.mubr.msk.f32.mxu1 %vm10636_vm1, %v17774_v8 }
 0x650   :  { %v7326_v46 = vadd.f32 %v16943_v59, %v7298_v32  ;;  %v7271_v4 = vadd.f32 %v7188_v16, %v16886_v21  ;;  %v10437_v62 = vpop.f32.mrf.mxu1  ;;  %10515 = vmatprep.subr.mxu1 %v17774_v8  ;;  %v8777_v21 = vld [vmem:[%s17134_s7 + $0x60] sm:$0xff] }
 0x651   :  { %v7022_v50 = vpop.f32.mrf.mxu0  ;;  %10516 = vmatpush3.msra.mxu1 %v8779_v42 }
 0x652   :  { %v7347_v3 = vmax.f32 %v7326_v46, 0.0  ;;  %v7299_v34 = vmul.f32 %v16936_v36, %v7271_v4  ;;  %v7193_v6 = vadd.f32 %v7192_v57, %v7022_v50  ;;  %v7197_v30 = vpop.f32.mrf.mxu1  ;;  %10517 = vmatprep.subr.mxu1 %v17774_v8 }
 0x653   :  { %v7024_v63 = vpop.f32.mrf.mxu0  ;;  %10518 = vmatpush3.msra.mxu1 %v8778_v19 }
 0x654   :  { %v7370_v12 = vmax.f32 %v7346_v38, %v7347_v3  ;;  %v7327_v22 = vadd.f32 %v16943_v59, %v7299_v34  ;;  %v7272_v37 = vadd.f32 %v7193_v6, %v16889_v43  ;;  %v10440_v58 = vpop.f32.mrf.mxu1  ;;  %10519 = vmatprep.subr.mxu1 %v17774_v8  ;;  %v8775_v43 = vld [vmem:[%s17134_s7 + $0x58] sm:$0xff] }
 0x655   :  { %v7027_v1 = vpop.f32.mrf.mxu0  ;;  %10520 = vmatpush3.msra.mxu1 %v8777_v21 }
 0x656   :  { %v7348_v9 = vmax.f32 %v7327_v22, 0.0  ;;  %v7300_v23 = vmul.f32 %v16936_v36, %v7272_v37  ;;  %v7198_v45 = vadd.f32 %v7197_v30, %v7027_v1  ;;  %v7202_v11 = vpop.f32.mrf.mxu1  ;;  %10535 = vmatprep.subr.mxu1 %v17774_v8  ;;  %v8784_v37 = vld [vmem:[%s17134_s7 + $0x90] sm:$0xff] }
 0x657   :  { %v7029_v41 = vpop.f32.mrf.mxu0 }
 0x658   :  { %v7371_v53 = vmax.f32 %v7370_v12, %v7348_v9  ;;  %v7273_v48 = vadd.f32 %v7198_v45, %v16892_v33  ;;  %v10443_v44 = vpop.f32.mrf.mxu1  ;;  %v7328_v49 = vadd.f32 %v16943_v59, %v7300_v23  ;;  %v8783_v23 = vld [vmem:[%s17134_s7 + $0x88] sm:$0xff] }
 0x659   :  { %v7032_v10 = vpop.f32.mrf.mxu0 }
 0x65a   :  { %v7301_v40 = vmul.f32 %v16936_v36, %v7273_v48  ;;  %v7203_v20 = vadd.f32 %v7202_v11, %v7032_v10  ;;  %v7207_v25 = vpop.f32.mrf.mxu1  ;;  %10489 = vmatmul.mubr.msk.f32.vlgmr.msra.gmra.mxu0 %vm7377_vm3, %v7371_v53  ;;  %v7349_v24 = vmax.f32 %v7328_v49, 0.0 }
 0x65b   :  { %v7034_v35 = vpop.f32.mrf.mxu0  ;;  %10503 = vmatpush3.msra.mxu0 %v8775_v43  ;;  %10510 = vmatprep.mubr.msk.f32.mxu0 %vm10636_vm1, %v17774_v8 }
 0x65c   :  { %v7329_v33 = vadd.f32 %v16943_v59, %v7301_v40  ;;  %v7274_v7 = vadd.f32 %v7203_v20, %v16895_v15  ;;  %v10446_v2 = vpop.f32.mrf.mxu1  ;;  %10504 = vmatprep.subr.mxu0 %v17774_v8  ;;  %v8772_v15 = vld [vmem:[%s17134_s7 + $0x40] sm:$0xff] }
 0x65d   :  { %v7037_v14 = vpop.f32.mrf.mxu0  ;;  %10505 = vmatpush3.msra.mxu0 %v8774_v5 }
 0x65e   :  { %v7350_v47 = vmax.f32 %v7329_v33, 0.0  ;;  %v7302_v60 = vmul.f32 %v16936_v36, %v7274_v7  ;;  %v7208_v39 = vadd.f32 %v7207_v25, %v7037_v14  ;;  %v7212_v29 = vpop.f32.mrf.mxu1  ;;  %10506 = vmatprep.subr.mxu0 %v17774_v8 }
 0x65f   :  { %v7039_v32 = vpop.f32.mrf.mxu0  ;;  %10507 = vmatpush3.msra.mxu0 %v8773_v0 }
 0x660   :  { %v7524_v16 = vmax.f32 %v7349_v24, %v7350_v47  ;;  %v7330_v57 = vadd.f32 %v16943_v59, %v7302_v60  ;;  %v7275_v42 = vadd.f32 %v7208_v39, %v16898_v18  ;;  %v10449_v61 = vpop.f32.mrf.mxu1  ;;  %10508 = vmatprep.subr.mxu0 %v17774_v8  ;;  %v8785_v18 = vld [vmem:[%s17134_s7 + $0x98] sm:$0xff]  ;;  %v8789_v32 = vld [vmem:[%s17134_s7 + $0xb0] sm:$0xff] }
 0x661   :  { %v7042_v46 = vpop.f32.mrf.mxu0  ;;  %10509 = vmatpush3.msra.mxu0 %v8772_v15  ;;  %v8788_v61 = vld [vmem:[%s17134_s7 + $0xa8] sm:$0xff] }
 0x662   :  { %v7351_v4 = vmax.f32 %v7330_v57, 0.0  ;;  %v7303_v62 = vmul.f32 %v16936_v36, %v7275_v42  ;;  %v7213_v19 = vadd.f32 %v7212_v29, %v7042_v46  ;;  %v7217_v50 = vpop.f32.mrf.mxu1  ;;  %10524 = vmatprep.subr.mxu0 %v17774_v8 }
 0x663   :  { %v7044_v38 = vpop.f32.mrf.mxu0 }
 0x664   :  { %v7525_v3 = vmax.f32 %v7524_v16, %v7351_v4  ;;  %v7276_v34 = vadd.f32 %v7213_v19, %v16901_v52  ;;  %v10452_v6 = vpop.f32.mrf.mxu1  ;;  %v7331_v21 = vadd.f32 %v16943_v59, %v7303_v62 }
 0x665   :  { %v7047_v30 = vpop.f32.mrf.mxu0 }
 0x666   :  { %v7304_v63 = vmul.f32 %v16936_v36, %v7276_v34  ;;  %v7218_v12 = vadd.f32 %v7217_v50, %v7047_v30  ;;  %v7222_v22 = vpop.f32.mrf.mxu1  ;;  %10511 = vmatmul.mubr.msk.f32.vlgmr.msra.gmra.mxu0 %vm7377_vm3, %v7525_v3  ;;  %v7352_v11 = vmax.f32 %v7331_v21, 0.0 }
 0x667   :  { %v7049_v58 = vpop.f32.mrf.mxu0  ;;  %10525 = vmatpush3.msra.mxu0 %v8785_v18  ;;  %10532 = vmatprep.mubr.msk.f32.mxu0 %vm10636_vm1, %v17774_v8 }
 0x668   :  { %v7332_v52 = vadd.f32 %v16943_v59, %v7304_v63  ;;  %v7277_v1 = vadd.f32 %v7218_v12, %v16904_v28  ;;  %v10455_v9 = vpop.f32.mrf.mxu1  ;;  %10526 = vmatprep.subr.mxu0 %v17774_v8  ;;  %v8782_v28 = vld [vmem:[%s17134_s7 + $0x80] sm:$0xff] }
 0x669   :  { %v7052_v45 = vpop.f32.mrf.mxu0  ;;  %10527 = vmatpush3.msra.mxu0 %v8784_v37 }
 0x66a   :  { %v7353_v41 = vmax.f32 %v7332_v52, 0.0  ;;  %v7305_v53 = vmul.f32 %v16936_v36, %v7277_v1  ;;  %v7223_v48 = vadd.f32 %v7222_v22, %v7052_v45  ;;  %v7227_v44 = vpop.f32.mrf.mxu1  ;;  %10528 = vmatprep.subr.mxu0 %v17774_v8 }
 0x66b   :  { %v7054_v43 = vpop.f32.mrf.mxu0  ;;  %10529 = vmatpush3.msra.mxu0 %v8783_v23 }
 0x66c   :  { %v7605_v10 = vmax.f32 %v7352_v11, %v7353_v41  ;;  %v7333_v49 = vadd.f32 %v16943_v59, %v7305_v53  ;;  %v7278_v40 = vadd.f32 %v7223_v48, %v16907_v55  ;;  %v10458_v20 = vpop.f32.mrf.mxu1  ;;  %10530 = vmatprep.subr.mxu0 %v17774_v8  ;;  %v8790_v55 = vld [vmem:[%s17134_s7 + $0xb8] sm:$0xff]  ;;  %v8794_v48 = vld [vmem:[%s17134_s7 + $0xd0] sm:$0xff] }
 0x66d   :  { %v7057_v25 = vpop.f32.mrf.mxu0  ;;  %10531 = vmatpush3.msra.mxu0 %v8782_v28 }
 0x66e   :  { %v7354_v5 = vmax.f32 %v7333_v49, 0.0  ;;  %v7306_v35 = vmul.f32 %v16936_v36, %v7278_v40  ;;  %v7228_v33 = vadd.f32 %v7227_v44, %v7057_v25  ;;  %v7232_v7 = vpop.f32.mrf.mxu1  ;;  %10546 = vmatprep.subr.mxu0 %v17774_v8 }
 0x66f   :  { %v7059_v2 = vpop.f32.mrf.mxu0 }
 0x670   :  { %v7606_v0 = vmax.f32 %v7605_v10, %v7354_v5  ;;  %v7279_v14 = vadd.f32 %v7228_v33, %v16910_v17  ;;  %v10461_v24 = vpop.f32.mrf.mxu1  ;;  %v7334_v60 = vadd.f32 %v16943_v59, %v7306_v35  ;;  %v8793_v10 = vld [vmem:[%s17134_s7 + $0xc8] sm:$0xff] }
 0x671   :  { %v7062_v47 = vpop.f32.mrf.mxu0 }
 0x672   :  { %v7307_v39 = vmul.f32 %v16936_v36, %v7279_v14  ;;  %v7233_v29 = vadd.f32 %v7232_v7, %v7062_v47  ;;  %v7237_v15 = vpop.f32.mrf.mxu1  ;;  %10522 = vmatmul.mubr.msk.f32.vlgmr.msra.gmra.mxu1 %vm7377_vm3, %v7606_v0  ;;  %v7355_v4 = vmax.f32 %v7334_v60, 0.0 }
 0x673   :  { %v7064_v16 = vpop.f32.mrf.mxu0  ;;  %10536 = vmatpush3.msra.mxu1 %v8790_v55  ;;  %10543 = vmatprep.mubr.msk.f32.mxu1 %vm10636_vm1, %v17774_v8 }
 0x674   :  { %v7335_v17 = vadd.f32 %v16943_v59, %v7307_v39  ;;  %v7280_v57 = vadd.f32 %v7233_v29, %v16913_v54  ;;  %v10464_v42 = vpop.f32.mrf.mxu1  ;;  %10537 = vmatprep.subr.mxu1 %v17774_v8  ;;  %v8787_v54 = vld [vmem:[%s17134_s7 + $0xa0] sm:$0xff] }
 0x675   :  { %v7067_v46 = vpop.f32.mrf.mxu0  ;;  %10538 = vmatpush3.msra.mxu1 %v8789_v32 }
 0x676   :  { %v7356_v62 = vmax.f32 %v7335_v17, 0.0  ;;  %v7308_v19 = vmul.f32 %v16936_v36, %v7280_v57  ;;  %v7238_v50 = vadd.f32 %v7237_v15, %v7067_v46  ;;  %v7242_v38 = vpop.f32.mrf.mxu1  ;;  %10539 = vmatprep.subr.mxu1 %v17774_v8 }
 0x677   :  { %v7069_v3 = vpop.f32.mrf.mxu0  ;;  %10540 = vmatpush3.msra.mxu1 %v8788_v61 }
 0x678   :  { %v7686_v34 = vmax.f32 %v7355_v4, %v7356_v62  ;;  %v7336_v6 = vadd.f32 %v16943_v59, %v7308_v19  ;;  %v7281_v18 = vadd.f32 %v7238_v50, %v16916_v13  ;;  %v10467_v30 = vpop.f32.mrf.mxu1  ;;  %10541 = vmatprep.subr.mxu1 %v17774_v8  ;;  %v8795_v13 = vld [vmem:[%s17134_s7 + $0xd8] sm:$0xff] }
 0x679   :  { %v7072_v21 = vpop.f32.mrf.mxu0  ;;  %10542 = vmatpush3.msra.mxu1 %v8787_v54 }
 0x67a   :  { %v7357_v63 = vmax.f32 %v7336_v6, 0.0  ;;  %v7309_v12 = vmul.f32 %v16936_v36, %v7281_v18  ;;  %v7243_v22 = vadd.f32 %v7242_v38, %v7072_v21  ;;  %v7247_v37 = vpop.f32.mrf.mxu1  ;;  %10557 = vmatprep.subr.mxu1 %v17774_v8 }
 0x67b   :  { %v7074_v58 = vpop.f32.mrf.mxu0 }
 0x67c   :  { %v7687_v52 = vmax.f32 %v7686_v34, %v7357_v63  ;;  %v7282_v1 = vadd.f32 %v7243_v22, %v16919_v31  ;;  %v10470_v9 = vpop.f32.mrf.mxu1  ;;  %v7337_v45 = vadd.f32 %v16943_v59, %v7309_v12  ;;  %v7941_v34 = vld [vmem:[%s17137_s9 + $0x18] sm:$0xff] }
 0x67d   :  { %v7077_v23 = vpop.f32.mrf.mxu0 }
 0x67e   :  { %v7310_v11 = vmul.f32 %v16936_v36, %v7282_v1  ;;  %v7248_v41 = vadd.f32 %v7247_v37, %v7077_v23  ;;  %v7252_v53 = vpop.f32.mrf.mxu1  ;;  %10533 = vmatmul.mubr.msk.f32.vlgmr.msra.gmra.mxu0 %vm7377_vm3, %v7687_v52  ;;  %v7358_v40 = vmax.f32 %v7337_v45, 0.0 }
 0x67f   :  { %v7079_v44 = vpop.f32.mrf.mxu0  ;;  %10547 = vmatpush3.msra.mxu0 %v8795_v13  ;;  %10554 = vmatprep.mubr.msk.f32.mxu0 %vm10636_vm1, %v17774_v8 }
 0x680   :  { %v7338_v31 = vadd.f32 %v16943_v59, %v7310_v11  ;;  %v7283_v28 = vadd.f32 %v7248_v41, %v16922_v26  ;;  %v10473_v43 = vpop.f32.mrf.mxu1  ;;  %10548 = vmatprep.subr.mxu0 %v17774_v8  ;;  %v8792_v26 = vld [vmem:[%s17134_s7 + $0xc0] sm:$0xff] }
 0x681   :  { %v7082_v49 = vpop.f32.mrf.mxu0  ;;  %10549 = vmatpush3.msra.mxu0 %v8794_v48  ;;  %v8798_v43 = vld [vmem:[%s17139_s10] ss:$0 sm:$0xff] }
 0x682   :  { %v7359_v20 = vmax.f32 %v7338_v31, 0.0  ;;  %v7311_v25 = vmul.f32 %v16936_v36, %v7283_v28  ;;  %v7253_v5 = vadd.f32 %v7252_v53, %v7082_v49  ;;  %v7257_v35 = vpop.f32.mrf.mxu1  ;;  %10550 = vmatprep.subr.mxu0 %v17774_v8 }
 0x683   :  { %v7084_v33 = vpop.f32.mrf.mxu0  ;;  %10551 = vmatpush3.msra.mxu0 %v8793_v10 }
 0x684   :  { %v7767_v7 = vmax.f32 %v7358_v40, %v7359_v20  ;;  %v7339_v2 = vadd.f32 %v16943_v59, %v7311_v25  ;;  %v7284_v0 = vadd.f32 %v7253_v5, %v16925_v27  ;;  %v10476_v14 = vpop.f32.mrf.mxu1  ;;  %10552 = vmatprep.subr.mxu0 %v17774_v8 }
 0x685   :  { %v7087_v24 = vpop.f32.mrf.mxu0  ;;  %10553 = vmatpush3.msra.mxu0 %v8792_v26 }
 0x686   :  { %v7360_v55 = vmax.f32 %v7339_v2, 0.0  ;;  %v7312_v47 = vmul.f32 %v16936_v36, %v7284_v0  ;;  %v7258_v60 = vadd.f32 %v7257_v35, %v7087_v24  ;;  %v7262_v39 = vpop.f32.mrf.mxu1 }
 0x687   :  { %v7089_v29 = vpop.f32.mrf.mxu0 }
 0x688   :  { %v7768_v15 = vmax.f32 %v7767_v7, %v7360_v55  ;;  %v7285_v32 = vadd.f32 %v7258_v60, %v16928_v51  ;;  %v10479_v16 = vpop.f32.mrf.mxu1  ;;  %v7340_v57 = vadd.f32 %v16943_v59, %v7312_v47 }
 0x689   :  { %v7092_v17 = vpop.f32.mrf.mxu0 }
 0x68a   :  { %v7313_v27 = vmul.f32 %v16936_v36, %v7285_v32  ;;  %v7263_v42 = vadd.f32 %v7262_v39, %v7092_v17  ;;  %10544 = vmatmul.mubr.msk.f32.vlgmr.msra.gmra.mxu1 %vm7377_vm3, %v7768_v15  ;;  %v7361_v62 = vmax.f32 %v7340_v57, 0.0 }
 0x68b   :  { %v7094_v61 = vpop.f32.mrf.mxu0  ;;  %10565 = vmatprep.mubr.msk.f32.mxu1 %vm10636_vm1, %v17774_v8  ;;  %10558 = vmatpush3.msra.mxu1 %v7941_v34 }
 0x68c   :  { %v7341_v46 = vadd.f32 %v16943_v59, %v7313_v27  ;;  %v7286_v4 = vadd.f32 %v7263_v42, %v16931_v56  ;;  %10559 = vmatprep.subr.mxu1 %v17774_v8  ;;  %v7940_v56 = vld [vmem:[%s17137_s9 + $0x10] sm:$0xff] }
 0x68d   :  { %10560 = vmatpush3.msra.mxu1 %v7940_v56 }
 0x68e   :  { %v7362_v19 = vmax.f32 %v7341_v46, 0.0  ;;  %v7314_v51 = vmul.f32 %v16936_v36, %v7286_v4  ;;  %10561 = vmatprep.subr.mxu1 %v17774_v8  ;;  %v7939_v36 = vld [vmem:[%s17137_s9 + $0x8] sm:$0xff] }
 0x68f   :  { %10562 = vmatpush3.msra.mxu1 %v7939_v36 }
 0x690   :  { %v7848_v50 = vmax.f32 %v7361_v62, %v7362_v19  ;;  %v7342_v38 = vadd.f32 %v16943_v59, %v7314_v51  ;;  %v7938_v59 = vld [vmem:[%s17137_s9] sm:$0xff]  ;;  %10563 = vmatprep.subr.mxu1 %v17774_v8 }
 0x691   :  { %10564 = vmatpush3.msra.mxu1 %v7938_v59  ;;  %v8797_v8 = vld [vmem:[%s17138_s8] ss:$0 sm:$0xff] }
 0x692   :  { %v7363_v54 = vmax.f32 %v7342_v38, 0.0 }
 0x694   :  { %v7849_v3 = vmax.f32 %v7848_v50, %v7363_v54 }
 0x696   :  { %10555 = vmatmul.mubr.msk.f32.vlgmr.msra.gmra.mxu0 %vm7377_vm3, %v7849_v3 }
 0x70e   :  { %v7520_v6 = vpop.f32.mrf.mxu1 }
 0x710   :  { %v10501_v18 = vpop.f32.mrf.mxu1 }
 0x71a   :  { %v7447_v30 = vpop.f32.mrf.mxu0 }
 0x71b   :  { %v7521_v13 = vadd.f32 %v7520_v6, %v7447_v30 }
 0x71c   :  { %v10490_v21 = vpop.f32.mrf.mxu0 }
 0x726   :  { %v7600_v63 = vpop.f32.mrf.mxu0 }
 0x727   :  { %v7604_v23 = vadd.f32 %v7600_v63, %v7521_v13 }
 0x728   :  { %v10512_v12 = vpop.f32.mrf.mxu0 }
 0x732   :  { %v7681_v22 = vpop.f32.mrf.mxu1 }
 0x733   :  { %v7685_v45 = vadd.f32 %v7681_v22, %v7604_v23 }
 0x734   :  { %v10523_v37 = vpop.f32.mrf.mxu1 }
 0x73e   :  { %v7762_v58 = vpop.f32.mrf.mxu0 }
 0x73f   :  { %v7766_v11 = vadd.f32 %v7762_v58, %v7685_v45 }
 0x740   :  { %v10534_v52 = vpop.f32.mrf.mxu0 }
 0x74a   :  { %v7843_v1 = vpop.f32.mrf.mxu1 }
 0x74b   :  { %v7847_v41 = vadd.f32 %v7843_v1, %v7766_v11 }
 0x74c   :  { %v10545_v9 = vpop.f32.mrf.mxu1 }
 0x756   :  { %v7924_v53 = vpop.f32.mrf.mxu0 }
 0x757   :  { %v7928_v48 = vadd.f32 %v7924_v53, %v7847_v41 }
 0x758   :  { %v10556_v44 = vpop.f32.mrf.mxu0 }
 0x759   :  { %v7936_v31 = vadd.f32 %v8797_v8, %v7928_v48 }
 0x75b   :  { %v7937_v28 = vmax.f32 %v7936_v31, 0.0 }
 0x75d   :  { %10566 = vmatmul.mubr.msk.f32.vlgmr.msra.gmra.mxu1 %vm7377_vm3, %v7937_v28 }
 0x81d   :  { %v8018_v10 = vpop.f32.mrf.mxu1 }
 0x81e   :  { %v8019_v49 = vadd.f32 %v8798_v43, %v8018_v10 }
 0x81f   :  { %v10567_v40 = vpop.f32.mrf.mxu1 }
 0x820   :  { %8023 = vst.msk [vmem:[%s17140_s11] sm:$0xff] %vm8022_vm4, %v8019_v49 }

</bundles_post_ra>
